<compile_context>
chip_gen: v7x
topology: tpu7x:2x2x1
jax: 0.10.0
libtpu: 0.0.40
codegen_flags: <defaults>
</compile_context>

<pallas_src>
import functools

import numpy as np
import jax
import jax.numpy as jnp
from jax.experimental import pallas as pl
from jax.experimental.pallas import tpu as pltpu

_EPS = 1e-5      # PyTorch GroupNorm default eps
_LANE = 128


def _round_up(x, m):
    return (x + m - 1) // m * m


def _tile_bytes(shape, dtype):
    """VMEM bytes of a block with the last two dims rounded to the dtype tile."""
    itemsize = np.dtype(dtype).itemsize
    sub = {4: 8, 2: 16, 1: 32}[itemsize]
    s = list(shape)
    if len(s) == 1:
        s = [1] + s
    s[-1] = _round_up(s[-1], _LANE)
    s[-2] = _round_up(s[-2], sub)
    n = itemsize
    for d in s:
        n *= d
    return n


# ----------------------------- activations (f32, in-kernel) ------------------
def _silu(x):
    # x * sigmoid(x): 1 exp + 1 approx EUP reciprocal.
    return x * pl.reciprocal(1.0 + jnp.exp(-x), approx=True)


def _mish(x):
    # mish(x) = x * tanh(softplus(x)) = x * e*(e+2) / (e*(e+2) + 2), e = exp(x)
    # (1 exp + 1 approx reciprocal instead of exp + log + tanh).
    e = jnp.exp(jnp.minimum(x, 20.0))
    t = e * (e + 2.0)
    return x * t * pl.reciprocal(t + 2.0, approx=True)


def _erf(x):
    # Abramowitz & Stegun 7.1.26, |err| < 1.5e-7: exact-GELU semantics within
    # f32 noise without relying on an erf lowering inside Mosaic.
    p = 0.3275911
    a1, a2, a3, a4, a5 = 0.254829592, -0.284496736, 1.421413741, -1.453152027, 1.061405429
    s = jnp.where(x >= 0.0, 1.0, -1.0)
    ax = jnp.abs(x)
    t = pl.reciprocal(1.0 + p * ax, approx=True)
    poly = ((((a5 * t + a4) * t + a3) * t + a2) * t + a1) * t
    return s * (1.0 - poly * jnp.exp(-ax * ax))


def _gelu_exact(x):
    return 0.5 * x * (1.0 + _erf(x * 0.7071067811865475))


# ----------------------------- fused Pallas kernel ---------------------------
def _double_conv_kernel(x_ref, w1_ref, w2_ref, gb_ref, o_ref, acc1_ref, h_ref, *,
                        H, W, Cmid, Cout, Cmid_p, Cout_p, G, residual):
    """One full DoubleConv on a single batch element.

    x_ref   : (Npg, Cin_k)        bf16  guarded, spatially padded, flat input
    w1_ref  : (9, Cin_k, Cmid_p)  bf16  conv1 weights, one matrix per tap
    w2_ref  : (9*Cmid_p, Cout_p)  bf16  conv2 weights, taps folded into K
    gb_ref  : (4, Cgb)            f32   [gamma1; beta1; gamma2; beta2]
    o_ref   : (Np, Cout_p)        bf16  output on the padded flat grid
    acc1_ref: (Np, Cmid_p)        f32   conv1 accumulator scratch
    h_ref   : (Npg, Cmid_p)       bf16  guarded SiLU(GN(conv1)) scratch
    """
    Hp, Wp = H + 2, W + 2
    Np = Hp * Wp
    # tap k = 3*dy + dx reads source position p + (dy-1)*Wp + (dx-1)  (+ guard G)
    offs = [G + (dy - 1) * Wp + (dx - 1) for dy in range(3) for dx in range(3)]

    # Interior-position mask on the padded flat grid: 1 for real output pixels,
    # 0 for the zero-padding border (whose conv values are garbage — excluded
    # from GN stats, zeroed before conv2, discarded host-side).  Column index
    # via float floor-div (exact for Np < 2**24; asserted in the wrapper).
    pf = jax.lax.broadcasted_iota(jnp.int32, (Np, 1), 0).astype(jnp.float32)
    colf = pf - Wp * jnp.floor(pf * (1.0 / Wp))
    interior = (pf >= Wp) & (pf < Np - Wp) & (colf >= 1.0) & (colf <= W)

    # ---- conv1: 9 shifted bf16 matmuls accumulated into f32 VMEM scratch ----
    # TODO(synk): fold the 9 taps into one K=9*Cin matmul (needs an unaligned
    # lane concat of the (Np, Cin) slices); per-tap kept for guaranteed lowering.
    acc1_ref[...] = jnp.dot(x_ref[pl.ds(offs[0], Np), :], w1_ref[0],
                            preferred_element_type=jnp.float32)
    for k in range(1, 9):
        acc1_ref[...] += jnp.dot(x_ref[pl.ds(offs[k], Np), :], w1_ref[k],
                                 preferred_element_type=jnp.float32)
    acc1 = acc1_ref[...]

    # ---- GroupNorm(1) + SiLU (two-pass masked stats, f32) -------------------
    inv_n1 = 1.0 / float(H * W * Cmid)
    lane_mid = jax.lax.broadcasted_iota(jnp.int32, (1, Cmid_p), 1) < Cmid
    mask1 = interior & lane_mid
    mu1 = jnp.sum(jnp.where(mask1, acc1, 0.0)) * inv_n1
    d1 = jnp.where(mask1, acc1 - mu1, 0.0)
    rstd1 = jax.lax.rsqrt(jnp.sum(d1 * d1) * inv_n1 + _EPS)
    g1 = gb_ref[0:1, :Cmid_p]
    b1 = gb_ref[1:2, :Cmid_p]
    h = _silu((acc1 - mu1) * rstd1 * g1 + b1)
    h = jnp.where(interior, h, 0.0)            # exact zero padding for conv2

    # Stage h in the guarded VMEM scratch (bf16); zero the guard rows so the
    # shifted slices below never read uninitialized memory.
    h_ref[pl.ds(0, G), :] = jnp.zeros((G, Cmid_p), h_ref.dtype)
    h_ref[pl.ds(G + Np, G), :] = jnp.zeros((G, Cmid_p), h_ref.dtype)
    h_ref[pl.ds(G, Np), :] = h.astype(h_ref.dtype)

    # ---- conv2: ONE matmul with K = 9*Cmid_p ---------------------------------
    # The 9 shifted slices are full 128-lane groups -> lane-aligned concat; all
    # tap accumulation stays inside the MXU (no per-tap pops / VPU adds).
    patches = jnp.concatenate([h_ref[pl.ds(off, Np), :] for off in offs], axis=-1)
    y = jnp.dot(patches, w2_ref[...], preferred_element_type=jnp.float32)

    # ---- GroupNorm(1) (+ residual) + final activation: single bf16 store ----
    inv_n2 = 1.0 / float(H * W * Cout)
    lane_out = jax.lax.broadcasted_iota(jnp.int32, (1, Cout_p), 1) < Cout
    mask2 = interior & lane_out
    mu2 = jnp.sum(jnp.where(mask2, y, 0.0)) * inv_n2
    d2 = jnp.where(mask2, y - mu2, 0.0)
    rstd2 = jax.lax.rsqrt(jnp.sum(d2 * d2) * inv_n2 + _EPS)
    g2 = gb_ref[2:3, :Cout_p]
    b2 = gb_ref[3:4, :Cout_p]
    y = (y - mu2) * rstd2 * g2 + b2

    if residual:
        # x was channel-padded to Cout_p host-side -> one full-width store.
        # (skip uses the bf16-cast x; within module tolerance)
        xin = x_ref[pl.ds(G, Np), :].astype(jnp.float32)
        o_ref[...] = _gelu_exact(y + xin).astype(o_ref.dtype)
    else:
        o_ref[...] = _mish(y).astype(o_ref.dtype)


# ----------------------------- wrapper ---------------------------------------
@functools.partial(jax.jit, static_argnames=("residual",))
def double_conv_forward(x_nchw, w1, w2, g1, b1, g2, b2, *, residual=False):
    B, Cin, H, W = x_nchw.shape
    Cmid = w1.shape[0]
    Cout = w2.shape[0]
    if residual:
        assert Cin == Cout, "residual path requires in==out channels"

    Hp, Wp = H + 2, W + 2
    Np = Hp * Wp
    assert Np < (1 << 24), "interior mask uses f32 index math; needs Np < 2**24"
    Gr = 2                              # guard rows (full padded rows); 2*Wp >= Wp+1
    G = Gr * Wp
    Npg = Np + 2 * G
    Cmid_p = _round_up(Cmid, _LANE)     # lane-dense intermediate / matmul N
    Cout_p = _round_up(Cout, _LANE)     # lane-dense output
    Cgb = max(Cmid_p, Cout_p)
    # Residual path: pad x channels to Cout_p so the skip-add is a single
    # full-width store in-kernel (the x block is lane-padded to 128 in VMEM
    # anyway, so this only costs a little extra HBM read on that path).
    Cin_k = Cout_p if residual else Cin

    # bf16 BEFORE the layout work; spatial pad, guard rows and channel pad are
    # one jnp.pad; then flatten to the guarded (Npg, Cin_k) slab.
    x_nhwc = jnp.transpose(x_nchw.astype(jnp.bfloat16), (0, 2, 3, 1))
    xg = jnp.pad(x_nhwc, ((0, 0), (1 + Gr, 1 + Gr), (1, 1), (0, Cin_k - Cin)))
    xg = xg.reshape(B, Npg, Cin_k)

    # conv1 weights: OIHW -> (tap, Cin_k, Cmid_p)   (per-tap matrices).
    w1m = jnp.transpose(w1, (2, 3, 1, 0)).reshape(9, Cin, Cmid)
    w1m = jnp.pad(w1m, ((0, 0), (0, Cin_k - Cin),
                        (0, Cmid_p - Cmid))).astype(jnp.bfloat16)
    # conv2 weights: OIHW -> (9*Cmid_p, Cout_p)     (taps folded into K).
    w2m = jnp.transpose(w2, (2, 3, 1, 0))                        # (3,3,Cmid,Cout)
    w2m = jnp.pad(w2m, ((0, 0), (0, 0), (0, Cmid_p - Cmid), (0, Cout_p - Cout)))
    w2m = w2m.reshape(9 * Cmid_p, Cout_p).astype(jnp.bfloat16)

    # Both GroupNorm affines in one small f32 block (one tiny DMA per step).
    def padc(v, c):
        return jnp.pad(v.astype(jnp.float32), (0, c - v.shape[0]))
    gb = jnp.stack([padc(g1, Cgb), padc(b1, Cgb), padc(g2, Cgb), padc(b2, Cgb)])

    # Tiling-aware VMEM budget: every block rounded to its dtype tile
    # ((16,128) bf16 / (8,128) f32); x2 for the double-buffered pipelined
    # blocks, x1 for scratch, plus the conv2 patch / f32 temporaries.
    blocks = (_tile_bytes((Npg, Cin_k), jnp.bfloat16)
              + _tile_bytes((9, Cin_k, Cmid_p), jnp.bfloat16)
              + _tile_bytes((9 * Cmid_p, Cout_p), jnp.bfloat16)
              + _tile_bytes((4, Cgb), jnp.float32)
              + _tile_bytes((Np, Cout_p), jnp.bfloat16))
    scratch = (_tile_bytes((Np, Cmid_p), jnp.float32)
               + _tile_bytes((Npg, Cmid_p), jnp.bfloat16))
    temps = (2 * _tile_bytes((Np, 9 * Cmid_p), jnp.bfloat16)
             + 6 * _tile_bytes((Np, max(Cmid_p, Cout_p)), jnp.float32))
    est = 2 * blocks + scratch + temps
    try:
        phys = int(pltpu.get_tpu_info().vmem_capacity_bytes)
    except Exception:
        phys = 64 * 2 ** 20             # conservative default: v7x per-core VMEM
    want = max(32 * 2 ** 20, 2 * est)
    cap = max(phys - 8 * 2 ** 20, 24 * 2 ** 20)   # headroom for Mosaic internals
    vmem_limit = int(min(want, cap))
    # TODO(synk): when `est` exceeds the per-generation cap, fall back to an
    # HW-tiled two-pass-GroupNorm variant instead of one-sample-resident.

    kernel = functools.partial(
        _double_conv_kernel, H=H, W=W, Cmid=Cmid, Cout=Cout,
        Cmid_p=Cmid_p, Cout_p=Cout_p, G=G, residual=residual)

    out = pl.pallas_call(
        kernel,
        out_shape=jax.ShapeDtypeStruct((B, Np, Cout_p), jnp.bfloat16),
        grid=(B,),
        in_specs=[
            pl.BlockSpec((None, Npg, Cin_k), lambda b: (b, 0, 0)),
            pl.BlockSpec((9, Cin_k, Cmid_p), lambda b: (0, 0, 0)),
            pl.BlockSpec((9 * Cmid_p, Cout_p), lambda b: (0, 0)),
            pl.BlockSpec((4, Cgb), lambda b: (0, 0)),
        ],
        out_specs=pl.BlockSpec((None, Np, Cout_p), lambda b: (b, 0, 0)),
        scratch_shapes=[pltpu.VMEM((Np, Cmid_p), jnp.float32),
                        pltpu.VMEM((Npg, Cmid_p), jnp.bfloat16)],
        compiler_params=pltpu.CompilerParams(
            dimension_semantics=("parallel",),
            vmem_limit_bytes=vmem_limit),
    )(xg, w1m, w2m, gb)

    # Drop the spatial border / channel padding (still bf16), back to NCHW f32.
    y = out.reshape(B, Hp, Wp, Cout_p)[:, 1:1 + H, 1:1 + W, :Cout]
    return jnp.transpose(y, (0, 3, 1, 2)).astype(jnp.float32)


# ----------------------------- module ----------------------------------------
class DoubleConvPallas:
    """Pallas version of the PyTorch DoubleConv module (deterministic init)."""

    def __init__(self, in_channels, out_channels, mid_channels=None, residual=False, key=None):
        mid = mid_channels if mid_channels else out_channels
        self.residual = residual
        if residual:
            assert in_channels == out_channels, "residual path requires in==out channels"
        key = jax.random.PRNGKey(0) if key is None else key
        k1, k2, k3, k4, k5, k6 = jax.random.split(key, 6)
        bnd1 = 1.0 / np.sqrt(in_channels * 9)
        bnd2 = 1.0 / np.sqrt(mid * 9)
        # Conv2d weights in PyTorch OIHW layout, kaiming-uniform-like, bias=False.
        self.w1 = jax.random.uniform(k1, (mid, in_channels, 3, 3), jnp.float32, -bnd1, bnd1)
        self.w2 = jax.random.uniform(k2, (out_channels, mid, 3, 3), jnp.float32, -bnd2, bnd2)
        # GroupNorm affine params (perturbed so the affine broadcast is exercised).
        self.g1 = 1.0 + 0.1 * jax.random.normal(k3, (mid,), jnp.float32)
        self.b1 = 0.1 * jax.random.normal(k4, (mid,), jnp.float32)
        self.g2 = 1.0 + 0.1 * jax.random.normal(k5, (out_channels,), jnp.float32)
        self.b2 = 0.1 * jax.random.normal(k6, (out_channels,), jnp.float32)

    def __call__(self, x_nchw):
        return double_conv_forward(x_nchw, self.w1, self.w2, self.g1, self.b1,
                                   self.g2, self.b2, residual=self.residual)


# ----------------------------- pure-JAX reference -----------------------------
def _ref_double_conv(x_nchw, m: DoubleConvPallas):
    x = jnp.transpose(x_nchw, (0, 2, 3, 1))

    def conv(a, w_oihw):
        return jax.lax.conv_general_dilated(
            a, jnp.transpose(w_oihw, (2, 3, 1, 0)), (1, 1), ((1, 1), (1, 1)),
            dimension_numbers=("NHWC", "HWIO", "NHWC"),
            precision=jax.lax.Precision.HIGHEST)

    def gn(a, g, b):
        mu = jnp.mean(a, axis=(1, 2, 3), keepdims=True)
        var = jnp.mean((a - mu) ** 2, axis=(1, 2, 3), keepdims=True)
        return (a - mu) / jnp.sqrt(var + _EPS) * g + b

    h = conv(x, m.w1)
    h = gn(h, m.g1, m.b1)
    h = h * jax.nn.sigmoid(h)                       # SiLU
    y = conv(h, m.w2)
    y = gn(y, m.g2, m.b2)
    if m.residual:
        y = jax.nn.gelu(x + y, approximate=False)   # F.gelu (exact)
    else:
        y = y * jnp.tanh(jax.nn.softplus(y))        # F.mish
    return jnp.transpose(y, (0, 3, 1, 2))


# ----------------------------- demo -------------------------------------------
if __name__ == "__main__":
    key = jax.random.PRNGKey(0)
    kx1, kx2, kp1, kp2 = jax.random.split(key, 4)

    # residual=False: Conv(4->8) -> GN -> SiLU -> Conv(8->8) -> GN -> Mish
    x = jax.random.normal(kx1, (2, 4, 16, 16), jnp.float32)
    m = DoubleConvPallas(4, 8, residual=False, key=kp1)
    y = jax.block_until_ready(m(x))
    np.testing.assert_allclose(np.asarray(y), np.asarray(_ref_double_conv(x, m)),
                               rtol=3e-2, atol=3e-2)

    # residual=True: GELU(x + model(x))  (requires in==out channels)
    x2 = jax.random.normal(kx2, (2, 8, 16, 16), jnp.float32)
    m2 = DoubleConvPallas(8, 8, residual=True, key=kp2)
    y2 = jax.block_until_ready(m2(x2))
    np.testing.assert_allclose(np.asarray(y2), np.asarray(_ref_double_conv(x2, m2)),
                               rtol=3e-2, atol=3e-2)

    print("KERNEL_OK")
</pallas_src>

<mosaic_0001>
module attributes {stable_mosaic.version = 11 : i64} {
  func.func @_double_conv_kernel(%arg0: i32, %arg1: memref<1x396x4xbf16, #tpu.memory_space<vmem>>, %arg2: memref<9x4x128xbf16, #tpu.memory_space<vmem>>, %arg3: memref<1152x128xbf16, #tpu.memory_space<vmem>>, %arg4: memref<4x128xf32, #tpu.memory_space<vmem>>, %arg5: memref<1x324x128xbf16, #tpu.memory_space<vmem>>, %arg6: memref<324x128xf32, #tpu.memory_space<vmem>>, %arg7: memref<396x128xbf16, #tpu.memory_space<vmem>>) attributes {dimension_semantics = [#tpu.dimension_semantics<parallel>], iteration_bounds = array<i64: 2>, scalar_prefetch = 0 : i64, scratch_operands = 2 : i64, tpu.core_type = #tpu.core_type<tc>, window_params = [{transform_indices = @transform_0, window_bounds = array<i64: 1, 396, 4>}, {pipeline_mode = #tpu.pipeline_mode<synchronous>, transform_indices = @transform_1, window_bounds = array<i64: 9, 4, 128>}, {pipeline_mode = #tpu.pipeline_mode<synchronous>, transform_indices = @transform_2, window_bounds = array<i64: 1152, 128>}, {pipeline_mode = #tpu.pipeline_mode<synchronous>, transform_indices = @transform_3, window_bounds = array<i64: 4, 128>}, {transform_indices = @transform_4, window_bounds = array<i64: 1, 324, 128>}]} {
    %0 = tpu.iota {dimensions = array<i32: 0>} : vector<324x1xi32>
    %1 = arith.sitofp %0 : vector<324x1xi32> to vector<324x1xf32>
    %cst = arith.constant 0.055555556 : f32
    %2 = vector.broadcast %cst : f32 to vector<324x1xf32>
    %3 = arith.mulf %1, %2 : vector<324x1xf32>
    %4 = math.floor %3 : vector<324x1xf32>
    %cst_0 = arith.constant 1.800000e+01 : f32
    %5 = vector.broadcast %cst_0 : f32 to vector<324x1xf32>
    %6 = arith.mulf %5, %4 : vector<324x1xf32>
    %7 = arith.subf %1, %6 : vector<324x1xf32>
    %cst_1 = arith.constant 1.800000e+01 : f32
    %8 = vector.broadcast %cst_1 : f32 to vector<324x1xf32>
    %9 = arith.cmpf oge, %1, %8 : vector<324x1xf32>
    %cst_2 = arith.constant 3.060000e+02 : f32
    %10 = vector.broadcast %cst_2 : f32 to vector<324x1xf32>
    %11 = arith.cmpf olt, %1, %10 : vector<324x1xf32>
    %12 = arith.andi %9, %11 : vector<324x1xi1>
    %cst_3 = arith.constant 1.000000e+00 : f32
    %13 = vector.broadcast %cst_3 : f32 to vector<324x1xf32>
    %14 = arith.cmpf oge, %7, %13 : vector<324x1xf32>
    %15 = arith.andi %12, %14 : vector<324x1xi1>
    %cst_4 = arith.constant 1.600000e+01 : f32
    %16 = vector.broadcast %cst_4 : f32 to vector<324x1xf32>
    %17 = arith.cmpf ole, %7, %16 : vector<324x1xf32>
    %18 = arith.andi %15, %17 : vector<324x1xi1>
    %c0 = arith.constant 0 : index
    %c17 = arith.constant 17 : index
    %c0_5 = arith.constant 0 : index
    %19 = vector.load %arg1[%c0, %c17, %c0_5] : memref<1x396x4xbf16, #tpu.memory_space<vmem>>, vector<1x324x4xbf16>
    %20 = vector.shape_cast %19 : vector<1x324x4xbf16> to vector<324x4xbf16>
    %c0_6 = arith.constant 0 : index
    %c0_7 = arith.constant 0 : index
    %c0_8 = arith.constant 0 : index
    %21 = vector.load %arg2[%c0_6, %c0_7, %c0_8] : memref<9x4x128xbf16, #tpu.memory_space<vmem>>, vector<1x4x128xbf16>
    %22 = vector.shape_cast %21 : vector<1x4x128xbf16> to vector<4x128xbf16>
    %cst_9 = arith.constant dense<0.000000e+00> : vector<324x128xf32>
    %23 = tpu.matmul %20, %22, %cst_9 {dimension_numbers = #tpu.dot_dimension_numbers<[1], [0], [0], [1], [0, 0, 1, 1], [], []>} : vector<324x4xbf16>, vector<4x128xbf16>, vector<324x128xf32> -> vector<324x128xf32>
    %c0_10 = arith.constant 0 : index
    %c0_11 = arith.constant 0 : index
    %24 = vector.load %arg6[%c0_10, %c0_11] : memref<324x128xf32, #tpu.memory_space<vmem>>, vector<324x128xf32>
    tpu.vector_store %arg6[%c0_10, %c0_11], %23 {strides = array<i32>} : memref<324x128xf32, #tpu.memory_space<vmem>>, vector<324x128xf32>,
    %c0_12 = arith.constant 0 : index
    %c0_13 = arith.constant 0 : index
    %25 = vector.load %arg6[%c0_12, %c0_13] : memref<324x128xf32, #tpu.memory_space<vmem>>, vector<324x128xf32>
    %c0_14 = arith.constant 0 : index
    %c18 = arith.constant 18 : index
    %c0_15 = arith.constant 0 : index
    %26 = vector.load %arg1[%c0_14, %c18, %c0_15] : memref<1x396x4xbf16, #tpu.memory_space<vmem>>, vector<1x324x4xbf16>
    %27 = vector.shape_cast %26 : vector<1x324x4xbf16> to vector<324x4xbf16>
    %c1 = arith.constant 1 : index
    %c0_16 = arith.constant 0 : index
    %c0_17 = arith.constant 0 : index
    %28 = vector.load %arg2[%c1, %c0_16, %c0_17] : memref<9x4x128xbf16, #tpu.memory_space<vmem>>, vector<1x4x128xbf16>
    %29 = vector.shape_cast %28 : vector<1x4x128xbf16> to vector<4x128xbf16>
    %cst_18 = arith.constant dense<0.000000e+00> : vector<324x128xf32>
    %30 = tpu.matmul %27, %29, %cst_18 {dimension_numbers = #tpu.dot_dimension_numbers<[1], [0], [0], [1], [0, 0, 1, 1], [], []>} : vector<324x4xbf16>, vector<4x128xbf16>, vector<324x128xf32> -> vector<324x128xf32>
    %31 = arith.addf %25, %30 : vector<324x128xf32>
    %c0_19 = arith.constant 0 : index
    %c0_20 = arith.constant 0 : index
    %32 = vector.load %arg6[%c0_19, %c0_20] : memref<324x128xf32, #tpu.memory_space<vmem>>, vector<324x128xf32>
    tpu.vector_store %arg6[%c0_19, %c0_20], %31 {strides = array<i32>} : memref<324x128xf32, #tpu.memory_space<vmem>>, vector<324x128xf32>,
    %c0_21 = arith.constant 0 : index
    %c0_22 = arith.constant 0 : index
    %33 = vector.load %arg6[%c0_21, %c0_22] : memref<324x128xf32, #tpu.memory_space<vmem>>, vector<324x128xf32>
    %c0_23 = arith.constant 0 : index
    %c19 = arith.constant 19 : index
    %c0_24 = arith.constant 0 : index
    %34 = vector.load %arg1[%c0_23, %c19, %c0_24] : memref<1x396x4xbf16, #tpu.memory_space<vmem>>, vector<1x324x4xbf16>
    %35 = vector.shape_cast %34 : vector<1x324x4xbf16> to vector<324x4xbf16>
    %c2 = arith.constant 2 : index
    %c0_25 = arith.constant 0 : index
    %c0_26 = arith.constant 0 : index
    %36 = vector.load %arg2[%c2, %c0_25, %c0_26] : memref<9x4x128xbf16, #tpu.memory_space<vmem>>, vector<1x4x128xbf16>
    %37 = vector.shape_cast %36 : vector<1x4x128xbf16> to vector<4x128xbf16>
    %cst_27 = arith.constant dense<0.000000e+00> : vector<324x128xf32>
    %38 = tpu.matmul %35, %37, %cst_27 {dimension_numbers = #tpu.dot_dimension_numbers<[1], [0], [0], [1], [0, 0, 1, 1], [], []>} : vector<324x4xbf16>, vector<4x128xbf16>, vector<324x128xf32> -> vector<324x128xf32>
    %39 = arith.addf %33, %38 : vector<324x128xf32>
    %c0_28 = arith.constant 0 : index
    %c0_29 = arith.constant 0 : index
    %40 = vector.load %arg6[%c0_28, %c0_29] : memref<324x128xf32, #tpu.memory_space<vmem>>, vector<324x128xf32>
    tpu.vector_store %arg6[%c0_28, %c0_29], %39 {strides = array<i32>} : memref<324x128xf32, #tpu.memory_space<vmem>>, vector<324x128xf32>,
    %c0_30 = arith.constant 0 : index
    %c0_31 = arith.constant 0 : index
    %41 = vector.load %arg6[%c0_30, %c0_31] : memref<324x128xf32, #tpu.memory_space<vmem>>, vector<324x128xf32>
    %c0_32 = arith.constant 0 : index
    %c35 = arith.constant 35 : index
    %c0_33 = arith.constant 0 : index
    %42 = vector.load %arg1[%c0_32, %c35, %c0_33] : memref<1x396x4xbf16, #tpu.memory_space<vmem>>, vector<1x324x4xbf16>
    %43 = vector.shape_cast %42 : vector<1x324x4xbf16> to vector<324x4xbf16>
    %c3 = arith.constant 3 : index
    %c0_34 = arith.constant 0 : index
    %c0_35 = arith.constant 0 : index
    %44 = vector.load %arg2[%c3, %c0_34, %c0_35] : memref<9x4x128xbf16, #tpu.memory_space<vmem>>, vector<1x4x128xbf16>
    %45 = vector.shape_cast %44 : vector<1x4x128xbf16> to vector<4x128xbf16>
    %cst_36 = arith.constant dense<0.000000e+00> : vector<324x128xf32>
    %46 = tpu.matmul %43, %45, %cst_36 {dimension_numbers = #tpu.dot_dimension_numbers<[1], [0], [0], [1], [0, 0, 1, 1], [], []>} : vector<324x4xbf16>, vector<4x128xbf16>, vector<324x128xf32> -> vector<324x128xf32>
    %47 = arith.addf %41, %46 : vector<324x128xf32>
    %c0_37 = arith.constant 0 : index
    %c0_38 = arith.constant 0 : index
    %48 = vector.load %arg6[%c0_37, %c0_38] : memref<324x128xf32, #tpu.memory_space<vmem>>, vector<324x128xf32>
    tpu.vector_store %arg6[%c0_37, %c0_38], %47 {strides = array<i32>} : memref<324x128xf32, #tpu.memory_space<vmem>>, vector<324x128xf32>,
    %c0_39 = arith.constant 0 : index
    %c0_40 = arith.constant 0 : index
    %49 = vector.load %arg6[%c0_39, %c0_40] : memref<324x128xf32, #tpu.memory_space<vmem>>, vector<324x128xf32>
    %c0_41 = arith.constant 0 : index
    %c36 = arith.constant 36 : index
    %c0_42 = arith.constant 0 : index
    %50 = vector.load %arg1[%c0_41, %c36, %c0_42] : memref<1x396x4xbf16, #tpu.memory_space<vmem>>, vector<1x324x4xbf16>
    %51 = vector.shape_cast %50 : vector<1x324x4xbf16> to vector<324x4xbf16>
    %c4 = arith.constant 4 : index
    %c0_43 = arith.constant 0 : index
    %c0_44 = arith.constant 0 : index
    %52 = vector.load %arg2[%c4, %c0_43, %c0_44] : memref<9x4x128xbf16, #tpu.memory_space<vmem>>, vector<1x4x128xbf16>
    %53 = vector.shape_cast %52 : vector<1x4x128xbf16> to vector<4x128xbf16>
    %cst_45 = arith.constant dense<0.000000e+00> : vector<324x128xf32>
    %54 = tpu.matmul %51, %53, %cst_45 {dimension_numbers = #tpu.dot_dimension_numbers<[1], [0], [0], [1], [0, 0, 1, 1], [], []>} : vector<324x4xbf16>, vector<4x128xbf16>, vector<324x128xf32> -> vector<324x128xf32>
    %55 = arith.addf %49, %54 : vector<324x128xf32>
    %c0_46 = arith.constant 0 : index
    %c0_47 = arith.constant 0 : index
    %56 = vector.load %arg6[%c0_46, %c0_47] : memref<324x128xf32, #tpu.memory_space<vmem>>, vector<324x128xf32>
    tpu.vector_store %arg6[%c0_46, %c0_47], %55 {strides = array<i32>} : memref<324x128xf32, #tpu.memory_space<vmem>>, vector<324x128xf32>,
    %c0_48 = arith.constant 0 : index
    %c0_49 = arith.constant 0 : index
    %57 = vector.load %arg6[%c0_48, %c0_49] : memref<324x128xf32, #tpu.memory_space<vmem>>, vector<324x128xf32>
    %c0_50 = arith.constant 0 : index
    %c37 = arith.constant 37 : index
    %c0_51 = arith.constant 0 : index
    %58 = vector.load %arg1[%c0_50, %c37, %c0_51] : memref<1x396x4xbf16, #tpu.memory_space<vmem>>, vector<1x324x4xbf16>
    %59 = vector.shape_cast %58 : vector<1x324x4xbf16> to vector<324x4xbf16>
    %c5 = arith.constant 5 : index
    %c0_52 = arith.constant 0 : index
    %c0_53 = arith.constant 0 : index
    %60 = vector.load %arg2[%c5, %c0_52, %c0_53] : memref<9x4x128xbf16, #tpu.memory_space<vmem>>, vector<1x4x128xbf16>
    %61 = vector.shape_cast %60 : vector<1x4x128xbf16> to vector<4x128xbf16>
    %cst_54 = arith.constant dense<0.000000e+00> : vector<324x128xf32>
    %62 = tpu.matmul %59, %61, %cst_54 {dimension_numbers = #tpu.dot_dimension_numbers<[1], [0], [0], [1], [0, 0, 1, 1], [], []>} : vector<324x4xbf16>, vector<4x128xbf16>, vector<324x128xf32> -> vector<324x128xf32>
    %63 = arith.addf %57, %62 : vector<324x128xf32>
    %c0_55 = arith.constant 0 : index
    %c0_56 = arith.constant 0 : index
    %64 = vector.load %arg6[%c0_55, %c0_56] : memref<324x128xf32, #tpu.memory_space<vmem>>, vector<324x128xf32>
    tpu.vector_store %arg6[%c0_55, %c0_56], %63 {strides = array<i32>} : memref<324x128xf32, #tpu.memory_space<vmem>>, vector<324x128xf32>,
    %c0_57 = arith.constant 0 : index
    %c0_58 = arith.constant 0 : index
    %65 = vector.load %arg6[%c0_57, %c0_58] : memref<324x128xf32, #tpu.memory_space<vmem>>, vector<324x128xf32>
    %c0_59 = arith.constant 0 : index
    %c53 = arith.constant 53 : index
    %c0_60 = arith.constant 0 : index
    %66 = vector.load %arg1[%c0_59, %c53, %c0_60] : memref<1x396x4xbf16, #tpu.memory_space<vmem>>, vector<1x324x4xbf16>
    %67 = vector.shape_cast %66 : vector<1x324x4xbf16> to vector<324x4xbf16>
    %c6 = arith.constant 6 : index
    %c0_61 = arith.constant 0 : index
    %c0_62 = arith.constant 0 : index
    %68 = vector.load %arg2[%c6, %c0_61, %c0_62] : memref<9x4x128xbf16, #tpu.memory_space<vmem>>, vector<1x4x128xbf16>
    %69 = vector.shape_cast %68 : vector<1x4x128xbf16> to vector<4x128xbf16>
    %cst_63 = arith.constant dense<0.000000e+00> : vector<324x128xf32>
    %70 = tpu.matmul %67, %69, %cst_63 {dimension_numbers = #tpu.dot_dimension_numbers<[1], [0], [0], [1], [0, 0, 1, 1], [], []>} : vector<324x4xbf16>, vector<4x128xbf16>, vector<324x128xf32> -> vector<324x128xf32>
    %71 = arith.addf %65, %70 : vector<324x128xf32>
    %c0_64 = arith.constant 0 : index
    %c0_65 = arith.constant 0 : index
    %72 = vector.load %arg6[%c0_64, %c0_65] : memref<324x128xf32, #tpu.memory_space<vmem>>, vector<324x128xf32>
    tpu.vector_store %arg6[%c0_64, %c0_65], %71 {strides = array<i32>} : memref<324x128xf32, #tpu.memory_space<vmem>>, vector<324x128xf32>,
    %c0_66 = arith.constant 0 : index
    %c0_67 = arith.constant 0 : index
    %73 = vector.load %arg6[%c0_66, %c0_67] : memref<324x128xf32, #tpu.memory_space<vmem>>, vector<324x128xf32>
    %c0_68 = arith.constant 0 : index
    %c54 = arith.constant 54 : index
    %c0_69 = arith.constant 0 : index
    %74 = vector.load %arg1[%c0_68, %c54, %c0_69] : memref<1x396x4xbf16, #tpu.memory_space<vmem>>, vector<1x324x4xbf16>
    %75 = vector.shape_cast %74 : vector<1x324x4xbf16> to vector<324x4xbf16>
    %c7 = arith.constant 7 : index
    %c0_70 = arith.constant 0 : index
    %c0_71 = arith.constant 0 : index
    %76 = vector.load %arg2[%c7, %c0_70, %c0_71] : memref<9x4x128xbf16, #tpu.memory_space<vmem>>, vector<1x4x128xbf16>
    %77 = vector.shape_cast %76 : vector<1x4x128xbf16> to vector<4x128xbf16>
    %cst_72 = arith.constant dense<0.000000e+00> : vector<324x128xf32>
    %78 = tpu.matmul %75, %77, %cst_72 {dimension_numbers = #tpu.dot_dimension_numbers<[1], [0], [0], [1], [0, 0, 1, 1], [], []>} : vector<324x4xbf16>, vector<4x128xbf16>, vector<324x128xf32> -> vector<324x128xf32>
    %79 = arith.addf %73, %78 : vector<324x128xf32>
    %c0_73 = arith.constant 0 : index
    %c0_74 = arith.constant 0 : index
    %80 = vector.load %arg6[%c0_73, %c0_74] : memref<324x128xf32, #tpu.memory_space<vmem>>, vector<324x128xf32>
    tpu.vector_store %arg6[%c0_73, %c0_74], %79 {strides = array<i32>} : memref<324x128xf32, #tpu.memory_space<vmem>>, vector<324x128xf32>,
    %c0_75 = arith.constant 0 : index
    %c0_76 = arith.constant 0 : index
    %81 = vector.load %arg6[%c0_75, %c0_76] : memref<324x128xf32, #tpu.memory_space<vmem>>, vector<324x128xf32>
    %c0_77 = arith.constant 0 : index
    %c55 = arith.constant 55 : index
    %c0_78 = arith.constant 0 : index
    %82 = vector.load %arg1[%c0_77, %c55, %c0_78] : memref<1x396x4xbf16, #tpu.memory_space<vmem>>, vector<1x324x4xbf16>
    %83 = vector.shape_cast %82 : vector<1x324x4xbf16> to vector<324x4xbf16>
    %c8 = arith.constant 8 : index
    %c0_79 = arith.constant 0 : index
    %c0_80 = arith.constant 0 : index
    %84 = vector.load %arg2[%c8, %c0_79, %c0_80] : memref<9x4x128xbf16, #tpu.memory_space<vmem>>, vector<1x4x128xbf16>
    %85 = vector.shape_cast %84 : vector<1x4x128xbf16> to vector<4x128xbf16>
    %cst_81 = arith.constant dense<0.000000e+00> : vector<324x128xf32>
    %86 = tpu.matmul %83, %85, %cst_81 {dimension_numbers = #tpu.dot_dimension_numbers<[1], [0], [0], [1], [0, 0, 1, 1], [], []>} : vector<324x4xbf16>, vector<4x128xbf16>, vector<324x128xf32> -> vector<324x128xf32>
    %87 = arith.addf %81, %86 : vector<324x128xf32>
    %c0_82 = arith.constant 0 : index
    %c0_83 = arith.constant 0 : index
    %88 = vector.load %arg6[%c0_82, %c0_83] : memref<324x128xf32, #tpu.memory_space<vmem>>, vector<324x128xf32>
    tpu.vector_store %arg6[%c0_82, %c0_83], %87 {strides = array<i32>} : memref<324x128xf32, #tpu.memory_space<vmem>>, vector<324x128xf32>,
    %c0_84 = arith.constant 0 : index
    %c0_85 = arith.constant 0 : index
    %89 = vector.load %arg6[%c0_84, %c0_85] : memref<324x128xf32, #tpu.memory_space<vmem>>, vector<324x128xf32>
    %90 = tpu.iota {dimensions = array<i32: 1>} : vector<1x128xi32>
    %c8_i32 = arith.constant 8 : i32
    %91 = vector.broadcast %c8_i32 : i32 to vector<1x128xi32>
    %92 = arith.cmpi slt, %90, %91 : vector<1x128xi32>
    %93 = vector.broadcast %18 : vector<324x1xi1> to vector<324x128xi1>
    %94 = vector.broadcast %92 : vector<1x128xi1> to vector<324x128xi1>
    %95 = arith.andi %93, %94 : vector<324x128xi1>
    %cst_86 = arith.constant 0.000000e+00 : f32
    %96 = vector.broadcast %cst_86 : f32 to vector<324x128xf32>
    %97 = arith.select %95, %89, %96 : vector<324x128xi1>, vector<324x128xf32>
    %98 = vector.shape_cast %97 : vector<324x128xf32> to vector<1x324x128xf32>
    %cst_87 = arith.constant dense<0.000000e+00> : vector<1xf32>
    %99 = vector.multi_reduction <add>, %98, %cst_87 [1, 2] : vector<1x324x128xf32> to vector<1xf32>
    %100 = vector.shape_cast %99 : vector<1xf32> to vector<1x1x1xf32>
    %101 = vector.extract %100[0, 0, 0] : f32 from vector<1x1x1xf32>
    %cst_88 = arith.constant 4.8828125E-4 : f32
    %102 = arith.mulf %101, %cst_88 : f32
    %103 = vector.broadcast %102 : f32 to vector<324x128xf32>
    %104 = arith.subf %89, %103 : vector<324x128xf32>
    %cst_89 = arith.constant 0.000000e+00 : f32
    %105 = vector.broadcast %cst_89 : f32 to vector<324x128xf32>
    %106 = arith.select %95, %104, %105 : vector<324x128xi1>, vector<324x128xf32>
    %107 = arith.mulf %106, %106 : vector<324x128xf32>
    %108 = vector.shape_cast %107 : vector<324x128xf32> to vector<1x324x128xf32>
    %cst_90 = arith.constant dense<0.000000e+00> : vector<1xf32>
    %109 = vector.multi_reduction <add>, %108, %cst_90 [1, 2] : vector<1x324x128xf32> to vector<1xf32>
    %110 = vector.shape_cast %109 : vector<1xf32> to vector<1x1x1xf32>
    %111 = vector.extract %110[0, 0, 0] : f32 from vector<1x1x1xf32>
    %cst_91 = arith.constant 4.8828125E-4 : f32
    %112 = arith.mulf %111, %cst_91 : f32
    %cst_92 = arith.constant 9.99999974E-6 : f32
    %113 = arith.addf %112, %cst_92 : f32
    %114 = math.rsqrt %113 : f32
    %c0_93 = arith.constant 0 : index
    %c0_94 = arith.constant 0 : index
    %115 = vector.load %arg4[%c0_93, %c0_94] : memref<4x128xf32, #tpu.memory_space<vmem>>, vector<1x128xf32>
    %c1_95 = arith.constant 1 : index
    %c0_96 = arith.constant 0 : index
    %116 = vector.load %arg4[%c1_95, %c0_96] : memref<4x128xf32, #tpu.memory_space<vmem>>, vector<1x128xf32>
    %117 = vector.broadcast %102 : f32 to vector<324x128xf32>
    %118 = arith.subf %89, %117 : vector<324x128xf32>
    %119 = vector.broadcast %114 : f32 to vector<324x128xf32>
    %120 = arith.mulf %118, %119 : vector<324x128xf32>
    %121 = vector.broadcast %115 : vector<1x128xf32> to vector<324x128xf32>
    %122 = arith.mulf %120, %121 : vector<324x128xf32>
    %123 = vector.broadcast %116 : vector<1x128xf32> to vector<324x128xf32>
    %124 = arith.addf %122, %123 : vector<324x128xf32>
    %cst_97 = arith.constant 0.000000e+00 : f32
    %125 = vector.broadcast %cst_97 : f32 to vector<324x128xf32>
    %126 = arith.subf %125, %124 : vector<324x128xf32>
    %127 = math.exp %126 : vector<324x128xf32>
    %cst_98 = arith.constant 1.000000e+00 : f32
    %128 = vector.broadcast %cst_98 : f32 to vector<324x128xf32>
    %129 = arith.addf %128, %127 : vector<324x128xf32>
    %130 = tpu.reciprocal %129 {approx = true} : vector<324x128xf32> -> vector<324x128xf32>
    %131 = arith.mulf %124, %130 : vector<324x128xf32>
    %cst_99 = arith.constant 0.000000e+00 : f32
    %132 = vector.shape_cast %18 : vector<324x1xi1> to vector<324x1xi1>
    %133 = vector.broadcast %132 : vector<324x1xi1> to vector<324x128xi1>
    %134 = vector.broadcast %cst_99 : f32 to vector<324x128xf32>
    %135 = arith.select %133, %131, %134 : vector<324x128xi1>, vector<324x128xf32>
    %cst_100 = arith.constant 0.000000e+00 : bf16
    %136 = vector.broadcast %cst_100 : bf16 to vector<36x128xbf16>
    %c0_101 = arith.constant 0 : index
    %c0_102 = arith.constant 0 : index
    %137 = vector.load %arg7[%c0_101, %c0_102] : memref<396x128xbf16, #tpu.memory_space<vmem>>, vector<36x128xbf16>
    tpu.vector_store %arg7[%c0_101, %c0_102], %136 {strides = array<i32>} : memref<396x128xbf16, #tpu.memory_space<vmem>>, vector<36x128xbf16>,
    %cst_103 = arith.constant 0.000000e+00 : bf16
    %138 = vector.broadcast %cst_103 : bf16 to vector<36x128xbf16>
    %c360 = arith.constant 360 : index
    %c0_104 = arith.constant 0 : index
    %139 = vector.load %arg7[%c360, %c0_104] : memref<396x128xbf16, #tpu.memory_space<vmem>>, vector<36x128xbf16>
    tpu.vector_store %arg7[%c360, %c0_104], %138 {strides = array<i32>} : memref<396x128xbf16, #tpu.memory_space<vmem>>, vector<36x128xbf16>,
    %140 = arith.truncf %135 : vector<324x128xf32> to vector<324x128xbf16>
    %c36_105 = arith.constant 36 : index
    %c0_106 = arith.constant 0 : index
    %141 = vector.load %arg7[%c36_105, %c0_106] : memref<396x128xbf16, #tpu.memory_space<vmem>>, vector<324x128xbf16>
    tpu.vector_store %arg7[%c36_105, %c0_106], %140 {strides = array<i32>} : memref<396x128xbf16, #tpu.memory_space<vmem>>, vector<324x128xbf16>,
    %c17_107 = arith.constant 17 : index
    %c0_108 = arith.constant 0 : index
    %142 = vector.load %arg7[%c17_107, %c0_108] : memref<396x128xbf16, #tpu.memory_space<vmem>>, vector<324x128xbf16>
    %c18_109 = arith.constant 18 : index
    %c0_110 = arith.constant 0 : index
    %143 = vector.load %arg7[%c18_109, %c0_110] : memref<396x128xbf16, #tpu.memory_space<vmem>>, vector<324x128xbf16>
    %c19_111 = arith.constant 19 : index
    %c0_112 = arith.constant 0 : index
    %144 = vector.load %arg7[%c19_111, %c0_112] : memref<396x128xbf16, #tpu.memory_space<vmem>>, vector<324x128xbf16>
    %c35_113 = arith.constant 35 : index
    %c0_114 = arith.constant 0 : index
    %145 = vector.load %arg7[%c35_113, %c0_114] : memref<396x128xbf16, #tpu.memory_space<vmem>>, vector<324x128xbf16>
    %c36_115 = arith.constant 36 : index
    %c0_116 = arith.constant 0 : index
    %146 = vector.load %arg7[%c36_115, %c0_116] : memref<396x128xbf16, #tpu.memory_space<vmem>>, vector<324x128xbf16>
    %c37_117 = arith.constant 37 : index
    %c0_118 = arith.constant 0 : index
    %147 = vector.load %arg7[%c37_117, %c0_118] : memref<396x128xbf16, #tpu.memory_space<vmem>>, vector<324x128xbf16>
    %c53_119 = arith.constant 53 : index
    %c0_120 = arith.constant 0 : index
    %148 = vector.load %arg7[%c53_119, %c0_120] : memref<396x128xbf16, #tpu.memory_space<vmem>>, vector<324x128xbf16>
    %c54_121 = arith.constant 54 : index
    %c0_122 = arith.constant 0 : index
    %149 = vector.load %arg7[%c54_121, %c0_122] : memref<396x128xbf16, #tpu.memory_space<vmem>>, vector<324x128xbf16>
    %c55_123 = arith.constant 55 : index
    %c0_124 = arith.constant 0 : index
    %150 = vector.load %arg7[%c55_123, %c0_124] : memref<396x128xbf16, #tpu.memory_space<vmem>>, vector<324x128xbf16>
    %151 = tpu.concatenate %142, %143, %144, %145, %146, %147, %148, %149, %150 in 1 : vector<324x128xbf16>, vector<324x128xbf16>, vector<324x128xbf16>, vector<324x128xbf16>, vector<324x128xbf16>, vector<324x128xbf16>, vector<324x128xbf16>, vector<324x128xbf16>, vector<324x128xbf16> -> vector<324x1152xbf16>
    %c0_125 = arith.constant 0 : index
    %c0_126 = arith.constant 0 : index
    %152 = vector.load %arg3[%c0_125, %c0_126] : memref<1152x128xbf16, #tpu.memory_space<vmem>>, vector<1152x128xbf16>
    %cst_127 = arith.constant dense<0.000000e+00> : vector<324x128xf32>
    %153 = tpu.matmul %151, %152, %cst_127 {dimension_numbers = #tpu.dot_dimension_numbers<[1], [0], [0], [1], [0, 0, 1, 1], [], []>} : vector<324x1152xbf16>, vector<1152x128xbf16>, vector<324x128xf32> -> vector<324x128xf32>
    %154 = tpu.iota {dimensions = array<i32: 1>} : vector<1x128xi32>
    %c8_i32_128 = arith.constant 8 : i32
    %155 = vector.broadcast %c8_i32_128 : i32 to vector<1x128xi32>
    %156 = arith.cmpi slt, %154, %155 : vector<1x128xi32>
    %157 = vector.broadcast %18 : vector<324x1xi1> to vector<324x128xi1>
    %158 = vector.broadcast %156 : vector<1x128xi1> to vector<324x128xi1>
    %159 = arith.andi %157, %158 : vector<324x128xi1>
    %cst_129 = arith.constant 0.000000e+00 : f32
    %160 = vector.broadcast %cst_129 : f32 to vector<324x128xf32>
    %161 = arith.select %159, %153, %160 : vector<324x128xi1>, vector<324x128xf32>
    %162 = vector.shape_cast %161 : vector<324x128xf32> to vector<1x324x128xf32>
    %cst_130 = arith.constant dense<0.000000e+00> : vector<1xf32>
    %163 = vector.multi_reduction <add>, %162, %cst_130 [1, 2] : vector<1x324x128xf32> to vector<1xf32>
    %164 = vector.shape_cast %163 : vector<1xf32> to vector<1x1x1xf32>
    %165 = vector.extract %164[0, 0, 0] : f32 from vector<1x1x1xf32>
    %cst_131 = arith.constant 4.8828125E-4 : f32
    %166 = arith.mulf %165, %cst_131 : f32
    %167 = vector.broadcast %166 : f32 to vector<324x128xf32>
    %168 = arith.subf %153, %167 : vector<324x128xf32>
    %cst_132 = arith.constant 0.000000e+00 : f32
    %169 = vector.broadcast %cst_132 : f32 to vector<324x128xf32>
    %170 = arith.select %159, %168, %169 : vector<324x128xi1>, vector<324x128xf32>
    %171 = arith.mulf %170, %170 : vector<324x128xf32>
    %172 = vector.shape_cast %171 : vector<324x128xf32> to vector<1x324x128xf32>
    %cst_133 = arith.constant dense<0.000000e+00> : vector<1xf32>
    %173 = vector.multi_reduction <add>, %172, %cst_133 [1, 2] : vector<1x324x128xf32> to vector<1xf32>
    %174 = vector.shape_cast %173 : vector<1xf32> to vector<1x1x1xf32>
    %175 = vector.extract %174[0, 0, 0] : f32 from vector<1x1x1xf32>
    %cst_134 = arith.constant 4.8828125E-4 : f32
    %176 = arith.mulf %175, %cst_134 : f32
    %cst_135 = arith.constant 9.99999974E-6 : f32
    %177 = arith.addf %176, %cst_135 : f32
    %178 = math.rsqrt %177 : f32
    %c2_136 = arith.constant 2 : index
    %c0_137 = arith.constant 0 : index
    %179 = vector.load %arg4[%c2_136, %c0_137] : memref<4x128xf32, #tpu.memory_space<vmem>>, vector<1x128xf32>
    %c3_138 = arith.constant 3 : index
    %c0_139 = arith.constant 0 : index
    %180 = vector.load %arg4[%c3_138, %c0_139] : memref<4x128xf32, #tpu.memory_space<vmem>>, vector<1x128xf32>
    %181 = vector.broadcast %166 : f32 to vector<324x128xf32>
    %182 = arith.subf %153, %181 : vector<324x128xf32>
    %183 = vector.broadcast %178 : f32 to vector<324x128xf32>
    %184 = arith.mulf %182, %183 : vector<324x128xf32>
    %185 = vector.broadcast %179 : vector<1x128xf32> to vector<324x128xf32>
    %186 = arith.mulf %184, %185 : vector<324x128xf32>
    %187 = vector.broadcast %180 : vector<1x128xf32> to vector<324x128xf32>
    %188 = arith.addf %186, %187 : vector<324x128xf32>
    %cst_140 = arith.constant 2.000000e+01 : f32
    %189 = vector.broadcast %cst_140 : f32 to vector<324x128xf32>
    %190 = arith.minimumf %188, %189 : vector<324x128xf32>
    %191 = math.exp %190 : vector<324x128xf32>
    %cst_141 = arith.constant 2.000000e+00 : f32
    %192 = vector.broadcast %cst_141 : f32 to vector<324x128xf32>
    %193 = arith.addf %191, %192 : vector<324x128xf32>
    %194 = arith.mulf %191, %193 : vector<324x128xf32>
    %195 = arith.mulf %188, %194 : vector<324x128xf32>
    %cst_142 = arith.constant 2.000000e+00 : f32
    %196 = vector.broadcast %cst_142 : f32 to vector<324x128xf32>
    %197 = arith.addf %194, %196 : vector<324x128xf32>
    %198 = tpu.reciprocal %197 {approx = true} : vector<324x128xf32> -> vector<324x128xf32>
    %199 = arith.mulf %195, %198 : vector<324x128xf32>
    %200 = arith.truncf %199 : vector<324x128xf32> to vector<324x128xbf16>
    %c0_143 = arith.constant 0 : index
    %c0_144 = arith.constant 0 : index
    %c0_145 = arith.constant 0 : index
    %201 = vector.load %arg5[%c0_143, %c0_144, %c0_145] : memref<1x324x128xbf16, #tpu.memory_space<vmem>>, vector<1x324x128xbf16>
    %202 = vector.shape_cast %201 : vector<1x324x128xbf16> to vector<324x128xbf16>
    %203 = vector.shape_cast %200 : vector<324x128xbf16> to vector<1x324x128xbf16>
    tpu.vector_store %arg5[%c0_143, %c0_144, %c0_145], %203 {strides = array<i32>} : memref<1x324x128xbf16, #tpu.memory_space<vmem>>, vector<1x324x128xbf16>,
    return
  }
  func.func @transform_0(%arg0: i32) -> (i32, i32, i32) {
    %c0_i32 = arith.constant 0 : i32
    %c0_i32_0 = arith.constant 0 : i32
    %c0_i32_1 = arith.constant 0 : i32
    return %arg0, %c0_i32, %c0_i32_0 : i32, i32, i32
  }
  func.func @transform_1(%arg0: i32) -> (i32, i32, i32) {
    %c0_i32 = arith.constant 0 : i32
    %c0_i32_0 = arith.constant 0 : i32
    %c0_i32_1 = arith.constant 0 : i32
    %c0_i32_2 = arith.constant 0 : i32
    return %c0_i32, %c0_i32_0, %c0_i32_1 : i32, i32, i32
  }
  func.func @transform_2(%arg0: i32) -> (i32, i32) {
    %c0_i32 = arith.constant 0 : i32
    %c0_i32_0 = arith.constant 0 : i32
    %c0_i32_1 = arith.constant 0 : i32
    return %c0_i32, %c0_i32_0 : i32, i32
  }
  func.func @transform_3(%arg0: i32) -> (i32, i32) {
    %c0_i32 = arith.constant 0 : i32
    %c0_i32_0 = arith.constant 0 : i32
    %c0_i32_1 = arith.constant 0 : i32
    return %c0_i32, %c0_i32_0 : i32, i32
  }
  func.func @transform_4(%arg0: i32) -> (i32, i32, i32) {
    %c0_i32 = arith.constant 0 : i32
    %c0_i32_0 = arith.constant 0 : i32
    %c0_i32_1 = arith.constant 0 : i32
    return %arg0, %c0_i32, %c0_i32_0 : i32, i32, i32
  }
}

</mosaic_0001>

<bundles_post_ra>
// kernel: double_conv_forward.1
= control target key start
LH: loop header
LB: loop body
LE: loop exit
PB: predicated region body
PF: predicated region fallthrough
CT: control target
= control target key end

     0   :  { %s16101_s15 = smov 0   ;;  %s22267_s0 = inlined_call_operand.vmem [shape: bf16[2,396,4], index: 0, kind: input, shape index: {}]   ;;  %s22268_s1 = inlined_call_operand.vmem [shape: bf16[9,4,128], index: 1, kind: input, shape index: {}]   ;;  %s22269_s2 = inlined_call_operand.vmem [shape: bf16[1152,128], index: 2, kind: input, shape index: {}]   ;;  %s22270_s3 = inlined_call_operand.vmem [shape: f32[4,128], index: 3, kind: input, shape index: {}]   ;;  %s22271_s4 = inlined_call_operand.vmem [shape: bf16[2,324,128], index: 4, kind: output, shape index: {}]  }
   0x1 LB: > { %s12453_s16 = sadd.s32 4294967295, %s16071_s15   ;;  %p12457_p0 = scmp.ge.s32.totalorder %s16071_s15, 1  ;;  %s16071_s15 = sphi %s16101_s15, %s14_s15  }
   0x2   : > { %p162_p1 = scmp.lt.s32.totalorder %s16071_s15, 3 }
   0x4   : > { %p163_p2 = pnand %p12457_p0, %p162_p1 }
   0x6   : > { %166 = sbr.rel (%p163_p2) target bundleno = 3925 (0xf55), region = 36 }
   0xd   : > { %vm22280_vm0 = vcmask 1041408   ;;  %v12545_v0 = vld [vmem:[%s22268_s1 + $0x4] sm:$0x3]  ;;  %v22301_v1 = vmov 0.0   ;;  %v774_v3 = vld [vmem:[%s22268_s1] sm:$0x3] }
   0xe   : > { %13639 = vmatprep.subr.bf16.mxu0 %v22301_v1  ;;  %13467 = vmatprep.subr.bf16.mxu1 %v22301_v1  ;;  %v2372_v2 = vsel %vm22280_vm0, %v12545_v0, 0  ;;  %p188_p3 = scmp.lt.s32.totalorder %s12453_s16, 1  ;;  %v1112_v4 = vsel %vm22280_vm0, %v774_v3, 0  ;;  %vm22272_vm1 = vmmov 0   ;;  %vm22279_vm2 = vsmask.f32 7424 }
   0xf   : > { %13640 = vmatpush3.bf16.msra.mxu0 %v2372_v2  ;;  %13469 = vmatprep.mubr.msk.bf16.mxu1 %vm22272_vm1, %v22301_v1  ;;  %vm22275_vm3 = vsmask.f32 6400  ;;  %vm1046_vm4 = vcmask 31744   ;;  %v12588_v20 = vld [vmem:[%s22268_s1 + $0x6] sm:$0x3]  ;;  %vm22278_vm5 = vcmask 1046528  }
  0x10   : > { %13468 = vmatpush3.bf16.msra.mxu1 %v1112_v4  ;;  %13641 = vmatprep.mubr.msk.bf16.mxu0 %vm22272_vm1, %v22301_v1  ;;  %s23923_s16 = smov (!%p188_p3, %s12453_s16), 1  ;;  %v3095_v35 = vsel %vm22280_vm0, %v12588_v20, 0  ;;  %vm22277_vm6 = vcmask 1045504   ;;  %vm22274_vm7 = vsmask.f32 5376  ;;  %vm22276_vm8 = vcmask 1044480  }
  0x11   : > { %13725 = vmatprep.subr.bf16.mxu0 %v22301_v1  ;;  %13553 = vmatprep.subr.bf16.mxu1 %v22301_v1  ;;  %s15357_s21 = smul.u32 200, %s23923_s16  ;;  %vm6179_vm9 = vsmask.f32 4352 }
  0x12   : > { %s15358_s9 = smul.u32 164, %s23923_s16 }
  0x13   : > { %s16131_s24 = scalar_lea.vmem %s22267_s0, %s15357_s21 }
  0x14   : > { %v15382_v5 = vld [vmem:[%s16131_s24 + $0x8] sm:$0xff]   ;;  %v15383_v6 = vld [vmem:[%s16131_s24 + $0x10] sm:$0xff]   ;;  %v15386_v16 = vld [vmem:[%s16131_s24 + $0x18] sm:$0xff]  }
  0x15   : > { %v880_v7 = vshrl.u32 %v15382_v5, 16  ;;  %v882_v8 = vshll.u32 %v15382_v5, 16  ;;  %v887_v9 = vshll.u32 %v15383_v6, 16  ;;  %v15385_v10 = vld [vmem:[%s16131_s24 + $0x10] sm:$0xff]   ;;  %v15384_v11 = vld [vmem:[%s16131_s24 + $0x8] sm:$0xfe]  }
  0x16   : > { %v2129_v14 = vshrl.u32 %v15385_v10, 16  ;;  %v2132_v15 = vshll.u32 %v15385_v10, 16  ;;  %v15387_v17 = vld [vmem:[%s16131_s24 + $0x18] sm:$0xff]   ;;  %v2121_v18 = vshrl.u32 %v15384_v11, 16  ;;  %v2124_v19 = vshll.u32 %v15384_v11, 16  ;;  %v15389_v34 = vld [vmem:[%s16131_s24 + $0x20] sm:$0xff]  }
  0x17   : > { %v884_v12 = vrot.slane %v882_v8, 1  ;;  %v889_v13 = vrot.slane %v887_v9, 1  ;;  %v891_v21 = vshrl.u32 %v15383_v6, 16  ;;  %v895_v25 = vshll.u32 %v15386_v16, 16  ;;  %v15388_v39 = vld [vmem:[%s16131_s24 + $0x20] sm:$0xff]   ;;  %v15391_v50 = vld [vmem:[%s16131_s24 + $0x28] sm:$0xff]  }
  0x18   : > { %v2131_v23 = vrot.slane %v2129_v14, 1  ;;  %v2134_v24 = vrot.slane %v2132_v15, 2  ;;  %v2123_v26 = vrot.slane %v2121_v18, 1  ;;  %v2126_v27 = vrot.slane %v2124_v19, 2  ;;  %v15390_v53 = vld [vmem:[%s16131_s24 + $0x28] sm:$0xff]   ;;  %v15393_v60 = vld [vmem:[%s16131_s24 + $0x30] sm:$0xff]  }
  0x19   : > { %v885_v22 = vor.u32 %v884_v12, %v880_v7  ;;  %v2138_v28 = vshrl.u32 %v15387_v17, 16  ;;  %v2141_v31 = vshll.u32 %v15387_v17, 16  ;;  %v893_v36 = vor.u32 %v891_v21, %v889_v13  ;;  %v15392_v3 = vld [vmem:[%s16131_s24 + $0x30] sm:$0xff]  }
  0x1a   : > { %v2135_v30 = vor.u32 %v2134_v24, %v2131_v23  ;;  %v2127_v32 = vor.u32 %v2126_v27, %v2123_v26  ;;  %v897_v37 = vrot.slane %v895_v25, 1  ;;  %v2147_v42 = vshrl.u32 %v15389_v34, 16  ;;  %v15397_v26 = vld [vmem:[%s16131_s24 + $0x40] sm:$0xff]  }
  0x1b   : > { %v890_v29 = vsel %vm22279_vm2, %v885_v22, %v889_v13  ;;  %v2140_v33 = vrot.slane %v2138_v28, 1  ;;  %v2143_v38 = vrot.slane %v2141_v31, 2  ;;  %v2150_v43 = vshll.u32 %v15389_v34, 16  ;;  %v15395_v13 = vld [vmem:[%s16131_s24 + $0x38] sm:$0xff]  }
  0x1c   : > { %13470 = vmatmul.mubr.msk.bf16.vlgmr.msra.gmra.mrb[0].mxu1 %vm1046_vm4, %v890_v29  ;;  %v2136_v40 = vsel %vm22275_vm3, %v2127_v32, %v2135_v30  ;;  %v898_v44 = vsel %vm22279_vm2, %v893_v36, %v897_v37  ;;  %v899_v45 = vshrl.u32 %v15386_v16, 16  ;;  %v903_v46 = vshll.u32 %v15388_v39, 16  ;;  %v15394_v16 = vld [vmem:[%s16131_s24 + $0x38] sm:$0xff]   ;;  %v15396_v29 = vld [vmem:[%s16131_s24 + $0x40] sm:$0xff]  }
  0x1d   : > { %13473 = vmatprep.mubr.msk.bf16.mxu1 %vm22272_vm1, %v22301_v1  ;;  %13642 = vmatmul.mubr.msk.bf16.vlgmr.msra.gmra.mrb[0].mxu0 %vm1046_vm4, %v2136_v40  ;;  %v2144_v41 = vor.u32 %v2143_v38, %v2140_v33  ;;  %v2149_v48 = vrot.slane %v2147_v42, 1  ;;  %v2152_v49 = vrot.slane %v2150_v43, 2  ;;  %v2156_v55 = vshrl.u32 %v15391_v50, 16  ;;  %v15398_v42 = vld [vmem:[%s16131_s24 + $0x48] sm:$0xff]  }
  0x1e   : > { %13726 = vmatpush3.bf16.msra.mxu0 %v3095_v35  ;;  %13645 = vmatprep.mubr.msk.bf16.mxu0 %vm22272_vm1, %v22301_v1  ;;  %v901_v51 = vor.u32 %v899_v45, %v897_v37  ;;  %v905_v52 = vrot.slane %v903_v46, 1  ;;  %v2159_v56 = vshll.u32 %v15391_v50, 16  ;;  %v907_v58 = vshrl.u32 %v15388_v39, 16  ;;  %v15399_v39 = vld [vmem:[%s16131_s24 + $0x48] sm:$0xff]  }
  0x1f   : > { %13811 = vmatprep.subr.bf16.mxu0 %v22301_v1  ;;  %v2145_v47 = vsel %vm22275_vm3, %v2135_v30, %v2144_v41  ;;  %v2153_v54 = vor.u32 %v2152_v49, %v2149_v48  ;;  %v911_v59 = vshll.u32 %v15390_v53, 16  ;;  %v2158_v62 = vrot.slane %v2156_v55, 1  ;;  %v15400_v55 = vld [vmem:[%s16131_s24 + $0x50] sm:$0xff]  }
  0x20   : > { %v906_v57 = vsel %vm22279_vm2, %v901_v51, %v905_v52  ;;  %v2161_v63 = vrot.slane %v2159_v56, 2  ;;  %v909_v0 = vor.u32 %v907_v58, %v905_v52  ;;  %v2165_v4 = vshrl.u32 %v15393_v60, 16  ;;  %v15401_v52 = vld [vmem:[%s16131_s24 + $0x50] sm:$0xff]   ;;  %v12502_v56 = vld [vmem:[%s22268_s1 + $0x2] sm:$0x3] }
  0x21   : > { %v2154_v61 = vsel %vm22275_vm3, %v2144_v41, %v2153_v54  ;;  %v913_v2 = vrot.slane %v911_v59, 1  ;;  %v2168_v6 = vshll.u32 %v15393_v60, 16  ;;  %v915_v8 = vshrl.u32 %v15390_v53, 16 }
  0x22   : > { %v2162_v5 = vor.u32 %v2161_v63, %v2158_v62  ;;  %v919_v9 = vshll.u32 %v15392_v3, 16  ;;  %v2167_v10 = vrot.slane %v2165_v4, 1  ;;  %v2174_v18 = vshrl.u32 %v15395_v13, 16 }
  0x23   : > { %v914_v7 = vsel %vm22279_vm2, %v909_v0, %v913_v2  ;;  %v2170_v12 = vrot.slane %v2168_v6, 2  ;;  %v917_v14 = vor.u32 %v915_v8, %v913_v2  ;;  %v2177_v19 = vshll.u32 %v15395_v13, 16  ;;  %v15403_v0 = vld [vmem:[%s16131_s24 + $0x58] sm:$0xff]  }
  0x24   : > { %13474 = vmatmul.mubr.msk.bf16.gmra.mrb[4].mxu1 %vm1046_vm4, %v898_v44  ;;  %v2163_v11 = vsel %vm22275_vm3, %v2153_v54, %v2162_v5  ;;  %v921_v15 = vrot.slane %v919_v9, 1  ;;  %v923_v21 = vshrl.u32 %v15392_v3, 16  ;;  %v927_v22 = vshll.u32 %v15394_v16, 16 }
  0x25   : > { %13477 = vmatprep.mubr.msk.bf16.mxu1 %vm22272_vm1, %v22301_v1  ;;  %13646 = vmatmul.mubr.msk.bf16.gmra.mrb[4].mxu0 %vm1046_vm4, %v2145_v47  ;;  %v2171_v17 = vor.u32 %v2170_v12, %v2167_v10  ;;  %v2176_v24 = vrot.slane %v2174_v18, 1  ;;  %v2179_v25 = vrot.slane %v2177_v19, 2  ;;  %v2183_v31 = vshrl.u32 %v15397_v26, 16  ;;  %v15404_v10 = vld [vmem:[%s16131_s24 + $0x60] sm:$0xff]  }
  0x26   : > { %13649 = vmatprep.mubr.msk.bf16.mxu0 %vm22272_vm1, %v22301_v1  ;;  %v922_v20 = vsel %vm22279_vm2, %v917_v14, %v921_v15  ;;  %v925_v27 = vor.u32 %v923_v21, %v921_v15  ;;  %v929_v28 = vrot.slane %v927_v22, 1  ;;  %v2186_v32 = vshll.u32 %v15397_v26, 16  ;;  %v15406_v22 = vld [vmem:[%s16131_s24 + $0x68] sm:$0xff]  }
  0x27   : > { %v2172_v23 = vsel %vm22275_vm3, %v2162_v5, %v2171_v17  ;;  %v2180_v30 = vor.u32 %v2179_v25, %v2176_v24  ;;  %v931_v34 = vshrl.u32 %v15394_v16, 16  ;;  %v935_v35 = vshll.u32 %v15396_v29, 16  ;;  %v15405_v16 = vld [vmem:[%s16131_s24 + $0x60] sm:$0xff]  }
  0x28   : > { %v930_v33 = vsel %vm22279_vm2, %v925_v27, %v929_v28  ;;  %v2185_v37 = vrot.slane %v2183_v31, 1  ;;  %v2188_v38 = vrot.slane %v2186_v32, 2  ;;  %v2192_v44 = vshrl.u32 %v15399_v39, 16  ;;  %v15407_v32 = vld [vmem:[%s16131_s24 + $0x68] sm:$0xff]  }
  0x29   : > { %v2181_v36 = vsel %vm22275_vm3, %v2171_v17, %v2180_v30  ;;  %v933_v40 = vor.u32 %v931_v34, %v929_v28  ;;  %v937_v41 = vrot.slane %v935_v35, 1  ;;  %v2195_v45 = vshll.u32 %v15399_v39, 16  ;;  %v15408_v34 = vld [vmem:[%s16131_s24 + $0x70] sm:$0xff]  }
  0x2a   : > { %v2189_v43 = vor.u32 %v2188_v38, %v2185_v37  ;;  %v939_v47 = vshrl.u32 %v15396_v29, 16  ;;  %v943_v48 = vshll.u32 %v15398_v42, 16  ;;  %v2194_v50 = vrot.slane %v2192_v44, 1 }
  0x2b   : > { %v938_v46 = vsel %vm22279_vm2, %v933_v40, %v937_v41  ;;  %v2197_v51 = vrot.slane %v2195_v45, 2  ;;  %v2201_v59 = vshrl.u32 %v15401_v52, 16  ;;  %v2204_v60 = vshll.u32 %v15401_v52, 16  ;;  %v15409_v40 = vld [vmem:[%s16131_s24 + $0x70] sm:$0xff]  }
  0x2c   : > { %13478 = vmatmul.mubr.msk.bf16.gmra.mrb[8].mxu1 %vm1046_vm4, %v906_v57  ;;  %v2190_v49 = vsel %vm22275_vm3, %v2180_v30, %v2189_v43  ;;  %v941_v53 = vor.u32 %v939_v47, %v937_v41  ;;  %v945_v54 = vrot.slane %v943_v48, 1  ;;  %v1648_v57 = vsel %vm22280_vm0, %v12502_v56, 0  ;;  %v15410_v47 = vld [vmem:[%s16131_s24 + $0x78] sm:$0xff]  }
  0x2d   : > { %13481 = vmatprep.mubr.msk.bf16.mxu1 %vm22272_vm1, %v22301_v1  ;;  %13650 = vmatmul.mubr.msk.bf16.gmra.mrb[8].mxu0 %vm1046_vm4, %v2154_v61  ;;  %v2198_v58 = vor.u32 %v2197_v51, %v2194_v50  ;;  %v947_v62 = vshrl.u32 %v15398_v42, 16  ;;  %v951_v63 = vshll.u32 %v15400_v55, 16  ;;  %v2203_v3 = vrot.slane %v2201_v59, 1 }
  0x2e   : > { %13653 = vmatprep.mubr.msk.bf16.mxu0 %vm22272_vm1, %v22301_v1  ;;  %13554 = vmatpush3.bf16.msra.mxu1 %v1648_v57  ;;  %v946_v61 = vsel %vm22279_vm2, %v941_v53, %v945_v54  ;;  %v2206_v4 = vrot.slane %v2204_v60, 2  ;;  %v2210_v8 = vshrl.u32 %v15403_v0, 16  ;;  %v2213_v9 = vshll.u32 %v15403_v0, 16  ;;  %v15411_v53 = vld [vmem:[%s16131_s24 + $0x78] sm:$0xff]   ;;  %v15412_v60 = vld [vmem:[%s16131_s24 + $0x80] sm:$0xff]  }
  0x2f   : > { %v2199_v2 = vsel %vm22275_vm3, %v2189_v43, %v2198_v58  ;;  %v949_v5 = vor.u32 %v947_v62, %v945_v54  ;;  %v953_v6 = vrot.slane %v951_v63, 1  ;;  %v955_v13 = vshrl.u32 %v15400_v55, 16 }
  0x30   : > { %v2212_v15 = vrot.slane %v2210_v8, 1  ;;  %v2215_v17 = vrot.slane %v2213_v9, 2  ;;  %v967_v18 = vshll.u32 %v15404_v10, 16  ;;  %v2222_v24 = vshll.u32 %v15405_v16, 16 }
  0x31   : > { %v954_v12 = vsel %vm22279_vm2, %v949_v5, %v953_v6  ;;  %v975_v31 = vshll.u32 %v15406_v22, 16  ;;  %v2231_v37 = vshll.u32 %v15407_v32, 16  ;;  %v971_v39 = vshrl.u32 %v15404_v10, 16  ;;  %v15414_v10 = vld [vmem:[%s16131_s24 + $0x88] sm:$0xff]  }
  0x32   : > { %v2216_v25 = vor.u32 %v2215_v17, %v2212_v15  ;;  %v969_v27 = vrot.slane %v967_v18, 1  ;;  %v2224_v30 = vrot.slane %v2222_v24, 2  ;;  %v983_v45 = vshll.u32 %v15408_v34, 16  ;;  %v15417_v24 = vld [vmem:[%s16131_s24 + $0x90] sm:$0xff]  }
  0x33   : > { %v977_v42 = vrot.slane %v975_v31, 1  ;;  %v2233_v44 = vrot.slane %v2231_v37, 2  ;;  %v2240_v50 = vshll.u32 %v15409_v40, 16  ;;  %v979_v52 = vshrl.u32 %v15406_v22, 16  ;;  %v15418_v37 = vld [vmem:[%s16131_s24 + $0x98] sm:$0xff]  }
  0x34   : > { %13482 = vmatmul.mubr.msk.bf16.gmra.mrb[12].mxu1 %vm1046_vm4, %v914_v7  ;;  %v15402_v7 = vld [vmem:[%s16131_s24 + $0x58] sm:$0xff]   ;;  %v973_v48 = vor.u32 %v971_v39, %v969_v27  ;;  %v985_v55 = vrot.slane %v983_v45, 1  ;;  %v2246_v62 = vshrl.u32 %v15411_v53, 16  ;;  %v2249_v63 = vshll.u32 %v15411_v53, 16  ;;  %v15421_v53 = vld [vmem:[%s16131_s24 + $0xa0] sm:$0xff]  }
  0x35   : > { %13485 = vmatprep.mubr.msk.bf16.mxu1 %vm22272_vm1, %v22301_v1  ;;  %13654 = vmatmul.mubr.msk.bf16.gmra.mrb[12].mxu0 %vm1046_vm4, %v2163_v11  ;;  %v2207_v11 = vor.u32 %v2206_v4, %v2203_v3  ;;  %v959_v14 = vshll.u32 %v15402_v7, 16  ;;  %v963_v26 = vshrl.u32 %v15402_v7, 16  ;;  %v2242_v57 = vrot.slane %v2240_v50, 2  ;;  %v15413_v3 = vld [vmem:[%s16131_s24 + $0x80] sm:$0xff]  }
  0x36   : > { %13657 = vmatprep.mubr.msk.bf16.mxu0 %vm22272_vm1, %v22301_v1  ;;  %v978_v54 = vsel %vm22279_vm2, %v973_v48, %v977_v42  ;;  %v2251_v7 = vrot.slane %v2249_v63, 2  ;;  %v999_v8 = vshll.u32 %v15412_v60, 16  ;;  %v995_v15 = vshrl.u32 %v15410_v47, 16  ;;  %v15420_v50 = vld [vmem:[%s16131_s24 + $0xa0] sm:$0xff]  }
  0x37   : > { %v2208_v19 = vsel %vm22275_vm3, %v2198_v58, %v2207_v11  ;;  %v961_v21 = vrot.slane %v959_v14, 1  ;;  %v991_v58 = vshll.u32 %v15410_v47, 16  ;;  %v2276_v39 = vshll.u32 %v15417_v24, 16  ;;  %v15422_v63 = vld [vmem:[%s16131_s24 + $0xa8] ss:$0 sps:$4 sm:$0x77]  }
  0x38   : > { %v1001_v18 = vrot.slane %v999_v8, 1  ;;  %v1023_v47 = vshll.u32 %v15418_v37, 16 }
  0x39   : > { %v965_v35 = vor.u32 %v963_v26, %v961_v21  ;;  %v993_v5 = vrot.slane %v991_v58, 1 }
  0x3b   : > { %v970_v41 = vsel %vm22279_vm2, %v965_v35, %v969_v27  ;;  %v2273_v35 = vshrl.u32 %v15417_v24, 16  ;;  %v15426_v24 = vld [vmem:[%s16131_s24 + $0x10] sm:$0xfe]  }
  0x3c   : > { %13486 = vmatmul.mubr.msk.bf16.gmra.mrb[16].mxu1 %vm1046_vm4, %v922_v20  ;;  %v957_v20 = vor.u32 %v955_v13, %v953_v6  ;;  %v2248_v6 = vrot.slane %v2246_v62, 1  ;;  %v2258_v13 = vshll.u32 %v15413_v3, 16 }
  0x3d   : > { %13489 = vmatprep.mubr.msk.bf16.mxu1 %vm22272_vm1, %v22301_v1  ;;  %13658 = vmatmul.mubr.msk.bf16.gmra.mrb[16].mxu0 %vm1046_vm4, %v2172_v23  ;;  %v2219_v23 = vshrl.u32 %v15405_v16, 16  ;;  %v15415_v16 = vld [vmem:[%s16131_s24 + $0x88] sm:$0xff]   ;;  %v2275_v45 = vrot.slane %v2273_v35, 1  ;;  %v15429_v35 = vld [vmem:[%s16131_s24 + $0x20] sm:$0xff]  }
  0x3e   : > { %13661 = vmatprep.mubr.msk.bf16.mxu0 %vm22272_vm1, %v22301_v1  ;;  %v962_v28 = vsel %vm22279_vm2, %v957_v20, %v961_v21  ;;  %v2252_v14 = vor.u32 %v2251_v7, %v2248_v6  ;;  %v2260_v20 = vrot.slane %v2258_v13, 2  ;;  %v1007_v21 = vshll.u32 %v15414_v10, 16 }
  0x3f   : > { %v2221_v29 = vrot.slane %v2219_v23, 1  ;;  %v15416_v23 = vld [vmem:[%s16131_s24 + $0x90] sm:$0xff]   ;;  %v2264_v26 = vshrl.u32 %v15415_v16, 16  ;;  %v2267_v27 = vshll.u32 %v15415_v16, 16  ;;  %v1035_v16 = vshrl.u32 %v15420_v50, 16 }
  0x41   : > { %v2225_v38 = vor.u32 %v2224_v30, %v2221_v29  ;;  %v1003_v29 = vshrl.u32 %v15412_v60, 16  ;;  %v1009_v30 = vrot.slane %v1007_v21, 1  ;;  %v1031_v60 = vshll.u32 %v15420_v50, 16 }
  0x44   : > { %13490 = vmatmul.mubr.msk.bf16.gmra.mrb[20].mxu1 %vm1046_vm4, %v930_v33  ;;  %v2217_v33 = vsel %vm22275_vm3, %v2207_v11, %v2216_v25 }
  0x45   : > { %13493 = vmatprep.mubr.msk.bf16.mxu1 %vm22272_vm1, %v22301_v1  ;;  %13662 = vmatmul.mubr.msk.bf16.gmra.mrb[20].mxu0 %vm1046_vm4, %v2181_v36  ;;  %v2228_v36 = vshrl.u32 %v15407_v32, 16  ;;  %v2266_v32 = vrot.slane %v2264_v26, 1 }
  0x46   : > { %13665 = vmatprep.mubr.msk.bf16.mxu0 %vm22272_vm1, %v22301_v1 }
  0x47   : > { %v2230_v43 = vrot.slane %v2228_v36, 1 }
  0x49   : > { %v2234_v51 = vor.u32 %v2233_v44, %v2230_v43 }
  0x4b   : > { %v2235_v59 = vsel %vm22275_vm3, %v2225_v38, %v2234_v51 }
  0x4c   : > { %13494 = vmatmul.mubr.msk.bf16.gmra.mrb[24].mxu1 %vm1046_vm4, %v938_v46  ;;  %v2226_v46 = vsel %vm22275_vm3, %v2216_v25, %v2225_v38  ;;  %v997_v25 = vor.u32 %v995_v15, %v993_v5  ;;  %v1005_v38 = vor.u32 %v1003_v29, %v1001_v18  ;;  %v15425_v29 = vld [vmem:[%s16131_s24 + $0x10] sm:$0xff]  }
  0x4d   : > { %13497 = vmatprep.mubr.msk.bf16.mxu1 %vm22272_vm1, %v22301_v1  ;;  %13666 = vmatmul.mubr.msk.bf16.gmra.mrb[24].mxu0 %vm1046_vm4, %v2190_v49  ;;  %v2237_v49 = vshrl.u32 %v15409_v40, 16  ;;  %v15419_v40 = vld [vmem:[%s16131_s24 + $0x98] sm:$0xff]  }
  0x4e   : > { %13669 = vmatprep.mubr.msk.bf16.mxu0 %vm22272_vm1, %v22301_v1  ;;  %v1002_v31 = vsel %vm22279_vm2, %v997_v25, %v1001_v18  ;;  %v1010_v44 = vsel %vm22279_vm2, %v1005_v38, %v1009_v30  ;;  %v2282_v48 = vshrl.u32 %v15419_v40, 16  ;;  %v1544_v38 = vrot.slane %v15425_v29, 1 }
  0x4f   : > { %v2239_v56 = vrot.slane %v2237_v49, 1 }
  0x50   : > { %v2284_v58 = vrot.slane %v2282_v48, 1 }
  0x51   : > { %v2243_v0 = vor.u32 %v2242_v57, %v2239_v56  ;;  %v1025_v56 = vrot.slane %v1023_v47, 1  ;;  %v15431_v47 = vld [vmem:[%s16131_s24 + $0x28] sm:$0xff]  }
  0x53   : > { %v2244_v9 = vsel %vm22275_vm3, %v2234_v51, %v2243_v0  ;;  %v2253_v22 = vsel %vm22275_vm3, %v2243_v0, %v2252_v14 }
  0x54   : > { %13498 = vmatmul.mubr.msk.bf16.gmra.mrb[28].mxu1 %vm1046_vm4, %v946_v61  ;;  %v981_v61 = vor.u32 %v979_v52, %v977_v42  ;;  %v1011_v42 = vshrl.u32 %v15414_v10, 16  ;;  %v2285_v52 = vshll.u32 %v15419_v40, 16  ;;  %v15423_v10 = vld [vmem:[%s16131_s24 + $0xa8] ss:$0 sps:$4 sm:$0xff]  }
  0x55   : > { %13501 = vmatprep.mubr.msk.bf16.mxu1 %vm22272_vm1, %v22301_v1  ;;  %13670 = vmatmul.mubr.msk.bf16.gmra.mrb[28].mxu0 %vm1046_vm4, %v2199_v2  ;;  %v987_v2 = vshrl.u32 %v15408_v34, 16  ;;  %v1015_v34 = vshll.u32 %v15416_v23, 16  ;;  %v2300_v13 = vshrl.u32 %v15423_v10, 16 }
  0x56   : > { %13673 = vmatprep.mubr.msk.bf16.mxu0 %vm22272_vm1, %v22301_v1  ;;  %v986_v4 = vsel %vm22279_vm2, %v981_v61, %v985_v55  ;;  %v1013_v51 = vor.u32 %v1011_v42, %v1009_v30  ;;  %v2291_v61 = vshrl.u32 %v15421_v53, 16  ;;  %v2844_v30 = vshrl.u32 %v15426_v24, 16 }
  0x57   : > { %v989_v11 = vor.u32 %v987_v2, %v985_v55  ;;  %v1017_v43 = vrot.slane %v1015_v34, 1  ;;  %v1019_v55 = vshrl.u32 %v15416_v23, 16  ;;  %v2294_v2 = vshll.u32 %v15421_v53, 16 }
  0x58   : > { %v2293_v6 = vrot.slane %v2291_v61, 1  ;;  %v2847_v34 = vshll.u32 %v15426_v24, 16  ;;  %v2846_v40 = vrot.slane %v2844_v30, 1 }
  0x59   : > { %v994_v17 = vsel %vm22279_vm2, %v989_v11, %v993_v5  ;;  %v1018_v57 = vsel %vm22279_vm2, %v1013_v51, %v1017_v43  ;;  %v1021_v0 = vor.u32 %v1019_v55, %v1017_v43  ;;  %v1033_v5 = vrot.slane %v1031_v60, 1  ;;  %v15428_v43 = vld [vmem:[%s16131_s24 + $0x18] sm:$0xff]   ;;  %v15430_v55 = vld [vmem:[%s16131_s24 + $0x20] sm:$0xff]  }
  0x5a   : > { %v2296_v8 = vrot.slane %v2294_v2, 2  ;;  %v1546_v51 = vrot.slane %v15428_v43, 1  ;;  %v1548_v61 = vrot.slane %v15430_v55, 1  ;;  %v15432_v2 = vld [vmem:[%s16131_s24 + $0x28] sm:$0xff]  }
  0x5b   : > { %v1026_v7 = vsel %vm22279_vm2, %v1021_v0, %v1025_v56  ;;  %v1037_v23 = vor.u32 %v1035_v16, %v1033_v5  ;;  %v15436_v16 = vld [vmem:[%s16131_s24 + $0x38] sm:$0xff]  }
  0x5c   : > { %13502 = vmatmul.mubr.msk.bf16.gmra.mrb[32].mxu1 %vm1046_vm4, %v954_v12  ;;  %v2255_v12 = vshrl.u32 %v15413_v3, 16  ;;  %v2297_v15 = vor.u32 %v2296_v8, %v2293_v6  ;;  %v15435_v6 = vld [vmem:[%s16131_s24 + $0x38] sm:$0xff]  }
  0x5d   : > { %13505 = vmatprep.mubr.msk.bf16.mxu1 %vm22272_vm1, %v22301_v1  ;;  %13674 = vmatmul.mubr.msk.bf16.gmra.mrb[32].mxu0 %vm1046_vm4, %v2208_v19 }
  0x5e   : > { %13677 = vmatprep.mubr.msk.bf16.mxu0 %vm22272_vm1, %v22301_v1  ;;  %v2257_v19 = vrot.slane %v2255_v12, 1 }
  0x64   : > { %13506 = vmatmul.mubr.msk.bf16.gmra.mrb[36].mxu1 %vm1046_vm4, %v962_v28  ;;  %v2261_v28 = vor.u32 %v2260_v20, %v2257_v19  ;;  %v2302_v19 = vrot.slane %v2300_v13, 1  ;;  %v15434_v13 = vld [vmem:[%s16131_s24 + $0x30] sm:$0xff]  }
  0x65   : > { %13509 = vmatprep.mubr.msk.bf16.mxu1 %vm22272_vm1, %v22301_v1  ;;  %13678 = vmatmul.mubr.msk.bf16.gmra.mrb[36].mxu0 %vm1046_vm4, %v2217_v33  ;;  %v2269_v33 = vrot.slane %v2267_v27, 2  ;;  %v1043_v27 = vshrl.u32 %v15422_v63, 16 }
  0x66   : > { %13681 = vmatprep.mubr.msk.bf16.mxu0 %vm22272_vm1, %v22301_v1  ;;  %v2262_v36 = vsel %vm22275_vm3, %v2252_v14, %v2261_v28  ;;  %v2303_v14 = vshll.u32 %v15423_v10, 16 }
  0x68   : > { %v2305_v20 = vrot.slane %v2303_v14, 2  ;;  %v2888_v14 = vshrl.u32 %v15435_v6, 16 }
  0x6a   : > { %v2306_v25 = vor.u32 %v2305_v20, %v2302_v19  ;;  %v15439_v20 = vld [vmem:[%s16131_s24 + $0x48] sm:$0xff]  }
  0x6b   : > { %v2906_v29 = vshrl.u32 %v15439_v20, 16  ;;  %v2909_v30 = vshll.u32 %v15439_v20, 16 }
  0x6c   : > { %13510 = vmatmul.mubr.msk.bf16.gmra.mrb[40].mxu1 %vm1046_vm4, %v970_v41  ;;  %v2270_v41 = vor.u32 %v2269_v33, %v2266_v32  ;;  %v2307_v33 = vsel %vm22275_vm3, %v2297_v15, %v2306_v25 }
  0x6d   : > { %13513 = vmatprep.mubr.msk.bf16.mxu1 %vm22272_vm1, %v22301_v1  ;;  %13682 = vmatmul.mubr.msk.bf16.gmra.mrb[40].mxu0 %vm1046_vm4, %v2226_v46  ;;  %v2278_v46 = vrot.slane %v2276_v39, 2 }
  0x6e   : > { %13685 = vmatprep.mubr.msk.bf16.mxu0 %vm22272_vm1, %v22301_v1  ;;  %v2271_v49 = vsel %vm22275_vm3, %v2261_v28, %v2270_v41  ;;  %v15424_v28 = vld [vmem:[%s16131_s24 + $0x8] sm:$0xfe]  }
  0x74   : > { %13514 = vmatmul.mubr.msk.bf16.gmra.mrb[44].mxu1 %vm1046_vm4, %v978_v54  ;;  %v2279_v54 = vor.u32 %v2278_v46, %v2275_v45  ;;  %v12631_v45 = vld [vmem:[%s22268_s1 + $0x8] sm:$0x3]  ;;  %v2864_v46 = vshll.u32 %v15429_v35, 16 }
  0x75   : > { %13517 = vmatprep.mubr.msk.bf16.mxu1 %vm22272_vm1, %v22301_v1  ;;  %13686 = vmatmul.mubr.msk.bf16.gmra.mrb[44].mxu0 %vm1046_vm4, %v2235_v59  ;;  %v2287_v59 = vrot.slane %v2285_v52, 2  ;;  %v3672_v50 = vsel %vm22280_vm0, %v12631_v45, 0 }
  0x76   : > { %13689 = vmatprep.mubr.msk.bf16.mxu0 %vm22272_vm1, %v22301_v1  ;;  %v2280_v62 = vsel %vm22275_vm3, %v2270_v41, %v2279_v54  ;;  %v2849_v41 = vrot.slane %v2847_v34, 2  ;;  %v15438_v34 = vld [vmem:[%s16131_s24 + $0x40] sm:$0xff]  }
  0x77   : > { %v2288_v3 = vor.u32 %v2287_v59, %v2284_v58  ;;  %v2873_v58 = vshll.u32 %v15431_v47, 16  ;;  %v15433_v59 = vld [vmem:[%s16131_s24 + $0x30] sm:$0xff]  }
  0x78   : > { %v2850_v48 = vor.u32 %v2849_v41, %v2846_v40  ;;  %v2911_v40 = vrot.slane %v2909_v30, 2 }
  0x79   : > { %v2289_v11 = vsel %vm22275_vm3, %v2279_v54, %v2288_v3  ;;  %v2298_v21 = vsel %vm22275_vm3, %v2288_v3, %v2297_v15  ;;  %v2866_v54 = vrot.slane %v2864_v46, 2  ;;  %v2875_v0 = vrot.slane %v2873_v58, 2  ;;  %v15443_v46 = vld [vmem:[%s16131_s24 + $0x58] sm:$0xff]  }
  0x7a   : > { %v2879_v3 = vshrl.u32 %v15433_v59, 16  ;;  %v2891_v15 = vshll.u32 %v15435_v6, 16 }
  0x7c   : > { %13518 = vmatmul.mubr.msk.bf16.gmra.mrb[48].mxu1 %vm1046_vm4, %v986_v4  ;;  %v1027_v4 = vshrl.u32 %v15418_v37, 16  ;;  %v1543_v37 = vrot.slane %v15424_v28, 1  ;;  %v2881_v10 = vrot.slane %v2879_v3, 1  ;;  %v2893_v24 = vrot.slane %v2891_v15, 2 }
  0x7d   : > { %13521 = vmatprep.mubr.msk.bf16.mxu1 %vm22272_vm1, %v22301_v1  ;;  %13690 = vmatmul.mubr.msk.bf16.gmra.mrb[48].mxu0 %vm1046_vm4, %v2244_v9  ;;  %v1039_v9 = vshll.u32 %v15422_v63, 16 }
  0x7e   : > { %13693 = vmatprep.mubr.msk.bf16.mxu0 %vm22272_vm1, %v22301_v1  ;;  %v1029_v12 = vor.u32 %v1027_v4, %v1025_v56  ;;  %v1545_v52 = vsel %vm22278_vm5, %v1543_v37, %v1544_v38  ;;  %v2870_v56 = vshrl.u32 %v15431_v47, 16  ;;  %v2882_v4 = vshll.u32 %v15433_v59, 16 }
  0x7f   : > { %v1041_v18 = vrot.slane %v1039_v9, 1  ;;  %v1550_v9 = vrot.slane %v15432_v2, 1 }
  0x80   : > { %v2872_v63 = vrot.slane %v2870_v56, 1 }
  0x81   : > { %v1042_v26 = vsel %vm22279_vm2, %v1037_v23, %v1041_v18  ;;  %v2890_v23 = vrot.slane %v2888_v14, 1  ;;  %v15446_v14 = vld [vmem:[%s16131_s24 + $0x60] sm:$0xff]  }
  0x82   : > { %v2876_v8 = vor.u32 %v2875_v0, %v2872_v63 }
  0x84   : > { %13522 = vmatmul.mubr.msk.bf16.gmra.mrb[52].mxu1 %vm1046_vm4, %v994_v17  ;;  %v1034_v17 = vsel %vm22279_vm2, %v1029_v12, %v1033_v5  ;;  %v1549_v12 = vsel %vm22278_vm5, %v1546_v51, %v1548_v61 }
  0x85   : > { %13525 = vmatprep.mubr.msk.bf16.mxu1 %vm22272_vm1, %v22301_v1  ;;  %13694 = vmatmul.mubr.msk.bf16.gmra.mrb[52].mxu0 %vm1046_vm4, %v2253_v22  ;;  %v15427_v22 = vld [vmem:[%s16131_s24 + $0x18] sm:$0xff]  }
  0x86   : > { %13697 = vmatprep.mubr.msk.bf16.mxu0 %vm22272_vm1, %v22301_v1  ;;  %v2855_v32 = vshll.u32 %v15427_v22, 16 }
  0x88   : > { %v2857_v42 = vrot.slane %v2855_v32, 2  ;;  %v2894_v32 = vor.u32 %v2893_v24, %v2890_v23  ;;  %v15448_v24 = vld [vmem:[%s16131_s24 + $0x68] sm:$0xff]  }
  0x8c   : > { %13526 = vmatmul.mubr.msk.bf16.gmra.mrb[56].mxu1 %vm1046_vm4, %v1002_v31  ;;  %v2852_v31 = vshrl.u32 %v15427_v22, 16  ;;  %v1552_v22 = vrot.slane %v15434_v13, 1 }
  0x8d   : > { %13529 = vmatprep.mubr.msk.bf16.mxu1 %vm22272_vm1, %v22301_v1  ;;  %13698 = vmatmul.mubr.msk.bf16.gmra.mrb[56].mxu0 %vm1046_vm4, %v2262_v36  ;;  %v1045_v36 = vor.u32 %v1043_v27, %v1041_v18 }
  0x8e   : > { %13701 = vmatprep.mubr.msk.bf16.mxu0 %vm22272_vm1, %v22301_v1  ;;  %v2854_v39 = vrot.slane %v2852_v31, 1 }
  0x94   : > { %13530 = vmatmul.mubr.msk.bf16.gmra.mrb[60].mxu1 %vm1046_vm4, %v1010_v44  ;;  %v2861_v44 = vshrl.u32 %v15429_v35, 16 }
  0x95   : > { %13533 = vmatprep.mubr.msk.bf16.mxu1 %vm22272_vm1, %v22301_v1  ;;  %13702 = vmatmul.mubr.msk.bf16.gmra.mrb[60].mxu0 %vm1046_vm4, %v2271_v49  ;;  %v2858_v49 = vor.u32 %v2857_v42, %v2854_v39  ;;  %v2908_v39 = vrot.slane %v2906_v29, 1  ;;  %v15440_v42 = vld [vmem:[%s16131_s24 + $0x48] sm:$0xff]   ;;  %v1566_v29 = vrot.slane %v15448_v24, 1 }
  0x96   : > { %13705 = vmatprep.mubr.msk.bf16.mxu0 %vm22272_vm1, %v22301_v1  ;;  %v2863_v53 = vrot.slane %v2861_v44, 1  ;;  %v1558_v47 = vrot.slane %v15440_v42, 1 }
  0x98   : > { %v2867_v60 = vor.u32 %v2866_v54, %v2863_v53  ;;  %v2924_v53 = vshrl.u32 %v15443_v46, 16  ;;  %v2927_v54 = vshll.u32 %v15443_v46, 16 }
  0x9a   : > { %v2868_v5 = vsel %vm22275_vm3, %v2858_v49, %v2867_v60  ;;  %v2877_v18 = vsel %vm22275_vm3, %v2867_v60, %v2876_v8  ;;  %v2926_v58 = vrot.slane %v2924_v53, 1  ;;  %v2929_v60 = vrot.slane %v2927_v54, 2  ;;  %v15454_v54 = vld [vmem:[%s16131_s24 + $0x80] sm:$0xff]  }
  0x9c   : > { %13534 = vmatmul.mubr.msk.bf16.gmra.mrb[64].mxu1 %vm1046_vm4, %v1018_v57  ;;  %v2859_v57 = vsel %vm22275_vm3, %v2850_v48, %v2858_v49  ;;  %v2912_v48 = vor.u32 %v2911_v40, %v2908_v39  ;;  %v2930_v63 = vor.u32 %v2929_v60, %v2926_v58  ;;  %v15457_v58 = vld [vmem:[%s16131_s24 + $0x90] sm:$0xff]  }
  0x9d   : > { %13537 = vmatprep.mubr.msk.bf16.mxu1 %vm22272_vm1, %v22301_v1  ;;  %13706 = vmatmul.mubr.msk.bf16.gmra.mrb[64].mxu0 %vm1046_vm4, %v2280_v62  ;;  %v1547_v62 = vsel %vm22278_vm5, %v1544_v38, %v1546_v51  ;;  %v1556_v38 = vrot.slane %v15438_v34, 1  ;;  %v15450_v34 = vld [vmem:[%s16131_s24 + $0x70] sm:$0xff]  }
  0x9e   : > { %13709 = vmatprep.mubr.msk.bf16.mxu0 %vm22272_vm1, %v22301_v1  ;;  %v1568_v39 = vrot.slane %v15450_v34, 1 }
  0x9f   : > { %v1559_v59 = vsel %vm22278_vm5, %v1556_v38, %v1558_v47 }
  0xa4   : > { %13538 = vmatmul.mubr.msk.bf16.gmra.mrb[68].mxu1 %vm1046_vm4, %v1026_v7  ;;  %v15437_v7 = vld [vmem:[%s16131_s24 + $0x40] sm:$0xff]  }
  0xa5   : > { %13541 = vmatprep.mubr.msk.bf16.mxu1 %vm22272_vm1, %v22301_v1  ;;  %13710 = vmatmul.mubr.msk.bf16.gmra.mrb[68].mxu0 %vm1046_vm4, %v2289_v11  ;;  %v2884_v11 = vrot.slane %v2882_v4, 2  ;;  %v2900_v19 = vshll.u32 %v15437_v7, 16  ;;  %v15444_v4 = vld [vmem:[%s16131_s24 + $0x58] sm:$0xff]  }
  0xa6   : > { %13713 = vmatprep.mubr.msk.bf16.mxu0 %vm22272_vm1, %v22301_v1 }
  0xa7   : > { %v2902_v28 = vrot.slane %v2900_v19, 2  ;;  %v1564_v19 = vrot.slane %v15446_v14, 1 }
  0xac   : > { %13542 = vmatmul.mubr.msk.bf16.gmra.mrb[72].mxu1 %vm1046_vm4, %v1034_v17  ;;  %v2897_v17 = vshrl.u32 %v15437_v7, 16 }
  0xad   : > { %13545 = vmatprep.mubr.msk.bf16.mxu1 %vm22272_vm1, %v22301_v1  ;;  %13714 = vmatmul.mubr.msk.bf16.gmra.mrb[72].mxu0 %vm1046_vm4, %v2298_v21  ;;  %v2885_v21 = vor.u32 %v2884_v11, %v2881_v10 }
  0xae   : > { %13717 = vmatprep.mubr.msk.bf16.mxu0 %vm22272_vm1, %v22301_v1  ;;  %v2899_v27 = vrot.slane %v2897_v17, 1 }
  0xaf   : > { %v2886_v31 = vsel %vm22275_vm3, %v2876_v8, %v2885_v21  ;;  %v2895_v35 = vsel %vm22275_vm3, %v2885_v21, %v2894_v32  ;;  %v15447_v8 = vld [vmem:[%s16131_s24 + $0x68] sm:$0xff]  }
  0xb0   : > { %v2903_v37 = vor.u32 %v2902_v28, %v2899_v27  ;;  %v2942_v11 = vshrl.u32 %v15447_v8, 16  ;;  %v15451_v28 = vld [vmem:[%s16131_s24 + $0x78] sm:$0xff]  }
  0xb2   : > { %v2904_v45 = vsel %vm22275_vm3, %v2894_v32, %v2903_v37  ;;  %v2913_v55 = vsel %vm22275_vm3, %v2903_v37, %v2912_v48  ;;  %v2963_v32 = vshll.u32 %v15451_v28, 16 }
  0xb4   : > { %13546 = vmatmul.mubr.msk.bf16.gmra.mrb[76].mxu1 %vm1046_vm4, %v1042_v26  ;;  %v1551_v26 = vsel %vm22278_vm5, %v1548_v61, %v1550_v9  ;;  %v15445_v61 = vld [vmem:[%s16131_s24 + $0x60] sm:$0xff]   ;;  %v2965_v37 = vrot.slane %v2963_v32, 2 }
  0xb5   : > { %13549 = vmatprep.mubr.msk.bf16.mxu1 %vm22272_vm1, %v22301_v1  ;;  %13718 = vmatmul.mubr.msk.bf16.gmra.mrb[76].mxu0 %vm1046_vm4, %v2307_v33  ;;  %v1553_v33 = vsel %vm22278_vm5, %v1550_v9, %v1552_v22  ;;  %v2933_v0 = vshrl.u32 %v15445_v61, 16  ;;  %v2936_v2 = vshll.u32 %v15445_v61, 16  ;;  %v1562_v9 = vrot.slane %v15444_v4, 1 }
  0xb6   : > { %13721 = vmatprep.mubr.msk.bf16.mxu0 %vm22272_vm1, %v22301_v1  ;;  %v2987_v61 = vshrl.u32 %v15457_v58, 16 }
  0xb7   : > { %v2935_v6 = vrot.slane %v2933_v0, 1  ;;  %v2938_v7 = vrot.slane %v2936_v2, 2  ;;  %v1565_v23 = vsel %vm22278_vm5, %v1562_v9, %v1564_v19  ;;  %v15456_v0 = vld [vmem:[%s16131_s24 + $0x88] sm:$0xff]  }
  0xb9   : > { %v2939_v10 = vor.u32 %v2938_v7, %v2935_v6  ;;  %v1574_v6 = vrot.slane %v15456_v0, 1 }
  0xbb   : > { %v2940_v15 = vsel %vm22275_vm3, %v2930_v63, %v2939_v10 }
  0xbc   : > { %13550 = vmatmul.mubr.msk.bf16.gmra.mrb[80].mxu1 %vm1046_vm4, %v1045_v36  ;;  %v15441_v36 = vld [vmem:[%s16131_s24 + $0x50] sm:$0xff]  }
  0xbd   : > { %13555 = vmatprep.mubr.msk.bf16.mxu1 %vm22272_vm1, %v22301_v1  ;;  %13722 = vmatmul.mubr.msk.bf16.gmra.mrb[80].mxu0 %vm1046_vm4, %v2306_v25  ;;  %v1554_v25 = vrot.slane %v15436_v16, 1  ;;  %v2915_v43 = vshrl.u32 %v15441_v36, 16  ;;  %v2918_v44 = vshll.u32 %v15441_v36, 16  ;;  %v2944_v16 = vrot.slane %v2942_v11, 1  ;;  %v15458_v11 = vld [vmem:[%s16131_s24 + $0x90] sm:$0xff]  }
  0xbe   : > { %13727 = vmatprep.mubr.msk.bf16.mxu0 %vm22272_vm1, %v22301_v1 }
  0xbf   : > { %v1555_v41 = vsel %vm22278_vm5, %v1552_v22, %v1554_v25  ;;  %v2917_v49 = vrot.slane %v2915_v43, 1  ;;  %v1557_v51 = vsel %vm22278_vm5, %v1554_v25, %v1556_v38  ;;  %v15453_v38 = vld [vmem:[%s16131_s24 + $0x80] sm:$0xff]   ;;  %v1569_v43 = vsel %vm22278_vm5, %v1566_v29, %v1568_v39 }
  0xc0   : > { %v2972_v42 = vshll.u32 %v15453_v38, 16 }
  0xc4   : > { %13556 = vmatmul.mubr.msk.bf16.vlgmr.msra.gmra.mrb[0].mxu1 %vm1046_vm4, %v1545_v52  ;;  %v15442_v52 = vld [vmem:[%s16131_s24 + $0x50] sm:$0xff]  }
  0xc5   : > { %13559 = vmatprep.mubr.msk.bf16.mxu1 %vm22272_vm1, %v22301_v1  ;;  %13728 = vmatmul.mubr.msk.bf16.vlgmr.msra.gmra.mrb[0].mxu0 %vm1046_vm4, %v2859_v57  ;;  %v1560_v57 = vrot.slane %v15442_v52, 1 }
  0xc6   : > { %13812 = vmatpush3.bf16.msra.mxu0 %v3672_v50  ;;  %13731 = vmatprep.mubr.msk.bf16.mxu0 %vm22272_vm1, %v22301_v1  ;;  %v2920_v50 = vrot.slane %v2918_v44, 2  ;;  %v15452_v44 = vld [vmem:[%s16131_s24 + $0x78] sm:$0xff]  }
  0xc7   : > { %13897 = vmatprep.subr.bf16.mxu0 %v22301_v1  ;;  %v1561_v3 = vsel %vm22278_vm5, %v1558_v47, %v1560_v57  ;;  %v1563_v13 = vsel %vm22278_vm5, %v1560_v57, %v1562_v9  ;;  %v2974_v47 = vrot.slane %v2972_v42, 2 }
  0xc8   : > { %v2921_v56 = vor.u32 %v2920_v50, %v2917_v49  ;;  %v1570_v49 = vrot.slane %v15452_v44, 1 }
  0xca   : > { %v1571_v53 = vsel %vm22278_vm5, %v1568_v39, %v1570_v49 }
  0xcc   : > { %13560 = vmatmul.mubr.msk.bf16.gmra.mrb[4].mxu1 %vm1046_vm4, %v1547_v62  ;;  %v2922_v62 = vsel %vm22275_vm3, %v2912_v48, %v2921_v56  ;;  %v15455_v48 = vld [vmem:[%s16131_s24 + $0x88] sm:$0xff]  }
  0xcd   : > { %13563 = vmatprep.mubr.msk.bf16.mxu1 %vm22272_vm1, %v22301_v1  ;;  %13732 = vmatmul.mubr.msk.bf16.gmra.mrb[4].mxu0 %vm1046_vm4, %v2868_v5  ;;  %v2931_v5 = vsel %vm22275_vm3, %v2921_v56, %v2930_v63  ;;  %v2981_v52 = vshll.u32 %v15455_v48, 16 }
  0xce   : > { %13735 = vmatprep.mubr.msk.bf16.mxu0 %vm22272_vm1, %v22301_v1 }
  0xcf   : > { %v2983_v57 = vrot.slane %v2981_v52, 2 }
  0xd4   : > { %13564 = vmatmul.mubr.msk.bf16.gmra.mrb[8].mxu1 %vm1046_vm4, %v1549_v12  ;;  %v2945_v12 = vshll.u32 %v15447_v8, 16 }
  0xd5   : > { %13567 = vmatprep.mubr.msk.bf16.mxu1 %vm22272_vm1, %v22301_v1  ;;  %13736 = vmatmul.mubr.msk.bf16.gmra.mrb[8].mxu0 %vm1046_vm4, %v2877_v18  ;;  %v15449_v18 = vld [vmem:[%s16131_s24 + $0x70] sm:$0xff]  }
  0xd6   : > { %13739 = vmatprep.mubr.msk.bf16.mxu0 %vm22272_vm1, %v22301_v1  ;;  %v2947_v17 = vrot.slane %v2945_v12, 2  ;;  %v2951_v21 = vshrl.u32 %v15449_v18, 16  ;;  %v2954_v22 = vshll.u32 %v15449_v18, 16 }
  0xd8   : > { %v2948_v20 = vor.u32 %v2947_v17, %v2944_v16  ;;  %v2956_v27 = vrot.slane %v2954_v22, 2  ;;  %v1576_v16 = vrot.slane %v15458_v11, 1 }
  0xda   : > { %v2949_v25 = vsel %vm22275_vm3, %v2939_v10, %v2948_v20 }
  0xdc   : > { %13568 = vmatmul.mubr.msk.bf16.gmra.mrb[12].mxu1 %vm1046_vm4, %v1551_v26  ;;  %v2953_v26 = vrot.slane %v2951_v21, 1  ;;  %v15460_v21 = vld [vmem:[%s16131_s24 + $0x98] sm:$0xff]  }
  0xdd   : > { %13571 = vmatprep.mubr.msk.bf16.mxu1 %vm22272_vm1, %v22301_v1  ;;  %13740 = vmatmul.mubr.msk.bf16.gmra.mrb[12].mxu0 %vm1046_vm4, %v2886_v31  ;;  %v2960_v31 = vshrl.u32 %v15451_v28, 16 }
  0xde   : > { %13743 = vmatprep.mubr.msk.bf16.mxu0 %vm22272_vm1, %v22301_v1  ;;  %v2957_v30 = vor.u32 %v2956_v27, %v2953_v26  ;;  %v1578_v26 = vrot.slane %v15460_v21, 1 }
  0xdf   : > { %v2962_v36 = vrot.slane %v2960_v31, 1  ;;  %v15462_v31 = vld [vmem:[%s16131_s24 + $0xa0] sm:$0xff]  }
  0xe1   : > { %v2966_v40 = vor.u32 %v2965_v37, %v2962_v36  ;;  %v1580_v36 = vrot.slane %v15462_v31, 1 }
  0xe4   : > { %13572 = vmatmul.mubr.msk.bf16.gmra.mrb[16].mxu1 %vm1046_vm4, %v1553_v33  ;;  %v1567_v33 = vsel %vm22278_vm5, %v1564_v19, %v1566_v29 }
  0xe5   : > { %13575 = vmatprep.mubr.msk.bf16.mxu1 %vm22272_vm1, %v22301_v1  ;;  %13744 = vmatmul.mubr.msk.bf16.gmra.mrb[16].mxu0 %vm1046_vm4, %v2895_v35  ;;  %v2958_v35 = vsel %vm22275_vm3, %v2948_v20, %v2957_v30  ;;  %v1577_v20 = vsel %vm22278_vm5, %v1574_v6, %v1576_v16 }
  0xe6   : > { %13747 = vmatprep.mubr.msk.bf16.mxu0 %vm22272_vm1, %v22301_v1 }
  0xec   : > { %13576 = vmatmul.mubr.msk.bf16.gmra.mrb[20].mxu1 %vm1046_vm4, %v1555_v41  ;;  %v2969_v41 = vshrl.u32 %v15453_v38, 16 }
  0xed   : > { %13579 = vmatprep.mubr.msk.bf16.mxu1 %vm22272_vm1, %v22301_v1  ;;  %13748 = vmatmul.mubr.msk.bf16.gmra.mrb[20].mxu0 %vm1046_vm4, %v2904_v45  ;;  %v2967_v45 = vsel %vm22275_vm3, %v2957_v30, %v2966_v40  ;;  %v1579_v30 = vsel %vm22278_vm5, %v1576_v16, %v1578_v26 }
  0xee   : > { %13751 = vmatprep.mubr.msk.bf16.mxu0 %vm22272_vm1, %v22301_v1  ;;  %v2971_v46 = vrot.slane %v2969_v41, 1  ;;  %v15464_v41 = vld [vmem:[%s16131_s24 + $0xa8] ss:$0 sps:$4 sm:$0x77]  }
  0xf0   : > { %v2975_v50 = vor.u32 %v2974_v47, %v2971_v46 }
  0xf4   : > { %13580 = vmatmul.mubr.msk.bf16.gmra.mrb[24].mxu1 %vm1046_vm4, %v1557_v51  ;;  %v2978_v51 = vshrl.u32 %v15455_v48, 16 }
  0xf5   : > { %13583 = vmatprep.mubr.msk.bf16.mxu1 %vm22272_vm1, %v22301_v1  ;;  %13752 = vmatmul.mubr.msk.bf16.gmra.mrb[24].mxu0 %vm1046_vm4, %v2913_v55  ;;  %v2976_v55 = vsel %vm22275_vm3, %v2966_v40, %v2975_v50  ;;  %v1581_v40 = vsel %vm22278_vm5, %v1578_v26, %v1580_v36 }
  0xf6   : > { %13755 = vmatprep.mubr.msk.bf16.mxu0 %vm22272_vm1, %v22301_v1  ;;  %v2980_v56 = vrot.slane %v2978_v51, 1 }
  0xf8   : > { %v2984_v60 = vor.u32 %v2983_v57, %v2980_v56 }
  0xfa   : > { %v2985_v2 = vsel %vm22275_vm3, %v2975_v50, %v2984_v60  ;;  %v15467_v50 = vld [vmem:[%s16131_s24 + $0x18] sm:$0xff]  }
  0xfb   : > { %v3568_v52 = vrot.slane %v15467_v50, 2 }
  0xfc   : > { %13584 = vmatmul.mubr.msk.bf16.gmra.mrb[28].mxu1 %vm1046_vm4, %v1559_v59  ;;  %v1572_v59 = vrot.slane %v15454_v54, 1 }
  0xfd   : > { %13587 = vmatprep.mubr.msk.bf16.mxu1 %vm22272_vm1, %v22301_v1  ;;  %13756 = vmatmul.mubr.msk.bf16.gmra.mrb[28].mxu0 %vm1046_vm4, %v2922_v62  ;;  %v2990_v62 = vshll.u32 %v15457_v58, 16 }
  0xfe   : > { %13759 = vmatprep.mubr.msk.bf16.mxu0 %vm22272_vm1, %v22301_v1  ;;  %v1573_v63 = vsel %vm22278_vm5, %v1570_v49, %v1572_v59  ;;  %v1575_v10 = vsel %vm22278_vm5, %v1572_v59, %v1574_v6  ;;  %v15466_v49 = vld [vmem:[%s16131_s24 + $0x10] sm:$0xfc]   ;;  %v15469_v59 = vld [vmem:[%s16131_s24 + $0x28] sm:$0xff]  }
  0xff   : > { %v2992_v4 = vrot.slane %v2990_v62, 2  ;;  %v3567_v51 = vrot.slane %v15466_v49, 2  ;;  %v15470_v62 = vld [vmem:[%s16131_s24 + $0x30] sm:$0xff]  }
 0x101   : > { %v3569_v54 = vsel %vm22277_vm6, %v3567_v51, %v3568_v52  ;;  %v15478_v51 = vld [vmem:[%s16131_s24 + $0x70] sm:$0xff]  }
 0x104   : > { %13588 = vmatmul.mubr.msk.bf16.gmra.mrb[32].mxu1 %vm1046_vm4, %v1561_v3  ;;  %v2989_v3 = vrot.slane %v2987_v61, 1 }
 0x105   : > { %13591 = vmatprep.mubr.msk.bf16.mxu1 %vm22272_vm1, %v22301_v1  ;;  %13760 = vmatmul.mubr.msk.bf16.gmra.mrb[32].mxu0 %vm1046_vm4, %v2931_v5  ;;  %v15459_v5 = vld [vmem:[%s16131_s24 + $0x98] sm:$0xff]  }
 0x106   : > { %13763 = vmatprep.mubr.msk.bf16.mxu0 %vm22272_vm1, %v22301_v1  ;;  %v2993_v7 = vor.u32 %v2992_v4, %v2989_v3  ;;  %v2996_v8 = vshrl.u32 %v15459_v5, 16  ;;  %v2999_v9 = vshll.u32 %v15459_v5, 16  ;;  %v15472_v5 = vld [vmem:[%s16131_s24 + $0x40] sm:$0xff]  }
 0x108   : > { %v2994_v12 = vsel %vm22275_vm3, %v2984_v60, %v2993_v7  ;;  %v3001_v14 = vrot.slane %v2999_v9, 2  ;;  %v3572_v60 = vrot.slane %v15469_v59, 2 }
 0x10c   : > { %13592 = vmatmul.mubr.msk.bf16.gmra.mrb[36].mxu1 %vm1046_vm4, %v1563_v13  ;;  %v2998_v13 = vrot.slane %v2996_v8, 1 }
 0x10d   : > { %13595 = vmatprep.mubr.msk.bf16.mxu1 %vm22272_vm1, %v22301_v1  ;;  %13764 = vmatmul.mubr.msk.bf16.gmra.mrb[36].mxu0 %vm1046_vm4, %v2940_v15  ;;  %v15461_v15 = vld [vmem:[%s16131_s24 + $0xa0] sm:$0xff]  }
 0x10e   : > { %13767 = vmatprep.mubr.msk.bf16.mxu0 %vm22272_vm1, %v22301_v1  ;;  %v3002_v17 = vor.u32 %v3001_v14, %v2998_v13  ;;  %v3005_v18 = vshrl.u32 %v15461_v15, 16  ;;  %v3008_v19 = vshll.u32 %v15461_v15, 16  ;;  %v15473_v15 = vld [vmem:[%s16131_s24 + $0x48] sm:$0xff]  }
 0x110   : > { %v3003_v22 = vsel %vm22275_vm3, %v2993_v7, %v3002_v17  ;;  %v3010_v24 = vrot.slane %v3008_v19, 2  ;;  %v3578_v7 = vrot.slane %v15472_v5, 2 }
 0x114   : > { %13596 = vmatmul.mubr.msk.bf16.gmra.mrb[40].mxu1 %vm1046_vm4, %v1565_v23  ;;  %v3007_v23 = vrot.slane %v3005_v18, 1  ;;  %v3580_v18 = vrot.slane %v15473_v15, 2 }
 0x115   : > { %13599 = vmatprep.mubr.msk.bf16.mxu1 %vm22272_vm1, %v22301_v1  ;;  %13768 = vmatmul.mubr.msk.bf16.gmra.mrb[40].mxu0 %vm1046_vm4, %v2949_v25  ;;  %v15463_v25 = vld [vmem:[%s16131_s24 + $0xa8] sm:$0xff]  }
 0x116   : > { %13771 = vmatprep.mubr.msk.bf16.mxu0 %vm22272_vm1, %v22301_v1  ;;  %v3011_v27 = vor.u32 %v3010_v24, %v3007_v23  ;;  %v3014_v28 = vshrl.u32 %v15463_v25, 16  ;;  %v3017_v29 = vshll.u32 %v15463_v25, 16  ;;  %v15474_v23 = vld [vmem:[%s16131_s24 + $0x50] sm:$0xff]  }
 0x117   : > { %v3582_v25 = vrot.slane %v15474_v23, 2 }
 0x118   : > { %v3012_v32 = vsel %vm22275_vm3, %v3002_v17, %v3011_v27  ;;  %v3019_v34 = vrot.slane %v3017_v29, 2 }
 0x119   : > { %v3583_v29 = vsel %vm22277_vm6, %v3580_v18, %v3582_v25 }
 0x11c   : > { %13600 = vmatmul.mubr.msk.bf16.gmra.mrb[44].mxu1 %vm1046_vm4, %v1567_v33  ;;  %v3016_v33 = vrot.slane %v3014_v28, 1 }
 0x11d   : > { %13603 = vmatprep.mubr.msk.bf16.mxu1 %vm22272_vm1, %v22301_v1  ;;  %13772 = vmatmul.mubr.msk.bf16.gmra.mrb[44].mxu0 %vm1046_vm4, %v2958_v35  ;;  %v15465_v35 = vld [vmem:[%s16131_s24 + $0xb0] ss:$0 sps:$4 sm:$0xff]  }
 0x11e   : > { %13775 = vmatprep.mubr.msk.bf16.mxu0 %vm22272_vm1, %v22301_v1  ;;  %v3020_v37 = vor.u32 %v3019_v34, %v3016_v33  ;;  %v3023_v38 = vshrl.u32 %v15465_v35, 16  ;;  %v3026_v39 = vshll.u32 %v15465_v35, 16 }
 0x120   : > { %v3021_v42 = vsel %vm22275_vm3, %v3011_v27, %v3020_v37  ;;  %v3028_v44 = vrot.slane %v3026_v39, 2 }
 0x124   : > { %13604 = vmatmul.mubr.msk.bf16.gmra.mrb[48].mxu1 %vm1046_vm4, %v1569_v43  ;;  %v3025_v43 = vrot.slane %v3023_v38, 1 }
 0x125   : > { %13607 = vmatprep.mubr.msk.bf16.mxu1 %vm22272_vm1, %v22301_v1  ;;  %13776 = vmatmul.mubr.msk.bf16.gmra.mrb[48].mxu0 %vm1046_vm4, %v2967_v45  ;;  %v1582_v45 = vrot.slane %v15464_v41, 1 }
 0x126   : > { %13779 = vmatprep.mubr.msk.bf16.mxu0 %vm22272_vm1, %v22301_v1  ;;  %v3029_v46 = vor.u32 %v3028_v44, %v3025_v43  ;;  %v15477_v44 = vld [vmem:[%s16131_s24 + $0x68] sm:$0xff]  }
 0x127   : > { %v1583_v47 = vsel %vm22278_vm5, %v1580_v36, %v1582_v45 }
 0x128   : > { %v3030_v48 = vsel %vm22275_vm3, %v3020_v37, %v3029_v46  ;;  %v15476_v37 = vld [vmem:[%s16131_s24 + $0x60] sm:$0xff]  }
 0x129   : > { %v3586_v39 = vrot.slane %v15476_v37, 2 }
 0x12c   : > { %13608 = vmatmul.mubr.msk.bf16.gmra.mrb[52].mxu1 %vm1046_vm4, %v1571_v53  ;;  %v12674_v53 = vld [vmem:[%s22268_s1 + $0xa] sm:$0x3] }
 0x12d   : > { %13611 = vmatprep.mubr.msk.bf16.mxu1 %vm22272_vm1, %v22301_v1  ;;  %13780 = vmatmul.mubr.msk.bf16.gmra.mrb[52].mxu0 %vm1046_vm4, %v2976_v55  ;;  %v15468_v55 = vld [vmem:[%s16131_s24 + $0x20] sm:$0xff]   ;;  %v4399_v56 = vsel %vm22280_vm0, %v12674_v53, 0  ;;  %v3590_v53 = vrot.slane %v15478_v51, 2 }
 0x12e   : > { %13783 = vmatprep.mubr.msk.bf16.mxu0 %vm22272_vm1, %v22301_v1  ;;  %v3570_v57 = vrot.slane %v15468_v55, 2 }
 0x130   : > { %v3571_v58 = vsel %vm22277_vm6, %v3568_v52, %v3570_v57  ;;  %v3573_v61 = vsel %vm22277_vm6, %v3570_v57, %v3572_v60 }
 0x134   : > { %13612 = vmatmul.mubr.msk.bf16.gmra.mrb[56].mxu1 %vm1046_vm4, %v1573_v63  ;;  %v3574_v63 = vrot.slane %v15470_v62, 2 }
 0x135   : > { %13615 = vmatprep.mubr.msk.bf16.mxu1 %vm22272_vm1, %v22301_v1  ;;  %13784 = vmatmul.mubr.msk.bf16.gmra.mrb[56].mxu0 %vm1046_vm4, %v2985_v2  ;;  %v15471_v2 = vld [vmem:[%s16131_s24 + $0x38] sm:$0xff]  }
 0x136   : > { %13787 = vmatprep.mubr.msk.bf16.mxu0 %vm22272_vm1, %v22301_v1  ;;  %v3575_v0 = vsel %vm22277_vm6, %v3572_v60, %v3574_v63  ;;  %v3576_v3 = vrot.slane %v15471_v2, 2  ;;  %v15480_v2 = vld [vmem:[%s16131_s24 + $0x80] sm:$0xff]  }
 0x138   : > { %v3577_v4 = vsel %vm22277_vm6, %v3574_v63, %v3576_v3  ;;  %v3579_v14 = vsel %vm22277_vm6, %v3576_v3, %v3578_v7 }
 0x13c   : > { %13616 = vmatmul.mubr.msk.bf16.gmra.mrb[60].mxu1 %vm1046_vm4, %v1575_v10 }
 0x13d   : > { %13619 = vmatprep.mubr.msk.bf16.mxu1 %vm22272_vm1, %v22301_v1  ;;  %13788 = vmatmul.mubr.msk.bf16.gmra.mrb[60].mxu0 %vm1046_vm4, %v2994_v12 }
 0x13e   : > { %13791 = vmatprep.mubr.msk.bf16.mxu0 %vm22272_vm1, %v22301_v1 }
 0x144   : > { %13620 = vmatmul.mubr.msk.bf16.gmra.mrb[64].mxu1 %vm1046_vm4, %v1577_v20 }
 0x145   : > { %13623 = vmatprep.mubr.msk.bf16.mxu1 %vm22272_vm1, %v22301_v1  ;;  %13792 = vmatmul.mubr.msk.bf16.gmra.mrb[64].mxu0 %vm1046_vm4, %v3003_v22  ;;  %v3581_v22 = vsel %vm22277_vm6, %v3578_v7, %v3580_v18 }
 0x146   : > { %13795 = vmatprep.mubr.msk.bf16.mxu0 %vm22272_vm1, %v22301_v1 }
 0x14c   : > { %13624 = vmatmul.mubr.msk.bf16.gmra.mrb[68].mxu1 %vm1046_vm4, %v1579_v30  ;;  %v15475_v30 = vld [vmem:[%s16131_s24 + $0x58] sm:$0xff]  }
 0x14d   : > { %13627 = vmatprep.mubr.msk.bf16.mxu1 %vm22272_vm1, %v22301_v1  ;;  %13796 = vmatmul.mubr.msk.bf16.gmra.mrb[68].mxu0 %vm1046_vm4, %v3012_v32  ;;  %v3584_v32 = vrot.slane %v15475_v30, 2 }
 0x14e   : > { %13799 = vmatprep.mubr.msk.bf16.mxu0 %vm22272_vm1, %v22301_v1 }
 0x14f   : > { %v3585_v36 = vsel %vm22277_vm6, %v3582_v25, %v3584_v32  ;;  %v3587_v43 = vsel %vm22277_vm6, %v3584_v32, %v3586_v39 }
 0x154   : > { %13628 = vmatmul.mubr.msk.bf16.gmra.mrb[72].mxu1 %vm1046_vm4, %v1581_v40 }
 0x155   : > { %13631 = vmatprep.mubr.msk.bf16.mxu1 %vm22272_vm1, %v22301_v1  ;;  %13800 = vmatmul.mubr.msk.bf16.gmra.mrb[72].mxu0 %vm1046_vm4, %v3021_v42 }
 0x156   : > { %13803 = vmatprep.mubr.msk.bf16.mxu0 %vm22272_vm1, %v22301_v1 }
 0x15c   : > { %13632 = vmatmul.mubr.msk.bf16.gmra.mrb[76].mxu1 %vm1046_vm4, %v1583_v47 }
 0x15d   : > { %13635 = vmatprep.mubr.msk.bf16.mxu1 %vm22272_vm1, %v22301_v1  ;;  %13804 = vmatmul.mubr.msk.bf16.gmra.mrb[76].mxu0 %vm1046_vm4, %v3030_v48 }
 0x15e   : > { %13807 = vmatprep.mubr.msk.bf16.mxu0 %vm22272_vm1, %v22301_v1 }
 0x164   : > { %13636 = vmatmul.mubr.msk.bf16.gmra.mrb[84].mxu1 %vm1046_vm4, %v1582_v45 }
 0x165   : > { %13808 = vmatmul.mubr.msk.bf16.gmra.mrb[84].mxu0 %vm1046_vm4, %v3029_v46  ;;  %v3588_v46 = vrot.slane %v15477_v44, 2 }
 0x166   : > { %13813 = vmatprep.mubr.msk.bf16.mxu0 %vm22272_vm1, %v22301_v1 }
 0x167   : > { %v3589_v50 = vsel %vm22277_vm6, %v3586_v39, %v3588_v46  ;;  %v3591_v57 = vsel %vm22277_vm6, %v3588_v46, %v3590_v53 }
 0x16d   : > { %13814 = vmatmul.mubr.msk.bf16.vlgmr.msra.gmra.mrb[0].mxu0 %vm1046_vm4, %v3569_v54 }
 0x16e   : > { %13898 = vmatpush3.bf16.msra.mxu0 %v4399_v56  ;;  %13817 = vmatprep.mubr.msk.bf16.mxu0 %vm22272_vm1, %v22301_v1 }
 0x16f   : > { %13983 = vmatprep.subr.bf16.mxu0 %v22301_v1 }
 0x175   : > { %13818 = vmatmul.mubr.msk.bf16.gmra.mrb[4].mxu0 %vm1046_vm4, %v3571_v58  ;;  %v15479_v58 = vld [vmem:[%s16131_s24 + $0x78] sm:$0xff]  }
 0x176   : > { %13821 = vmatprep.mubr.msk.bf16.mxu0 %vm22272_vm1, %v22301_v1  ;;  %v3592_v60 = vrot.slane %v15479_v58, 2 }
 0x17d   : > { %13822 = vmatmul.mubr.msk.bf16.gmra.mrb[8].mxu0 %vm1046_vm4, %v3573_v61 }
 0x17e   : > { %13825 = vmatprep.mubr.msk.bf16.mxu0 %vm22272_vm1, %v22301_v1 }
 0x185   : > { %13826 = vmatmul.mubr.msk.bf16.gmra.mrb[12].mxu0 %vm1046_vm4, %v3575_v0  ;;  %v3593_v0 = vsel %vm22277_vm6, %v3590_v53, %v3592_v60  ;;  %v15488_v53 = vld [vmem:[%s16131_s24 + $0x18] sm:$0xff]  }
 0x186   : > { %13829 = vmatprep.mubr.msk.bf16.mxu0 %vm22272_vm1, %v22301_v1  ;;  %v4159_v58 = vshll.u32 %v15488_v53, 16 }
 0x18d   : > { %13830 = vmatmul.mubr.msk.bf16.gmra.mrb[16].mxu0 %vm1046_vm4, %v3577_v4  ;;  %v3594_v4 = vrot.slane %v15480_v2, 2  ;;  %v4161_v2 = vrot.slane %v4159_v58, 3 }
 0x18e   : > { %13833 = vmatprep.mubr.msk.bf16.mxu0 %vm22272_vm1, %v22301_v1 }
 0x18f   : > { %v1308_v6 = vpop.f32.mrb[80].mxu1 }
 0x190   : > { %1354 = vst [vmem:[#allocation2 + $0x140] sm:$0xf] %v1308_v6  ;;  %v13551_v8 = vpop.f32.mrb[81].mxu1  ;;  %v16593_v10 = vpop.f32.mrb[80].mxu0 }
 0x191   : > { %v1311_v9 = vpop.f32.mrb[82].mxu1  ;;  %v13723_v12 = vpop.f32.mrb[81].mxu0  ;;  %v3595_v8 = vsel %vm22277_vm6, %v3592_v60, %v3594_v4 }
 0x192   : > { %v13552_v11 = vpop.f32.mrb[83].mxu1  ;;  %v2571_v13 = vpop.f32.mrb[82].mxu0  ;;  %v15481_v9 = vld [vmem:[%s16131_s24 + $0x88] sm:$0xff]  }
 0x193   : > { %v13724_v16 = vpop.f32.mrb[83].mxu0  ;;  %v3596_v12 = vrot.slane %v15481_v9, 2 }
 0x195   : > { %13834 = vmatmul.mubr.msk.bf16.gmra.mrb[20].mxu0 %vm1046_vm4, %v3579_v14  ;;  %v3597_v16 = vsel %vm22277_vm6, %v3594_v4, %v3596_v12 }
 0x196   : > { %13837 = vmatprep.mubr.msk.bf16.mxu0 %vm22272_vm1, %v22301_v1 }
 0x197   : > { %v1684_v17 = vpop.f32.mrb[0].mxu1 }
 0x198   : > { %14341 = vst [vmem:[#allocation2] sm:$0xff] %v1684_v17  ;;  %v13557_v19 = vpop.f32.mrb[1].mxu1  ;;  %v15482_v17 = vld [vmem:[%s16131_s24 + $0x90] sm:$0xff]  }
 0x199   : > { %v1687_v20 = vpop.f32.mrb[2].mxu1  ;;  %v3598_v19 = vrot.slane %v15482_v17, 2  ;;  %v15490_v17 = vld [vmem:[%s16131_s24 + $0x28] sm:$0xff]  }
 0x19a   : > { %14344 = vst [vmem:[#allocation2 + $0x8] sm:$0xff] %v1687_v20  ;;  %v13558_v21 = vpop.f32.mrb[3].mxu1 }
 0x19b   : > { %v3599_v23 = vsel %vm22277_vm6, %v3596_v12, %v3598_v19  ;;  %v12717_v12 = vld [vmem:[%s22268_s1 + $0xc] sm:$0x3] }
 0x19d   : > { %13838 = vmatmul.mubr.msk.bf16.gmra.mrb[24].mxu0 %vm1046_vm4, %v3581_v22 }
 0x19e   : > { %13841 = vmatprep.mubr.msk.bf16.mxu0 %vm22272_vm1, %v22301_v1 }
 0x19f   : > { %v1692_v24 = vpop.f32.mrb[4].mxu1 }
 0x1a0   : > { %14347 = vst [vmem:[#allocation2 + $0x10] sm:$0xff] %v1692_v24  ;;  %v13561_v26 = vpop.f32.mrb[5].mxu1  ;;  %v15483_v24 = vld [vmem:[%s16131_s24 + $0x98] sm:$0xff]  }
 0x1a1   : > { %v1695_v27 = vpop.f32.mrb[6].mxu1  ;;  %v3600_v26 = vrot.slane %v15483_v24, 2 }
 0x1a2   : > { %14350 = vst [vmem:[#allocation2 + $0x18] sm:$0xff] %v1695_v27  ;;  %v13562_v28 = vpop.f32.mrb[7].mxu1 }
 0x1a3   : > { %v3601_v30 = vsel %vm22277_vm6, %v3598_v19, %v3600_v26 }
 0x1a5   : > { %13842 = vmatmul.mubr.msk.bf16.gmra.mrb[28].mxu0 %vm1046_vm4, %v3583_v29 }
 0x1a6   : > { %13845 = vmatprep.mubr.msk.bf16.mxu0 %vm22272_vm1, %v22301_v1 }
 0x1a7   : > { %v1700_v31 = vpop.f32.mrb[8].mxu1 }
 0x1a8   : > { %14353 = vst [vmem:[#allocation2 + $0x20] sm:$0xff] %v1700_v31  ;;  %v13565_v33 = vpop.f32.mrb[9].mxu1  ;;  %v15484_v31 = vld [vmem:[%s16131_s24 + $0xa0] sm:$0xff]  }
 0x1a9   : > { %v1703_v34 = vpop.f32.mrb[10].mxu1  ;;  %v3602_v33 = vrot.slane %v15484_v31, 2 }
 0x1aa   : > { %14356 = vst [vmem:[#allocation2 + $0x28] sm:$0xff] %v1703_v34  ;;  %v13566_v35 = vpop.f32.mrb[11].mxu1 }
 0x1ab   : > { %v3603_v37 = vsel %vm22277_vm6, %v3600_v26, %v3602_v33 }
 0x1ad   : > { %13846 = vmatmul.mubr.msk.bf16.gmra.mrb[32].mxu0 %vm1046_vm4, %v3585_v36 }
 0x1ae   : > { %13849 = vmatprep.mubr.msk.bf16.mxu0 %vm22272_vm1, %v22301_v1 }
 0x1af   : > { %v1708_v38 = vpop.f32.mrb[12].mxu1 }
 0x1b0   : > { %14359 = vst [vmem:[#allocation2 + $0x30] sm:$0xff] %v1708_v38  ;;  %v13569_v40 = vpop.f32.mrb[13].mxu1  ;;  %v15485_v38 = vld [vmem:[%s16131_s24 + $0xa8] sm:$0xff]  }
 0x1b1   : > { %v1711_v41 = vpop.f32.mrb[14].mxu1  ;;  %v3604_v40 = vrot.slane %v15485_v38, 2 }
 0x1b2   : > { %14362 = vst [vmem:[#allocation2 + $0x38] sm:$0xff] %v1711_v41  ;;  %v13570_v42 = vpop.f32.mrb[15].mxu1 }
 0x1b3   : > { %v3605_v44 = vsel %vm22277_vm6, %v3602_v33, %v3604_v40 }
 0x1b5   : > { %13850 = vmatmul.mubr.msk.bf16.gmra.mrb[36].mxu0 %vm1046_vm4, %v3587_v43 }
 0x1b6   : > { %13853 = vmatprep.mubr.msk.bf16.mxu0 %vm22272_vm1, %v22301_v1 }
 0x1b7   : > { %v1716_v45 = vpop.f32.mrb[16].mxu1 }
 0x1b8   : > { %14365 = vst [vmem:[#allocation2 + $0x40] sm:$0xff] %v1716_v45  ;;  %v13573_v47 = vpop.f32.mrb[17].mxu1  ;;  %v15486_v45 = vld [vmem:[%s16131_s24 + $0xb0] ss:$0 sps:$4 sm:$0xff]  }
 0x1b9   : > { %v1719_v48 = vpop.f32.mrb[18].mxu1  ;;  %v3606_v47 = vrot.slane %v15486_v45, 2 }
 0x1ba   : > { %14368 = vst [vmem:[#allocation2 + $0x48] sm:$0xff] %v1719_v48  ;;  %v13574_v49 = vpop.f32.mrb[19].mxu1 }
 0x1bb   : > { %v3607_v51 = vsel %vm22277_vm6, %v3604_v40, %v3606_v47  ;;  %v15492_v40 = vld [vmem:[%s16131_s24 + $0x38] sm:$0xff]  }
 0x1bc   : > { %v4195_v45 = vshll.u32 %v15492_v40, 16 }
 0x1bd   : > { %13854 = vmatmul.mubr.msk.bf16.gmra.mrb[40].mxu0 %vm1046_vm4, %v3589_v50 }
 0x1be   : > { %13857 = vmatprep.mubr.msk.bf16.mxu0 %vm22272_vm1, %v22301_v1 }
 0x1bf   : > { %v1724_v52 = vpop.f32.mrb[20].mxu1 }
 0x1c0   : > { %14371 = vst [vmem:[#allocation2 + $0x50] sm:$0xff] %v1724_v52  ;;  %v13577_v54 = vpop.f32.mrb[21].mxu1  ;;  %v15487_v52 = vld [vmem:[%s16131_s24 + $0x10] sm:$0xfc]  }
 0x1c1   : > { %v1727_v55 = vpop.f32.mrb[22].mxu1 }
 0x1c2   : > { %14374 = vst [vmem:[#allocation2 + $0x58] sm:$0xff] %v1727_v55  ;;  %v13578_v56 = vpop.f32.mrb[23].mxu1  ;;  %v4148_v55 = vshrl.u32 %v15487_v52, 16 }
 0x1c3   : > { %v4151_v56 = vshll.u32 %v15487_v52, 16 }
 0x1c5   : > { %13858 = vmatmul.mubr.msk.bf16.gmra.mrb[44].mxu0 %vm1046_vm4, %v3591_v57  ;;  %v4156_v57 = vshrl.u32 %v15488_v53, 16 }
 0x1c6   : > { %13861 = vmatprep.mubr.msk.bf16.mxu0 %vm22272_vm1, %v22301_v1 }
 0x1c7   : > { %v1732_v59 = vpop.f32.mrb[24].mxu1 }
 0x1c8   : > { %14377 = vst [vmem:[#allocation2 + $0x60] sm:$0xff] %v1732_v59  ;;  %v13581_v61 = vpop.f32.mrb[25].mxu1 }
 0x1c9   : > { %v1735_v62 = vpop.f32.mrb[26].mxu1 }
 0x1ca   : > { %14380 = vst [vmem:[#allocation2 + $0x68] sm:$0xff] %v1735_v62  ;;  %v13582_v63 = vpop.f32.mrb[27].mxu1  ;;  %v4150_v62 = vrot.slane %v4148_v55, 2 }
 0x1cb   : > { %v4153_v63 = vrot.slane %v4151_v56, 3 }
 0x1cd   : > { %13862 = vmatmul.mubr.msk.bf16.gmra.mrb[48].mxu0 %vm1046_vm4, %v3593_v0  ;;  %v4158_v0 = vrot.slane %v4156_v57, 2 }
 0x1ce   : > { %13865 = vmatprep.mubr.msk.bf16.mxu0 %vm22272_vm1, %v22301_v1 }
 0x1cf   : > { %v1740_v3 = vpop.f32.mrb[28].mxu1 }
 0x1d0   : > { %14383 = vst [vmem:[#allocation2 + $0x70] sm:$0xff] %v1740_v3  ;;  %v13585_v5 = vpop.f32.mrb[29].mxu1  ;;  %v15489_v3 = vld [vmem:[%s16131_s24 + $0x20] sm:$0xff]  }
 0x1d1   : > { %v1743_v6 = vpop.f32.mrb[30].mxu1  ;;  %v4154_v5 = vor.u32 %v4153_v63, %v4150_v62  ;;  %v15494_v62 = vld [vmem:[%s16131_s24 + $0x48] sm:$0xff]   ;;  %v1395_v63 = vld [vmem:[#allocation2 + $0x140] sm:$0xf] }
 0x1d2   : > { %14386 = vst [vmem:[#allocation2 + $0x78] sm:$0xff] %v1743_v6  ;;  %v13586_v7 = vpop.f32.mrb[31].mxu1  ;;  %v4162_v6 = vor.u32 %v4161_v2, %v4158_v0 }
 0x1d3   : > { %v4165_v7 = vshrl.u32 %v15489_v3, 16 }
 0x1d5   : > { %13866 = vmatmul.mubr.msk.bf16.gmra.mrb[52].mxu0 %vm1046_vm4, %v3595_v8  ;;  %v4168_v8 = vshll.u32 %v15489_v3, 16 }
 0x1d6   : > { %13869 = vmatprep.mubr.msk.bf16.mxu0 %vm22272_vm1, %v22301_v1 }
 0x1d7   : > { %v1748_v11 = vpop.f32.mrb[32].mxu1 }
 0x1d8   : > { %14389 = vst [vmem:[#allocation2 + $0x80] sm:$0xff] %v1748_v11  ;;  %v13589_v13 = vpop.f32.mrb[33].mxu1 }
 0x1d9   : > { %v1751_v14 = vpop.f32.mrb[34].mxu1 }
 0x1da   : > { %14392 = vst [vmem:[#allocation2 + $0x88] sm:$0xff] %v1751_v14  ;;  %v13590_v15 = vpop.f32.mrb[35].mxu1  ;;  %v4163_v14 = vsel %vm22274_vm7, %v4154_v5, %v4162_v6  ;;  %v4213_v5 = vshll.u32 %v15494_v62, 16 }
 0x1db   : > { %v4167_v15 = vrot.slane %v4165_v7, 2 }
 0x1dd   : > { %13870 = vmatmul.mubr.msk.bf16.gmra.mrb[56].mxu0 %vm1046_vm4, %v3597_v16  ;;  %v4170_v16 = vrot.slane %v4168_v8, 3 }
 0x1de   : > { %13873 = vmatprep.mubr.msk.bf16.mxu0 %vm22272_vm1, %v22301_v1 }
 0x1df   : > { %v1756_v18 = vpop.f32.mrb[36].mxu1 }
 0x1e0   : > { %14395 = vst [vmem:[#allocation2 + $0x90] sm:$0xff] %v1756_v18  ;;  %v13593_v20 = vpop.f32.mrb[37].mxu1  ;;  %v5125_v18 = vsel %vm22280_vm0, %v12717_v12, 0 }
 0x1e1   : > { %v1759_v21 = vpop.f32.mrb[38].mxu1  ;;  %v4171_v20 = vor.u32 %v4170_v16, %v4167_v15  ;;  %v4215_v15 = vrot.slane %v4213_v5, 3  ;;  %v15495_v16 = vld [vmem:[%s16131_s24 + $0x50] sm:$0xff]  }
 0x1e2   : > { %14398 = vst [vmem:[#allocation2 + $0x98] sm:$0xff] %v1759_v21  ;;  %v13594_v22 = vpop.f32.mrb[39].mxu1  ;;  %v4174_v21 = vshrl.u32 %v15490_v17, 16 }
 0x1e3   : > { %v4177_v22 = vshll.u32 %v15490_v17, 16  ;;  %v4172_v26 = vsel %vm22274_vm7, %v4162_v6, %v4171_v20 }
 0x1e5   : > { %13874 = vmatmul.mubr.msk.bf16.gmra.mrb[60].mxu0 %vm1046_vm4, %v3599_v23 }
 0x1e6   : > { %13877 = vmatprep.mubr.msk.bf16.mxu0 %vm22272_vm1, %v22301_v1 }
 0x1e7   : > { %v1764_v25 = vpop.f32.mrb[40].mxu1 }
 0x1e8   : > { %14401 = vst [vmem:[#allocation2 + $0xa0] sm:$0xff] %v1764_v25  ;;  %v13597_v27 = vpop.f32.mrb[41].mxu1 }
 0x1e9   : > { %v1767_v28 = vpop.f32.mrb[42].mxu1  ;;  %v4176_v27 = vrot.slane %v4174_v21, 2 }
 0x1ea   : > { %14404 = vst [vmem:[#allocation2 + $0xa8] sm:$0xff] %v1767_v28  ;;  %v13598_v29 = vpop.f32.mrb[43].mxu1  ;;  %v4179_v28 = vrot.slane %v4177_v22, 3 }
 0x1eb   : > { %v15491_v29 = vld [vmem:[%s16131_s24 + $0x30] sm:$0xff]  }
 0x1ec   : > { %v4180_v31 = vor.u32 %v4179_v28, %v4176_v27  ;;  %v4183_v33 = vshrl.u32 %v15491_v29, 16 }
 0x1ed   : > { %13878 = vmatmul.mubr.msk.bf16.gmra.mrb[64].mxu0 %vm1046_vm4, %v3601_v30 }
 0x1ee   : > { %13881 = vmatprep.mubr.msk.bf16.mxu0 %vm22272_vm1, %v22301_v1  ;;  %v4185_v38 = vrot.slane %v4183_v33, 2 }
 0x1ef   : > { %v1772_v32 = vpop.f32.mrb[44].mxu1 }
 0x1f0   : > { %14407 = vst [vmem:[#allocation2 + $0xb0] sm:$0xff] %v1772_v32  ;;  %v13601_v34 = vpop.f32.mrb[45].mxu1 }
 0x1f1   : > { %v1775_v35 = vpop.f32.mrb[46].mxu1  ;;  %v4186_v34 = vshll.u32 %v15491_v29, 16 }
 0x1f2   : > { %14410 = vst [vmem:[#allocation2 + $0xb8] sm:$0xff] %v1775_v35  ;;  %v13602_v36 = vpop.f32.mrb[47].mxu1 }
 0x1f5   : > { %13882 = vmatmul.mubr.msk.bf16.gmra.mrb[68].mxu0 %vm1046_vm4, %v3603_v37  ;;  %v4181_v37 = vsel %vm22274_vm7, %v4171_v20, %v4180_v31  ;;  %v4222_v20 = vshll.u32 %v15495_v16, 16 }
 0x1f6   : > { %13885 = vmatprep.mubr.msk.bf16.mxu0 %vm22272_vm1, %v22301_v1 }
 0x1f7   : > { %v1780_v39 = vpop.f32.mrb[48].mxu1 }
 0x1f8   : > { %14413 = vst [vmem:[#allocation2 + $0xc0] sm:$0xff] %v1780_v39  ;;  %v13605_v41 = vpop.f32.mrb[49].mxu1  ;;  %v4188_v39 = vrot.slane %v4186_v34, 3  ;;  %v15497_v34 = vld [vmem:[%s16131_s24 + $0x60] sm:$0xff]  }
 0x1f9   : > { %v1783_v42 = vpop.f32.mrb[50].mxu1 }
 0x1fa   : > { %14416 = vst [vmem:[#allocation2 + $0xc8] sm:$0xff] %v1783_v42  ;;  %v13606_v43 = vpop.f32.mrb[51].mxu1  ;;  %v4189_v42 = vor.u32 %v4188_v39, %v4185_v38 }
 0x1fd   : > { %13886 = vmatmul.mubr.msk.bf16.gmra.mrb[72].mxu0 %vm1046_vm4, %v3605_v44  ;;  %v4192_v44 = vshrl.u32 %v15492_v40, 16 }
 0x1fe   : > { %13889 = vmatprep.mubr.msk.bf16.mxu0 %vm22272_vm1, %v22301_v1 }
 0x1ff   : > { %v1788_v46 = vpop.f32.mrb[52].mxu1 }
 0x200   : > { %14419 = vst [vmem:[#allocation2 + $0xd0] sm:$0xff] %v1788_v46  ;;  %v13609_v48 = vpop.f32.mrb[53].mxu1 }
 0x201   : > { %v1791_v49 = vpop.f32.mrb[54].mxu1  ;;  %v4190_v48 = vsel %vm22274_vm7, %v4180_v31, %v4189_v42 }
 0x202   : > { %14422 = vst [vmem:[#allocation2 + $0xd8] sm:$0xff] %v1791_v49  ;;  %v13610_v50 = vpop.f32.mrb[55].mxu1  ;;  %v4194_v49 = vrot.slane %v4192_v44, 2 }
 0x203   : > { %v4197_v50 = vrot.slane %v4195_v45, 3 }
 0x205   : > { %13890 = vmatmul.mubr.msk.bf16.gmra.mrb[76].mxu0 %vm1046_vm4, %v3607_v51  ;;  %v15493_v51 = vld [vmem:[%s16131_s24 + $0x40] sm:$0xff]  }
 0x206   : > { %13893 = vmatprep.mubr.msk.bf16.mxu0 %vm22272_vm1, %v22301_v1  ;;  %v4201_v55 = vshrl.u32 %v15493_v51, 16  ;;  %v4204_v56 = vshll.u32 %v15493_v51, 16 }
 0x207   : > { %v1796_v54 = vpop.f32.mrb[56].mxu1 }
 0x208   : > { %14425 = vst [vmem:[#allocation2 + $0xe0] sm:$0xff] %v1796_v54  ;;  %v13613_v59 = vpop.f32.mrb[57].mxu1  ;;  %v4198_v54 = vor.u32 %v4197_v50, %v4194_v49 }
 0x209   : > { %v1799_v60 = vpop.f32.mrb[58].mxu1 }
 0x20a   : > { %14428 = vst [vmem:[#allocation2 + $0xe8] sm:$0xff] %v1799_v60  ;;  %v13614_v61 = vpop.f32.mrb[59].mxu1  ;;  %v4199_v59 = vsel %vm22274_vm7, %v4189_v42, %v4198_v54  ;;  %v4203_v60 = vrot.slane %v4201_v55, 2  ;;  %v15500_v55 = vld [vmem:[%s16131_s24 + $0x78] sm:$0xff]  }
 0x20b   : > { %v4206_v61 = vrot.slane %v4204_v56, 3 }
 0x20d   : > { %13894 = vmatmul.mubr.msk.bf16.gmra.mrb[88].mxu0 %vm1046_vm4, %v3606_v47  ;;  %v4207_v3 = vor.u32 %v4206_v61, %v4203_v60 }
 0x20e   : > { %13899 = vmatprep.mubr.msk.bf16.mxu0 %vm22272_vm1, %v22301_v1 }
 0x20f   : > { %v1804_v4 = vpop.f32.mrb[60].mxu1 }
 0x210   : > { %14431 = vst [vmem:[#allocation2 + $0xf0] sm:$0xff] %v1804_v4  ;;  %v13617_v9 = vpop.f32.mrb[61].mxu1  ;;  %v4210_v4 = vshrl.u32 %v15494_v62, 16  ;;  %v15501_v62 = vld [vmem:[%s16131_s24 + $0x80] sm:$0xff]  }
 0x211   : > { %v1807_v11 = vpop.f32.mrb[62].mxu1 }
 0x212   : > { %14434 = vst [vmem:[#allocation2 + $0xf8] sm:$0xff] %v1807_v11  ;;  %v13618_v13 = vpop.f32.mrb[63].mxu1 }
 0x213   : > { %v4208_v13 = vsel %vm22274_vm7, %v4198_v54, %v4207_v3 }
 0x215   : > { %13900 = vmatmul.mubr.msk.bf16.vlgmr.msra.gmra.mrb[0].mxu0 %vm1046_vm4, %v4163_v14  ;;  %v4212_v14 = vrot.slane %v4210_v4, 2 }
 0x216   : > { %13984 = vmatpush3.bf16.msra.mxu0 %v5125_v18  ;;  %13903 = vmatprep.mubr.msk.bf16.mxu0 %vm22272_vm1, %v22301_v1 }
 0x217   : > { %v1812_v19 = vpop.f32.mrb[64].mxu1  ;;  %14069 = vmatprep.subr.bf16.mxu0 %v22301_v1  ;;  %v4216_v18 = vor.u32 %v4215_v15, %v4212_v14  ;;  %v15503_v14 = vld [vmem:[%s16131_s24 + $0x90] sm:$0xff]  }
 0x218   : > { %14437 = vst [vmem:[#allocation2 + $0x100] sm:$0xff] %v1812_v19  ;;  %v13621_v23 = vpop.f32.mrb[65].mxu1  ;;  %v4219_v19 = vshrl.u32 %v15495_v16, 16  ;;  %v4291_v16 = vshrl.u32 %v15503_v14, 16 }
 0x219   : > { %v1815_v24 = vpop.f32.mrb[66].mxu1  ;;  %v4217_v23 = vsel %vm22274_vm7, %v4207_v3, %v4216_v18 }
 0x21a   : > { %14440 = vst [vmem:[#allocation2 + $0x108] sm:$0xff] %v1815_v24  ;;  %v13622_v25 = vpop.f32.mrb[67].mxu1  ;;  %v4221_v24 = vrot.slane %v4219_v19, 2  ;;  %v4293_v19 = vrot.slane %v4291_v16, 2 }
 0x21b   : > { %v4224_v25 = vrot.slane %v4222_v20, 3 }
 0x21d   : > { %13904 = vmatmul.mubr.msk.bf16.gmra.mrb[4].mxu0 %vm1046_vm4, %v4172_v26  ;;  %v15496_v26 = vld [vmem:[%s16131_s24 + $0x58] sm:$0xff]   ;;  %v4225_v27 = vor.u32 %v4224_v25, %v4221_v24 }
 0x21e   : > { %13907 = vmatprep.mubr.msk.bf16.mxu0 %vm22272_vm1, %v22301_v1  ;;  %v4228_v28 = vshrl.u32 %v15496_v26, 16  ;;  %v4231_v29 = vshll.u32 %v15496_v26, 16 }
 0x21f   : > { %v1820_v30 = vpop.f32.mrb[68].mxu1 }
 0x220   : > { %14443 = vst [vmem:[#allocation2 + $0x110] sm:$0xff] %v1820_v30  ;;  %v13625_v32 = vpop.f32.mrb[69].mxu1  ;;  %v4233_v33 = vrot.slane %v4231_v29, 3 }
 0x221   : > { %v1823_v35 = vpop.f32.mrb[70].mxu1  ;;  %v4230_v32 = vrot.slane %v4228_v28, 2  ;;  %v15505_v28 = vld [vmem:[%s16131_s24 + $0xa0] sm:$0xff]  }
 0x222   : > { %14446 = vst [vmem:[#allocation2 + $0x118] sm:$0xff] %v1823_v35  ;;  %v13626_v36 = vpop.f32.mrb[71].mxu1 }
 0x223   : > { %v4234_v35 = vor.u32 %v4233_v33, %v4230_v32  ;;  %v4237_v36 = vshrl.u32 %v15497_v34, 16 }
 0x225   : > { %13908 = vmatmul.mubr.msk.bf16.gmra.mrb[8].mxu0 %vm1046_vm4, %v4181_v37  ;;  %v4240_v37 = vshll.u32 %v15497_v34, 16  ;;  %v4235_v38 = vsel %vm22274_vm7, %v4225_v27, %v4234_v35  ;;  %v4239_v39 = vrot.slane %v4237_v36, 2  ;;  %v15506_v34 = vld [vmem:[%s16131_s24 + $0xa8] sm:$0xff]  }
 0x226   : > { %13911 = vmatprep.mubr.msk.bf16.mxu0 %vm22272_vm1, %v22301_v1  ;;  %v4318_v36 = vshrl.u32 %v15506_v34, 16 }
 0x227   : > { %v1828_v41 = vpop.f32.mrb[72].mxu1  ;;  %v4242_v40 = vrot.slane %v4240_v37, 3  ;;  %v4321_v37 = vshll.u32 %v15506_v34, 16 }
 0x228   : > { %14449 = vst [vmem:[#allocation2 + $0x120] sm:$0xff] %v1828_v41  ;;  %v13629_v43 = vpop.f32.mrb[73].mxu1  ;;  %v15498_v41 = vld [vmem:[%s16131_s24 + $0x68] sm:$0xff]  }
 0x229   : > { %v1831_v46 = vpop.f32.mrb[74].mxu1  ;;  %v4243_v42 = vor.u32 %v4242_v40, %v4239_v39  ;;  %v4246_v43 = vshrl.u32 %v15498_v41, 16  ;;  %v4249_v44 = vshll.u32 %v15498_v41, 16  ;;  %v4320_v39 = vrot.slane %v4318_v36, 2  ;;  %v15507_v41 = vld [vmem:[%s16131_s24 + $0xb0] sm:$0x1f]  }
 0x22a   : > { %14452 = vst [vmem:[#allocation2 + $0x128] sm:$0xff] %v1831_v46  ;;  %v13630_v47 = vpop.f32.mrb[75].mxu1  ;;  %v4323_v40 = vrot.slane %v4321_v37, 3 }
 0x22b   : > { %v4244_v45 = vsel %vm22274_vm7, %v4234_v35, %v4243_v42  ;;  %v4248_v46 = vrot.slane %v4246_v43, 2  ;;  %v4251_v47 = vrot.slane %v4249_v44, 3  ;;  %v4327_v43 = vshrl.u32 %v15507_v41, 16 }
 0x22c   : > { %v4330_v44 = vshll.u32 %v15507_v41, 16 }
 0x22d   : > { %13912 = vmatmul.mubr.msk.bf16.gmra.mrb[12].mxu0 %vm1046_vm4, %v4190_v48  ;;  %v15499_v48 = vld [vmem:[%s16131_s24 + $0x70] sm:$0xff]   ;;  %v4252_v49 = vor.u32 %v4251_v47, %v4248_v46  ;;  %v4329_v46 = vrot.slane %v4327_v43, 2 }
 0x22e   : > { %13915 = vmatprep.mubr.msk.bf16.mxu0 %vm22272_vm1, %v22301_v1  ;;  %v4255_v50 = vshrl.u32 %v15499_v48, 16  ;;  %v4258_v51 = vshll.u32 %v15499_v48, 16  ;;  %v4332_v47 = vrot.slane %v4330_v44, 3 }
 0x22f   : > { %v1836_v52 = vpop.f32.mrb[76].mxu1 }
 0x230   : > { %14455 = vst [vmem:[#allocation2 + $0x130] sm:$0xff] %v1836_v52  ;;  %v13633_v53 = vpop.f32.mrb[77].mxu1  ;;  %v4253_v52 = vsel %vm22274_vm7, %v4243_v42, %v4252_v49  ;;  %v4260_v54 = vrot.slane %v4258_v51, 3  ;;  %v4324_v42 = vor.u32 %v4323_v40, %v4320_v39  ;;  %v4333_v48 = vor.u32 %v4332_v47, %v4329_v46  ;;  %v15509_v51 = vld [vmem:[%s16131_s24 + $0x20] sm:$0xff]   ;;  %v15516_v47 = vld [vmem:[%s16131_s24 + $0x58] sm:$0xff]  }
 0x231   : > { %v1839_v57 = vpop.f32.mrb[78].mxu1  ;;  %v4257_v53 = vrot.slane %v4255_v50, 2  ;;  %v15508_v50 = vld [vmem:[%s16131_s24 + $0x18] sm:$0xfc]  }
 0x232   : > { %14458 = vst [vmem:[#allocation2 + $0x138] sm:$0xff] %v1839_v57  ;;  %v13634_v58 = vpop.f32.mrb[79].mxu1  ;;  %v4264_v57 = vshrl.u32 %v15500_v55, 16 }
 0x233   : > { %v4261_v56 = vor.u32 %v4260_v54, %v4257_v53  ;;  %v4267_v58 = vshll.u32 %v15500_v55, 16  ;;  %v4877_v53 = vshll.u32 %v15508_v50, 16  ;;  %v4882_v54 = vshrl.u32 %v15509_v51, 16 }
 0x234   : > { %v4266_v60 = vrot.slane %v4264_v57, 2  ;;  %v4885_v55 = vshll.u32 %v15509_v51, 16  ;;  %v4948_v51 = vshll.u32 %v15516_v47, 16 }
 0x235   : > { %13916 = vmatmul.mubr.msk.bf16.gmra.mrb[16].mxu0 %vm1046_vm4, %v4199_v59  ;;  %v4262_v59 = vsel %vm22274_vm7, %v4252_v49, %v4261_v56  ;;  %v4269_v61 = vrot.slane %v4267_v58, 3  ;;  %v4334_v49 = vsel %vm22274_vm7, %v4324_v42, %v4333_v48  ;;  %v4879_v57 = vrot.slane %v4877_v53, 3 }
 0x236   : > { %13919 = vmatprep.mubr.msk.bf16.mxu0 %vm22272_vm1, %v22301_v1  ;;  %v4884_v58 = vrot.slane %v4882_v54, 2  ;;  %v4950_v54 = vrot.slane %v4948_v51, 3 }
 0x237   : > { %v1844_v0 = vpop.f32.mrb[84].mxu1 }
 0x238   : > { %v1890_v2 = vadd.f32 %v1844_v0, %v1395_v63  ;;  %v13637_v6 = vpop.f32.mrb[85].mxu1  ;;  %v3291_v8 = vpop.f32.mrb[84].mxu0  ;;  %v4270_v63 = vor.u32 %v4269_v61, %v4266_v60  ;;  %v4273_v0 = vshrl.u32 %v15501_v62, 16  ;;  %v15510_v60 = vld [vmem:[%s16131_s24 + $0x28] sm:$0xff]  }
 0x239   : > { %v1847_v7 = vpop.f32.mrb[86].mxu1  ;;  %v13809_v11 = vpop.f32.mrb[85].mxu0  ;;  %v15502_v6 = vld [vmem:[%s16131_s24 + $0x88] sm:$0xff]  }
 0x23a   : > { %1931 = vst [vmem:[#allocation2 + $0x140] sm:$0xf] %v1890_v2  ;;  %v13638_v9 = vpop.f32.mrb[87].mxu1  ;;  %v3294_v12 = vpop.f32.mrb[86].mxu0  ;;  %v4276_v2 = vshll.u32 %v15501_v62, 16  ;;  %v4271_v3 = vsel %vm22274_vm7, %v4261_v56, %v4270_v63  ;;  %v4275_v4 = vrot.slane %v4273_v0, 2 }
 0x23b   : > { %v13810_v17 = vpop.f32.mrb[87].mxu0  ;;  %v4285_v9 = vshll.u32 %v15502_v6, 16  ;;  %v4894_v0 = vshll.u32 %v15510_v60, 16 }
 0x23c   : > { %v4278_v5 = vrot.slane %v4276_v2, 3  ;;  %v4294_v17 = vshll.u32 %v15503_v14, 16  ;;  %v12760_v2 = vld [vmem:[%s22268_s1 + $0xe] sm:$0x3] }
 0x23d   : > { %13920 = vmatmul.mubr.msk.bf16.gmra.mrb[20].mxu0 %vm1046_vm4, %v4208_v13  ;;  %v4287_v13 = vrot.slane %v4285_v9, 3 }
 0x23e   : > { %13923 = vmatprep.mubr.msk.bf16.mxu0 %vm22272_vm1, %v22301_v1  ;;  %v4279_v7 = vor.u32 %v4278_v5, %v4275_v4  ;;  %v4296_v20 = vrot.slane %v4294_v17, 3  ;;  %v4896_v5 = vrot.slane %v4894_v0, 3 }
 0x240   : > { %v4280_v11 = vsel %vm22274_vm7, %v4270_v63, %v4279_v7  ;;  %v4891_v63 = vshrl.u32 %v15510_v60, 16 }
 0x241   : > { %v1972_v21 = vld [vmem:[#allocation2 + $0x140] sm:$0xf] }
 0x242   : > { %v2614_v22 = vadd.f32 %v16593_v10, %v1972_v21  ;;  %v4226_v10 = vsel %vm22274_vm7, %v4216_v18, %v4225_v27  ;;  %v15504_v21 = vld [vmem:[%s16131_s24 + $0x98] sm:$0xff]   ;;  %v4893_v4 = vrot.slane %v4891_v63, 2 }
 0x243   : > { %v4303_v24 = vshll.u32 %v15504_v21, 16 }
 0x244   : > { %2655 = vst [vmem:[#allocation2 + $0x140] sm:$0xf] %v2614_v22  ;;  %v4297_v22 = vor.u32 %v4296_v20, %v4293_v19 }
 0x245   : > { %13924 = vmatmul.mubr.msk.bf16.gmra.mrb[24].mxu0 %vm1046_vm4, %v4217_v23  ;;  %v4300_v23 = vshrl.u32 %v15504_v21, 16  ;;  %v4305_v27 = vrot.slane %v4303_v24, 3 }
 0x246   : > { %13927 = vmatprep.mubr.msk.bf16.mxu0 %vm22272_vm1, %v22301_v1 }
 0x247   : > { %v4302_v26 = vrot.slane %v4300_v23, 2 }
 0x249   : > { %v4306_v29 = vor.u32 %v4305_v27, %v4302_v26 }
 0x24b   : > { %v2696_v30 = vld [vmem:[#allocation2 + $0x140] sm:$0xf] }
 0x24c   : > { %v3337_v31 = vadd.f32 %v3291_v8, %v2696_v30  ;;  %v4282_v8 = vshrl.u32 %v15502_v6, 16  ;;  %v4309_v30 = vshrl.u32 %v15505_v28, 16  ;;  %v15511_v6 = vld [vmem:[%s16131_s24 + $0x30] sm:$0xff]  }
 0x24d   : > { %13928 = vmatmul.mubr.msk.bf16.gmra.mrb[28].mxu0 %vm1046_vm4, %v4226_v10  ;;  %v4307_v10 = vsel %vm22274_vm7, %v4297_v22, %v4306_v29  ;;  %v4900_v9 = vshrl.u32 %v15511_v6, 16 }
 0x24e   : > { %3378 = vst [vmem:[#allocation2 + $0x140] sm:$0xf] %v3337_v31  ;;  %13931 = vmatprep.mubr.msk.bf16.mxu0 %vm22272_vm1, %v22301_v1  ;;  %v4284_v12 = vrot.slane %v4282_v8, 2  ;;  %v4312_v31 = vshll.u32 %v15505_v28, 16  ;;  %v4311_v32 = vrot.slane %v4309_v30, 2  ;;  %v4897_v8 = vor.u32 %v4896_v5, %v4893_v4 }
 0x250   : > { %v4288_v15 = vor.u32 %v4287_v13, %v4284_v12  ;;  %v4314_v33 = vrot.slane %v4312_v31, 3  ;;  %v4902_v13 = vrot.slane %v4900_v9, 2 }
 0x252   : > { %v4289_v18 = vsel %vm22274_vm7, %v4279_v7, %v4288_v15  ;;  %v4298_v25 = vsel %vm22274_vm7, %v4288_v15, %v4297_v22  ;;  %v4315_v35 = vor.u32 %v4314_v33, %v4311_v32  ;;  %v5705_v7 = vsel %vm22280_vm0, %v12760_v2, 0  ;;  %v15512_v15 = vld [vmem:[%s16131_s24 + $0x38] sm:$0xff]   ;;  %v15513_v22 = vld [vmem:[%s16131_s24 + $0x40] sm:$0xff]  }
 0x253   : > { %v4909_v17 = vshrl.u32 %v15512_v15, 16  ;;  %v4918_v24 = vshrl.u32 %v15513_v22, 16 }
 0x255   : > { %13932 = vmatmul.mubr.msk.bf16.gmra.mrb[32].mxu0 %vm1046_vm4, %v4235_v38  ;;  %v4316_v38 = vsel %vm22274_vm7, %v4306_v29, %v4315_v35  ;;  %v4911_v20 = vrot.slane %v4909_v17, 2  ;;  %v4920_v27 = vrot.slane %v4918_v24, 2  ;;  %v15514_v29 = vld [vmem:[%s16131_s24 + $0x48] sm:$0xff]   ;;  %v3419_v39 = vld [vmem:[#allocation2 + $0x140] sm:$0xf] }
 0x256   : > { %13935 = vmatprep.mubr.msk.bf16.mxu0 %vm22272_vm1, %v22301_v1  ;;  %v4927_v31 = vshrl.u32 %v15514_v29, 16 }
 0x258   : > { %v4929_v33 = vrot.slane %v4927_v31, 2 }
 0x25d   : > { %13936 = vmatmul.mubr.msk.bf16.gmra.mrb[36].mxu0 %vm1046_vm4, %v4244_v45  ;;  %v4325_v45 = vsel %vm22274_vm7, %v4315_v35, %v4324_v42  ;;  %v15515_v35 = vld [vmem:[%s16131_s24 + $0x50] sm:$0xff]  }
 0x25e   : > { %13939 = vmatprep.mubr.msk.bf16.mxu0 %vm22272_vm1, %v22301_v1  ;;  %v4936_v37 = vshrl.u32 %v15515_v35, 16 }
 0x265   : > { %13940 = vmatmul.mubr.msk.bf16.gmra.mrb[40].mxu0 %vm1046_vm4, %v4253_v52  ;;  %v4874_v52 = vshrl.u32 %v15508_v50, 16  ;;  %v4945_v50 = vshrl.u32 %v15516_v47, 16 }
 0x266   : > { %13943 = vmatprep.mubr.msk.bf16.mxu0 %vm22272_vm1, %v22301_v1 }
 0x267   : > { %v4876_v56 = vrot.slane %v4874_v52, 2  ;;  %v4947_v53 = vrot.slane %v4945_v50, 2 }
 0x269   : > { %v4880_v61 = vor.u32 %v4879_v57, %v4876_v56  ;;  %v4951_v56 = vor.u32 %v4950_v54, %v4947_v53 }
 0x26d   : > { %13944 = vmatmul.mubr.msk.bf16.gmra.mrb[44].mxu0 %vm1046_vm4, %v4262_v59  ;;  %v4887_v59 = vrot.slane %v4885_v55, 3  ;;  %v15517_v55 = vld [vmem:[%s16131_s24 + $0x60] sm:$0xff]  }
 0x26e   : > { %13947 = vmatprep.mubr.msk.bf16.mxu0 %vm22272_vm1, %v22301_v1  ;;  %v4954_v57 = vshrl.u32 %v15517_v55, 16 }
 0x26f   : > { %v4888_v62 = vor.u32 %v4887_v59, %v4884_v58  ;;  %v4957_v58 = vshll.u32 %v15517_v55, 16  ;;  %v15526_v55 = vld [vmem:[%s16131_s24 + $0xa8] sm:$0xff]  }
 0x270   : > { %v4956_v60 = vrot.slane %v4954_v57, 2  ;;  %v5035_v57 = vshrl.u32 %v15526_v55, 16 }
 0x271   : > { %v4898_v12 = vsel %vm22274_vm7, %v4888_v62, %v4897_v8 }
 0x275   : > { %13948 = vmatmul.mubr.msk.bf16.gmra.mrb[48].mxu0 %vm1046_vm4, %v4271_v3  ;;  %v4889_v3 = vsel %vm22274_vm7, %v4880_v61, %v4888_v62  ;;  %v4959_v61 = vrot.slane %v4957_v58, 3  ;;  %v15518_v62 = vld [vmem:[%s16131_s24 + $0x68] sm:$0xff]   ;;  %v5038_v58 = vshll.u32 %v15526_v55, 16  ;;  %v15540_v55 = vld [vmem:[%s16131_s24 + $0x70] sm:$0xff]  }
 0x276   : > { %13951 = vmatprep.mubr.msk.bf16.mxu0 %vm22272_vm1, %v22301_v1  ;;  %v4963_v0 = vshrl.u32 %v15518_v62, 16  ;;  %v4966_v2 = vshll.u32 %v15518_v62, 16  ;;  %v15527_v62 = vld [vmem:[%s16131_s24 + $0xb0] sm:$0xff]  }
 0x277   : > { %v4960_v63 = vor.u32 %v4959_v61, %v4956_v60  ;;  %v5037_v60 = vrot.slane %v5035_v57, 2  ;;  %v5040_v61 = vrot.slane %v5038_v58, 3  ;;  %v15541_v58 = vld [vmem:[%s16131_s24 + $0x78] sm:$0xff]  }
 0x278   : > { %v4965_v4 = vrot.slane %v4963_v0, 2  ;;  %v4968_v5 = vrot.slane %v4966_v2, 3  ;;  %v5044_v0 = vshrl.u32 %v15527_v62, 16  ;;  %v5047_v2 = vshll.u32 %v15527_v62, 16 }
 0x27d   : > { %13952 = vmatmul.mubr.msk.bf16.gmra.mrb[52].mxu0 %vm1046_vm4, %v4280_v11  ;;  %v4903_v11 = vshll.u32 %v15511_v6, 16  ;;  %v15519_v6 = vld [vmem:[%s16131_s24 + $0x70] sm:$0xff]  }
 0x27e   : > { %13955 = vmatprep.mubr.msk.bf16.mxu0 %vm22272_vm1, %v22301_v1  ;;  %v4975_v9 = vshll.u32 %v15519_v6, 16 }
 0x27f   : > { %v4905_v14 = vrot.slane %v4903_v11, 3 }
 0x281   : > { %v4906_v16 = vor.u32 %v4905_v14, %v4902_v13  ;;  %v4977_v13 = vrot.slane %v4975_v9, 3  ;;  %v15520_v14 = vld [vmem:[%s16131_s24 + $0x78] sm:$0xff]  }
 0x282   : > { %v4984_v17 = vshll.u32 %v15520_v14, 16 }
 0x283   : > { %v4907_v19 = vsel %vm22274_vm7, %v4897_v8, %v4906_v16  ;;  %v4972_v8 = vshrl.u32 %v15519_v6, 16  ;;  %v15528_v6 = vld [vmem:[%s16131_s24 + $0xb8] sm:$0x1f]  }
 0x284   : > { %v5056_v9 = vshll.u32 %v15528_v6, 16 }
 0x285   : > { %13956 = vmatmul.mubr.msk.bf16.gmra.mrb[56].mxu0 %vm1046_vm4, %v4289_v18  ;;  %v4912_v18 = vshll.u32 %v15512_v15, 16 }
 0x286   : > { %13959 = vmatprep.mubr.msk.bf16.mxu0 %vm22272_vm1, %v22301_v1 }
 0x287   : > { %v4914_v21 = vrot.slane %v4912_v18, 3 }
 0x289   : > { %v4915_v23 = vor.u32 %v4914_v21, %v4911_v20  ;;  %v4986_v20 = vrot.slane %v4984_v17, 3  ;;  %v15521_v21 = vld [vmem:[%s16131_s24 + $0x80] sm:$0xff]  }
 0x28a   : > { %v4993_v24 = vshll.u32 %v15521_v21, 16  ;;  %v15530_v17 = vld [vmem:[%s16131_s24 + $0x20] sm:$0xff]  }
 0x28b   : > { %v4916_v26 = vsel %vm22274_vm7, %v4906_v16, %v4915_v23  ;;  %v4981_v16 = vshrl.u32 %v15520_v14, 16 }
 0x28d   : > { %13960 = vmatmul.mubr.msk.bf16.gmra.mrb[60].mxu0 %vm1046_vm4, %v4298_v25  ;;  %v4921_v25 = vshll.u32 %v15513_v22, 16 }
 0x28e   : > { %13963 = vmatprep.mubr.msk.bf16.mxu0 %vm22272_vm1, %v22301_v1 }
 0x28f   : > { %v4923_v28 = vrot.slane %v4921_v25, 3 }
 0x291   : > { %v4924_v30 = vor.u32 %v4923_v28, %v4920_v27  ;;  %v4995_v27 = vrot.slane %v4993_v24, 3  ;;  %v15522_v28 = vld [vmem:[%s16131_s24 + $0x88] sm:$0xff]  }
 0x292   : > { %v5002_v31 = vshll.u32 %v15522_v28, 16 }
 0x293   : > { %v4925_v32 = vsel %vm22274_vm7, %v4915_v23, %v4924_v30  ;;  %v4990_v23 = vshrl.u32 %v15521_v21, 16 }
 0x295   : > { %13964 = vmatmul.mubr.msk.bf16.gmra.mrb[64].mxu0 %vm1046_vm4, %v4307_v10  ;;  %v4930_v10 = vshll.u32 %v15514_v29, 16 }
 0x296   : > { %13967 = vmatprep.mubr.msk.bf16.mxu0 %vm22272_vm1, %v22301_v1 }
 0x297   : > { %v4932_v34 = vrot.slane %v4930_v10, 3 }
 0x299   : > { %v4933_v36 = vor.u32 %v4932_v34, %v4929_v33  ;;  %v5004_v33 = vrot.slane %v5002_v31, 3  ;;  %v15523_v34 = vld [vmem:[%s16131_s24 + $0x90] sm:$0xff]  }
 0x29b   : > { %v4934_v44 = vsel %vm22274_vm7, %v4924_v30, %v4933_v36  ;;  %v4999_v30 = vshrl.u32 %v15522_v28, 16 }
 0x29d   : > { %13968 = vmatmul.mubr.msk.bf16.gmra.mrb[68].mxu0 %vm1046_vm4, %v4316_v38  ;;  %v4939_v38 = vshll.u32 %v15515_v35, 16 }
 0x29e   : > { %13971 = vmatprep.mubr.msk.bf16.mxu0 %vm22272_vm1, %v22301_v1 }
 0x29f   : > { %v4941_v46 = vrot.slane %v4939_v38, 3 }
 0x2a5   : > { %13972 = vmatmul.mubr.msk.bf16.gmra.mrb[72].mxu0 %vm1046_vm4, %v4325_v45  ;;  %v4938_v45 = vrot.slane %v4936_v37, 2  ;;  %v5011_v37 = vshll.u32 %v15523_v34, 16 }
 0x2a6   : > { %13975 = vmatprep.mubr.msk.bf16.mxu0 %vm22272_vm1, %v22301_v1 }
 0x2ad   : > { %13976 = vmatmul.mubr.msk.bf16.gmra.mrb[76].mxu0 %vm1046_vm4, %v4334_v49  ;;  %v4942_v49 = vor.u32 %v4941_v46, %v4938_v45 }
 0x2ae   : > { %13979 = vmatprep.mubr.msk.bf16.mxu0 %vm22272_vm1, %v22301_v1 }
 0x2af   : > { %v4943_v52 = vsel %vm22274_vm7, %v4933_v36, %v4942_v49  ;;  %v4952_v59 = vsel %vm22274_vm7, %v4942_v49, %v4951_v56  ;;  %v5008_v36 = vshrl.u32 %v15523_v34, 16  ;;  %v15535_v34 = vld [vmem:[%s16131_s24 + $0x48] sm:$0xff]  }
 0x2b5   : > { %13980 = vmatmul.mubr.msk.bf16.gmra.mrb[92].mxu0 %vm1046_vm4, %v4333_v48 }
 0x2b6   : > { %13985 = vmatprep.mubr.msk.bf16.mxu0 %vm22272_vm1, %v22301_v1 }
 0x2bd   : > { %13986 = vmatmul.mubr.msk.bf16.vlgmr.msra.gmra.mrb[0].mxu0 %vm1046_vm4, %v4889_v3  ;;  %v4961_v3 = vsel %vm22274_vm7, %v4951_v56, %v4960_v63 }
 0x2be   : > { %14070 = vmatpush3.bf16.msra.mxu0 %v5705_v7  ;;  %13989 = vmatprep.mubr.msk.bf16.mxu0 %vm22272_vm1, %v22301_v1  ;;  %v4969_v7 = vor.u32 %v4968_v5, %v4965_v4  ;;  %v5046_v4 = vrot.slane %v5044_v0, 2  ;;  %v5049_v5 = vrot.slane %v5047_v2, 3  ;;  %v15543_v0 = vld [vmem:[%s16131_s24 + $0x88] sm:$0xff]  }
 0x2bf   : > { %14155 = vmatprep.subr.bf16.mxu0 %v22301_v1  ;;  %v5627_v2 = vrot.slane %v15543_v0, 3 }
 0x2c0   : > { %v4970_v11 = vsel %vm22274_vm7, %v4960_v63, %v4969_v7  ;;  %v5041_v63 = vor.u32 %v5040_v61, %v5037_v60  ;;  %v15542_v61 = vld [vmem:[%s16131_s24 + $0x80] sm:$0xff]  }
 0x2c1   : > { %v5625_v62 = vrot.slane %v15542_v61, 3  ;;  %v15556_v61 = vld [vmem:[%s16131_s24 + $0x48] sm:$0xff]  }
 0x2c2   : > { %v6237_v0 = vshll.u32 %v15556_v61, 16 }
 0x2c5   : > { %13990 = vmatmul.mubr.msk.bf16.gmra.mrb[4].mxu0 %vm1046_vm4, %v4898_v12  ;;  %v4974_v12 = vrot.slane %v4972_v8, 2  ;;  %v5053_v8 = vshrl.u32 %v15528_v6, 16 }
 0x2c6   : > { %13993 = vmatprep.mubr.msk.bf16.mxu0 %vm22272_vm1, %v22301_v1 }
 0x2c7   : > { %v4978_v15 = vor.u32 %v4977_v13, %v4974_v12  ;;  %v5055_v12 = vrot.slane %v5053_v8, 2  ;;  %v5058_v13 = vrot.slane %v5056_v9, 3 }
 0x2c9   : > { %v4979_v18 = vsel %vm22274_vm7, %v4969_v7, %v4978_v15  ;;  %v5050_v7 = vor.u32 %v5049_v5, %v5046_v4  ;;  %v5059_v14 = vor.u32 %v5058_v13, %v5055_v12  ;;  %v15544_v4 = vld [vmem:[%s16131_s24 + $0x90] sm:$0xff]  }
 0x2ca   : > { %v5629_v5 = vrot.slane %v15544_v4, 3  ;;  %v6239_v4 = vrot.slane %v6237_v0, 4 }
 0x2cc   : > { %v5630_v6 = vsel %vm22276_vm8, %v5627_v2, %v5629_v5 }
 0x2cd   : > { %13994 = vmatmul.mubr.msk.bf16.gmra.mrb[8].mxu0 %vm1046_vm4, %v4907_v19  ;;  %v4983_v19 = vrot.slane %v4981_v16, 2  ;;  %v15529_v16 = vld [vmem:[%s16131_s24 + $0x18] sm:$0xf8]  }
 0x2ce   : > { %13997 = vmatprep.mubr.msk.bf16.mxu0 %vm22272_vm1, %v22301_v1 }
 0x2cf   : > { %v4987_v22 = vor.u32 %v4986_v20, %v4983_v19  ;;  %v5601_v19 = vrot.slane %v15530_v17, 3  ;;  %v12803_v20 = vld [vmem:[%s22268_s1 + $0x10] sm:$0x3] }
 0x2d0   : > { %v15548_v17 = vld [vmem:[%s16131_s24 + $0xb0] sm:$0xff]  }
 0x2d1   : > { %v4988_v25 = vsel %vm22274_vm7, %v4978_v15, %v4987_v22  ;;  %v5060_v15 = vsel %vm22274_vm7, %v5050_v7, %v5059_v14 }
 0x2d5   : > { %13998 = vmatmul.mubr.msk.bf16.gmra.mrb[12].mxu0 %vm1046_vm4, %v4916_v26  ;;  %v4992_v26 = vrot.slane %v4990_v23, 2  ;;  %v6432_v23 = vsel %vm22280_vm0, %v12803_v20, 0  ;;  %v15549_v20 = vld [vmem:[%s16131_s24 + $0xb8] sm:$0x1f]  }
 0x2d6   : > { %14001 = vmatprep.mubr.msk.bf16.mxu0 %vm22272_vm1, %v22301_v1 }
 0x2d7   : > { %v4996_v29 = vor.u32 %v4995_v27, %v4992_v26  ;;  %v15532_v26 = vld [vmem:[%s16131_s24 + $0x30] sm:$0xff]  }
 0x2d8   : > { %v5605_v27 = vrot.slane %v15532_v26, 3 }
 0x2d9   : > { %v4997_v10 = vsel %vm22274_vm7, %v4987_v22, %v4996_v29  ;;  %v15531_v22 = vld [vmem:[%s16131_s24 + $0x28] sm:$0xff]  }
 0x2da   : > { %v5603_v24 = vrot.slane %v15531_v22, 3 }
 0x2dc   : > { %v5606_v28 = vsel %vm22276_vm8, %v5603_v24, %v5605_v27 }
 0x2dd   : > { %14002 = vmatmul.mubr.msk.bf16.gmra.mrb[16].mxu0 %vm1046_vm4, %v4925_v32  ;;  %v5001_v32 = vrot.slane %v4999_v30, 2 }
 0x2de   : > { %14005 = vmatprep.mubr.msk.bf16.mxu0 %vm22272_vm1, %v22301_v1 }
 0x2df   : > { %v5005_v35 = vor.u32 %v5004_v33, %v5001_v32 }
 0x2e0   : > { %v3868_v40 = vpop.f32.mrb[88].mxu0 }
 0x2e1   : > { %v3914_v41 = vadd.f32 %v3868_v40, %v3419_v39  ;;  %v13895_v42 = vpop.f32.mrb[89].mxu0  ;;  %v5006_v38 = vsel %vm22274_vm7, %v4996_v29, %v5005_v35  ;;  %v5010_v39 = vrot.slane %v5008_v36, 2  ;;  %v5013_v40 = vrot.slane %v5011_v37, 3  ;;  %v15533_v29 = vld [vmem:[%s16131_s24 + $0x38] sm:$0xff]  }
 0x2e2   : > { %v3871_v43 = vpop.f32.mrb[90].mxu0  ;;  %v5607_v30 = vrot.slane %v15533_v29, 3 }
 0x2e3   : > { %3955 = vst [vmem:[#allocation2 + $0x140] sm:$0xf] %v3914_v41  ;;  %v13896_v48 = vpop.f32.mrb[91].mxu0  ;;  %v15524_v41 = vld [vmem:[%s16131_s24 + $0x98] sm:$0xff]   ;;  %v5014_v42 = vor.u32 %v5013_v40, %v5010_v39 }
 0x2e4   : > { %v5017_v43 = vshrl.u32 %v15524_v41, 16  ;;  %v15525_v48 = vld [vmem:[%s16131_s24 + $0xa0] sm:$0xff]   ;;  %v5608_v31 = vsel %vm22276_vm8, %v5605_v27, %v5607_v30 }
 0x2e5   : > { %14006 = vmatmul.mubr.msk.bf16.gmra.mrb[20].mxu0 %vm1046_vm4, %v4934_v44  ;;  %v5020_v44 = vshll.u32 %v15524_v41, 16  ;;  %v5015_v45 = vsel %vm22274_vm7, %v5005_v35, %v5014_v42  ;;  %v5026_v50 = vshrl.u32 %v15525_v48, 16  ;;  %v5029_v51 = vshll.u32 %v15525_v48, 16 }
 0x2e6   : > { %14009 = vmatprep.mubr.msk.bf16.mxu0 %vm22272_vm1, %v22301_v1  ;;  %v5019_v46 = vrot.slane %v5017_v43, 2  ;;  %v5611_v35 = vrot.slane %v15535_v34, 3 }
 0x2e7   : > { %v5022_v47 = vrot.slane %v5020_v44, 3  ;;  %v5028_v53 = vrot.slane %v5026_v50, 2  ;;  %v5031_v54 = vrot.slane %v5029_v51, 3 }
 0x2e9   : > { %v5023_v49 = vor.u32 %v5022_v47, %v5019_v46  ;;  %v5032_v56 = vor.u32 %v5031_v54, %v5028_v53  ;;  %v15537_v46 = vld [vmem:[%s16131_s24 + $0x58] sm:$0xff]  }
 0x2ea   : > { %v3996_v36 = vld [vmem:[#allocation2 + $0x140] sm:$0xf]  ;;  %v5615_v47 = vrot.slane %v15537_v46, 3 }
 0x2ed   : > { %14010 = vmatmul.mubr.msk.bf16.gmra.mrb[24].mxu0 %vm1046_vm4, %v4943_v52  ;;  %v5024_v52 = vsel %vm22274_vm7, %v5014_v42, %v5023_v49  ;;  %v15536_v42 = vld [vmem:[%s16131_s24 + $0x50] sm:$0xff]  }
 0x2ee   : > { %14013 = vmatprep.mubr.msk.bf16.mxu0 %vm22272_vm1, %v22301_v1  ;;  %v5613_v44 = vrot.slane %v15536_v42, 3 }
 0x2f0   : > { %v5616_v48 = vsel %vm22276_vm8, %v5613_v44, %v5615_v47 }
 0x2f5   : > { %14014 = vmatmul.mubr.msk.bf16.gmra.mrb[28].mxu0 %vm1046_vm4, %v4952_v59  ;;  %v5033_v59 = vsel %vm22274_vm7, %v5023_v49, %v5032_v56  ;;  %v15538_v49 = vld [vmem:[%s16131_s24 + $0x60] sm:$0xff]  }
 0x2f6   : > { %14017 = vmatprep.mubr.msk.bf16.mxu0 %vm22272_vm1, %v22301_v1  ;;  %v5617_v50 = vrot.slane %v15538_v49, 3 }
 0x2f8   : > { %v5618_v51 = vsel %vm22276_vm8, %v5615_v47, %v5617_v50  ;;  %v15554_v47 = vld [vmem:[%s16131_s24 + $0x38] sm:$0xff]  }
 0x2f9   : > { %v6216_v49 = vshrl.u32 %v15554_v47, 16 }
 0x2fd   : > { %14018 = vmatmul.mubr.msk.bf16.gmra.mrb[32].mxu0 %vm1046_vm4, %v4961_v3  ;;  %v5042_v3 = vsel %vm22274_vm7, %v5032_v56, %v5041_v63  ;;  %v5621_v56 = vrot.slane %v15540_v55, 3 }
 0x2fe   : > { %14021 = vmatprep.mubr.msk.bf16.mxu0 %vm22272_vm1, %v22301_v1 }
 0x305   : > { %14022 = vmatmul.mubr.msk.bf16.gmra.mrb[36].mxu0 %vm1046_vm4, %v4970_v11  ;;  %v5051_v11 = vsel %vm22274_vm7, %v5041_v63, %v5050_v7  ;;  %v15545_v7 = vld [vmem:[%s16131_s24 + $0x98] sm:$0xff]  }
 0x306   : > { %14025 = vmatprep.mubr.msk.bf16.mxu0 %vm22272_vm1, %v22301_v1  ;;  %v5631_v8 = vrot.slane %v15545_v7, 3 }
 0x308   : > { %v5632_v9 = vsel %vm22276_vm8, %v5629_v5, %v5631_v8  ;;  %v15557_v5 = vld [vmem:[%s16131_s24 + $0x50] sm:$0xff]  }
 0x309   : > { %v6243_v7 = vshrl.u32 %v15557_v5, 16 }
 0x30d   : > { %14026 = vmatmul.mubr.msk.bf16.gmra.mrb[40].mxu0 %vm1046_vm4, %v4979_v18  ;;  %v5600_v18 = vrot.slane %v15529_v16, 3 }
 0x30e   : > { %14029 = vmatprep.mubr.msk.bf16.mxu0 %vm22272_vm1, %v22301_v1 }
 0x30f   : > { %v5602_v21 = vsel %vm22276_vm8, %v5600_v18, %v5601_v19  ;;  %v5637_v18 = vrot.slane %v15548_v17, 3 }
 0x315   : > { %14030 = vmatmul.mubr.msk.bf16.gmra.mrb[44].mxu0 %vm1046_vm4, %v4988_v25  ;;  %v5604_v25 = vsel %vm22276_vm8, %v5601_v19, %v5603_v24  ;;  %v15551_v24 = vld [vmem:[%s16131_s24 + $0x20] sm:$0xff]  }
 0x316   : > { %14033 = vmatprep.mubr.msk.bf16.mxu0 %vm22272_vm1, %v22301_v1  ;;  %v6189_v27 = vshrl.u32 %v15551_v24, 16 }
 0x31d   : > { %14034 = vmatmul.mubr.msk.bf16.gmra.mrb[48].mxu0 %vm1046_vm4, %v4997_v10  ;;  %v15534_v10 = vld [vmem:[%s16131_s24 + $0x40] sm:$0xff]  }
 0x31e   : > { %14037 = vmatprep.mubr.msk.bf16.mxu0 %vm22272_vm1, %v22301_v1  ;;  %v5609_v32 = vrot.slane %v15534_v10, 3 }
 0x320   : > { %v5610_v33 = vsel %vm22276_vm8, %v5607_v30, %v5609_v32  ;;  %v5612_v41 = vsel %vm22276_vm8, %v5609_v32, %v5611_v35  ;;  %v15552_v32 = vld [vmem:[%s16131_s24 + $0x28] sm:$0xff]  }
 0x325   : > { %14038 = vmatmul.mubr.msk.bf16.gmra.mrb[52].mxu0 %vm1046_vm4, %v5006_v38 }
 0x326   : > { %14041 = vmatprep.mubr.msk.bf16.mxu0 %vm22272_vm1, %v22301_v1 }
 0x32d   : > { %14042 = vmatmul.mubr.msk.bf16.gmra.mrb[56].mxu0 %vm1046_vm4, %v5015_v45  ;;  %v5614_v45 = vsel %vm22276_vm8, %v5611_v35, %v5613_v44  ;;  %v6198_v35 = vshrl.u32 %v15552_v32, 16 }
 0x32e   : > { %14045 = vmatprep.mubr.msk.bf16.mxu0 %vm22272_vm1, %v22301_v1 }
 0x335   : > { %14046 = vmatmul.mubr.msk.bf16.gmra.mrb[60].mxu0 %vm1046_vm4, %v5024_v52  ;;  %v15539_v52 = vld [vmem:[%s16131_s24 + $0x68] sm:$0xff]  }
 0x336   : > { %14049 = vmatprep.mubr.msk.bf16.mxu0 %vm22272_vm1, %v22301_v1  ;;  %v5619_v53 = vrot.slane %v15539_v52, 3  ;;  %v6218_v52 = vrot.slane %v6216_v49, 3 }
 0x338   : > { %v5620_v54 = vsel %vm22276_vm8, %v5617_v50, %v5619_v53  ;;  %v5622_v57 = vsel %vm22276_vm8, %v5619_v53, %v5621_v56  ;;  %v6219_v50 = vshll.u32 %v15554_v47, 16 }
 0x33a   : > { %v6221_v53 = vrot.slane %v6219_v50, 4 }
 0x33c   : > { %v6222_v55 = vor.u32 %v6221_v53, %v6218_v52  ;;  %v15563_v53 = vld [vmem:[%s16131_s24 + $0x80] sm:$0xff]  }
 0x33d   : > { %14050 = vmatmul.mubr.msk.bf16.gmra.mrb[64].mxu0 %vm1046_vm4, %v5033_v59  ;;  %v5623_v59 = vrot.slane %v15541_v58, 3 }
 0x33e   : > { %14053 = vmatprep.mubr.msk.bf16.mxu0 %vm22272_vm1, %v22301_v1 }
 0x33f   : > { %v5624_v60 = vsel %vm22276_vm8, %v5621_v56, %v5623_v59  ;;  %v5626_v63 = vsel %vm22276_vm8, %v5623_v59, %v5625_v62 }
 0x345   : > { %14054 = vmatmul.mubr.msk.bf16.gmra.mrb[68].mxu0 %vm1046_vm4, %v5042_v3  ;;  %v5628_v3 = vsel %vm22276_vm8, %v5625_v62, %v5627_v2 }
 0x346   : > { %14057 = vmatprep.mubr.msk.bf16.mxu0 %vm22272_vm1, %v22301_v1 }
 0x34d   : > { %14058 = vmatmul.mubr.msk.bf16.gmra.mrb[72].mxu0 %vm1046_vm4, %v5051_v11  ;;  %v15546_v11 = vld [vmem:[%s16131_s24 + $0xa0] sm:$0xff]  }
 0x34e   : > { %14061 = vmatprep.mubr.msk.bf16.mxu0 %vm22272_vm1, %v22301_v1  ;;  %v5633_v12 = vrot.slane %v15546_v11, 3 }
 0x350   : > { %v5634_v13 = vsel %vm22276_vm8, %v5631_v8, %v5633_v12  ;;  %v6246_v8 = vshll.u32 %v15557_v5, 16 }
 0x352   : > { %v6248_v17 = vrot.slane %v6246_v8, 4 }
 0x355   : > { %14062 = vmatmul.mubr.msk.bf16.gmra.mrb[76].mxu0 %vm1046_vm4, %v5060_v15 }
 0x356   : > { %14065 = vmatprep.mubr.msk.bf16.mxu0 %vm22272_vm1, %v22301_v1 }
 0x35d   : > { %14066 = vmatmul.mubr.msk.bf16.gmra.mrb[96].mxu0 %vm1046_vm4, %v5059_v14  ;;  %v15547_v14 = vld [vmem:[%s16131_s24 + $0xa8] sm:$0xff]  }
 0x35e   : > { %14071 = vmatprep.mubr.msk.bf16.mxu0 %vm22272_vm1, %v22301_v1  ;;  %v5635_v15 = vrot.slane %v15547_v14, 3 }
 0x360   : > { %v5636_v16 = vsel %vm22276_vm8, %v5633_v12, %v5635_v15  ;;  %v5638_v19 = vsel %vm22276_vm8, %v5635_v15, %v5637_v18 }
 0x365   : > { %14072 = vmatmul.mubr.msk.bf16.vlgmr.msra.gmra.mrb[0].mxu0 %vm1046_vm4, %v5602_v21  ;;  %v5639_v21 = vrot.slane %v15549_v20, 3 }
 0x366   : > { %14156 = vmatpush3.bf16.msra.mxu0 %v6432_v23  ;;  %14075 = vmatprep.mubr.msk.bf16.mxu0 %vm22272_vm1, %v22301_v1  ;;  %v15550_v23 = vld [vmem:[%s16131_s24 + $0x18] sm:$0xf8]  }
 0x367   : > { %v5640_v22 = vsel %vm22276_vm8, %v5637_v18, %v5639_v21  ;;  %v6184_v26 = vshll.u32 %v15550_v23, 16  ;;  %v15558_v18 = vld [vmem:[%s16131_s24 + $0x58] sm:$0xff]  }
 0x369   : > { %v6186_v30 = vrot.slane %v6184_v26, 4  ;;  %v15559_v26 = vld [vmem:[%s16131_s24 + $0x60] sm:$0xff]  }
 0x36d   : > { %14076 = vmatmul.mubr.msk.bf16.gmra.mrb[4].mxu0 %vm1046_vm4, %v5604_v25  ;;  %v6181_v25 = vshrl.u32 %v15550_v23, 16 }
 0x36e   : > { %14079 = vmatprep.mubr.msk.bf16.mxu0 %vm22272_vm1, %v22301_v1 }
 0x36f   : > { %v6183_v29 = vrot.slane %v6181_v25, 3 }
 0x375   : > { %14080 = vmatmul.mubr.msk.bf16.gmra.mrb[8].mxu0 %vm1046_vm4, %v5606_v28  ;;  %v6192_v28 = vshll.u32 %v15551_v24, 16 }
 0x376   : > { %14083 = vmatprep.mubr.msk.bf16.mxu0 %vm22272_vm1, %v22301_v1 }
 0x377   : > { %v6194_v10 = vrot.slane %v6192_v28, 4  ;;  %v6261_v28 = vshrl.u32 %v15559_v26, 16 }
 0x37d   : > { %14084 = vmatmul.mubr.msk.bf16.gmra.mrb[12].mxu0 %vm1046_vm4, %v5608_v31  ;;  %v6191_v31 = vrot.slane %v6189_v27, 3 }
 0x37e   : > { %14087 = vmatprep.mubr.msk.bf16.mxu0 %vm22272_vm1, %v22301_v1 }
 0x37f   : > { %v6195_v34 = vor.u32 %v6194_v10, %v6191_v31  ;;  %v6263_v31 = vrot.slane %v6261_v28, 3 }
 0x385   : > { %14088 = vmatmul.mubr.msk.bf16.gmra.mrb[16].mxu0 %vm1046_vm4, %v5610_v33  ;;  %v6187_v33 = vor.u32 %v6186_v30, %v6183_v29  ;;  %v6264_v29 = vshll.u32 %v15559_v26, 16  ;;  %v15568_v26 = vld [vmem:[%s16131_s24 + $0xa8] sm:$0xff]  }
 0x386   : > { %14091 = vmatprep.mubr.msk.bf16.mxu0 %vm22272_vm1, %v22301_v1  ;;  %v6342_v28 = vshrl.u32 %v15568_v26, 16 }
 0x387   : > { %v6266_v10 = vrot.slane %v6264_v29, 4  ;;  %v6345_v29 = vshll.u32 %v15568_v26, 16 }
 0x388   : > { %v4595_v37 = vpop.f32.mrb[92].mxu0 }
 0x389   : > { %v4641_v38 = vadd.f32 %v4595_v37, %v3996_v36  ;;  %v13981_v39 = vpop.f32.mrb[93].mxu0  ;;  %v6201_v36 = vshll.u32 %v15552_v32, 16  ;;  %v6196_v37 = vsel %vm6179_vm9, %v6187_v33, %v6195_v34  ;;  %v15560_v32 = vld [vmem:[%s16131_s24 + $0x68] sm:$0xff]   ;;  %v6267_v33 = vor.u32 %v6266_v10, %v6263_v31 }
 0x38a   : > { %v4598_v40 = vpop.f32.mrb[94].mxu0  ;;  %v6344_v31 = vrot.slane %v6342_v28, 3  ;;  %v6347_v10 = vrot.slane %v6345_v29, 4 }
 0x38b   : > { %4682 = vst [vmem:[#allocation2 + $0x140] sm:$0xf] %v4641_v38  ;;  %v13982_v43 = vpop.f32.mrb[95].mxu0  ;;  %v6200_v38 = vrot.slane %v6198_v35, 3  ;;  %v6203_v39 = vrot.slane %v6201_v36, 4  ;;  %v15553_v40 = vld [vmem:[%s16131_s24 + $0x30] sm:$0xff]  }
 0x38c   : > { %v6207_v42 = vshrl.u32 %v15553_v40, 16  ;;  %v6210_v43 = vshll.u32 %v15553_v40, 16  ;;  %v6273_v35 = vshll.u32 %v15560_v32, 16 }
 0x38d   : > { %14092 = vmatmul.mubr.msk.bf16.gmra.mrb[20].mxu0 %vm1046_vm4, %v5612_v41  ;;  %v6204_v41 = vor.u32 %v6203_v39, %v6200_v38  ;;  %v15561_v39 = vld [vmem:[%s16131_s24 + $0x70] sm:$0xff]  }
 0x38e   : > { %14095 = vmatprep.mubr.msk.bf16.mxu0 %vm22272_vm1, %v22301_v1  ;;  %v6212_v46 = vrot.slane %v6210_v43, 4  ;;  %v6275_v38 = vrot.slane %v6273_v35, 4 }
 0x38f   : > { %v6205_v44 = vsel %vm6179_vm9, %v6195_v34, %v6204_v41  ;;  %v6270_v34 = vshrl.u32 %v15560_v32, 16  ;;  %v15569_v32 = vld [vmem:[%s16131_s24 + $0xb0] sm:$0xff]  }
 0x390   : > { %v6354_v35 = vshll.u32 %v15569_v32, 16 }
 0x395   : > { %14096 = vmatmul.mubr.msk.bf16.gmra.mrb[24].mxu0 %vm1046_vm4, %v5614_v45  ;;  %v6209_v45 = vrot.slane %v6207_v42, 3  ;;  %v6282_v42 = vshll.u32 %v15561_v39, 16 }
 0x396   : > { %14099 = vmatprep.mubr.msk.bf16.mxu0 %vm22272_vm1, %v22301_v1 }
 0x39d   : > { %14100 = vmatmul.mubr.msk.bf16.gmra.mrb[28].mxu0 %vm1046_vm4, %v5616_v48  ;;  %v6213_v48 = vor.u32 %v6212_v46, %v6209_v45  ;;  %v6284_v45 = vrot.slane %v6282_v42, 4  ;;  %v15562_v46 = vld [vmem:[%s16131_s24 + $0x78] sm:$0xff]  }
 0x39e   : > { %14103 = vmatprep.mubr.msk.bf16.mxu0 %vm22272_vm1, %v22301_v1  ;;  %v6291_v49 = vshll.u32 %v15562_v46, 16 }
 0x39f   : > { %v6223_v58 = vsel %vm6179_vm9, %v6213_v48, %v6222_v55 }
 0x3a0   : > { %v6293_v52 = vrot.slane %v6291_v49, 4 }
 0x3a5   : > { %14104 = vmatmul.mubr.msk.bf16.gmra.mrb[32].mxu0 %vm1046_vm4, %v5618_v51  ;;  %v6214_v51 = vsel %vm6179_vm9, %v6204_v41, %v6213_v48  ;;  %v6279_v41 = vshrl.u32 %v15561_v39, 16  ;;  %v6288_v48 = vshrl.u32 %v15562_v46, 16  ;;  %v15570_v39 = vld [vmem:[%s16131_s24 + $0xb8] sm:$0x3f]  }
 0x3a6   : > { %14107 = vmatprep.mubr.msk.bf16.mxu0 %vm22272_vm1, %v22301_v1  ;;  %v6363_v42 = vshll.u32 %v15570_v39, 16 }
 0x3ad   : > { %14108 = vmatmul.mubr.msk.bf16.gmra.mrb[36].mxu0 %vm1046_vm4, %v5620_v54  ;;  %v15555_v54 = vld [vmem:[%s16131_s24 + $0x40] sm:$0xff]  }
 0x3ae   : > { %14111 = vmatprep.mubr.msk.bf16.mxu0 %vm22272_vm1, %v22301_v1  ;;  %v6225_v56 = vshrl.u32 %v15555_v54, 16 }
 0x3b0   : > { %v6227_v59 = vrot.slane %v6225_v56, 3  ;;  %v6300_v56 = vshll.u32 %v15563_v53, 16 }
 0x3b5   : > { %14112 = vmatmul.mubr.msk.bf16.gmra.mrb[40].mxu0 %vm1046_vm4, %v5622_v57  ;;  %v6228_v57 = vshll.u32 %v15555_v54, 16 }
 0x3b6   : > { %14115 = vmatprep.mubr.msk.bf16.mxu0 %vm22272_vm1, %v22301_v1 }
 0x3bd   : > { %14116 = vmatmul.mubr.msk.bf16.gmra.mrb[44].mxu0 %vm1046_vm4, %v5624_v60  ;;  %v6230_v60 = vrot.slane %v6228_v57, 4 }
 0x3be   : > { %14119 = vmatprep.mubr.msk.bf16.mxu0 %vm22272_vm1, %v22301_v1 }
 0x3bf   : > { %v6231_v62 = vor.u32 %v6230_v60, %v6227_v59  ;;  %v6302_v59 = vrot.slane %v6300_v56, 4  ;;  %v15564_v60 = vld [vmem:[%s16131_s24 + $0x88] sm:$0xff]  }
 0x3c1   : > { %v6232_v2 = vsel %vm6179_vm9, %v6222_v55, %v6231_v62  ;;  %v6297_v55 = vshrl.u32 %v15563_v53, 16 }
 0x3c5   : > { %14120 = vmatmul.mubr.msk.bf16.gmra.mrb[48].mxu0 %vm1046_vm4, %v5626_v63  ;;  %v6234_v63 = vshrl.u32 %v15556_v61, 16 }
 0x3c6   : > { %14123 = vmatprep.mubr.msk.bf16.mxu0 %vm22272_vm1, %v22301_v1 }
 0x3cd   : > { %14124 = vmatmul.mubr.msk.bf16.gmra.mrb[52].mxu0 %vm1046_vm4, %v5628_v3  ;;  %v6236_v3 = vrot.slane %v6234_v63, 3  ;;  %v6309_v63 = vshll.u32 %v15564_v60, 16 }
 0x3ce   : > { %14127 = vmatprep.mubr.msk.bf16.mxu0 %vm22272_vm1, %v22301_v1 }
 0x3d5   : > { %14128 = vmatmul.mubr.msk.bf16.gmra.mrb[56].mxu0 %vm1046_vm4, %v5630_v6  ;;  %v6240_v6 = vor.u32 %v6239_v4, %v6236_v3  ;;  %v6311_v3 = vrot.slane %v6309_v63, 4  ;;  %v15565_v4 = vld [vmem:[%s16131_s24 + $0x90] sm:$0xff]  }
 0x3d6   : > { %14131 = vmatprep.mubr.msk.bf16.mxu0 %vm22272_vm1, %v22301_v1 }
 0x3d7   : > { %v6241_v15 = vsel %vm6179_vm9, %v6231_v62, %v6240_v6  ;;  %v6306_v62 = vshrl.u32 %v15564_v60, 16 }
 0x3dd   : > { %14132 = vmatmul.mubr.msk.bf16.gmra.mrb[60].mxu0 %vm1046_vm4, %v5632_v9  ;;  %v4723_v9 = vld [vmem:[#allocation2 + $0x140] sm:$0xf] }
 0x3de   : > { %14135 = vmatprep.mubr.msk.bf16.mxu0 %vm22272_vm1, %v22301_v1 }
 0x3e5   : > { %14136 = vmatmul.mubr.msk.bf16.gmra.mrb[64].mxu0 %vm1046_vm4, %v5634_v13 }
 0x3e6   : > { %14139 = vmatprep.mubr.msk.bf16.mxu0 %vm22272_vm1, %v22301_v1 }
 0x3ed   : > { %14140 = vmatmul.mubr.msk.bf16.gmra.mrb[68].mxu0 %vm1046_vm4, %v5636_v16  ;;  %v6245_v16 = vrot.slane %v6243_v7, 3  ;;  %v6318_v7 = vshll.u32 %v15565_v4, 16 }
 0x3ee   : > { %14143 = vmatprep.mubr.msk.bf16.mxu0 %vm22272_vm1, %v22301_v1 }
 0x3ef   : > { %v6249_v20 = vor.u32 %v6248_v17, %v6245_v16 }
 0x3f1   : > { %v6250_v23 = vsel %vm6179_vm9, %v6240_v6, %v6249_v20  ;;  %v6315_v6 = vshrl.u32 %v15565_v4, 16 }
 0x3f5   : > { %14144 = vmatmul.mubr.msk.bf16.gmra.mrb[72].mxu0 %vm1046_vm4, %v5638_v19 }
 0x3f6   : > { %14147 = vmatprep.mubr.msk.bf16.mxu0 %vm22272_vm1, %v22301_v1 }
 0x3fd   : > { %14148 = vmatmul.mubr.msk.bf16.gmra.mrb[76].mxu0 %vm1046_vm4, %v5640_v22  ;;  %v6255_v22 = vshll.u32 %v15558_v18, 16 }
 0x3fe   : > { %14151 = vmatprep.mubr.msk.bf16.mxu0 %vm22272_vm1, %v22301_v1 }
 0x3ff   : > { %v6257_v25 = vrot.slane %v6255_v22, 4 }
 0x405   : > { %14152 = vmatmul.mubr.msk.bf16.gmra.mrb[100].mxu0 %vm1046_vm4, %v5639_v21  ;;  %v6252_v21 = vshrl.u32 %v15558_v18, 16 }
 0x406   : > { %14157 = vmatprep.mubr.msk.bf16.mxu0 %vm22272_vm1, %v22301_v1 }
 0x407   : > { %v6254_v24 = vrot.slane %v6252_v21, 3 }
 0x409   : > { %v6258_v27 = vor.u32 %v6257_v25, %v6254_v24 }
 0x40b   : > { %v6259_v30 = vsel %vm6179_vm9, %v6249_v20, %v6258_v27  ;;  %v6268_v36 = vsel %vm6179_vm9, %v6258_v27, %v6267_v33 }
 0x40d   : > { %14158 = vmatmul.mubr.msk.bf16.vlgmr.msra.gmra.mrb[0].mxu0 %vm1046_vm4, %v6196_v37  ;;  %v6272_v37 = vrot.slane %v6270_v34, 3  ;;  %v6351_v34 = vshrl.u32 %v15569_v32, 16 }
 0x40e   : > { %14161 = vmatprep.mubr.msk.bf16.mxu0 %vm22272_vm1, %v22301_v1 }
 0x40f   : > { %v6276_v40 = vor.u32 %v6275_v38, %v6272_v37  ;;  %v6353_v37 = vrot.slane %v6351_v34, 3  ;;  %v6356_v38 = vrot.slane %v6354_v35, 4 }
 0x411   : > { %v6277_v43 = vsel %vm6179_vm9, %v6267_v33, %v6276_v40  ;;  %v6348_v33 = vor.u32 %v6347_v10, %v6344_v31  ;;  %v14357_v31 = vld [vmem:[#allocation2 + $0x28] sm:$0xff] }
 0x415   : > { %14162 = vmatmul.mubr.msk.bf16.gmra.mrb[4].mxu0 %vm1046_vm4, %v6205_v44  ;;  %v6281_v44 = vrot.slane %v6279_v41, 3  ;;  %v6360_v41 = vshrl.u32 %v15570_v39, 16 }
 0x416   : > { %14165 = vmatprep.mubr.msk.bf16.mxu0 %vm22272_vm1, %v22301_v1 }
 0x417   : > { %v6285_v47 = vor.u32 %v6284_v45, %v6281_v44  ;;  %v6362_v44 = vrot.slane %v6360_v41, 3  ;;  %v6365_v45 = vrot.slane %v6363_v42, 4 }
 0x419   : > { %v6286_v50 = vsel %vm6179_vm9, %v6276_v40, %v6285_v47  ;;  %v6357_v40 = vor.u32 %v6356_v38, %v6353_v37  ;;  %v6366_v46 = vor.u32 %v6365_v45, %v6362_v44 }
 0x41d   : > { %14166 = vmatmul.mubr.msk.bf16.gmra.mrb[8].mxu0 %vm1046_vm4, %v6214_v51  ;;  %v6290_v51 = vrot.slane %v6288_v48, 3 }
 0x41e   : > { %14169 = vmatprep.mubr.msk.bf16.mxu0 %vm22272_vm1, %v22301_v1 }
 0x41f   : > { %v6294_v54 = vor.u32 %v6293_v52, %v6290_v51 }
 0x421   : > { %v6295_v57 = vsel %vm6179_vm9, %v6285_v47, %v6294_v54  ;;  %v6367_v47 = vsel %vm6179_vm9, %v6357_v40, %v6366_v46 }
 0x425   : > { %14170 = vmatmul.mubr.msk.bf16.gmra.mrb[12].mxu0 %vm1046_vm4, %v6223_v58  ;;  %v6299_v58 = vrot.slane %v6297_v55, 3 }
 0x426   : > { %14173 = vmatprep.mubr.msk.bf16.mxu0 %vm22272_vm1, %v22301_v1 }
 0x427   : > { %v6303_v61 = vor.u32 %v6302_v59, %v6299_v58 }
 0x429   : > { %v6304_v0 = vsel %vm6179_vm9, %v6294_v54, %v6303_v61  ;;  %v199_v54 = vlaneseq }
 0x42b   : > { %v17102_v55 = vshrl.u32 %v199_v54, 7 }
 0x42d   : > { %14174 = vmatmul.mubr.msk.bf16.gmra.mrb[16].mxu0 %vm1046_vm4, %v6232_v2  ;;  %v6308_v2 = vrot.slane %v6306_v62, 3  ;;  %v206_v37 = vadd.s32 48, %v17102_v55  ;;  %v207_v39 = vadd.s32 56, %v17102_v55 }
 0x42e   : > { %14177 = vmatprep.mubr.msk.bf16.mxu0 %vm22272_vm1, %v22301_v1 }
 0x42f   : > { %v6312_v5 = vor.u32 %v6311_v3, %v6308_v2  ;;  %v17112_v2 = vcvt.s32.f32 %v17102_v55  ;;  %v202_v3 = vadd.s32 16, %v17102_v55 }
 0x430   : > { %v5321_v11 = vpop.f32.mrb[96].mxu0 }
 0x431   : > { %v5367_v12 = vadd.f32 %v5321_v11, %v4723_v9  ;;  %v14067_v13 = vpop.f32.mrb[97].mxu0  ;;  %v6313_v8 = vsel %vm6179_vm9, %v6303_v61, %v6312_v5  ;;  %v6317_v9 = vrot.slane %v6315_v6, 3  ;;  %v6320_v11 = vrot.slane %v6318_v7, 4  ;;  %v14345_v61 = vld [vmem:[#allocation2 + $0x8] sm:$0xff]  ;;  %v14348_v6 = vld [vmem:[#allocation2 + $0x10] sm:$0xff] }
 0x432   : > { %v5324_v14 = vpop.f32.mrb[98].mxu0  ;;  %vm446_vm10 = vcmp.ge.f32.partialorder %v17112_v2, 18.0  ;;  %vm487_vm11 = vcmp.lt.f32.partialorder %v17112_v2, 306.0 }
 0x433   : > { %5408 = vst [vmem:[#allocation2 + $0x140] sm:$0xf] %v5367_v12  ;;  %v14068_v19 = vpop.f32.mrb[99].mxu0  ;;  %v15566_v12 = vld [vmem:[%s16131_s24 + $0x98] sm:$0xff]   ;;  %v6321_v13 = vor.u32 %v6320_v11, %v6317_v9  ;;  %v282_v9 = vmul.f32 0.055555556, %v17112_v2  ;;  %vm17166_vm15 = vmand %vm446_vm10, %vm487_vm11 }
 0x434   : > { %v6324_v14 = vshrl.u32 %v15566_v12, 16  ;;  %v15567_v19 = vld [vmem:[%s16131_s24 + $0xa0] sm:$0xff]  }
 0x435   : > { %14178 = vmatmul.mubr.msk.bf16.gmra.mrb[20].mxu0 %vm1046_vm4, %v6241_v15  ;;  %v6327_v15 = vshll.u32 %v15566_v12, 16  ;;  %v6322_v16 = vsel %vm6179_vm9, %v6312_v5, %v6321_v13  ;;  %v6333_v21 = vshrl.u32 %v15567_v19, 16  ;;  %v6336_v22 = vshll.u32 %v15567_v19, 16  ;;  %v14351_v12 = vld [vmem:[#allocation2 + $0x18] sm:$0xff] }
 0x436   : > { %14181 = vmatprep.mubr.msk.bf16.mxu0 %vm22272_vm1, %v22301_v1  ;;  %v6326_v17 = vrot.slane %v6324_v14, 3  ;;  %v203_v14 = vadd.s32 24, %v17102_v55  ;;  %v323_v19 = vfloor.f32 %v282_v9 }
 0x437   : > { %v6329_v18 = vrot.slane %v6327_v15, 4  ;;  %v6335_v24 = vrot.slane %v6333_v21, 3  ;;  %v6338_v25 = vrot.slane %v6336_v22, 4 }
 0x438   : > { %v17130_v21 = vcvt.s32.f32 %v203_v14  ;;  %v364_v29 = vmul.f32 18.0, %v323_v19  ;;  %v211_v19 = vadd.s32 88, %v17102_v55 }
 0x439   : > { %v6330_v20 = vor.u32 %v6329_v18, %v6326_v17  ;;  %v6339_v27 = vor.u32 %v6338_v25, %v6335_v24  ;;  %v204_v18 = vadd.s32 32, %v17102_v55  ;;  %v14354_v24 = vld [vmem:[#allocation2 + $0x20] sm:$0xff]  ;;  %v205_v25 = vadd.s32 40, %v17102_v55 }
 0x43a   : > { %v5449_v48 = vld [vmem:[#allocation2 + $0x140] sm:$0xf]  ;;  %v285_v32 = vmul.f32 0.055555556, %v17130_v21 }
 0x43b   : > { %v17133_v26 = vcvt.s32.f32 %v204_v18 }
 0x43c   : > { %v326_v42 = vfloor.f32 %v285_v32  ;;  %v22665_v32 = vmov 0 }
 0x43d   : > { %14182 = vmatmul.mubr.msk.bf16.gmra.mrb[24].mxu0 %vm1046_vm4, %v6250_v23  ;;  %v6331_v23 = vsel %vm6179_vm9, %v6321_v13, %v6330_v20  ;;  %v17120_v13 = vcvt.s32.f32 %v202_v3  ;;  %v286_v38 = vmul.f32 0.055555556, %v17133_v26  ;;  %vm491_vm8 = vcmp.lt.f32.partialorder %v17133_v26, 306.0 }
 0x43e   : > { %14185 = vmatprep.mubr.msk.bf16.mxu0 %vm22272_vm1, %v22301_v1 }
 0x43f   : > { %vm448_vm10 = vcmp.ge.f32.partialorder %v17120_v13, 18.0  ;;  %vm489_vm11 = vcmp.lt.f32.partialorder %v17120_v13, 306.0 }
 0x445   : > { %14186 = vmatmul.mubr.msk.bf16.gmra.mrb[28].mxu0 %vm1046_vm4, %v6259_v30  ;;  %v6340_v30 = vsel %vm6179_vm9, %v6330_v20, %v6339_v27  ;;  %v284_v20 = vmul.f32 0.055555556, %v17120_v13 }
 0x446   : > { %14189 = vmatprep.mubr.msk.bf16.mxu0 %vm22272_vm1, %v22301_v1 }
 0x447   : > { %v325_v10 = vfloor.f32 %v284_v20 }
 0x449   : > { %v366_v41 = vmul.f32 18.0, %v325_v10  ;;  %v22662_v10 = vmov 0 }
 0x44d   : > { %14190 = vmatmul.mubr.msk.bf16.gmra.mrb[32].mxu0 %vm1046_vm4, %v6268_v36  ;;  %v6349_v36 = vsel %vm6179_vm9, %v6339_v27, %v6348_v33 }
 0x44e   : > { %14193 = vmatprep.mubr.msk.bf16.mxu0 %vm22272_vm1, %v22301_v1 }
 0x455   : > { %14194 = vmatmul.mubr.msk.bf16.gmra.mrb[36].mxu0 %vm1046_vm4, %v6277_v43  ;;  %v6358_v43 = vsel %vm6179_vm9, %v6348_v33, %v6357_v40  ;;  %v405_v40 = vsub.f32 %v17112_v2, %v364_v29 }
 0x456   : > { %14197 = vmatprep.mubr.msk.bf16.mxu0 %vm22272_vm1, %v22301_v1 }
 0x457   : > { %vm569_vm14 = vcmp.ge.f32.partialorder %v405_v40, 1.0 }
 0x45d   : > { %14198 = vmatmul.mubr.msk.bf16.gmra.mrb[40].mxu0 %vm1046_vm4, %v6286_v50 }
 0x45e   : > { %14201 = vmatprep.mubr.msk.bf16.mxu0 %vm22272_vm1, %v22301_v1 }
 0x465   : > { %14202 = vmatmul.mubr.msk.bf16.gmra.mrb[44].mxu0 %vm1046_vm4, %v6295_v57  ;;  %v14342_v57 = vld [vmem:[#allocation2] sm:$0xff] }
 0x466   : > { %14205 = vmatprep.mubr.msk.bf16.mxu0 %vm22272_vm1, %v22301_v1 }
 0x46d   : > { %14206 = vmatmul.mubr.msk.bf16.gmra.mrb[48].mxu0 %vm1046_vm4, %v6304_v0  ;;  %v201_v0 = vadd.s32 8, %v17102_v55 }
 0x46e   : > { %14209 = vmatprep.mubr.msk.bf16.mxu0 %vm22272_vm1, %v22301_v1 }
 0x46f   : > { %v17115_v4 = vcvt.s32.f32 %v201_v0 }
 0x471   : > { %v283_v17 = vmul.f32 0.055555556, %v17115_v4  ;;  %vm447_vm12 = vcmp.ge.f32.partialorder %v17115_v4, 18.0  ;;  %vm488_vm13 = vcmp.lt.f32.partialorder %v17115_v4, 306.0 }
 0x473   : > { %v324_v22 = vfloor.f32 %v283_v17 }
 0x475   : > { %14210 = vmatmul.mubr.msk.bf16.gmra.mrb[52].mxu0 %vm1046_vm4, %v6313_v8  ;;  %v365_v35 = vmul.f32 18.0, %v324_v22 }
 0x476   : > { %14213 = vmatprep.mubr.msk.bf16.mxu0 %vm22272_vm1, %v22301_v1 }
 0x477   : > { %v406_v44 = vsub.f32 %v17115_v4, %v365_v35 }
 0x479   : > { %vm570_vm9 = vcmp.ge.f32.partialorder %v406_v44, 1.0 }
 0x47d   : > { %14214 = vmatmul.mubr.msk.bf16.gmra.mrb[56].mxu0 %vm1046_vm4, %v6322_v16 }
 0x47e   : > { %14217 = vmatprep.mubr.msk.bf16.mxu0 %vm22272_vm1, %v22301_v1 }
 0x485   : > { %14218 = vmatmul.mubr.msk.bf16.gmra.mrb[60].mxu0 %vm1046_vm4, %v6331_v23 }
 0x486   : > { %14221 = vmatprep.mubr.msk.bf16.mxu0 %vm22272_vm1, %v22301_v1 }
 0x48d   : > { %14222 = vmatmul.mubr.msk.bf16.gmra.mrb[64].mxu0 %vm1046_vm4, %v6340_v30 }
 0x48e   : > { %14225 = vmatprep.mubr.msk.bf16.mxu0 %vm22272_vm1, %v22301_v1 }
 0x495   : > { %14226 = vmatmul.mubr.msk.bf16.gmra.mrb[68].mxu0 %vm1046_vm4, %v6349_v36  ;;  %v17141_v36 = vcvt.s32.f32 %v205_v25 }
 0x496   : > { %14229 = vmatprep.mubr.msk.bf16.mxu0 %vm22272_vm1, %v22301_v1 }
 0x497   : > { %v287_v45 = vmul.f32 0.055555556, %v17141_v36  ;;  %vm451_vm6 = vcmp.ge.f32.partialorder %v17141_v36, 18.0 }
 0x49d   : > { %14230 = vmatmul.mubr.msk.bf16.gmra.mrb[72].mxu0 %vm1046_vm4, %v6358_v43  ;;  %v208_v43 = vadd.s32 64, %v17102_v55 }
 0x49e   : > { %14233 = vmatprep.mubr.msk.bf16.mxu0 %vm22272_vm1, %v22301_v1 }
 0x49f   : > { %v17176_v3 = vcvt.s32.f32 %v208_v43 }
 0x4a1   : > { %v290_v18 = vmul.f32 0.055555556, %v17176_v3 }
 0x4a5   : > { %14234 = vmatmul.mubr.msk.bf16.gmra.mrb[76].mxu0 %vm1046_vm4, %v6367_v47 }
 0x4a6   : > { %14237 = vmatprep.mubr.msk.bf16.mxu0 %vm22272_vm1, %v22301_v1  ;;  %vm652_vm1 = vcmp.le.f32.partialorder %v406_v44, 16.0 }
 0x4ad   : > { %14238 = vmatmul.mubr.msk.bf16.gmra.mrb[104].mxu0 %vm1046_vm4, %v6366_v46  ;;  %v17154_v46 = vcvt.s32.f32 %v206_v37  ;;  %vm17182_vm4 = vmand %vm447_vm12, %vm488_vm13  ;;  %vm651_vm13 = vcmp.le.f32.partialorder %v405_v40, 16.0  ;;  %v212_v37 = vadd.s32 96, %v17102_v55 }
 0x4ae   : > { %vm17195_vm12 = vmand %vm17166_vm15, %vm569_vm14  ;;  %vm449_vm15 = vcmp.ge.f32.partialorder %v17130_v21, 18.0 }
 0x4af   : > { %vm17206_vm7 = vmand %vm17182_vm4, %vm570_vm9  ;;  %vm490_vm4 = vcmp.lt.f32.partialorder %v17130_v21, 306.0 }
 0x4b0   : > { %vm17218_vm14 = vmand %vm448_vm10, %vm489_vm11  ;;  %vm450_vm11 = vcmp.ge.f32.partialorder %v17133_v26, 18.0 }
 0x4b1   : > { %vm17232_vm9 = vmand %vm17195_vm12, %vm651_vm13 }
 0x4b2   : > { %v22663_v10 = vsel %vm17232_vm9, 4294967295, %v22662_v10  ;;  %vm17239_vm10 = vmand %vm17206_vm7, %vm652_vm1 }
 0x4b3   : > { %22664 = vst [vmem:[#allocation4_spill] sm:$0xff] %v22663_v10  ;;  %v22666_v32 = vsel %vm17239_vm10, 4294967295, %v22665_v32  ;;  %vm17265_vm7 = vmand %vm449_vm15, %vm490_vm4  ;;  %v237_v10 = vadd.s32 296, %v17102_v55 }
 0x4b4   : > { %22667 = vst [vmem:[#allocation5_spill] sm:$0xff] %v22666_v32  ;;  %v14429_v32 = vld [vmem:[#allocation2 + $0xe8] sm:$0xff] }
 0x4d8   : > { %v5901_v49 = vpop.f32.mrb[100].mxu0 }
 0x4d9   : > { %v5947_v50 = vadd.f32 %v5901_v49, %v5449_v48  ;;  %v14153_v51 = vpop.f32.mrb[101].mxu0  ;;  %v14360_v48 = vld [vmem:[#allocation2 + $0x30] sm:$0xff]  ;;  %v327_v49 = vfloor.f32 %v286_v38  ;;  %v22697_v38 = vmov 0 }
 0x4da   : > { %v5904_v52 = vpop.f32.mrb[102].mxu0 }
 0x4db   : > { %5988 = vst [vmem:[#allocation2 + $0x140] sm:$0xf] %v5947_v50  ;;  %v14154_v53 = vpop.f32.mrb[103].mxu0  ;;  %v17159_v52 = vcvt.s32.f32 %v207_v39  ;;  %v368_v9 = vmul.f32 18.0, %v327_v49  ;;  %v331_v39 = vfloor.f32 %v290_v18  ;;  %v213_v49 = vadd.s32 104, %v17102_v55 }
 0x4dd   : > { %v17332_v18 = vcvt.s32.f32 %v213_v49 }
 0x4e0   : > { %v6468_v56 = vpop.f32.mrb[0].mxu0 }
 0x4e1   : > { %v17104_v58 = vadd.f32 %v14342_v57, %v6468_v56  ;;  %v14159_v59 = vpop.f32.mrb[1].mxu0  ;;  %v14363_v56 = vld [vmem:[#allocation2 + $0x38] sm:$0xff]  ;;  %v209_v57 = vadd.s32 72, %v17102_v55 }
 0x4e2   : > { %v6471_v60 = vpop.f32.mrb[2].mxu0 }
 0x4e3   : > { %6675 = vst [vmem:[#allocation2] sm:$0xff] %v17104_v58  ;;  %v17107_v62 = vadd.f32 %v14345_v61, %v6471_v60  ;;  %v14160_v63 = vpop.f32.mrb[3].mxu0  ;;  %v17171_v60 = vsub.f32 %v17120_v13, %v366_v41  ;;  %v367_v61 = vmul.f32 18.0, %v326_v42  ;;  %v17202_v14 = vcvt.s32.f32 %v209_v57 }
 0x4e4   : > { %v17259_v42 = vcvt.s32.f32 %v211_v19  ;;  %v372_v57 = vmul.f32 18.0, %v331_v39 }
 0x4e5   : > { %6676 = vst [vmem:[#allocation2 + $0x8] sm:$0xff] %v17107_v62  ;;  %vm571_vm3 = vcmp.ge.f32.partialorder %v17171_v60, 1.0  ;;  %v17212_v17 = vsub.f32 %v17130_v21, %v367_v61  ;;  %vm653_vm1 = vcmp.le.f32.partialorder %v17171_v60, 16.0  ;;  %v216_v21 = vadd.s32 128, %v17102_v55 }
 0x4e6   : > { %vm17251_vm12 = vmand %vm17218_vm14, %vm571_vm3  ;;  %v293_v59 = vmul.f32 0.055555556, %v17259_v42 }
 0x4e7   : > { %vm572_vm3 = vcmp.ge.f32.partialorder %v17212_v17, 1.0  ;;  %vm17279_vm14 = vmand %vm450_vm11, %vm491_vm8  ;;  %vm492_vm8 = vcmp.lt.f32.partialorder %v17141_v36, 306.0 }
 0x4e8   : > { %v6476_v5 = vpop.f32.mrb[4].mxu0  ;;  %vm17289_vm4 = vmand %vm17251_vm12, %vm653_vm1  ;;  %vm654_vm12 = vcmp.le.f32.partialorder %v17212_v17, 16.0  ;;  %v22686_v17 = vmov 0 }
 0x4e9   : > { %v17117_v7 = vadd.f32 %v14348_v6, %v6476_v5  ;;  %v14163_v8 = vpop.f32.mrb[5].mxu0  ;;  %v328_v5 = vfloor.f32 %v287_v45  ;;  %v288_v6 = vmul.f32 0.055555556, %v17154_v46  ;;  %vm17301_vm11 = vmand %vm17265_vm7, %vm572_vm3  ;;  %vm452_vm3 = vcmp.ge.f32.partialorder %v17154_v46, 18.0 }
 0x4ea   : > { %v6479_v11 = vpop.f32.mrb[6].mxu0  ;;  %v210_v8 = vadd.s32 80, %v17102_v55  ;;  %vm17322_vm7 = vmand %vm451_vm6, %vm492_vm8  ;;  %vm493_vm6 = vcmp.lt.f32.partialorder %v17154_v46, 306.0 }
 0x4eb   : > { %6677 = vst [vmem:[#allocation2 + $0x10] sm:$0xff] %v17117_v7  ;;  %v17124_v15 = vadd.f32 %v14351_v12, %v6479_v11  ;;  %v14164_v16 = vpop.f32.mrb[7].mxu0  ;;  %v289_v11 = vmul.f32 0.055555556, %v17159_v52  ;;  %v17200_v12 = vand.u32 127, %v199_v54  ;;  %v369_v20 = vmul.f32 18.0, %v328_v5 }
 0x4ec   : > { %v329_v22 = vfloor.f32 %v288_v6  ;;  %v17223_v25 = vcvt.s32.f32 %v210_v8  ;;  %v14372_v5 = vld [vmem:[#allocation2 + $0x50] sm:$0xff]  ;;  %v214_v6 = vadd.s32 112, %v17102_v55  ;;  %v14375_v16 = vld [vmem:[#allocation2 + $0x58] sm:$0xff] }
 0x4ed   : > { %6678 = vst [vmem:[#allocation2 + $0x18] sm:$0xff] %v17124_v15  ;;  %v330_v29 = vfloor.f32 %v289_v11  ;;  %v17271_v44 = vsub.f32 %v17141_v36, %v369_v20  ;;  %vm22281_vm13 = vcmp.lt.s32.totalorder %v17200_v12, 8  ;;  %v22683_v36 = vmov 0 }
 0x4ee   : > { %v370_v45 = vmul.f32 18.0, %v329_v22  ;;  %vm17349_vm8 = vmand %vm17239_vm10, %vm22281_vm13  ;;  %v22689_v22 = vmov 0 }
 0x4ef   : > { %vm574_vm2 = vcmp.ge.f32.partialorder %v17271_v44, 1.0  ;;  %v22687_v17 = vsel %vm17349_vm8, 4294967295, %v22686_v17 }
 0x4f0   : > { %v6484_v23 = vpop.f32.mrb[8].mxu0  ;;  %v17315_v61 = vsub.f32 %v17154_v46, %v370_v45  ;;  %22688 = vst [vmem:[#allocation8_spill] sm:$0xff] %v22687_v17  ;;  %vm17371_vm0 = vmand %vm17322_vm7, %vm574_vm2 }
 0x4f1   : > { %v17135_v27 = vadd.f32 %v14354_v24, %v6484_v23  ;;  %v14167_v28 = vpop.f32.mrb[9].mxu0  ;;  %v14366_v24 = vld [vmem:[#allocation2 + $0x40] sm:$0xff]  ;;  %vm17391_vm2 = vmand %vm17289_vm4, %vm22281_vm13 }
 0x4f2   : > { %v6487_v30 = vpop.f32.mrb[10].mxu0  ;;  %v409_v28 = vsub.f32 %v17133_v26, %v368_v9  ;;  %v22698_v38 = vsel %vm17391_vm2, 4294967295, %v22697_v38  ;;  %vm17399_vm7 = vmand %vm452_vm3, %vm493_vm6 }
 0x4f3   : > { %6679 = vst [vmem:[#allocation2 + $0x20] sm:$0xff] %v17135_v27  ;;  %v17139_v33 = vadd.f32 %v14357_v31, %v6487_v30  ;;  %v14168_v34 = vpop.f32.mrb[11].mxu0  ;;  %v14369_v31 = vld [vmem:[#allocation2 + $0x48] sm:$0xff]  ;;  %22699 = vst [vmem:[#allocation11_spill] sm:$0xff] %v22698_v38 }
 0x4f4   : > { %v291_v34 = vmul.f32 0.055555556, %v17202_v14  ;;  %vm573_vm15 = vcmp.ge.f32.partialorder %v409_v28, 1.0  ;;  %vm655_vm1 = vcmp.le.f32.partialorder %v409_v28, 16.0  ;;  %v17501_v28 = vcvt.s32.f32 %v216_v21 }
 0x4f5   : > { %6680 = vst [vmem:[#allocation2 + $0x28] sm:$0xff] %v17139_v33  ;;  %vm17309_vm5 = vmand %vm17279_vm14, %vm573_vm15  ;;  %vm22706_vm15 = vcmp.le.f32.partialorder %v17271_v44, 16.0  ;;  %v218_v21 = vadd.s32 144, %v17102_v55 }
 0x4f6   : > { %v332_v26 = vfloor.f32 %v291_v34  ;;  %vm17338_vm14 = vmand %vm17301_vm11, %vm654_vm12  ;;  %v17376_v34 = vcvt.s32.f32 %v214_v6 }
 0x4f7   : > { %v22684_v36 = vsel %vm17338_vm14, 4294967295, %v22683_v36  ;;  %vm17356_vm11 = vmand %vm17309_vm5, %vm655_vm1  ;;  %vm575_vm5 = vcmp.ge.f32.partialorder %v17315_v61, 1.0  ;;  %v17610_v39 = vcvt.s32.f32 %v218_v21 }
 0x4f8   : > { %v6492_v47 = vpop.f32.mrb[12].mxu0  ;;  %22685 = vst [vmem:[#allocation7_spill] sm:$0xff] %v22684_v36  ;;  %v373_v19 = vmul.f32 18.0, %v332_v26  ;;  %v22690_v22 = vsel %vm17356_vm11, 4294967295, %v22689_v22  ;;  %vm17383_vm1 = vmand %vm17232_vm9, %vm22281_vm13  ;;  %vm22702_vm13 = vcmp.lt.f32.partialorder %v17159_v52, 306.0  ;;  %v14378_v26 = vld [vmem:[#allocation2 + $0x60] sm:$0xff] }
 0x4f9   : > { %v17157_v50 = vadd.f32 %v14360_v48, %v6492_v47  ;;  %v14171_v51 = vpop.f32.mrb[13].mxu0  ;;  %v292_v47 = vmul.f32 0.055555556, %v17223_v25  ;;  %v371_v48 = vmul.f32 18.0, %v330_v29  ;;  %22691 = vst [vmem:[#allocation9_spill] sm:$0xff] %v22690_v22  ;;  %vm17425_vm12 = vmand %vm17371_vm0, %vm22706_vm15  ;;  %vm22712_vm15 = vcmp.lt.s32.totalorder %v17200_v12, 8 }
 0x4fa   : > { %v6495_v53 = vpop.f32.mrb[14].mxu0  ;;  %v22674_v51 = vmov 0  ;;  %v17419_v43 = vsub.f32 %v17202_v14, %v373_v19  ;;  %vm17436_vm3 = vmand %vm17399_vm7, %vm575_vm5  ;;  %v217_v19 = vadd.s32 136, %v17102_v55  ;;  %vm22722_vm0 = vcmp.lt.s32.totalorder %v17200_v12, 8 }
 0x4fb   : > { %6681 = vst [vmem:[#allocation2 + $0x30] sm:$0xff] %v17157_v50  ;;  %v17174_v63 = vadd.f32 %v14363_v56, %v6495_v53  ;;  %v14172_v0 = vpop.f32.mrb[15].mxu0  ;;  %v22675_v51 = vsel %vm17289_vm4, 4294967295, %v22674_v51  ;;  %v17295_v53 = vcvt.s32.f32 %v212_v37  ;;  %v17328_v9 = vsub.f32 %v17159_v52, %v371_v48  ;;  %vm17482_vm6 = vmand %vm17356_vm11, %vm22722_vm0 }
 0x4fc   : > { %22676 = vst [vmem:[#allocation6_spill] sm:$0xff] %v22675_v51  ;;  %v333_v0 = vfloor.f32 %v292_v47  ;;  %v22694_v37 = vmov 0  ;;  %vm22703_vm4 = vcmp.ge.f32.partialorder %v17159_v52, 18.0  ;;  %v22707_v47 = vmov 0 }
 0x4fd   : > { %6682 = vst [vmem:[#allocation2 + $0x38] sm:$0xff] %v17174_v63  ;;  %v294_v20 = vmul.f32 0.055555556, %v17295_v53  ;;  %v22695_v37 = vsel %vm17383_vm1, 4294967295, %v22694_v37  ;;  %vm17412_vm10 = vmand %vm22703_vm4, %vm22702_vm13  ;;  %v22708_v47 = vsel %vm17425_vm12, 4294967295, %v22707_v47  ;;  %vm495_vm13 = vcmp.lt.f32.partialorder %v17176_v3, 306.0 }
 0x4fe   : > { %22696 = vst [vmem:[#allocation10_spill] sm:$0xff] %v22695_v37  ;;  %22709 = vst [vmem:[#allocation12_spill] sm:$0xff] %v22708_v47  ;;  %v296_v56 = vmul.f32 0.055555556, %v17376_v34  ;;  %vm22716_vm5 = vcmp.ge.f32.partialorder %v17328_v9, 1.0  ;;  %vm22730_vm0 = vcmp.le.f32.partialorder %v17328_v9, 16.0 }
 0x4ff   : > { %v335_v45 = vfloor.f32 %v294_v20  ;;  %vm17451_vm4 = vmand %vm17338_vm14, %vm22712_vm15  ;;  %vm22719_vm15 = vcmp.ge.f32.partialorder %v17176_v3, 18.0  ;;  %v298_v48 = vmul.f32 0.055555556, %v17501_v28  ;;  %vm22756_vm9 = vcmp.ge.f32.partialorder %v17419_v43, 1.0 }
 0x500   : > { %v6500_v23 = vpop.f32.mrb[16].mxu0  ;;  %vm17459_vm7 = vmand %vm17412_vm10, %vm22716_vm5  ;;  %vm22737_vm10 = vcmp.lt.f32.partialorder %v17202_v14, 306.0  ;;  %v6888_v21 = vsel %vm17451_vm4, %v17124_v15, 0.0  ;;  %v22771_v15 = vmov 0  ;;  %v22926_v47 = vmov 0 }
 0x501   : > { %v17227_v30 = vadd.f32 %v14366_v24, %v6500_v23  ;;  %v14175_v13 = vpop.f32.mrb[17].mxu0  ;;  %v17362_v23 = vsub.f32 %v17176_v3, %v372_v57  ;;  %v334_v24 = vfloor.f32 %v293_v59  ;;  %v22713_v59 = vmov 0  ;;  %vm17471_vm14 = vmand %vm22719_vm15, %vm495_vm13 }
 0x502   : > { %v6503_v35 = vpop.f32.mrb[18].mxu0  ;;  %v22714_v59 = vsel %vm17451_vm4, 4294967295, %v22713_v59  ;;  %v376_v8 = vmul.f32 18.0, %v335_v45  ;;  %vm22726_vm13 = vcmp.le.f32.partialorder %v17315_v61, 16.0  ;;  %v22727_v3 = vmov 0 }
 0x503   : > { %6683 = vst [vmem:[#allocation2 + $0x40] sm:$0xff] %v17227_v30  ;;  %v17257_v40 = vadd.f32 %v14369_v31, %v6503_v35  ;;  %v14176_v41 = vpop.f32.mrb[19].mxu0  ;;  %v374_v31 = vmul.f32 18.0, %v333_v0  ;;  %v215_v35 = vadd.s32 120, %v17102_v55  ;;  %v375_v52 = vmul.f32 18.0, %v334_v24  ;;  %22715 = vst [vmem:[#allocation13_spill] sm:$0xff] %v22714_v59 }
 0x504   : > { %v295_v41 = vmul.f32 0.055555556, %v17332_v18  ;;  %vm17490_vm15 = vmand %vm17436_vm3, %vm22726_vm13  ;;  %v22731_v61 = vmov 0  ;;  %vm497_vm13 = vcmp.lt.f32.partialorder %v17223_v25, 306.0  ;;  %vm22734_vm5 = vcmp.ge.f32.partialorder %v17362_v23, 1.0 }
 0x505   : > { %6684 = vst [vmem:[#allocation2 + $0x48] sm:$0xff] %v17257_v40  ;;  %v17442_v44 = vsub.f32 %v17223_v25, %v374_v31  ;;  %v17445_v57 = vcvt.s32.f32 %v215_v35  ;;  %v22728_v3 = vsel %vm17490_vm15, 4294967295, %v22727_v3  ;;  %v17496_v20 = vsub.f32 %v17259_v42, %v375_v52  ;;  %vm17507_vm3 = vmand %vm17459_vm7, %vm22730_vm0 }
 0x506   : > { %22729 = vst [vmem:[#allocation15_spill] sm:$0xff] %v22728_v3  ;;  %v22732_v61 = vsel %vm17507_vm3, 4294967295, %v22731_v61  ;;  %v337_v31 = vfloor.f32 %v296_v56  ;;  %vm17518_vm11 = vmand %vm17471_vm14, %vm22734_vm5  ;;  %vm22738_vm14 = vcmp.ge.f32.partialorder %v17202_v14, 18.0  ;;  %v17538_v45 = vsub.f32 %v17295_v53, %v376_v8 }
 0x507   : > { %22733 = vst [vmem:[#allocation16_spill] sm:$0xff] %v22732_v61  ;;  %v297_v35 = vmul.f32 0.055555556, %v17445_v57  ;;  %vm17533_vm5 = vmand %vm22738_vm14, %vm22737_vm10  ;;  %v17540_v52 = vcvt.s32.f32 %v217_v19  ;;  %vm22741_vm7 = vcmp.lt.s32.totalorder %v17200_v12, 8  ;;  %vm22745_vm10 = vcmp.ge.f32.partialorder %v17223_v25, 18.0 }
 0x508   : > { %v6508_v2 = vpop.f32.mrb[20].mxu0  ;;  %vm17547_vm0 = vmand %vm17425_vm12, %vm22741_vm7  ;;  %v6887_v25 = vsel %vm17391_vm2, %v17117_v7, 0.0  ;;  %v22749_v56 = vmov 0  ;;  %v378_v60 = vmul.f32 18.0, %v337_v31  ;;  %v14387_v31 = vld [vmem:[#allocation2 + $0x78] sm:$0xff]  ;;  %vm22763_vm12 = vcmp.ge.f32.partialorder %v17259_v42, 18.0 }
 0x509   : > { %v17330_v11 = vadd.f32 %v14372_v5, %v6508_v2  ;;  %v14179_v4 = vpop.f32.mrb[21].mxu0  ;;  %v336_v5 = vfloor.f32 %v295_v41  ;;  %v6886_v41 = vsel %vm17349_vm8, %v17107_v62, 0.0  ;;  %v22742_v62 = vmov 0  ;;  %vm17555_vm14 = vmand %vm22745_vm10, %vm497_vm13 }
 0x50a   : > { %v6511_v54 = vpop.f32.mrb[22].mxu0  ;;  %v22743_v62 = vsel %vm17547_vm0, 4294967295, %v22742_v62  ;;  %vm22748_vm13 = vcmp.le.f32.partialorder %v17362_v23, 16.0  ;;  %v338_v6 = vfloor.f32 %v297_v35  ;;  %vm22752_vm10 = vcmp.lt.s32.totalorder %v17200_v12, 8 }
 0x50b   : > { %6685 = vst [vmem:[#allocation2 + $0x50] sm:$0xff] %v17330_v11  ;;  %v17365_v29 = vadd.f32 %v14375_v16, %v6511_v54  ;;  %v14180_v13 = vpop.f32.mrb[23].mxu0  ;;  %v14381_v16 = vld [vmem:[#allocation2 + $0x68] sm:$0xff]  ;;  %v22723_v54 = vmov 0  ;;  %v377_v9 = vmul.f32 18.0, %v336_v5  ;;  %22744 = vst [vmem:[#allocation17_spill] sm:$0xff] %v22743_v62 }
 0x50c   : > { %v22724_v54 = vsel %vm17482_vm6, 4294967295, %v22723_v54  ;;  %vm17573_vm7 = vmand %vm17518_vm11, %vm22748_vm13  ;;  %v14384_v5 = vld [vmem:[#allocation2 + $0x70] sm:$0xff]  ;;  %v299_v35 = vmul.f32 0.055555556, %v17540_v52  ;;  %vm22762_vm13 = vcmp.lt.f32.partialorder %v17259_v42, 306.0  ;;  %v22767_v42 = vmov 0 }
 0x50d   : > { %6686 = vst [vmem:[#allocation2 + $0x58] sm:$0xff] %v17365_v29  ;;  %22725 = vst [vmem:[#allocation14_spill] sm:$0xff] %v22724_v54  ;;  %v22750_v56 = vsel %vm17573_vm7, 4294967295, %v22749_v56  ;;  %v17595_v23 = vsub.f32 %v17332_v18, %v377_v9  ;;  %vm500_vm4 = vcmp.lt.f32.partialorder %v17332_v18, 306.0 }
 0x50e   : > { %22751 = vst [vmem:[#allocation18_spill] sm:$0xff] %v22750_v56  ;;  %vm17581_vm8 = vmand %vm17490_vm15, %vm22752_vm10  ;;  %vm22759_vm10 = vcmp.ge.f32.partialorder %v17442_v44, 1.0 }
 0x50f   : > { %vm17589_vm11 = vmand %vm17533_vm5, %vm22756_vm9  ;;  %vm22774_vm5 = vcmp.le.f32.partialorder %v17442_v44, 16.0  ;;  %v6889_v44 = vsel %vm17482_vm6, %v17135_v27, 0.0  ;;  %v22782_v27 = vmov 0  ;;  %vm22785_vm9 = vcmp.lt.f32.partialorder %v17295_v53, 306.0 }
 0x510   : > { %v6516_v49 = vpop.f32.mrb[24].mxu0  ;;  %vm17603_vm15 = vmand %vm17555_vm14, %vm22759_vm10  ;;  %vm22766_vm14 = vcmp.le.f32.partialorder %v17419_v43, 16.0  ;;  %v22775_v43 = vmov 0  ;;  %v6891_v1 = vsel %vm17581_vm8, %v17157_v50, 0.0  ;;  %v22810_v50 = vmov 0 }
 0x511   : > { %v17465_v0 = vadd.f32 %v14378_v26, %v6516_v49  ;;  %v14183_v2 = vpop.f32.mrb[25].mxu0  ;;  %v219_v49 = vadd.s32 152, %v17102_v55  ;;  %v6885_v26 = vsel %vm17383_vm1, %v17104_v58, 0.0  ;;  %v22753_v58 = vmov 0  ;;  %vm17616_vm2 = vmand %vm22763_vm12, %vm22762_vm13 }
 0x512   : > { %v6519_v4 = vpop.f32.mrb[26].mxu0  ;;  %v6926_v8 = vadd.f32 %v6886_v41, %v6885_v26  ;;  %v22754_v58 = vsel %vm17581_vm8, 4294967295, %v22753_v58  ;;  %v339_v26 = vfloor.f32 %v298_v48  ;;  %vm17632_vm12 = vmand %vm17589_vm11, %vm22766_vm14  ;;  %v220_v48 = vadd.s32 160, %v17102_v55 }
 0x513   : > { %6687 = vst [vmem:[#allocation2 + $0x60] sm:$0xff] %v17465_v0  ;;  %v17499_v24 = vadd.f32 %v14381_v16, %v6519_v4  ;;  %v14184_v13 = vpop.f32.mrb[27].mxu0  ;;  %22755 = vst [vmem:[#allocation19_spill] sm:$0xff] %v22754_v58  ;;  %v22768_v42 = vsel %vm17632_vm12, 4294967295, %v22767_v42  ;;  %vm22770_vm13 = vcmp.lt.s32.totalorder %v17200_v12, 8  ;;  %vm22781_vm14 = vcmp.lt.s32.totalorder %v17200_v12, 8 }
 0x514   : > { %v6927_v9 = vadd.f32 %v6926_v8, %v6887_v25  ;;  %22769 = vst [vmem:[#allocation20_spill] sm:$0xff] %v22768_v42  ;;  %v17637_v25 = vsub.f32 %v17376_v34, %v378_v60  ;;  %vm17644_vm10 = vmand %vm17507_vm3, %vm22770_vm13  ;;  %vm22778_vm13 = vcmp.ge.f32.partialorder %v17496_v20, 1.0  ;;  %v340_v60 = vfloor.f32 %v299_v35  ;;  %v14390_v35 = vld [vmem:[#allocation2 + $0x80] sm:$0xff] }
 0x515   : > { %6688 = vst [vmem:[#allocation2 + $0x68] sm:$0xff] %v17499_v24  ;;  %v22772_v15 = vsel %vm17644_vm10, 4294967295, %v22771_v15  ;;  %vm17652_vm11 = vmand %vm17603_vm15, %vm22774_vm5  ;;  %vm22789_vm3 = vcmp.ge.f32.partialorder %v17332_v18, 18.0  ;;  %v22793_v18 = vmov 0  ;;  %vm22803_vm5 = vcmp.ge.f32.partialorder %v17595_v23, 1.0 }
 0x516   : > { %22773 = vst [vmem:[#allocation21_spill] sm:$0xff] %v22772_v15  ;;  %v22776_v43 = vsel %vm17652_vm11, 4294967295, %v22775_v43  ;;  %vm17668_vm15 = vmand %vm17616_vm2, %vm22778_vm13  ;;  %v6928_v8 = vadd.f32 %v6927_v9, %v6888_v21  ;;  %vm22786_vm2 = vcmp.ge.f32.partialorder %v17295_v53, 18.0  ;;  %v17703_v9 = vcvt.s32.f32 %v220_v48 }
 0x517   : > { %22777 = vst [vmem:[#allocation22_spill] sm:$0xff] %v22776_v43  ;;  %vm17678_vm1 = vmand %vm17573_vm7, %vm22781_vm14  ;;  %vm501_vm14 = vcmp.lt.f32.partialorder %v17376_v34, 306.0  ;;  %v221_v21 = vadd.s32 168, %v17102_v55  ;;  %v381_v48 = vmul.f32 18.0, %v340_v60 }
 0x518   : > { %v6524_v2 = vpop.f32.mrb[28].mxu0  ;;  %v22783_v27 = vsel %vm17678_vm1, 4294967295, %v22782_v27  ;;  %vm17686_vm13 = vmand %vm22786_vm2, %vm22785_vm9  ;;  %v6929_v41 = vadd.f32 %v6928_v8, %v6889_v44  ;;  %vm22792_vm9 = vcmp.le.f32.partialorder %v17496_v20, 16.0  ;;  %vm22796_vm2 = vcmp.ge.f32.partialorder %v17538_v45, 1.0 }
 0x519   : > { %v17597_v4 = vadd.f32 %v14384_v5, %v6524_v2  ;;  %v14187_v16 = vpop.f32.mrb[29].mxu0  ;;  %v17623_v2 = vcvt.s32.f32 %v219_v49  ;;  %v379_v5 = vmul.f32 18.0, %v338_v6  ;;  %v300_v6 = vmul.f32 0.055555556, %v17610_v39  ;;  %22784 = vst [vmem:[#allocation23_spill] sm:$0xff] %v22783_v27  ;;  %vm17694_vm6 = vmand %vm22789_vm3, %vm500_vm4  ;;  %v14393_v49 = vld [vmem:[#allocation2 + $0x88] sm:$0xff] }
 0x51a   : > { %v6527_v13 = vpop.f32.mrb[30].mxu0  ;;  %v380_v16 = vmul.f32 18.0, %v339_v26  ;;  %vm17709_vm4 = vmand %vm17668_vm15, %vm22792_vm9  ;;  %vm22799_vm9 = vcmp.lt.s32.totalorder %v17200_v12, 8  ;;  %v17798_v20 = vsub.f32 %v17540_v52, %v381_v48  ;;  %v6892_v48 = vsel %vm17644_vm10, %v17174_v63, 0.0 }
 0x51b   : > { %6689 = vst [vmem:[#allocation2 + $0x70] sm:$0xff] %v17597_v4  ;;  %v17621_v46 = vadd.f32 %v14387_v31, %v6527_v13  ;;  %v14188_v14 = vpop.f32.mrb[31].mxu0  ;;  %v301_v19 = vmul.f32 0.055555556, %v17623_v2  ;;  %v17701_v53 = vsub.f32 %v17445_v57, %v379_v5  ;;  %v22794_v18 = vsel %vm17709_vm4, 4294967295, %v22793_v18  ;;  %vm17724_vm7 = vmand %vm17686_vm13, %vm22796_vm2 }
 0x51c   : > { %22795 = vst [vmem:[#allocation24_spill] sm:$0xff] %v22794_v18  ;;  %v6890_v5 = vsel %vm17547_vm0, %v17139_v33, 0.0  ;;  %v341_v8 = vfloor.f32 %v300_v6  ;;  %vm17733_vm3 = vmand %vm17632_vm12, %vm22799_vm9  ;;  %v22800_v33 = vmov 0  ;;  %v17746_v60 = vsub.f32 %v17501_v28, %v380_v16 }
 0x51d   : > { %6690 = vst [vmem:[#allocation2 + $0x78] sm:$0xff] %v17621_v46  ;;  %v22801_v33 = vsel %vm17733_vm3, 4294967295, %v22800_v33  ;;  %vm17741_vm13 = vmand %vm17694_vm6, %vm22803_vm5  ;;  %vm22806_vm6 = vcmp.ge.f32.partialorder %v17376_v34, 18.0  ;;  %v302_v16 = vmul.f32 0.055555556, %v17703_v9  ;;  %v22814_v34 = vmov 0 }
 0x51e   : > { %22802 = vst [vmem:[#allocation25_spill] sm:$0xff] %v22801_v33  ;;  %vm17759_vm5 = vmand %vm22806_vm6, %vm501_vm14  ;;  %vm22813_vm14 = vcmp.le.f32.partialorder %v17538_v45, 16.0  ;;  %v22818_v45 = vmov 0  ;;  %v22829_v63 = vmov 0  ;;  %v6893_v18 = vsel %vm17678_vm1, %v17227_v30, 0.0 }
 0x51f   : > { %vm22809_vm15 = vmmov %vm22799_vm9  ;;  %vm22821_vm9 = vcmp.ge.f32.partialorder %v17637_v25, 1.0  ;;  %v22841_v30 = vmov 0 }
 0x520   : > { %v6532_v31 = vpop.f32.mrb[32].mxu0  ;;  %vm17770_vm12 = vmand %vm17652_vm11, %vm22809_vm15  ;;  %vm22817_vm15 = vcmp.le.f32.partialorder %v17595_v23, 16.0 }
 0x521   : > { %v17714_v14 = vadd.f32 %v14390_v35, %v6532_v31  ;;  %v14191_v26 = vpop.f32.mrb[33].mxu0  ;;  %v342_v35 = vfloor.f32 %v301_v19  ;;  %v6930_v19 = vadd.f32 %v6929_v41, %v6890_v5  ;;  %v22811_v50 = vsel %vm17770_vm12, 4294967295, %v22810_v50  ;;  %vm17778_vm6 = vmand %vm17724_vm7, %vm22813_vm14 }
 0x522   : > { %v6535_v44 = vpop.f32.mrb[34].mxu0  ;;  %v222_v26 = vadd.s32 176, %v17102_v55  ;;  %22812 = vst [vmem:[#allocation26_spill] sm:$0xff] %v22811_v50  ;;  %v22815_v34 = vsel %vm17778_vm6, 4294967295, %v22814_v34  ;;  %v17784_v41 = vcvt.s32.f32 %v221_v21  ;;  %v223_v5 = vadd.s32 184, %v17102_v55  ;;  %vm17791_vm2 = vmand %vm17741_vm13, %vm22817_vm15 }
 0x523   : > { %6691 = vst [vmem:[#allocation2 + $0x80] sm:$0xff] %v17714_v14  ;;  %v17749_v6 = vadd.f32 %v14393_v49, %v6535_v44  ;;  %v14192_v31 = vpop.f32.mrb[35].mxu0  ;;  %22816 = vst [vmem:[#allocation27_spill] sm:$0xff] %v22815_v34  ;;  %v22819_v45 = vsel %vm17791_vm2, 4294967295, %v22818_v45  ;;  %v382_v44 = vmul.f32 18.0, %v341_v8  ;;  %v6931_v21 = vadd.f32 %v6930_v19, %v6891_v1  ;;  %v14402_v1 = vld [vmem:[#allocation2 + $0xa0] sm:$0xff] }
 0x524   : > { %22820 = vst [vmem:[#allocation28_spill] sm:$0xff] %v22819_v45  ;;  %vm17804_vm11 = vmand %vm17759_vm5, %vm22821_vm9  ;;  %v383_v49 = vmul.f32 18.0, %v342_v35  ;;  %v17809_v7 = vcvt.s32.f32 %v222_v26  ;;  %vm22824_vm15 = vcmp.lt.f32.partialorder %v17445_v57, 306.0  ;;  %vm22825_vm7 = vcmp.ge.f32.partialorder %v17445_v57, 18.0  ;;  %v14396_v31 = vld [vmem:[#allocation2 + $0x90] sm:$0xff] }
 0x525   : > { %6692 = vst [vmem:[#allocation2 + $0x88] sm:$0xff] %v17749_v6  ;;  %vm17818_vm14 = vmand %vm22825_vm7, %vm22824_vm15  ;;  %v343_v35 = vfloor.f32 %v302_v16  ;;  %vm22828_vm13 = vcmp.lt.s32.totalorder %v17200_v12, 8  ;;  %vm22832_vm7 = vcmp.lt.f32.partialorder %v17501_v28, 306.0  ;;  %vm22833_vm15 = vcmp.ge.f32.partialorder %v17501_v28, 18.0 }
 0x526   : > { %vm17828_vm10 = vmand %vm17709_vm4, %vm22828_vm13  ;;  %v303_v16 = vmul.f32 0.055555556, %v17784_v41  ;;  %v17844_v19 = vcvt.s32.f32 %v223_v5  ;;  %vm22836_vm13 = vcmp.le.f32.partialorder %v17637_v25, 16.0  ;;  %v22837_v28 = vmov 0  ;;  %v14399_v5 = vld [vmem:[#allocation2 + $0x98] sm:$0xff] }
 0x527   : > { %v22830_v63 = vsel %vm17828_vm10, 4294967295, %v22829_v63  ;;  %vm17836_vm8 = vmand %vm22833_vm15, %vm22832_vm7  ;;  %v6932_v43 = vadd.f32 %v6931_v21, %v6892_v48  ;;  %vm22840_vm9 = vcmp.lt.s32.totalorder %v17200_v12, 8  ;;  %v304_v48 = vmul.f32 0.055555556, %v17809_v7 }
 0x528   : > { %v6540_v8 = vpop.f32.mrb[36].mxu0  ;;  %22831 = vst [vmem:[#allocation29_spill] sm:$0xff] %v22830_v63  ;;  %vm17853_vm7 = vmand %vm17804_vm11, %vm22836_vm13  ;;  %vm22844_vm11 = vcmp.ge.f32.partialorder %v17701_v53, 1.0  ;;  %v384_v34 = vmul.f32 18.0, %v343_v35  ;;  %vm22851_vm4 = vcmp.ge.f32.partialorder %v17540_v52, 18.0  ;;  %v344_v57 = vfloor.f32 %v303_v16 }
 0x529   : > { %v17841_v26 = vadd.f32 %v14396_v31, %v6540_v8  ;;  %v14195_v13 = vpop.f32.mrb[37].mxu0  ;;  %v22838_v28 = vsel %vm17853_vm7, 4294967295, %v22837_v28  ;;  %v17859_v8 = vsub.f32 %v17610_v39, %v382_v44  ;;  %vm17866_vm5 = vmand %vm17778_vm6, %vm22840_vm9  ;;  %v17880_v44 = vsub.f32 %v17623_v2, %v383_v49 }
 0x52a   : > { %22839 = vst [vmem:[#allocation30_spill] sm:$0xff] %v22838_v28  ;;  %v6543_v31 = vpop.f32.mrb[38].mxu0  ;;  %v224_v13 = vadd.s32 192, %v17102_v55  ;;  %v22842_v30 = vsel %vm17866_vm5, 4294967295, %v22841_v30  ;;  %vm17874_vm13 = vmand %vm17818_vm14, %vm22844_vm11  ;;  %vm22847_vm9 = vcmp.ge.f32.partialorder %v17746_v60, 1.0  ;;  %v225_v49 = vadd.s32 200, %v17102_v55 }
 0x52b   : > { %22843 = vst [vmem:[#allocation31_spill] sm:$0xff] %v22842_v30  ;;  %6693 = vst [vmem:[#allocation2 + $0x90] sm:$0xff] %v17841_v26  ;;  %v17882_v21 = vadd.f32 %v14399_v5, %v6543_v31  ;;  %v14196_v23 = vpop.f32.mrb[39].mxu0  ;;  %v6933_v31 = vadd.f32 %v6932_v43, %v6893_v18  ;;  %vm22850_vm6 = vcmp.lt.f32.partialorder %v17540_v52, 306.0  ;;  %v6894_v35 = vsel %vm17733_vm3, %v17257_v40, 0.0  ;;  %v14411_v28 = vld [vmem:[#allocation2 + $0xb8] sm:$0xff] }
 0x52c   : > { %vm17889_vm15 = vmand %vm17836_vm8, %vm22847_vm9  ;;  %v305_v23 = vmul.f32 0.055555556, %v17844_v19  ;;  %vm22854_vm9 = vcmp.le.f32.partialorder %v17701_v53, 16.0  ;;  %v22855_v52 = vmov 0  ;;  %v17920_v43 = vcvt.s32.f32 %v224_v13 }
 0x52d   : > { %vm17900_vm1 = vmand %vm22851_vm4, %vm22850_vm6  ;;  %6694 = vst [vmem:[#allocation2 + $0x98] sm:$0xff] %v17882_v21  ;;  %vm22858_vm11 = vcmp.lt.s32.totalorder %v17200_v12, 8  ;;  %v22859_v40 = vmov 0  ;;  %vm22862_vm3 = vcmp.le.f32.partialorder %v17746_v60, 16.0  ;;  %v22863_v53 = vmov 0 }
 0x52e   : > { %vm17914_vm14 = vmand %vm17874_vm13, %vm22854_vm9  ;;  %vm465_vm9 = vcmp.ge.f32.partialorder %v17623_v2, 18.0  ;;  %vm506_vm6 = vcmp.lt.f32.partialorder %v17623_v2, 306.0  ;;  %v345_v18 = vfloor.f32 %v304_v48  ;;  %v6895_v16 = vsel %vm17770_vm12, %v17330_v11, 0.0 }
 0x52f   : > { %v22856_v52 = vsel %vm17914_vm14, 4294967295, %v22855_v52  ;;  %vm17926_vm8 = vmand %vm17791_vm2, %vm22858_vm11  ;;  %vm22866_vm11 = vcmp.ge.f32.partialorder %v17798_v20, 1.0  ;;  %v17953_v13 = vsub.f32 %v17703_v9, %v384_v34  ;;  %v226_v45 = vadd.s32 208, %v17102_v55 }
 0x530   : > { %22857 = vst [vmem:[#allocation32_spill] sm:$0xff] %v22856_v52  ;;  %v22860_v40 = vsel %vm17926_vm8, 4294967295, %v22859_v40  ;;  %vm17934_vm13 = vmand %vm17889_vm15, %vm22862_vm3  ;;  %v6548_v25 = vpop.f32.mrb[40].mxu0  ;;  %v17956_v48 = vcvt.s32.f32 %v225_v49  ;;  %v6934_v42 = vadd.f32 %v6933_v31, %v6894_v35  ;;  %vm22869_vm3 = vcmp.lt.s32.totalorder %v17200_v12, 8  ;;  %v14405_v35 = vld [vmem:[#allocation2 + $0xa8] sm:$0xff] }
 0x531   : > { %22861 = vst [vmem:[#allocation33_spill] sm:$0xff] %v22860_v40  ;;  %v22864_v53 = vsel %vm17934_vm13, 4294967295, %v22863_v53  ;;  %vm17948_vm2 = vmand %vm17900_vm1, %vm22866_vm11  ;;  %v22870_v11 = vmov 0  ;;  %vm22873_vm1 = vcmp.lt.f32.partialorder %v17610_v39, 306.0  ;;  %vm22874_vm11 = vcmp.ge.f32.partialorder %v17610_v39, 18.0  ;;  %v14199_v49 = vpop.f32.mrb[41].mxu0 }
 0x532   : > { %22865 = vst [vmem:[#allocation34_spill] sm:$0xff] %v22864_v53  ;;  %vm17962_vm15 = vmand %vm17853_vm7, %vm22869_vm3  ;;  %v17974_v5 = vadd.f32 %v14402_v1, %v6548_v25  ;;  %v385_v31 = vmul.f32 18.0, %v344_v57  ;;  %v346_v56 = vfloor.f32 %v305_v23  ;;  %v6551_v39 = vpop.f32.mrb[42].mxu0  ;;  %v227_v25 = vadd.s32 216, %v17102_v55 }
 0x533   : > { %v22871_v11 = vsel %vm17962_vm15, 4294967295, %v22870_v11  ;;  %vm17970_vm4 = vmand %vm22874_vm11, %vm22873_vm1  ;;  %v306_v1 = vmul.f32 0.055555556, %v17920_v43  ;;  %v6935_v57 = vadd.f32 %v6934_v42, %v6895_v16  ;;  %vm22879_vm11 = vcmp.le.f32.partialorder %v17798_v20, 16.0  ;;  %v14200_v49 = vpop.f32.mrb[43].mxu0 }
 0x534   : > { %22872 = vst [vmem:[#allocation35_spill] sm:$0xff] %v22871_v11  ;;  %vm17980_vm3 = vmand %vm465_vm9, %vm506_vm6  ;;  %v22880_v2 = vmov 0  ;;  %v17998_v23 = vadd.f32 %v14405_v35, %v6551_v39  ;;  %v386_v61 = vmul.f32 18.0, %v345_v18  ;;  %v6896_v42 = vsel %vm17828_vm10, %v17365_v29, 0.0 }
 0x535   : > { %vm17992_vm12 = vmand %vm17948_vm2, %vm22879_vm11  ;;  %6695 = vst [vmem:[#allocation2 + $0xa0] sm:$0xff] %v17974_v5  ;;  %vm22883_vm9 = vcmp.ge.f32.partialorder %v17859_v8, 1.0  ;;  %v18012_v16 = vcvt.s32.f32 %v226_v45  ;;  %v307_v60 = vmul.f32 0.055555556, %v17956_v48  ;;  %vm22886_vm7 = vcmp.lt.s32.totalorder %v17200_v12, 8 }
 0x536   : > { %v22881_v2 = vsel %vm17992_vm12, 4294967295, %v22880_v2  ;;  %vm18007_vm2 = vmand %vm17970_vm4, %vm22883_vm9  ;;  %v22887_v29 = vmov 0  ;;  %vm22890_vm6 = vcmp.ge.f32.partialorder %v17880_v44, 1.0  ;;  %v18033_v45 = vsub.f32 %v17784_v41, %v385_v31  ;;  %6696 = vst [vmem:[#allocation2 + $0xa8] sm:$0xff] %v17998_v23 }
 0x537   : > { %22882 = vst [vmem:[#allocation36_spill] sm:$0xff] %v22881_v2  ;;  %vm18019_vm1 = vmand %vm17914_vm14, %vm22886_vm7  ;;  %v387_v34 = vmul.f32 18.0, %v346_v56  ;;  %v6897_v35 = vsel %vm17866_vm5, %v17465_v0, 0.0  ;;  %vm22893_vm7 = vcmp.lt.f32.partialorder %v17703_v9, 306.0  ;;  %v228_v31 = vadd.s32 224, %v17102_v55 }
 0x538   : > { %v22888_v29 = vsel %vm18019_vm1, 4294967295, %v22887_v29  ;;  %vm18027_vm4 = vmand %vm17980_vm3, %vm22890_vm6  ;;  %vm22894_vm3 = vcmp.ge.f32.partialorder %v17703_v9, 18.0  ;;  %v18049_v39 = vcvt.s32.f32 %v227_v25  ;;  %v347_v49 = vfloor.f32 %v306_v1  ;;  %v14408_v1 = vld [vmem:[#allocation2 + $0xb0] sm:$0xff] }
 0x539   : > { %22889 = vst [vmem:[#allocation37_spill] sm:$0xff] %v22888_v29  ;;  %vm18044_vm6 = vmand %vm22894_vm3, %vm22893_vm7  ;;  %v6936_v52 = vadd.f32 %v6935_v57, %v6896_v42  ;;  %vm22897_vm9 = vcmp.lt.s32.totalorder %v17200_v12, 8  ;;  %v22898_v0 = vmov 0  ;;  %vm22901_vm14 = vcmp.le.f32.partialorder %v17859_v8, 16.0  ;;  %v6556_v8 = vpop.f32.mrb[44].mxu0 }
 0x53a   : > { %vm18055_vm11 = vmand %vm17934_vm13, %vm22897_vm9  ;;  %v22902_v56 = vmov 0  ;;  %vm508_vm3 = vcmp.lt.f32.partialorder %v17784_v41, 306.0  ;;  %v427_v9 = vsub.f32 %v17809_v7, %v386_v61  ;;  %vm468_vm5 = vcmp.ge.f32.partialorder %v17809_v7, 18.0  ;;  %v14203_v53 = vpop.f32.mrb[45].mxu0 }
 0x53b   : > { %v22899_v0 = vsel %vm18055_vm11, 4294967295, %v22898_v0  ;;  %vm18063_vm7 = vmand %vm18007_vm2, %vm22901_vm14  ;;  %vm22905_vm10 = vcmp.le.f32.partialorder %v17880_v44, 16.0  ;;  %v22906_v25 = vmov 0  ;;  %vm509_vm13 = vcmp.lt.f32.partialorder %v17809_v7, 306.0 }
 0x53c   : > { %22900 = vst [vmem:[#allocation38_spill] sm:$0xff] %v22899_v0  ;;  %v22903_v56 = vsel %vm18063_vm7, 4294967295, %v22902_v56  ;;  %vm18074_vm9 = vmand %vm18027_vm4, %vm22905_vm10  ;;  %v229_v57 = vadd.s32 232, %v17102_v55  ;;  %v308_v42 = vmul.f32 0.055555556, %v18012_v16  ;;  %v348_v20 = vfloor.f32 %v307_v60 }
 0x53d   : > { %22904 = vst [vmem:[#allocation39_spill] sm:$0xff] %v22903_v56  ;;  %v22907_v25 = vsel %vm18074_vm9, 4294967295, %v22906_v25  ;;  %v6937_v61 = vadd.f32 %v6936_v52, %v6897_v35  ;;  %vm22909_vm14 = vcmp.ge.f32.partialorder %v17953_v13, 1.0  ;;  %v18090_v18 = vadd.f32 %v14408_v1, %v6556_v8  ;;  %v6559_v35 = vpop.f32.mrb[46].mxu0 }
 0x53e   : > { %22908 = vst [vmem:[#allocation40_spill] sm:$0xff] %v22907_v25  ;;  %vm18085_vm2 = vmand %vm18044_vm6, %vm22909_vm14  ;;  %v18093_v3 = vsub.f32 %v17844_v19, %v387_v34  ;;  %v6898_v52 = vsel %vm17926_vm8, %v17499_v24, 0.0  ;;  %vm22912_vm4 = vcmp.ge.f32.partialorder %v17784_v41, 18.0  ;;  %v18106_v8 = vcvt.s32.f32 %v228_v31  ;;  %v14417_v25 = vld [vmem:[#allocation2 + $0xc8] sm:$0xff] }
 0x53f   : > { %vm18102_vm6 = vmand %vm22912_vm4, %vm508_vm3  ;;  %v309_v53 = vmul.f32 0.055555556, %v18049_v39  ;;  %v388_v34 = vmul.f32 18.0, %v347_v49  ;;  %vm22915_vm14 = vcmp.lt.s32.totalorder %v17200_v12, 8  ;;  %v22916_v24 = vmov 0  ;;  %6697 = vst [vmem:[#allocation2 + $0xb0] sm:$0xff] %v18090_v18 }
 0x540   : > { %vm18113_vm10 = vmand %vm17992_vm12, %vm22915_vm14  ;;  %v18126_v31 = vadd.f32 %v14411_v28, %v6559_v35  ;;  %v14204_v49 = vpop.f32.mrb[47].mxu0  ;;  %v6899_v1 = vsel %vm17962_vm15, %v17597_v4, 0.0  ;;  %vm22921_vm12 = vcmp.le.f32.partialorder %v17953_v13, 16.0  ;;  %v22922_v7 = vmov 0 }
 0x541   : > { %v22917_v24 = vsel %vm18113_vm10, 4294967295, %v22916_v24  ;;  %vm18121_vm3 = vmand %vm468_vm5, %vm509_vm13  ;;  %v18141_v2 = vcvt.s32.f32 %v229_v57  ;;  %v349_v35 = vfloor.f32 %v308_v42  ;;  %v389_v28 = vmul.f32 18.0, %v348_v20  ;;  %v6564_v41 = vpop.f32.mrb[48].mxu0 }
 0x542   : > { %22918 = vst [vmem:[#allocation41_spill] sm:$0xff] %v22917_v24  ;;  %vm18137_vm5 = vmand %vm18085_vm2, %vm22921_vm12  ;;  %v6938_v49 = vadd.f32 %v6937_v61, %v6898_v52  ;;  %vm672_vm2 = vcmp.le.f32.partialorder %v18033_v45, 16.0  ;;  %vm22932_vm0 = vcmp.ge.f32.partialorder %v427_v9, 1.0  ;;  %v230_v57 = vadd.s32 240, %v17102_v55 }
 0x543   : > { %v22923_v7 = vsel %vm18137_vm5, 4294967295, %v22922_v7  ;;  %vm22925_vm13 = vmmov %vm22915_vm14  ;;  %vm22929_vm14 = vcmp.ge.f32.partialorder %v18033_v45, 1.0  ;;  %6698 = vst [vmem:[#allocation2 + $0xb8] sm:$0xff] %v18126_v31  ;;  %v310_v42 = vmul.f32 0.055555556, %v18106_v8  ;;  %v350_v20 = vfloor.f32 %v309_v53 }
 0x544   : > { %22924 = vst [vmem:[#allocation42_spill] sm:$0xff] %v22923_v7  ;;  %vm18147_vm8 = vmand %vm18063_vm7, %vm22925_vm13  ;;  %v18172_v61 = vsub.f32 %v17920_v43, %v388_v34  ;;  %v6939_v44 = vadd.f32 %v6938_v49, %v6899_v1  ;;  %v231_v52 = vadd.s32 248, %v17102_v55  ;;  %v6900_v53 = vsel %vm18019_vm1, %v17621_v46, 0.0  ;;  %v14414_v1 = vld [vmem:[#allocation2 + $0xc0] sm:$0xff] }
 0x545   : > { %v22927_v47 = vsel %vm18147_vm8, 4294967295, %v22926_v47  ;;  %vm18155_vm12 = vmand %vm18102_vm6, %vm22929_vm14  ;;  %v22939_v34 = vmov 0  ;;  %v390_v49 = vmul.f32 18.0, %v349_v35  ;;  %v18198_v56 = vsub.f32 %v17956_v48, %v389_v28  ;;  %v14207_v35 = vpop.f32.mrb[49].mxu0 }
 0x546   : > { %22928 = vst [vmem:[#allocation43_spill] sm:$0xff] %v22927_v47  ;;  %vm18165_vm13 = vmand %vm18121_vm3, %vm22932_vm0  ;;  %vm22935_vm0 = vcmp.lt.f32.partialorder %v17844_v19, 306.0  ;;  %vm22936_vm3 = vcmp.ge.f32.partialorder %v17844_v19, 18.0  ;;  %v311_v19 = vmul.f32 0.055555556, %v18141_v2  ;;  %v22943_v46 = vmov 0 }
 0x547   : > { %vm18181_vm15 = vmand %vm22936_vm3, %vm22935_vm0  ;;  %vm22942_vm0 = vcmp.lt.s32.totalorder %v17200_v12, 8  ;;  %v22947_v45 = vmov 0  ;;  %v18215_v4 = vadd.f32 %v14414_v1, %v6564_v41  ;;  %vm512_vm14 = vcmp.lt.f32.partialorder %v17956_v48, 306.0 }
 0x548   : > { %vm18192_vm4 = vmand %vm18155_vm12, %vm672_vm2  ;;  %vm22946_vm12 = vcmp.le.f32.partialorder %v427_v9, 16.0  ;;  %v6901_v28 = vsel %vm18055_vm11, %v17714_v14, 0.0  ;;  %v6567_v9 = vpop.f32.mrb[50].mxu0  ;;  %v18223_v13 = vcvt.s32.f32 %v230_v57  ;;  %v351_v22 = vfloor.f32 %v310_v42 }
 0x549   : > { %v22940_v34 = vsel %vm18192_vm4, 4294967295, %v22939_v34  ;;  %vm18204_vm3 = vmand %vm18074_vm9, %vm22942_vm0  ;;  %v391_v36 = vmul.f32 18.0, %v350_v20  ;;  %v6940_v1 = vadd.f32 %v6939_v44, %v6900_v53  ;;  %v22954_v14 = vmov 0  ;;  %6699 = vst [vmem:[#allocation2 + $0xc0] sm:$0xff] %v18215_v4  ;;  %v14208_v42 = vpop.f32.mrb[51].mxu0 }
 0x54a   : > { %22941 = vst [vmem:[#allocation44_spill] sm:$0xff] %v22940_v34  ;;  %v22944_v46 = vsel %vm18204_vm3, 4294967295, %v22943_v46  ;;  %vm18211_vm2 = vmand %vm18165_vm13, %vm22946_vm12  ;;  %vm22950_vm13 = vcmp.ge.f32.partialorder %v18093_v3, 1.0  ;;  %vm22953_vm12 = vcmp.lt.s32.totalorder %v17200_v12, 8  ;;  %v18242_v57 = vadd.f32 %v14417_v25, %v6567_v9  ;;  %v6572_v41 = vpop.f32.mrb[52].mxu0 }
 0x54b   : > { %22945 = vst [vmem:[#allocation45_spill] sm:$0xff] %v22944_v46  ;;  %v22948_v45 = vsel %vm18211_vm2, 4294967295, %v22947_v45  ;;  %vm18229_vm0 = vmand %vm18181_vm15, %vm22950_vm13  ;;  %v18244_v20 = vcvt.s32.f32 %v231_v52  ;;  %vm22958_vm15 = vcmp.lt.f32.partialorder %v17920_v43, 306.0  ;;  %vm22959_vm13 = vcmp.ge.f32.partialorder %v17920_v43, 18.0 }
 0x54c   : > { %22949 = vst [vmem:[#allocation46_spill] sm:$0xff] %v22948_v45  ;;  %vm18237_vm7 = vmand %vm18137_vm5, %vm22953_vm12  ;;  %v352_v60 = vfloor.f32 %v311_v19  ;;  %v431_v53 = vsub.f32 %v18012_v16, %v390_v49  ;;  %vm22962_vm5 = vcmp.ge.f32.partialorder %v17956_v48, 18.0  ;;  %vm594_vm11 = vcmp.ge.f32.partialorder %v18198_v56, 1.0 }
 0x54d   : > { %v22955_v14 = vsel %vm18237_vm7, 4294967295, %v22954_v14  ;;  %22957 = vst [vmem:[#allocation48_spill] sm:$0xff] %v18242_v57  ;;  %vm18250_vm6 = vmand %vm22959_vm13, %vm22958_vm15  ;;  %v6941_v43 = vadd.f32 %v6940_v1, %v6901_v28  ;;  %vm513_vm13 = vcmp.lt.f32.partialorder %v18012_v16, 306.0  ;;  %vm22965_vm1 = vcmp.le.f32.partialorder %v18093_v3, 16.0  ;;  %v14420_v1 = vld [vmem:[#allocation2 + $0xd0] sm:$0xff] }
 0x54e   : > { %22956 = vst [vmem:[#allocation47_spill] sm:$0xff] %v22955_v14  ;;  %vm18260_vm9 = vmand %vm22962_vm5, %vm512_vm14  ;;  %v22966_v48 = vmov 0  ;;  %v6902_v52 = vsel %vm18113_vm10, %v17749_v6, 0.0  ;;  %v312_v19 = vmul.f32 0.055555556, %v18223_v13  ;;  %v392_v49 = vmul.f32 18.0, %v351_v22 }
 0x54f   : > { %6700 = vst [vmem:[#allocation2 + $0xc8] sm:$0xff] %v18242_v57  ;;  %vm18273_vm7 = vmand %vm18229_vm0, %vm22965_vm1  ;;  %v18282_v35 = vsub.f32 %v18049_v39, %v391_v36  ;;  %vm22969_vm5 = vcmp.ge.f32.partialorder %v18172_v61, 1.0  ;;  %v22973_v6 = vmov 0  ;;  %v232_v22 = vadd.s32 256, %v17102_v55 }
 0x550   : > { %v22967_v48 = vsel %vm18273_vm7, 4294967295, %v22966_v48  ;;  %vm18288_vm14 = vmand %vm18250_vm6, %vm22969_vm5  ;;  %v313_v36 = vmul.f32 0.055555556, %v18244_v20  ;;  %v6903_v9 = vsel %vm18147_vm8, %v17841_v26, 0.0  ;;  %v233_v42 = vadd.s32 264, %v17102_v55 }
 0x551   : > { %22968 = vst [vmem:[#allocation49_spill] sm:$0xff] %v22967_v48  ;;  %vm22972_vm1 = vmmov %vm22953_vm12  ;;  %v393_v44 = vmul.f32 18.0, %v352_v60  ;;  %vm22978_vm5 = vcmp.ge.f32.partialorder %v18012_v16, 18.0  ;;  %v6942_v25 = vadd.f32 %v6941_v43, %v6902_v52  ;;  %v22982_v26 = vmov 0  ;;  %v14211_v60 = vpop.f32.mrb[53].mxu0  ;;  %v14423_v52 = vld [vmem:[#allocation2 + $0xd8] sm:$0xff] }
 0x552   : > { %vm18296_vm0 = vmand %vm18192_vm4, %vm22972_vm1  ;;  %v18332_v7 = vadd.f32 %v14420_v1, %v6572_v41  ;;  %v22986_v16 = vmov 0  ;;  %v6575_v43 = vpop.f32.mrb[54].mxu0  ;;  %v353_v45 = vfloor.f32 %v312_v19  ;;  %v18344_v51 = vsub.f32 %v18106_v8, %v392_v49 }
 0x553   : > { %v22974_v6 = vsel %vm18296_vm0, 4294967295, %v22973_v6  ;;  %vm18308_vm6 = vmand %vm18260_vm9, %vm594_vm11  ;;  %vm22989_vm11 = vcmp.lt.f32.partialorder %v18049_v39, 306.0  ;;  %vm22990_vm4 = vcmp.ge.f32.partialorder %v18049_v39, 18.0  ;;  %v6943_v3 = vadd.f32 %v6942_v25, %v6903_v9  ;;  %v14212_v19 = vpop.f32.mrb[55].mxu0 }
 0x554   : > { %22975 = vst [vmem:[#allocation50_spill] sm:$0xff] %v22974_v6  ;;  %vm18320_vm1 = vmand %vm22978_vm5, %vm513_vm13  ;;  %vm22985_vm13 = vcmp.le.f32.partialorder %v18172_v61, 16.0  ;;  %v18357_v41 = vadd.f32 %v14423_v52, %v6575_v43  ;;  %v18359_v49 = vcvt.s32.f32 %v232_v22  ;;  %v354_v1 = vfloor.f32 %v313_v36 }
 0x555   : > { %vm22981_vm9 = vmmov %vm22953_vm12  ;;  %6701 = vst [vmem:[#allocation2 + $0xd0] sm:$0xff] %v18332_v7  ;;  %v6904_v39 = vsel %vm18204_vm3, %v17882_v21, 0.0  ;;  %v18367_v60 = vcvt.s32.f32 %v233_v42  ;;  %v434_v9 = vsub.f32 %v18141_v2, %v393_v44  ;;  %v22995_v22 = vmov 0 }
 0x556   : > { %vm18328_vm12 = vmand %vm18211_vm2, %vm22981_vm9  ;;  %6702 = vst [vmem:[#allocation2 + $0xd8] sm:$0xff] %v18357_v41  ;;  %vm22998_vm2 = vcmp.ge.f32.partialorder %v18282_v35, 1.0  ;;  %vm23001_vm8 = vcmp.lt.s32.totalorder %v17200_v12, 8  ;;  %v394_v36 = vmul.f32 18.0, %v353_v45  ;;  %v23007_v28 = vmov 0  ;;  %v6580_v45 = vpop.f32.mrb[56].mxu0 }
 0x557   : > { %v22983_v26 = vsel %vm18328_vm12, 4294967295, %v22982_v26  ;;  %vm18339_vm5 = vmand %vm18288_vm14, %vm22985_vm13  ;;  %vm22993_vm13 = vcmp.ge.f32.partialorder %v431_v53, 1.0  ;;  %v6944_v42 = vadd.f32 %v6943_v3, %v6904_v39  ;;  %v314_v44 = vmul.f32 0.055555556, %v18359_v49 }
 0x558   : > { %22984 = vst [vmem:[#allocation51_spill] sm:$0xff] %v22983_v26  ;;  %v22987_v16 = vsel %vm18339_vm5, 4294967295, %v22986_v16  ;;  %vm18351_vm15 = vmand %vm22990_vm4, %vm22989_vm11  ;;  %vm515_vm4 = vcmp.lt.f32.partialorder %v18106_v8, 306.0  ;;  %vm22994_vm11 = vcmp.le.f32.partialorder %v18198_v56, 16.0  ;;  %v23002_v56 = vmov 0 }
 0x559   : > { %22988 = vst [vmem:[#allocation52_spill] sm:$0xff] %v22987_v16  ;;  %vm636_vm9 = vmand %vm18320_vm1, %vm22993_vm13  ;;  %vm678_vm1 = vcmp.le.f32.partialorder %v18282_v35, 16.0  ;;  %vm23006_vm13 = vcmp.le.f32.partialorder %v431_v53, 16.0  ;;  %v395_v25 = vmul.f32 18.0, %v354_v1  ;;  %v14426_v53 = vld [vmem:[#allocation2 + $0xe0] sm:$0xff]  ;;  %v234_v52 = vadd.s32 272, %v17102_v55 }
 0x55a   : > { %vm18375_vm14 = vmand %vm18308_vm6, %vm22994_vm11  ;;  %vm23005_vm11 = vnez %v22955_v14  ;;  %v18433_v19 = vadd.f32 %v14426_v53, %v6580_v45  ;;  %v14215_v1 = vpop.f32.mrb[57].mxu0  ;;  %v235_v39 = vadd.s32 280, %v17102_v55  ;;  %v23021_v16 = vmov 0 }
 0x55b   : > { %v22996_v22 = vsel %vm18375_vm14, 4294967295, %v22995_v22  ;;  %vm18386_vm3 = vmand %vm18351_vm15, %vm22998_vm2  ;;  %v6905_v34 = vsel %vm23005_vm11, %v17974_v5, 0.0  ;;  %vm23013_vm11 = vcmp.lt.s32.totalorder %v17200_v12, 8  ;;  %v23014_v5 = vmov 0  ;;  %v6583_v48 = vpop.f32.mrb[58].mxu0 }
 0x55c   : > { %22997 = vst [vmem:[#allocation53_spill] sm:$0xff] %v22996_v22  ;;  %vm18394_vm6 = vmand %vm18273_vm7, %vm23001_vm8  ;;  %vm23010_vm8 = vcmp.ge.f32.partialorder %v18106_v8, 18.0  ;;  %v315_v8 = vmul.f32 0.055555556, %v18367_v60  ;;  %v6945_v3 = vadd.f32 %v6944_v42, %v6905_v34  ;;  %v18448_v34 = vsub.f32 %v18223_v13, %v394_v36  ;;  %v14216_v42 = vpop.f32.mrb[59].mxu0 }
 0x55d   : > { %v23003_v56 = vsel %vm18394_vm6, 4294967295, %v23002_v56  ;;  %vm18403_vm2 = vmand %vm636_vm9, %vm23006_vm13  ;;  %vm23018_vm13 = vcmp.ge.f32.partialorder %v18141_v2, 18.0  ;;  %6703 = vst [vmem:[#allocation2 + $0xe0] sm:$0xff] %v18433_v19  ;;  %v18460_v21 = vadd.f32 %v14429_v32, %v6583_v48  ;;  %v355_v45 = vfloor.f32 %v314_v44 }
 0x55e   : > { %23004 = vst [vmem:[#allocation54_spill] sm:$0xff] %v23003_v56  ;;  %v23008_v28 = vsel %vm18403_vm2, 4294967295, %v23007_v28  ;;  %vm18410_vm15 = vmand %vm23010_vm8, %vm515_vm4  ;;  %vm23017_vm4 = vcmp.lt.f32.partialorder %v18141_v2, 306.0  ;;  %v6906_v2 = vsel %vm18296_vm0, %v17998_v23, 0.0  ;;  %v436_v36 = vsub.f32 %v18244_v20, %v395_v25 }
 0x55f   : > { %23009 = vst [vmem:[#allocation55_spill] sm:$0xff] %v23008_v28  ;;  %vm18419_vm9 = vmand %vm18339_vm5, %vm23013_vm11  ;;  %vm23027_vm5 = vcmp.ge.f32.partialorder %v434_v9, 1.0  ;;  %v6907_v43 = vsel %vm18328_vm12, %v18090_v18, 0.0  ;;  %v18470_v53 = vcvt.s32.f32 %v234_v52  ;;  %v356_v1 = vfloor.f32 %v315_v8 }
 0x560   : > { %v23015_v5 = vsel %vm18419_vm9, 4294967295, %v23014_v5  ;;  %vm18429_vm8 = vmand %vm23018_vm13, %vm23017_vm4  ;;  %vm23024_vm4 = vcmp.ge.f32.partialorder %v18344_v51, 1.0  ;;  %v23029_v32 = vmov 0  ;;  %v6946_v48 = vadd.f32 %v6945_v3, %v6906_v2  ;;  %6704 = vst [vmem:[#allocation2 + $0xe8] sm:$0xff] %v18460_v21  ;;  %v6588_v2 = vpop.f32.mrb[60].mxu0 }
 0x561   : > { %23016 = vst [vmem:[#allocation56_spill] sm:$0xff] %v23015_v5  ;;  %vm18440_vm11 = vmand %vm18386_vm3, %vm678_vm1  ;;  %vm23028_vm1 = vcmp.lt.s32.totalorder %v17200_v12, 8  ;;  %v18482_v44 = vcvt.s32.f32 %v235_v39  ;;  %vm23032_vm7 = vcmp.le.f32.partialorder %v18344_v51, 16.0  ;;  %v23033_v25 = vmov 0  ;;  %v14432_v51 = vld [vmem:[#allocation2 + $0xf0] sm:$0xff]  ;;  %v14219_v22 = vpop.f32.mrb[61].mxu0 }
 0x562   : > { %v23022_v16 = vsel %vm18440_vm11, 4294967295, %v23021_v16  ;;  %vm18454_vm13 = vmand %vm18410_vm15, %vm23024_vm4  ;;  %vm517_vm4 = vcmp.lt.f32.partialorder %v18223_v13, 306.0  ;;  %v23036_v52 = vmov 0  ;;  %vm23039_vm0 = vcmp.le.f32.partialorder %v434_v9, 16.0 }
 0x563   : > { %23023 = vst [vmem:[#allocation57_spill] sm:$0xff] %v23022_v16  ;;  %vm639_vm15 = vmand %vm18429_vm8, %vm23027_vm5  ;;  %vm518_vm8 = vcmp.lt.f32.partialorder %v18244_v20, 306.0  ;;  %v23040_v8 = vmov 0  ;;  %v396_v61 = vmul.f32 18.0, %v355_v45  ;;  %vm599_vm10 = vcmp.ge.f32.partialorder %v18448_v34, 1.0  ;;  %v14438_v45 = vld [vmem:[#allocation2 + $0x100] sm:$0xff] }
 0x564   : > { %vm18477_vm3 = vmand %vm18375_vm14, %vm23028_vm1  ;;  %v6947_v39 = vadd.f32 %v6946_v48, %v6907_v43  ;;  %v236_v35 = vadd.s32 288, %v17102_v55  ;;  %v316_v9 = vmul.f32 0.055555556, %v18470_v53  ;;  %v397_v42 = vmul.f32 18.0, %v356_v1  ;;  %v14435_v48 = vld [vmem:[#allocation2 + $0xf8] sm:$0xff] }
 0x565   : > { %v23030_v32 = vsel %vm18477_vm3, 4294967295, %v23029_v32  ;;  %vm18490_vm12 = vmand %vm18454_vm13, %vm23032_vm7  ;;  %vm23043_vm7 = vcmp.ge.f32.partialorder %v18223_v13, 18.0  ;;  %vm600_vm3 = vcmp.ge.f32.partialorder %v436_v36, 1.0  ;;  %v6908_v13 = vsel %vm18394_vm6, %v18126_v31, 0.0 }
 0x566   : > { %23031 = vst [vmem:[#allocation58_spill] sm:$0xff] %v23030_v32  ;;  %v23034_v25 = vsel %vm18490_vm12, 4294967295, %v23033_v25  ;;  %vm18498_vm14 = vmand %vm18403_vm2, %vm23028_vm1  ;;  %v18525_v28 = vadd.f32 %v14432_v51, %v6588_v2  ;;  %v317_v43 = vmul.f32 0.055555556, %v18482_v44  ;;  %v23050_v1 = vmov 0 }
 0x567   : > { %23035 = vst [vmem:[#allocation59_spill] sm:$0xff] %v23034_v25  ;;  %v23037_v52 = vsel %vm18498_vm14, 4294967295, %v23036_v52  ;;  %vm18503_vm5 = vmand %vm639_vm15, %vm23039_vm0  ;;  %vm23046_vm0 = vcmp.ge.f32.partialorder %v18244_v20, 18.0  ;;  %v6591_v20 = vpop.f32.mrb[62].mxu0  ;;  %v6909_v51 = vsel %vm18419_vm9, %v18215_v4, 0.0  ;;  %v437_v56 = vsub.f32 %v18359_v49, %v396_v61 }
 0x568   : > { %23038 = vst [vmem:[#allocation60_spill] sm:$0xff] %v23037_v52  ;;  %v23041_v8 = vsel %vm18503_vm5, 4294967295, %v23040_v8  ;;  %vm18509_vm13 = vmand %vm23043_vm7, %vm517_vm4  ;;  %v18550_v2 = vadd.f32 %v14435_v48, %v6591_v20  ;;  %v14220_v16 = vpop.f32.mrb[63].mxu0  ;;  %v6948_v3 = vadd.f32 %v6947_v39, %v6908_v13  ;;  %v18557_v26 = vcvt.s32.f32 %v236_v35 }
 0x569   : > { %23042 = vst [vmem:[#allocation61_spill] sm:$0xff] %v23041_v8  ;;  %vm18518_vm15 = vmand %vm23046_vm0, %vm518_vm8  ;;  %v357_v6 = vfloor.f32 %v316_v9  ;;  %v438_v5 = vsub.f32 %v18367_v60, %v397_v42  ;;  %v23056_v16 = vmov 0  ;;  %v358_v61 = vfloor.f32 %v317_v43 }
 0x56a   : > { %vm23049_vm4 = vmmov %vm23028_vm1  ;;  %6705 = vst [vmem:[#allocation2 + $0xf0] sm:$0xff] %v18525_v28  ;;  %v23060_v39 = vmov 0  ;;  %v6949_v35 = vadd.f32 %v6948_v3, %v6909_v51  ;;  %v18580_v9 = vcvt.s32.f32 %v237_v10  ;;  %v23064_v42 = vmov 0  ;;  %v6596_v10 = vpop.f32.mrb[64].mxu0 }
 0x56b   : > { %vm18532_vm1 = vmand %vm18440_vm11, %vm23049_vm4  ;;  %6706 = vst [vmem:[#allocation2 + $0xf8] sm:$0xff] %v18550_v2  ;;  %vm23067_vm2 = vnez %v23030_v32  ;;  %vm601_vm9 = vcmp.ge.f32.partialorder %v437_v56, 1.0  ;;  %v398_v43 = vmul.f32 18.0, %v357_v6  ;;  %v6911_v48 = vsel %vm18498_vm14, %v18332_v7, 0.0 }
 0x56c   : > { %v23051_v1 = vsel %vm18532_vm1, 4294967295, %v23050_v1  ;;  %vm18541_vm8 = vmand %vm18509_vm13, %vm599_vm10  ;;  %vm519_vm13 = vcmp.lt.f32.partialorder %v18359_v49, 306.0  ;;  %v18605_v22 = vadd.f32 %v14438_v45, %v6596_v10  ;;  %v239_v51 = vadd.s32 312, %v17102_v55  ;;  %v14444_v45 = vld [vmem:[#allocation2 + $0x110] sm:$0xff] }
 0x56d   : > { %23052 = vst [vmem:[#allocation62_spill] sm:$0xff] %v23051_v1  ;;  %vm641_vm10 = vmand %vm18518_vm15, %vm600_vm3  ;;  %vm479_vm3 = vcmp.ge.f32.partialorder %v18367_v60, 18.0  ;;  %vm520_vm15 = vcmp.lt.f32.partialorder %v18367_v60, 306.0  ;;  %v6910_v60 = vsel %vm23067_vm2, %v18242_v57, 0.0  ;;  %v399_v3 = vmul.f32 18.0, %v358_v61  ;;  %v14441_v57 = vld [vmem:[#allocation2 + $0x108] sm:$0xff] }
 0x56e   : > { %vm23055_vm0 = vmmov %vm23049_vm4  ;;  %vm23059_vm4 = vcmp.le.f32.partialorder %v18448_v34, 16.0  ;;  %v238_v34 = vadd.s32 304, %v17102_v55  ;;  %v23074_v6 = vmov 0  ;;  %v6950_v25 = vadd.f32 %v6949_v35, %v6910_v60  ;;  %6707 = vst [vmem:[#allocation2 + $0x100] sm:$0xff] %v18605_v22 }
 0x56f   : > { %vm18565_vm7 = vmand %vm18490_vm12, %vm23055_vm0  ;;  %vm23063_vm0 = vcmp.le.f32.partialorder %v436_v36, 16.0  ;;  %v318_v36 = vmul.f32 0.055555556, %v18557_v26  ;;  %v319_v52 = vmul.f32 0.055555556, %v18580_v9  ;;  %v439_v8 = vsub.f32 %v18470_v53, %v398_v43 }
 0x570   : > { %v23057_v16 = vsel %vm18565_vm7, 4294967295, %v23056_v16  ;;  %vm18576_vm11 = vmand %vm18541_vm8, %vm23059_vm4  ;;  %vm23068_vm8 = vcmp.ge.f32.partialorder %v18359_v49, 18.0  ;;  %v14223_v49 = vpop.f32.mrb[65].mxu0  ;;  %v6951_v60 = vadd.f32 %v6950_v25, %v6911_v48  ;;  %v440_v25 = vsub.f32 %v18482_v44, %v399_v3 }
 0x571   : > { %23058 = vst [vmem:[#allocation63_spill] sm:$0xff] %v23057_v16  ;;  %v23061_v39 = vsel %vm18576_vm11, 4294967295, %v23060_v39  ;;  %vm18583_vm12 = vmand %vm641_vm10, %vm23063_vm0  ;;  %vm602_vm0 = vcmp.ge.f32.partialorder %v438_v5, 1.0  ;;  %v6599_v32 = vpop.f32.mrb[66].mxu0  ;;  %v18627_v49 = vcvt.s32.f32 %v238_v34  ;;  %v359_v13 = vfloor.f32 %v318_v36 }
 0x572   : > { %23062 = vst [vmem:[#allocation64_spill] sm:$0xff] %v23061_v39  ;;  %v23065_v42 = vsel %vm18583_vm12, 4294967295, %v23064_v42  ;;  %vm18593_vm4 = vmand %vm23068_vm8, %vm519_vm13  ;;  %vm23073_vm13 = vcmp.lt.s32.totalorder %v17200_v12, 8  ;;  %v18625_v61 = vadd.f32 %v14441_v57, %v6599_v32  ;;  %v14224_v10 = vpop.f32.mrb[67].mxu0  ;;  %v23082_v57 = vmov 0 }
 0x573   : > { %23066 = vst [vmem:[#allocation65_spill] sm:$0xff] %v23065_v42  ;;  %vm18598_vm10 = vmand %vm479_vm3, %vm520_vm15  ;;  %vm683_vm15 = vcmp.le.f32.partialorder %v437_v56, 16.0  ;;  %v6912_v32 = vsel %vm18532_vm1, %v18357_v41, 0.0  ;;  %v18649_v34 = vcvt.s32.f32 %v239_v51  ;;  %v23085_v36 = vmov 0  ;;  %v6604_v3 = vpop.f32.mrb[68].mxu0 }
 0x574   : > { %vm18612_vm8 = vmand %vm18503_vm5, %vm23073_vm13  ;;  %6708 = vst [vmem:[#allocation2 + $0x108] sm:$0xff] %v18625_v61  ;;  %v360_v43 = vfloor.f32 %v319_v52  ;;  %vm481_vm5 = vcmp.ge.f32.partialorder %v18482_v44, 18.0  ;;  %vm23088_vm1 = vcmp.le.f32.partialorder %v438_v5, 16.0  ;;  %v23089_v20 = vmov 0  ;;  %v14227_v39 = vpop.f32.mrb[69].mxu0 }
 0x575   : > { %v23075_v6 = vsel %vm18612_vm8, 4294967295, %v23074_v6  ;;  %vm18620_vm3 = vmand %vm18593_vm4, %vm601_vm9  ;;  %vm23081_vm9 = vcmp.lt.s32.totalorder %v17200_v12, 8  ;;  %v6913_v56 = vsel %vm18565_vm7, %v18433_v19, 0.0  ;;  %v240_v48 = vadd.s32 320, %v17102_v55 }
 0x576   : > { %23076 = vst [vmem:[#allocation66_spill] sm:$0xff] %v23075_v6  ;;  %vm18632_vm13 = vmand %vm18598_vm10, %vm602_vm0  ;;  %vm480_vm10 = vcmp.ge.f32.partialorder %v18470_v53, 18.0  ;;  %vm521_vm0 = vcmp.lt.f32.partialorder %v18470_v53, 306.0  ;;  %v320_v51 = vmul.f32 0.055555556, %v18627_v49  ;;  %v23093_v5 = vmov 0 }
 0x577   : > { %vm18641_vm4 = vmand %vm18576_vm11, %vm23081_vm9  ;;  %vm522_vm11 = vcmp.lt.f32.partialorder %v18482_v44, 306.0  ;;  %v6952_v52 = vadd.f32 %v6951_v60, %v6912_v32  ;;  %v400_v10 = vmul.f32 18.0, %v359_v13  ;;  %v18689_v55 = vadd.f32 %v14444_v45, %v6604_v3  ;;  %v6607_v13 = vpop.f32.mrb[70].mxu0  ;;  %v14447_v32 = vld [vmem:[#allocation2 + $0x118] sm:$0xff] }
 0x578   : > { %v23083_v57 = vsel %vm18641_vm4, 4294967295, %v23082_v57  ;;  %vm18657_vm9 = vmand %vm18620_vm3, %vm683_vm15  ;;  %vm23092_vm3 = vcmp.lt.s32.totalorder %v17200_v12, 8  ;;  %v321_v42 = vmul.f32 0.055555556, %v18649_v34  ;;  %v401_v16 = vmul.f32 18.0, %v360_v43 }
 0x579   : > { %23084 = vst [vmem:[#allocation67_spill] sm:$0xff] %v23083_v57  ;;  %v23086_v36 = vsel %vm18657_vm9, 4294967295, %v23085_v36  ;;  %vm18666_vm14 = vmand %vm18632_vm13, %vm23088_vm1  ;;  %vm603_vm13 = vcmp.ge.f32.partialorder %v439_v8, 1.0  ;;  %v6953_v53 = vadd.f32 %v6952_v52, %v6913_v56  ;;  %v23101_v39 = vmov 0  ;;  %v14228_v56 = vpop.f32.mrb[71].mxu0 }
 0x57a   : > { %23087 = vst [vmem:[#allocation68_spill] sm:$0xff] %v23086_v36  ;;  %v23090_v20 = vsel %vm18666_vm14, 4294967295, %v23089_v20  ;;  %vm18679_vm15 = vmand %vm18583_vm12, %vm23092_vm3  ;;  %vm604_vm12 = vcmp.ge.f32.partialorder %v440_v25, 1.0  ;;  %v6914_v44 = vsel %vm18612_vm8, %v18460_v21, 0.0  ;;  %v18712_v3 = vadd.f32 %v14447_v32, %v6607_v13  ;;  %v6612_v13 = vpop.f32.mrb[72].mxu0 }
 0x57b   : > { %23091 = vst [vmem:[#allocation69_spill] sm:$0xff] %v23090_v20  ;;  %v23094_v5 = vsel %vm18679_vm15, 4294967295, %v23093_v5  ;;  %vm18685_vm1 = vmand %vm480_vm10, %vm521_vm0  ;;  %vm23100_vm10 = vcmp.lt.s32.totalorder %v17200_v12, 8  ;;  %v18714_v52 = vcvt.s32.f32 %v240_v48  ;;  %v361_v43 = vfloor.f32 %v320_v51  ;;  %v14453_v20 = vld [vmem:[#allocation2 + $0x128] sm:$0xff] }
 0x57c   : > { %23095 = vst [vmem:[#allocation70_spill] sm:$0xff] %v23094_v5  ;;  %vm18696_vm3 = vmand %vm481_vm5, %vm522_vm11  ;;  %vm685_vm5 = vcmp.le.f32.partialorder %v439_v8, 16.0  ;;  %v441_v45 = vsub.f32 %v18557_v26, %v400_v10  ;;  %v6915_v48 = vsel %vm18641_vm4, %v18525_v28, 0.0  ;;  %v362_v51 = vfloor.f32 %v321_v42 }
 0x57d   : > { %vm18704_vm0 = vmand %vm18657_vm9, %vm23100_vm10  ;;  %6709 = vst [vmem:[#allocation2 + $0x110] sm:$0xff] %v18689_v55  ;;  %vm686_vm9 = vcmp.le.f32.partialorder %v440_v25, 16.0  ;;  %vm23106_vm8 = vcmp.lt.s32.totalorder %v17200_v12, 8  ;;  %v23107_v8 = vmov 0  ;;  %v6954_v25 = vadd.f32 %v6953_v53, %v6914_v44 }
 0x57e   : > { %v23102_v39 = vsel %vm18704_vm0, 4294967295, %v23101_v39  ;;  %vm644_vm11 = vmand %vm18685_vm1, %vm603_vm13  ;;  %6710 = vst [vmem:[#allocation2 + $0x118] sm:$0xff] %v18712_v3  ;;  %vm482_vm1 = vcmp.ge.f32.partialorder %v18557_v26, 18.0  ;;  %vm523_vm13 = vcmp.lt.f32.partialorder %v18557_v26, 306.0  ;;  %v442_v10 = vsub.f32 %v18580_v9, %v401_v16  ;;  %v14450_v16 = vld [vmem:[#allocation2 + $0x120] sm:$0xff] }
 0x57f   : > { %23103 = vst [vmem:[#allocation71_spill] sm:$0xff] %v23102_v39  ;;  %vm18723_vm10 = vmand %vm18696_vm3, %vm604_vm12  ;;  %vm483_vm3 = vcmp.ge.f32.partialorder %v18580_v9, 18.0  ;;  %v23110_v35 = vmov 0  ;;  %v322_v42 = vmul.f32 0.055555556, %v18714_v52  ;;  %v402_v26 = vmul.f32 18.0, %v361_v43 }
 0x580   : > { %vm18737_vm12 = vmand %vm18666_vm14, %vm23106_vm8  ;;  %vm524_vm7 = vcmp.lt.f32.partialorder %v18580_v9, 306.0  ;;  %v23113_v60 = vmov 0  ;;  %v6955_v53 = vadd.f32 %v6954_v25, %v6915_v48  ;;  %v6916_v44 = vsel %vm18679_vm15, %v18550_v2, 0.0  ;;  %v14231_v43 = vpop.f32.mrb[73].mxu0 }
 0x581   : > { %v23108_v8 = vsel %vm18737_vm12, 4294967295, %v23107_v8  ;;  %vm18743_vm4 = vmand %vm644_vm11, %vm685_vm5  ;;  %vm605_vm11 = vcmp.ge.f32.partialorder %v441_v45, 1.0  ;;  %v18762_v56 = vadd.f32 %v14450_v16, %v6612_v13  ;;  %v403_v36 = vmul.f32 18.0, %v362_v51  ;;  %v6615_v25 = vpop.f32.mrb[74].mxu0 }
 0x582   : > { %23109 = vst [vmem:[#allocation72_spill] sm:$0xff] %v23108_v8  ;;  %v23111_v35 = vsel %vm18743_vm4, 4294967295, %v23110_v35  ;;  %vm18751_vm8 = vmand %vm18723_vm10, %vm686_vm9  ;;  %vm23118_vm9 = vcmp.lt.s32.totalorder %v17200_v12, 8  ;;  %v23119_v48 = vmov 0  ;;  %v6917_v51 = vsel %vm18704_vm0, %v18605_v22, 0.0  ;;  %v14232_v16 = vpop.f32.mrb[75].mxu0 }
 0x583   : > { %23112 = vst [vmem:[#allocation73_spill] sm:$0xff] %v23111_v35  ;;  %v23114_v60 = vsel %vm18751_vm8, 4294967295, %v23113_v60  ;;  %vm18755_vm14 = vmand %vm482_vm1, %vm523_vm13  ;;  %v18782_v13 = vadd.f32 %v14453_v20, %v6615_v25  ;;  %v363_v43 = vfloor.f32 %v322_v42  ;;  %v443_v35 = vsub.f32 %v18627_v49, %v402_v26  ;;  %v6620_v57 = vpop.f32.mrb[76].mxu0 }
 0x584   : > { %23115 = vst [vmem:[#allocation74_spill] sm:$0xff] %v23114_v60  ;;  %vm18768_vm5 = vmand %vm18743_vm4, %vm23118_vm9  ;;  %v6956_v9 = vadd.f32 %v6955_v53, %v6916_v44  ;;  %vm525_vm9 = vcmp.lt.f32.partialorder %v18627_v49, 306.0  ;;  %vm23124_vm13 = vcmp.lt.s32.totalorder %v17200_v12, 8  ;;  %v23125_v20 = vmov 0  ;;  %v14456_v44 = vld [vmem:[#allocation2 + $0x130] sm:$0xff] }
 0x585   : > { %v23120_v48 = vsel %vm18768_vm5, 4294967295, %v23119_v48  ;;  %vm18774_vm10 = vmand %vm483_vm3, %vm524_vm7  ;;  %6711 = vst [vmem:[#allocation2 + $0x120] sm:$0xff] %v18762_v56  ;;  %vm484_vm3 = vcmp.ge.f32.partialorder %v18627_v49, 18.0  ;;  %v444_v42 = vsub.f32 %v18649_v34, %v403_v36  ;;  %vm23128_vm4 = vcmp.ge.f32.partialorder %v442_v10, 1.0  ;;  %v14235_v36 = vpop.f32.mrb[77].mxu0 }
 0x586   : > { %23121 = vst [vmem:[#allocation75_spill] sm:$0xff] %v23120_v48  ;;  %vm646_vm7 = vmand %vm18755_vm14, %vm605_vm11  ;;  %vm688_vm11 = vcmp.le.f32.partialorder %v442_v10, 16.0  ;;  %v6957_v26 = vadd.f32 %v6956_v9, %v6917_v51  ;;  %vm485_vm0 = vcmp.ge.f32.partialorder %v18649_v34, 18.0  ;;  %vm526_vm15 = vcmp.lt.f32.partialorder %v18649_v34, 306.0  ;;  %v6623_v16 = vpop.f32.mrb[78].mxu0 }
 0x587   : > { %vm18794_vm1 = vmand %vm18751_vm8, %vm23124_vm13  ;;  %6712 = vst [vmem:[#allocation2 + $0x128] sm:$0xff] %v18782_v13  ;;  %vm23129_vm2 = vcmp.le.f32.partialorder %v441_v45, 16.0  ;;  %v23130_v49 = vmov 0  ;;  %v6918_v53 = vsel %vm18737_vm12, %v18625_v61, 0.0  ;;  %v404_v32 = vmul.f32 18.0, %v363_v43  ;;  %v14459_v43 = vld [vmem:[#allocation2 + $0x138] sm:$0xff] }
 0x588   : > { %v23126_v20 = vsel %vm18794_vm1, 4294967295, %v23125_v20  ;;  %vm647_vm14 = vmand %vm18774_vm10, %vm23128_vm4  ;;  %vm607_vm8 = vcmp.ge.f32.partialorder %v443_v35, 1.0  ;;  %v23133_v10 = vmov 0  ;;  %v6919_v34 = vsel %vm18768_vm5, %v18689_v55, 0.0  ;;  %v14236_v60 = vpop.f32.mrb[79].mxu0 }
 0x589   : > { %23127 = vst [vmem:[#allocation76_spill] sm:$0xff] %v23126_v20  ;;  %vm18806_vm6 = vmand %vm646_vm7, %vm23129_vm2  ;;  %v18820_v45 = vadd.f32 %v14456_v44, %v6620_v57  ;;  %vm608_vm10 = vcmp.ge.f32.partialorder %v444_v42, 1.0  ;;  %v6958_v51 = vadd.f32 %v6957_v26, %v6918_v53  ;;  %v18827_v9 = vadd.f32 %v14459_v43, %v6623_v16  ;;  %v6628_v44 = vpop.f32.mrb[104].mxu0  ;;  %v15571_v20 = vld [vmem:[%s22269_s2] sm:$0xff]  }
 0x58a   : > { %v23131_v49 = vsel %vm18806_vm6, 4294967295, %v23130_v49  ;;  %vm566_vm13 = vmand %vm484_vm3, %vm525_vm9  ;;  %vm689_vm3 = vcmp.le.f32.partialorder %v443_v35, 16.0  ;;  %v445_v48 = vsub.f32 %v18714_v52, %v404_v32  ;;  %vm23138_vm9 = vcmp.lt.s32.totalorder %v17200_v12, 8  ;;  %v14239_v25 = vpop.f32.mrb[105].mxu0 }
 0x58b   : > { %23132 = vst [vmem:[#allocation77_spill] sm:$0xff] %v23131_v49  ;;  %vm18813_vm4 = vmand %vm647_vm14, %vm688_vm11  ;;  %v23139_v57 = vmov 0  ;;  %v6959_v26 = vadd.f32 %v6958_v51, %v6919_v34  ;;  %v6920_v35 = vsel %vm18794_vm1, %v18712_v3, 0.0  ;;  %vm690_vm11 = vcmp.le.f32.partialorder %v444_v42, 16.0  ;;  %v6029_v42 = vld [vmem:[#allocation2 + $0x140] sm:$0xf] }
 0x58c   : > { %v23134_v10 = vsel %vm18813_vm4, 4294967295, %v23133_v10  ;;  %vm18822_vm2 = vmand %vm485_vm0, %vm526_vm15  ;;  %6713 = vst [vmem:[#allocation2 + $0x130] sm:$0xff] %v18820_v45  ;;  %vm486_vm0 = vcmp.ge.f32.partialorder %v18714_v52, 18.0  ;;  %v23142_v60 = vmov 0  ;;  %v23148_v34 = vmov 0  ;;  %v6631_v43 = vpop.f32.mrb[106].mxu0 }
 0x58d   : > { %23135 = vst [vmem:[#allocation78_spill] sm:$0xff] %v23134_v10  ;;  %vm648_vm7 = vmand %vm566_vm13, %vm607_vm8  ;;  %vm527_vm8 = vcmp.lt.f32.partialorder %v18714_v52, 306.0  ;;  %v23145_v52 = vmov 0  ;;  %v6960_v32 = vadd.f32 %v6959_v26, %v6920_v35  ;;  %v6674_v36 = vadd.f32 %v6628_v44, %v6029_v42  ;;  %v14240_v35 = vpop.f32.mrb[107].mxu0 }
 0x58e   : > { %vm18834_vm15 = vmand %vm18806_vm6, %vm23138_vm9  ;;  %6714 = vst [vmem:[#allocation2 + $0x138] sm:$0xff] %v18827_v9  ;;  %v23152_v51 = vmov 0  ;;  %v23156_v42 = vmov 0 }
 0x58f   : > { %v23140_v57 = vsel %vm18834_vm15, 4294967295, %v23139_v57  ;;  %vm649_vm14 = vmand %vm18822_vm2, %vm608_vm10  ;;  %v6921_v53 = vsel %vm18834_vm15, %v18762_v56, 0.0  ;;  %vm609_vm10 = vcmp.ge.f32.partialorder %v445_v48, 1.0  ;;  %6715 = vst [vmem:[#allocation2 + $0x140] sm:$0xf] %v6674_v36  ;;  %v23163_v36 = vmov 0 }
 0x590   : > { %23141 = vst [vmem:[#allocation79_spill] sm:$0xff] %v23140_v57  ;;  %vm18846_vm13 = vmand %vm648_vm7, %vm689_vm3  ;;  %v6961_v16 = vadd.f32 %v6960_v32, %v6921_v53 }
 0x591   : > { %v23143_v60 = vsel %vm18846_vm13, 4294967295, %v23142_v60  ;;  %vm18854_vm6 = vmand %vm18813_vm4, %vm23138_vm9 }
 0x592   : > { %23144 = vst [vmem:[#allocation80_spill] sm:$0xff] %v23143_v60  ;;  %v23146_v52 = vsel %vm18854_vm6, 4294967295, %v23145_v52  ;;  %vm568_vm2 = vmand %vm486_vm0, %vm527_vm8  ;;  %vm691_vm8 = vcmp.le.f32.partialorder %v445_v48, 16.0  ;;  %v6922_v26 = vsel %vm18854_vm6, %v18782_v13, 0.0  ;;  %v23159_v48 = vmov 0 }
 0x593   : > { %23147 = vst [vmem:[#allocation81_spill] sm:$0xff] %v23146_v52  ;;  %vm18861_vm7 = vmand %vm649_vm14, %vm690_vm11  ;;  %v6962_v32 = vadd.f32 %v6961_v16, %v6922_v26 }
 0x594   : > { %v23149_v34 = vsel %vm18861_vm7, 4294967295, %v23148_v34  ;;  %vm23151_vm3 = vmmov %vm23138_vm9 }
 0x595   : > { %23150 = vst [vmem:[#allocation82_spill] sm:$0xff] %v23149_v34  ;;  %vm18869_vm9 = vmand %vm18846_vm13, %vm23151_vm3 }
 0x596   : > { %v23153_v51 = vsel %vm18869_vm9, 4294967295, %v23152_v51  ;;  %vm650_vm0 = vmand %vm568_vm2, %vm609_vm10  ;;  %v6923_v53 = vsel %vm18869_vm9, %v18820_v45, 0.0  ;;  %v18902_v43 = vld [vmem:[#allocation2 + $0x140] sm:$0xf] }
 0x597   : > { %23154 = vst [vmem:[#allocation83_spill] sm:$0xff] %v23153_v51  ;;  %vm23155_vm14 = vmmov %vm23151_vm3  ;;  %v6963_v44 = vadd.f32 %v6962_v32, %v6923_v53  ;;  %v16008_v51 = vld [vmem:[#allocation2] sm:$0xff] }
 0x598   : > { %vm18880_vm11 = vmand %vm18861_vm7, %vm23155_vm14  ;;  %vm22451_vm14 = vcmask 1043456  }
 0x599   : > { %v23157_v42 = vsel %vm18880_vm11, 4294967295, %v23156_v42  ;;  %vm18887_vm2 = vmand %vm650_vm0, %vm691_vm8  ;;  %v6924_v25 = vsel %vm18880_vm11, %v18827_v9, 0.0  ;;  %vm23167_vm0 = vnez %v22695_v37  ;;  %vm23168_vm8 = vnez %v22687_v17 }
 0x59a   : > { %23158 = vst [vmem:[#allocation84_spill] sm:$0xff] %v23157_v42  ;;  %v23160_v48 = vsel %vm18887_vm2, 4294967295, %v23159_v48  ;;  %vm23162_vm10 = vmmov %vm23151_vm3  ;;  %v6964_v26 = vadd.f32 %v6963_v44, %v6924_v25  ;;  %v16009_v44 = vld [vmem:[#allocation2 + $0x8] sm:$0xff] }
 0x59b   : > { %23161 = vst [vmem:[#allocation85_spill] sm:$0xff] %v23160_v48  ;;  %vm18895_vm3 = vmand %vm18887_vm2, %vm23162_vm10  ;;  %vm23169_vm10 = vnez %v22698_v38 }
 0x59c   : > { %v23164_v36 = vsel %vm18895_vm3, 4294967295, %v23163_v36  ;;  %v6925_v16 = vsel %vm18895_vm3, %v18902_v43, 0.0 }
 0x59d   : > { %23165 = vst [vmem:[#allocation86_spill] sm:$0xff] %v23164_v36  ;;  %v6966_v12 = vsel %vm22451_vm14, %v6925_v16, 0.0  ;;  %v16010_v16 = vld [vmem:[#allocation2 + $0x10] sm:$0xff]  ;;  %vm23170_vm14 = vnez %v22714_v59 }
 0x59e   : > { %v6967_v35 = vadd.f32 %v6966_v12, %v6964_v26  ;;  %v16012_v12 = vld [vmem:[#allocation2 + $0x20] sm:$0xff] }
 0x5a0   : > { %6968 = vadd.xlane.f32.xlu0 %v6967_v35 }
 0x62d   : > { %v6969_v53 = vpop.xlane.xlu0 %6968 }
 0x62e   : > { %v6970_v32 = vrot.slane %v6969_v53, 4 }
 0x630   : > { %v6971_v48 = vadd.f32 %v6970_v32, %v6969_v53  ;;  %v16013_v32 = vld [vmem:[#allocation2 + $0x28] sm:$0xff] }
 0x632   : > { %v6972_v34 = vrot.slane %v6971_v48, 2 }
 0x634   : > { %v6973_v60 = vadd.f32 %v6972_v34, %v6971_v48 }
 0x636   : > { %v6974_v10 = vrot.slane %v6973_v60, 1 }
 0x638   : > { %v6975_v49 = vadd.f32 %v6974_v10, %v6973_v60  ;;  %v16011_v60 = vld [vmem:[#allocation2 + $0x18] sm:$0xff] }
 0x63a   : > { %15359 = vpush %v6975_v49 }
 0x66b   : > { %s15360_s13 = spop %15359 }
 0x66c   : > { %s6977_s14 = smul.f32 0.00048828125, %s15360_s13 }
 0x66e   : > { %v18908_v42 = vstv %s6977_s14 }
 0x66f   : > { %v18911_v36 = vsub.f32 %v16008_v51, %v18908_v42  ;;  %v18914_v25 = vsub.f32 %v16009_v44, %v18908_v42  ;;  %v18917_v26 = vsub.f32 %v16010_v16, %v18908_v42  ;;  %v18926_v34 = vsub.f32 %v16011_v60, %v18908_v42 }
 0x670   : > { %v18929_v35 = vsub.f32 %v16012_v12, %v18908_v42  ;;  %v18935_v44 = vsub.f32 %v16013_v32, %v18908_v42 }
 0x671   : > { %23166 = vst [vmem:[#allocation87_spill] sm:$0xff] %v18917_v26  ;;  %v7020_v49 = vsel %vm23167_vm0, %v18911_v36, 0.0  ;;  %v7021_v10 = vsel %vm23168_vm8, %v18914_v25, 0.0  ;;  %v7022_v53 = vsel %vm23169_vm10, %v18917_v26, 0.0  ;;  %v7023_v16 = vsel %vm23170_vm14, %v18926_v34, 0.0  ;;  %v16015_v26 = vld [vmem:[#allocation2 + $0x38] sm:$0xff] }
 0x672   : > { %v7061_v51 = vmul.f32 %v7020_v49, %v7020_v49  ;;  %v7062_v48 = vmul.f32 %v7021_v10, %v7021_v10  ;;  %v7063_v60 = vmul.f32 %v7022_v53, %v7022_v53  ;;  %v16014_v49 = vld [vmem:[#allocation2 + $0x30] sm:$0xff]  ;;  %vm23171_vm8 = vnez %v22724_v54 }
 0x673   : > { %v18941_v10 = vsub.f32 %v16014_v49, %v18908_v42  ;;  %v7024_v12 = vsel %vm23171_vm8, %v18929_v35, 0.0  ;;  %v7064_v38 = vmul.f32 %v7023_v16, %v7023_v16  ;;  %v18947_v32 = vsub.f32 %v16015_v26, %v18908_v42 }
 0x674   : > { %v7102_v17 = vadd.f32 %v7062_v48, %v7061_v51  ;;  %vm23172_vm10 = vnez %v22743_v62  ;;  %v7065_v53 = vmul.f32 %v7024_v12, %v7024_v12  ;;  %v16016_v48 = vld [vmem:[#allocation2 + $0x40] sm:$0xff]  ;;  %vm23173_vm14 = vnez %v22754_v58 }
 0x675   : > { %v7025_v59 = vsel %vm23172_vm10, %v18935_v44, 0.0  ;;  %v18953_v49 = vsub.f32 %v16016_v48, %v18908_v42  ;;  %v7026_v54 = vsel %vm23173_vm14, %v18941_v10, 0.0  ;;  %vm23174_vm8 = vnez %v22772_v15 }
 0x676   : > { %v7103_v37 = vadd.f32 %v7102_v17, %v7063_v60  ;;  %v7066_v16 = vmul.f32 %v7025_v59, %v7025_v59  ;;  %v16017_v60 = vld [vmem:[#allocation2 + $0x48] sm:$0xff]  ;;  %v7027_v62 = vsel %vm23174_vm8, %v18947_v32, 0.0  ;;  %v7067_v12 = vmul.f32 %v7026_v54, %v7026_v54 }
 0x677   : > { %v18959_v26 = vsub.f32 %v16017_v60, %v18908_v42  ;;  %vm23175_vm10 = vnez %v22783_v27  ;;  %v7068_v59 = vmul.f32 %v7027_v62, %v7027_v62  ;;  %vm23176_vm14 = vnez %v22801_v33 }
 0x678   : > { %v7104_v51 = vadd.f32 %v7103_v37, %v7064_v38  ;;  %v16018_v38 = vld [vmem:[#allocation2 + $0x50] sm:$0xff]  ;;  %v7028_v58 = vsel %vm23175_vm10, %v18953_v49, 0.0  ;;  %vm23177_vm8 = vnez %v22811_v50  ;;  %vm23178_vm10 = vnez %v22830_v63 }
 0x679   : > { %v18965_v48 = vsub.f32 %v16018_v38, %v18908_v42  ;;  %v7029_v15 = vsel %vm23176_vm14, %v18959_v26, 0.0  ;;  %v7069_v54 = vmul.f32 %v7028_v58, %v7028_v58  ;;  %vm23179_vm14 = vnez %v22842_v30 }
 0x67a   : > { %v7105_v17 = vadd.f32 %v7104_v51, %v7065_v53  ;;  %v16019_v51 = vld [vmem:[#allocation2 + $0x58] sm:$0xff]  ;;  %v7070_v62 = vmul.f32 %v7029_v15, %v7029_v15 }
 0x67b   : > { %v18971_v60 = vsub.f32 %v16019_v51, %v18908_v42  ;;  %v7030_v27 = vsel %vm23177_vm8, %v18965_v48, 0.0  ;;  %vm23180_vm8 = vnez %v22860_v40 }
 0x67c   : > { %v7106_v37 = vadd.f32 %v7105_v17, %v7066_v16  ;;  %v16020_v17 = vld [vmem:[#allocation2 + $0x60] sm:$0xff]  ;;  %v7071_v58 = vmul.f32 %v7030_v27, %v7030_v27 }
 0x67d   : > { %v18977_v38 = vsub.f32 %v16020_v17, %v18908_v42  ;;  %v7031_v33 = vsel %vm23178_vm10, %v18971_v60, 0.0  ;;  %vm23181_vm10 = vnez %v22871_v11 }
 0x67e   : > { %v7107_v53 = vadd.f32 %v7106_v37, %v7067_v12  ;;  %v16021_v37 = vld [vmem:[#allocation2 + $0x68] sm:$0xff]  ;;  %v7072_v15 = vmul.f32 %v7031_v33, %v7031_v33 }
 0x67f   : > { %v18983_v51 = vsub.f32 %v16021_v37, %v18908_v42  ;;  %v7032_v50 = vsel %vm23179_vm14, %v18977_v38, 0.0  ;;  %vm23182_vm14 = vnez %v22888_v29 }
 0x680   : > { %v7108_v16 = vadd.f32 %v7107_v53, %v7068_v59  ;;  %v16022_v53 = vld [vmem:[#allocation2 + $0x70] sm:$0xff]  ;;  %v7073_v27 = vmul.f32 %v7032_v50, %v7032_v50 }
 0x681   : > { %v18989_v17 = vsub.f32 %v16022_v53, %v18908_v42  ;;  %v7033_v63 = vsel %vm23180_vm8, %v18983_v51, 0.0  ;;  %vm23183_vm8 = vnez %v22899_v0 }
 0x682   : > { %v7109_v12 = vadd.f32 %v7108_v16, %v7069_v54  ;;  %v16023_v16 = vld [vmem:[#allocation2 + $0x78] sm:$0xff]  ;;  %v7074_v33 = vmul.f32 %v7033_v63, %v7033_v63 }
 0x683   : > { %v18995_v37 = vsub.f32 %v16023_v16, %v18908_v42  ;;  %v7034_v30 = vsel %vm23181_vm10, %v18989_v17, 0.0  ;;  %vm23184_vm10 = vnez %v22917_v24 }
 0x684   : > { %v7110_v59 = vadd.f32 %v7109_v12, %v7070_v62  ;;  %v16024_v12 = vld [vmem:[#allocation2 + $0x80] sm:$0xff]  ;;  %v7075_v50 = vmul.f32 %v7034_v30, %v7034_v30 }
 0x685   : > { %v19001_v53 = vsub.f32 %v16024_v12, %v18908_v42  ;;  %v7035_v40 = vsel %vm23182_vm14, %v18995_v37, 0.0  ;;  %vm23185_vm14 = vnez %v22927_v47  ;;  %v23193_v47 = vld [vmem:[#allocation54_spill] sm:$0xff] }
 0x686   : > { %v7111_v54 = vadd.f32 %v7110_v59, %v7071_v58  ;;  %v16025_v59 = vld [vmem:[#allocation2 + $0x88] sm:$0xff]  ;;  %v7076_v63 = vmul.f32 %v7035_v40, %v7035_v40 }
 0x687   : > { %v19007_v16 = vsub.f32 %v16025_v59, %v18908_v42  ;;  %v7036_v11 = vsel %vm23183_vm8, %v19001_v53, 0.0  ;;  %vm23186_vm8 = vnez %v22944_v46 }
 0x688   : > { %v7112_v62 = vadd.f32 %v7111_v54, %v7072_v15  ;;  %v16026_v54 = vld [vmem:[#allocation2 + $0x90] sm:$0xff]  ;;  %v7077_v30 = vmul.f32 %v7036_v11, %v7036_v11 }
 0x689   : > { %v19013_v12 = vsub.f32 %v16026_v54, %v18908_v42  ;;  %v7037_v29 = vsel %vm23184_vm10, %v19007_v16, 0.0  ;;  %vm23187_vm10 = vnez %v22955_v14 }
 0x68a   : > { %v7113_v58 = vadd.f32 %v7112_v62, %v7073_v27  ;;  %v16027_v62 = vld [vmem:[#allocation2 + $0x98] sm:$0xff]  ;;  %v7078_v40 = vmul.f32 %v7037_v29, %v7037_v29 }
 0x68b   : > { %v19019_v59 = vsub.f32 %v16027_v62, %v18908_v42  ;;  %v7038_v0 = vsel %vm23185_vm14, %v19013_v12, 0.0 }
 0x68c   : > { %v7114_v15 = vadd.f32 %v7113_v58, %v7074_v33  ;;  %v16028_v58 = vld [vmem:[#allocation2 + $0xa0] sm:$0xff]  ;;  %v7079_v11 = vmul.f32 %v7038_v0, %v7038_v0 }
 0x68d   : > { %v19025_v54 = vsub.f32 %v16028_v58, %v18908_v42  ;;  %v7039_v62 = vsel %vm23186_vm8, %v19019_v59, 0.0 }
 0x68e   : > { %v7115_v27 = vadd.f32 %v7114_v15, %v7075_v50  ;;  %v19032_v15 = vsub.f32 %v17998_v23, %v18908_v42  ;;  %v7080_v29 = vmul.f32 %v7039_v62, %v7039_v62  ;;  %v19046_v23 = vsub.f32 %v18126_v31, %v18908_v42 }
 0x68f   : > { %v7040_v58 = vsel %vm23187_vm10, %v19025_v54, 0.0  ;;  %vm23194_vm10 = vnez %v23193_v47 }
 0x690   : > { %v7116_v33 = vadd.f32 %v7115_v27, %v7076_v63  ;;  %v19039_v27 = vsub.f32 %v18090_v18, %v18908_v42  ;;  %v7081_v0 = vmul.f32 %v7040_v58, %v7040_v58  ;;  %v19053_v18 = vsub.f32 %v18215_v4, %v18908_v42 }
 0x691   : > { %v19067_v4 = vsub.f32 %v18332_v7, %v18908_v42  ;;  %v19081_v7 = vsub.f32 %v18433_v19, %v18908_v42  ;;  %v19095_v19 = vsub.f32 %v18525_v28, %v18908_v42  ;;  %v19109_v28 = vsub.f32 %v18605_v22, %v18908_v42 }
 0x692   : > { %v7117_v50 = vadd.f32 %v7116_v33, %v7077_v30  ;;  %v23188_v33 = vld [vmem:[#allocation50_spill] sm:$0xff]  ;;  %v19123_v22 = vsub.f32 %v18689_v55, %v18908_v42  ;;  %v19137_v55 = vsub.f32 %v18762_v56, %v18908_v42  ;;  %v19151_v56 = vsub.f32 %v18820_v45, %v18908_v42 }
 0x693   : > { %vm23189_vm14 = vnez %v23188_v33  ;;  %v7043_v33 = vsel %vm23194_vm10, %v19046_v23, 0.0 }
 0x694   : > { %v7118_v63 = vadd.f32 %v7117_v50, %v7078_v40  ;;  %v7041_v46 = vsel %vm23189_vm14, %v19032_v15, 0.0  ;;  %v23190_v50 = vld [vmem:[#allocation51_spill] sm:$0xff]  ;;  %v7058_v57 = vsel %vm18869_vm9, %v19151_v56, 0.0 }
 0x695   : > { %vm23191_vm8 = vnez %v23190_v50  ;;  %v7082_v62 = vmul.f32 %v7041_v46, %v7041_v46  ;;  %v7084_v46 = vmul.f32 %v7043_v33, %v7043_v33 }
 0x696   : > { %v7119_v30 = vadd.f32 %v7118_v63, %v7079_v11  ;;  %v7042_v14 = vsel %vm23191_vm8, %v19039_v27, 0.0  ;;  %v23192_v63 = vld [vmem:[#allocation48_spill] sm:$0xff] }
 0x697   : > { %v19060_v31 = vsub.f32 %v23192_v63, %v18908_v42  ;;  %v7083_v58 = vmul.f32 %v7042_v14, %v7042_v14  ;;  %v23197_v63 = vld [vmem:[#allocation58_spill] sm:$0xff] }
 0x698   : > { %v7120_v40 = vadd.f32 %v7119_v30, %v7080_v29  ;;  %v23195_v30 = vld [vmem:[#allocation56_spill] sm:$0xff]  ;;  %vm23198_vm8 = vnez %v23197_v63 }
 0x699   : > { %vm23196_vm14 = vnez %v23195_v30  ;;  %v7045_v47 = vsel %vm23198_vm8, %v19060_v31, 0.0 }
 0x69a   : > { %v7121_v11 = vadd.f32 %v7120_v40, %v7081_v0  ;;  %v7044_v50 = vsel %vm23196_vm14, %v19053_v18, 0.0  ;;  %v19074_v40 = vsub.f32 %v18357_v41, %v18908_v42  ;;  %v7086_v33 = vmul.f32 %v7045_v47, %v7045_v47 }
 0x69b   : > { %v7085_v14 = vmul.f32 %v7044_v50, %v7044_v50  ;;  %v19088_v41 = vsub.f32 %v18460_v21, %v18908_v42  ;;  %vm23201_vm14 = vnez %v23051_v1  ;;  %v19102_v21 = vsub.f32 %v18550_v2, %v18908_v42 }
 0x69c   : > { %v7122_v29 = vadd.f32 %v7121_v11, %v7082_v62  ;;  %v23199_v11 = vld [vmem:[#allocation60_spill] sm:$0xff]  ;;  %v19116_v2 = vsub.f32 %v18625_v61, %v18908_v42  ;;  %v19130_v61 = vsub.f32 %v18712_v3, %v18908_v42  ;;  %v19144_v3 = vsub.f32 %v18782_v13, %v18908_v42 }
 0x69d   : > { %vm23200_vm10 = vnez %v23199_v11 }
 0x69e   : > { %v7123_v0 = vadd.f32 %v7122_v29, %v7083_v58  ;;  %v7046_v30 = vsel %vm23200_vm10, %v19067_v4, 0.0  ;;  %v7047_v29 = vsel %vm23201_vm14, %v19074_v40, 0.0  ;;  %vm23204_vm10 = vnez %v23075_v6 }
 0x69f   : > { %v7087_v50 = vmul.f32 %v7046_v30, %v7046_v30  ;;  %v7088_v47 = vmul.f32 %v7047_v29, %v7047_v29 }
 0x6a0   : > { %v7124_v62 = vadd.f32 %v7123_v0, %v7084_v46  ;;  %v23202_v0 = vld [vmem:[#allocation63_spill] sm:$0xff] }
 0x6a1   : > { %vm23203_vm8 = vnez %v23202_v0 }
 0x6a2   : > { %v7125_v58 = vadd.f32 %v7124_v62, %v7085_v14  ;;  %v7048_v11 = vsel %vm23203_vm8, %v19081_v7, 0.0  ;;  %v7049_v62 = vsel %vm23204_vm10, %v19088_v41, 0.0  ;;  %vm23207_vm8 = vnez %v23094_v5 }
 0x6a3   : > { %v7089_v30 = vmul.f32 %v7048_v11, %v7048_v11  ;;  %v7090_v29 = vmul.f32 %v7049_v62, %v7049_v62  ;;  %vm23208_vm10 = vnez %v23102_v39  ;;  %v7054_v39 = vsel %vm18768_vm5, %v19123_v22, 0.0 }
 0x6a4   : > { %v7126_v46 = vadd.f32 %v7125_v58, %v7086_v33  ;;  %v23205_v58 = vld [vmem:[#allocation67_spill] sm:$0xff] }
 0x6a5   : > { %vm23206_vm14 = vnez %v23205_v58 }
 0x6a6   : > { %v7127_v14 = vadd.f32 %v7126_v46, %v7087_v50  ;;  %v7050_v0 = vsel %vm23206_vm14, %v19095_v19, 0.0  ;;  %v7051_v46 = vsel %vm23207_vm8, %v19102_v21, 0.0 }
 0x6a7   : > { %v7091_v11 = vmul.f32 %v7050_v0, %v7050_v0  ;;  %v7092_v62 = vmul.f32 %v7051_v46, %v7051_v46 }
 0x6a8   : > { %v7128_v33 = vadd.f32 %v7127_v14, %v7088_v47  ;;  %v7052_v14 = vsel %vm23208_vm10, %v19109_v28, 0.0 }
 0x6a9   : > { %v7093_v0 = vmul.f32 %v7052_v14, %v7052_v14  ;;  %v7095_v14 = vmul.f32 %v7054_v39, %v7054_v39  ;;  %v7057_v39 = vsel %vm18854_vm6, %v19144_v3, 0.0  ;;  %vm23213_vm6 = vcmask 1043456  }
 0x6aa   : > { %v7129_v50 = vadd.f32 %v7128_v33, %v7089_v30  ;;  %v7053_v33 = vsel %vm18737_vm12, %v19116_v2, 0.0 }
 0x6ab   : > { %v7094_v46 = vmul.f32 %v7053_v33, %v7053_v33  ;;  %v19158_v33 = vsub.f32 %v18902_v43, %v18908_v42 }
 0x6ac   : > { %v7130_v47 = vadd.f32 %v7129_v50, %v7090_v29 }
 0x6ad   : > { %v7060_v43 = vsel %vm18895_vm3, %v19158_v33, 0.0 }
 0x6ae   : > { %v7131_v30 = vadd.f32 %v7130_v47, %v7091_v11  ;;  %v7055_v47 = vsel %vm18794_vm1, %v19130_v61, 0.0  ;;  %v7101_v52 = vmul.f32 %v7060_v43, %v7060_v43  ;;  %v15580_v43 = vld [vmem:[%s22269_s2 + $0x48] sm:$0xff]  }
 0x6af   : > { %v7096_v13 = vmul.f32 %v7055_v47, %v7055_v47  ;;  %v7098_v47 = vmul.f32 %v7057_v39, %v7057_v39  ;;  %v22505_v39 = vmov 0  }
 0x6b0   : > { %v7132_v29 = vadd.f32 %v7131_v30, %v7092_v62  ;;  %v7056_v30 = vsel %vm18834_vm15, %v19137_v55, 0.0  ;;  %10418 = vmatprep.subr.bf16.mxu1 %v22505_v39  ;;  %7580 = vst [vmem:[#allocation3 + $0x8] sm:$0xf] %v22505_v39  ;;  %7581 = vst [vmem:[#allocation3 + $0xc] sm:$0xf] %v22505_v39 }
 0x6b1   : > { %v7097_v45 = vmul.f32 %v7056_v30, %v7056_v30  ;;  %7582 = vst [vmem:[#allocation3 + $0x10] sm:$0x3] %v22505_v39  ;;  %7583 = vst [vmem:[#allocation3 + $0xb4] sm:$0xf] %v22505_v39  ;;  %10419 = vmatpush1.bf16.msra.mxu1 %v15571_v20  ;;  %v15575_v20 = vld [vmem:[%s22269_s2 + $0x20] sm:$0xff]  }
 0x6b2   : > { %v7133_v11 = vadd.f32 %v7132_v29, %v7093_v0  ;;  %v19162_v29 = vsub.f32 %v18827_v9, %v18908_v42  ;;  %v7099_v42 = vmul.f32 %v7058_v57, %v7058_v57  ;;  %7584 = vst [vmem:[#allocation3 + $0xb8] sm:$0xf] %v22505_v39  ;;  %7585 = vst [vmem:[#allocation3 + $0xbc] sm:$0xf] %v22505_v39  ;;  %10420 = vmatprep.subr.bf16.mxu1 %v22505_v39  ;;  %v15573_v57 = vld [vmem:[%s22269_s2 + $0x10] sm:$0xff]  }
 0x6b4   : > { %v7134_v62 = vadd.f32 %v7133_v11, %v7094_v46  ;;  %v7059_v9 = vsel %vm18880_vm11, %v19162_v29, 0.0 }
 0x6b5   : > { %v7100_v8 = vmul.f32 %v7059_v9, %v7059_v9 }
 0x6b6   : > { %v7135_v0 = vadd.f32 %v7134_v62, %v7095_v14 }
 0x6b8   : > { %v7136_v46 = vadd.f32 %v7135_v0, %v7096_v13  ;;  %v7141_v0 = vsel %vm23213_vm6, %v7101_v52, 0.0  ;;  %v15574_v52 = vld [vmem:[%s22269_s2 + $0x18] sm:$0xff]  }
 0x6ba   : > { %v7137_v14 = vadd.f32 %v7136_v46, %v7097_v45  ;;  %v15577_v45 = vld [vmem:[%s22269_s2 + $0x30] sm:$0xff]   ;;  %v15578_v46 = vld [vmem:[%s22269_s2 + $0x38] sm:$0xff]  }
 0x6bc   : > { %v7138_v50 = vadd.f32 %v7137_v14, %v7098_v47 }
 0x6be   : > { %v7139_v30 = vadd.f32 %v7138_v50, %v7099_v42  ;;  %v15576_v50 = vld [vmem:[%s22269_s2 + $0x28] sm:$0xff]  }
 0x6c0   : > { %v7140_v13 = vadd.f32 %v7139_v30, %v7100_v8  ;;  %v15572_v8 = vld [vmem:[%s22269_s2 + $0x8] sm:$0xff]  }
 0x6c1   : > { %10421 = vmatpush1.bf16.msra.mxu1 %v15572_v8 }
 0x6c2   : > { %v7142_v11 = vadd.f32 %v7141_v0, %v7140_v13  ;;  %10422 = vmatprep.subr.bf16.mxu1 %v22505_v39 }
 0x6c4   : > { %7143 = vadd.xlane.f32.xlu0 %v7142_v11  ;;  %v15579_v11 = vld [vmem:[%s22269_s2 + $0x40] sm:$0xff]  }
 0x6c5   : > { %10423 = vmatpush1.bf16.msra.mxu1 %v15573_v57 }
 0x6c6   : > { %10424 = vmatprep.subr.bf16.mxu1 %v22505_v39 }
 0x6c9   : > { %10425 = vmatpush1.bf16.msra.mxu1 %v15574_v52 }
 0x6ca   : > { %10426 = vmatprep.subr.bf16.mxu1 %v22505_v39 }
 0x6cd   : > { %10427 = vmatpush1.bf16.msra.mxu1 %v15575_v20 }
 0x6ce   : > { %10428 = vmatprep.subr.bf16.mxu1 %v22505_v39 }
 0x6d1   : > { %10429 = vmatpush1.bf16.msra.mxu1 %v15576_v50 }
 0x6d2   : > { %10430 = vmatprep.subr.bf16.mxu1 %v22505_v39 }
 0x6d5   : > { %10431 = vmatpush1.bf16.msra.mxu1 %v15577_v45  ;;  %v23214_v45 = vld [vmem:[#allocation87_spill] sm:$0xff] }
 0x6d6   : > { %10432 = vmatprep.subr.bf16.mxu1 %v22505_v39 }
 0x6d9   : > { %10433 = vmatpush1.bf16.msra.mxu1 %v15578_v46 }
 0x6da   : > { %10434 = vmatprep.subr.bf16.mxu1 %v22505_v39 }
 0x6dd   : > { %10435 = vmatpush1.bf16.msra.mxu1 %v15579_v11 }
 0x6de   : > { %10436 = vmatprep.subr.bf16.mxu1 %v22505_v39 }
 0x6e1   : > { %10437 = vmatpush1.bf16.msra.mxu1 %v15580_v43 }
 0x6e2   : > { %10438 = vmatprep.subr.bf16.mxu1 %v22505_v39 }
 0x751   : > { %v7144_v47 = vpop.xlane.xlu0 %7143 }
 0x752   : > { %v7145_v14 = vrot.slane %v7144_v47, 4 }
 0x754   : > { %v7146_v9 = vadd.f32 %v7145_v14, %v7144_v47 }
 0x756   : > { %v7147_v42 = vrot.slane %v7146_v9, 2 }
 0x758   : > { %v7148_v30 = vadd.f32 %v7147_v42, %v7146_v9 }
 0x75a   : > { %v7149_v13 = vrot.slane %v7148_v30, 1 }
 0x75c   : > { %v7150_v0 = vadd.f32 %v7149_v13, %v7148_v30 }
 0x75e   : > { %15361 = vpush %v7150_v0 }
 0x78f   : > { %s15362_s11 = spop %15361 }
 0x790   : > { %s7152_s12 = smul.f32 0.00048828125, %s15362_s11  ;;  %s22142_s11 = scalar_lea.vmem %s22271_s4, %s15358_s9 }
 0x792   : > { %s7153_s13 = sadd.f32 1e-05, %s7152_s12 }
 0x794   : > { %v7154_v8 = vstv %s7153_s13 }
 0x795   : > { %15676 = vrsqrt.f32 %v7154_v8 }
 0x79f   : > { %v15677_v57 = vpop.eup %15676 }
 0x7a0   : > { %15363 = vpush %v15677_v57 }
 0x7d1   : > { %s15364_s14 = spop %15363 }
 0x7d2   : > { %v7159_v52 = vstv %s15364_s14 }
 0x7d3   : > { %v7160_v20 = vmul.f32 %v7159_v52, %v18911_v36  ;;  %v7161_v50 = vmul.f32 %v7159_v52, %v18914_v25  ;;  %v7162_v46 = vmul.f32 %v7159_v52, %v23214_v45  ;;  %v7163_v11 = vmul.f32 %v7159_v52, %v18926_v34 }
 0x7d4   : > { %v7164_v43 = vmul.f32 %v7159_v52, %v18929_v35  ;;  %v7165_v47 = vmul.f32 %v7159_v52, %v18935_v44  ;;  %v7166_v14 = vmul.f32 %v7159_v52, %v18941_v10  ;;  %v7167_v9 = vmul.f32 %v7159_v52, %v18947_v32 }
 0x7d5   : > { %v7168_v42 = vmul.f32 %v7159_v52, %v18953_v49  ;;  %v7169_v30 = vmul.f32 %v7159_v52, %v18959_v26  ;;  %v7170_v36 = vmul.f32 %v7159_v52, %v18965_v48  ;;  %v7171_v25 = vmul.f32 %v7159_v52, %v18971_v60 }
 0x7d6   : > { %v7172_v13 = vmul.f32 %v7159_v52, %v18977_v38  ;;  %v7173_v34 = vmul.f32 %v7159_v52, %v18983_v51  ;;  %v7174_v35 = vmul.f32 %v7159_v52, %v18989_v17  ;;  %v7175_v44 = vmul.f32 %v7159_v52, %v18995_v37 }
 0x7d7   : > { %v7176_v10 = vmul.f32 %v7159_v52, %v19001_v53  ;;  %v7177_v32 = vmul.f32 %v7159_v52, %v19007_v16  ;;  %v7178_v49 = vmul.f32 %v7159_v52, %v19013_v12  ;;  %v7179_v26 = vmul.f32 %v7159_v52, %v19019_v59  ;;  %v19254_v16 = vld [vmem:[%s22270_s3] ss:$0 sm:$0xff] }
 0x7d8   : > { %v7180_v48 = vmul.f32 %v7159_v52, %v19025_v54  ;;  %v7181_v60 = vmul.f32 %v7159_v52, %v19032_v15  ;;  %v7182_v38 = vmul.f32 %v7159_v52, %v19039_v27  ;;  %v7183_v51 = vmul.f32 %v7159_v52, %v19046_v23 }
 0x7d9   : > { %v7184_v17 = vmul.f32 %v7159_v52, %v19053_v18  ;;  %v7185_v37 = vmul.f32 %v7159_v52, %v19060_v31  ;;  %v7186_v53 = vmul.f32 %v7159_v52, %v19067_v4  ;;  %v7187_v12 = vmul.f32 %v7159_v52, %v19074_v40 }
 0x7da   : > { %v7188_v59 = vmul.f32 %v7159_v52, %v19081_v7  ;;  %v7189_v54 = vmul.f32 %v7159_v52, %v19088_v41  ;;  %v7190_v15 = vmul.f32 %v7159_v52, %v19095_v19  ;;  %v7191_v27 = vmul.f32 %v7159_v52, %v19102_v21 }
 0x7db   : > { %v7192_v23 = vmul.f32 %v7159_v52, %v19109_v28  ;;  %v7193_v18 = vmul.f32 %v7159_v52, %v19116_v2  ;;  %v7194_v31 = vmul.f32 %v7159_v52, %v19123_v22  ;;  %v7195_v4 = vmul.f32 %v7159_v52, %v19130_v61 }
 0x7dc   : > { %v7196_v0 = vmul.f32 %v7159_v52, %v19137_v55  ;;  %v7197_v40 = vmul.f32 %v7159_v52, %v19144_v3  ;;  %v7198_v7 = vmul.f32 %v7159_v52, %v19151_v56  ;;  %v7199_v41 = vmul.f32 %v7159_v52, %v19162_v29 }
 0x7dd   : > { %v7200_v19 = vmul.f32 %v7159_v52, %v19158_v33  ;;  %v7205_v21 = vmul.f32 %v19254_v16, %v7160_v20  ;;  %v7206_v28 = vmul.f32 %v19254_v16, %v7161_v50  ;;  %v7207_v2 = vmul.f32 %v19254_v16, %v7162_v46  ;;  %v19287_v50 = vld [vmem:[%s22270_s3 + $0x1] ss:$0 sm:$0xff] }
 0x7de   : > { %v7208_v22 = vmul.f32 %v19254_v16, %v7163_v11  ;;  %v7209_v61 = vmul.f32 %v19254_v16, %v7164_v43  ;;  %v7210_v55 = vmul.f32 %v19254_v16, %v7165_v47  ;;  %v7211_v3 = vmul.f32 %v19254_v16, %v7166_v14 }
 0x7df   : > { %v7212_v56 = vmul.f32 %v19254_v16, %v7167_v9  ;;  %v7213_v29 = vmul.f32 %v19254_v16, %v7168_v42  ;;  %v7214_v33 = vmul.f32 %v19254_v16, %v7169_v30  ;;  %v7215_v8 = vmul.f32 %v19254_v16, %v7170_v36 }
 0x7e0   : > { %v7216_v57 = vmul.f32 %v19254_v16, %v7171_v25  ;;  %v7217_v52 = vmul.f32 %v19254_v16, %v7172_v13  ;;  %v7218_v20 = vmul.f32 %v19254_v16, %v7173_v34  ;;  %v7219_v45 = vmul.f32 %v19254_v16, %v7174_v35 }
 0x7e1   : > { %v19291_v46 = vmul.f32 %v19254_v16, %v7175_v44  ;;  %v19294_v11 = vmul.f32 %v19254_v16, %v7176_v10  ;;  %v19297_v43 = vmul.f32 %v19254_v16, %v7177_v32  ;;  %v19300_v47 = vmul.f32 %v19254_v16, %v7178_v49 }
 0x7e2   : > { %v19303_v14 = vmul.f32 %v19254_v16, %v7179_v26  ;;  %v19306_v9 = vmul.f32 %v19254_v16, %v7180_v48  ;;  %v19309_v42 = vmul.f32 %v19254_v16, %v7181_v60  ;;  %v19312_v30 = vmul.f32 %v19254_v16, %v7182_v38 }
 0x7e3   : > { %v19315_v36 = vmul.f32 %v19254_v16, %v7183_v51  ;;  %v19318_v25 = vmul.f32 %v19254_v16, %v7184_v17  ;;  %v19321_v13 = vmul.f32 %v19254_v16, %v7185_v37  ;;  %v19324_v34 = vmul.f32 %v19254_v16, %v7186_v53 }
 0x7e4   : > { %v19327_v35 = vadd.f32 %v19287_v50, %v7205_v21  ;;  %v19330_v44 = vadd.f32 %v19287_v50, %v7206_v28  ;;  %v19333_v10 = vadd.f32 %v19287_v50, %v7207_v2  ;;  %v19336_v32 = vmul.f32 %v19254_v16, %v7187_v12 }
 0x7e5   : > { %v19339_v49 = vmul.f32 %v19254_v16, %v7188_v59  ;;  %v19342_v26 = vmul.f32 %v19254_v16, %v7189_v54  ;;  %v19345_v48 = vadd.f32 %v19287_v50, %v7208_v22  ;;  %v19348_v60 = vmul.f32 %v19254_v16, %v7190_v15 }
 0x7e6   : > { %v19351_v38 = vmul.f32 %v19254_v16, %v7191_v27  ;;  %v19354_v51 = vmul.f32 %v19254_v16, %v7192_v23  ;;  %v19357_v17 = vadd.f32 %v19287_v50, %v7209_v61  ;;  %v19360_v37 = vmul.f32 %v19254_v16, %v7193_v18 }
 0x7e7   : > { %v19363_v53 = vmul.f32 %v19254_v16, %v7194_v31  ;;  %v19366_v12 = vadd.f32 %v19287_v50, %v7210_v55  ;;  %v19369_v59 = vadd.f32 %v19287_v50, %v7211_v3  ;;  %v19372_v54 = vmul.f32 %v19254_v16, %v7195_v4  ;;  %v15581_v4 = vld [vmem:[%s22269_s2 + $0x50] sm:$0xff]  }
 0x7e8   : > { %v7291_v15 = vsub.f32 0.0, %v19327_v35  ;;  %v7292_v27 = vsub.f32 0.0, %v19330_v44  ;;  %v7293_v23 = vsub.f32 0.0, %v19333_v10  ;;  %v19378_v18 = vmul.f32 %v19254_v16, %v7196_v0  ;;  %10439 = vmatpush1.bf16.msra.mxu1 %v15581_v4 }
 0x7e9   : > { %v19381_v31 = vmul.f32 %v19254_v16, %v7197_v40  ;;  %v19384_v21 = vadd.f32 %v19287_v50, %v7212_v56  ;;  %v7294_v28 = vsub.f32 0.0, %v19345_v48  ;;  %v19391_v2 = vmul.f32 %v19254_v16, %v7198_v7  ;;  %v15582_v7 = vld [vmem:[%s22269_s2 + $0x58] sm:$0xff]  }
 0x7ea   : > { %v19394_v22 = vmul.f32 %v19254_v16, %v7199_v41  ;;  %v19397_v0 = vadd.f32 %v19287_v50, %v7213_v29  ;;  %v7295_v40 = vsub.f32 0.0, %v19357_v17  ;;  %v19401_v61 = vmul.f32 %v19254_v16, %v7200_v19 }
 0x7eb   : > { %v19404_v55 = vadd.f32 %v19287_v50, %v7214_v33  ;;  %v7296_v3 = vsub.f32 0.0, %v19366_v12  ;;  %v7297_v56 = vsub.f32 0.0, %v19369_v59  ;;  %v19412_v41 = vadd.f32 %v19287_v50, %v7215_v8 }
 0x7ec   : > { %v7332_v29 = vmul.f32 1.442695, %v7291_v15  ;;  %v7334_v39 = vmul.f32 1.442695, %v7292_v27  ;;  %v7336_v62 = vmul.f32 1.442695, %v7293_v23  ;;  %v19416_v19 = vadd.f32 %v19287_v50, %v7216_v57 }
 0x7ed   : > { %v23215_v16 = vmov 0   ;;  %v19419_v33 = vadd.f32 %v19287_v50, %v7217_v52  ;;  %v7298_v4 = vsub.f32 0.0, %v19384_v21  ;;  %v7338_v5 = vmul.f32 1.442695, %v7294_v28  ;;  %v15583_v52 = vld [vmem:[%s22269_s2 + $0x60] sm:$0xff]  }
 0x7ee   : > { %10440 = vmatprep.subr.bf16.mxu1 %v23215_v16  ;;  %v19423_v58 = vadd.f32 %v19287_v50, %v7218_v20  ;;  %v7299_v8 = vsub.f32 0.0, %v19397_v0  ;;  %15678 = vpow2.f32 %v7332_v29  ;;  %v7340_v15 = vmul.f32 1.442695, %v7295_v40 }
 0x7ef   : > { %v19427_v27 = vadd.f32 %v19287_v50, %v7219_v45  ;;  %v7300_v23 = vsub.f32 0.0, %v19404_v55  ;;  %15680 = vpow2.f32 %v7334_v39  ;;  %v7342_v57 = vmul.f32 1.442695, %v7296_v3  ;;  %10441 = vmatpush1.bf16.msra.mxu1 %v15582_v7 }
 0x7f0   : > { %v19435_v20 = vadd.f32 %v19287_v50, %v19291_v46  ;;  %v7301_v28 = vsub.f32 0.0, %v19412_v41  ;;  %15682 = vpow2.f32 %v7336_v62  ;;  %v7344_v40 = vmul.f32 1.442695, %v7297_v56  ;;  %10442 = vmatprep.subr.bf16.mxu1 %v23215_v16 }
 0x7f1   : > { %v19441_v45 = vadd.f32 %v19287_v50, %v19294_v11  ;;  %v7302_v39 = vsub.f32 0.0, %v19416_v19  ;;  %15684 = vpow2.f32 %v7338_v5  ;;  %v7346_v3 = vmul.f32 1.442695, %v7298_v4  ;;  %v15584_v5 = vld [vmem:[%s22269_s2 + $0x68] sm:$0xff]  }
 0x7f2   : > { %v19446_v7 = vadd.f32 %v19287_v50, %v19297_v43  ;;  %v7303_v46 = vsub.f32 0.0, %v19419_v33  ;;  %15686 = vpow2.f32 %v7340_v15  ;;  %v7348_v29 = vmul.f32 1.442695, %v7299_v8 }
 0x7f3   : > { %v19451_v62 = vadd.f32 %v19287_v50, %v19300_v47  ;;  %v7304_v56 = vsub.f32 0.0, %v19423_v58  ;;  %15688 = vpow2.f32 %v7342_v57  ;;  %v7350_v11 = vmul.f32 1.442695, %v7300_v23  ;;  %10443 = vmatpush1.bf16.msra.mxu1 %v15583_v52 }
 0x7f4   : > { %23216 = vst [vmem:[#allocation48_spill] sm:$0xff] %v19446_v7  ;;  %v19459_v43 = vadd.f32 %v19287_v50, %v19303_v14  ;;  %v7305_v4 = vsub.f32 0.0, %v19427_v27  ;;  %15690 = vpow2.f32 %v7344_v40  ;;  %v7352_v8 = vmul.f32 1.442695, %v7301_v28  ;;  %10444 = vmatprep.subr.bf16.mxu1 %v23215_v16 }
 0x7f5   : > { %23217 = vst [vmem:[#allocation87_spill] sm:$0xff] %v19451_v62  ;;  %v19465_v47 = vadd.f32 %v19287_v50, %v19306_v9  ;;  %v7306_v15 = vsub.f32 0.0, %v19435_v20  ;;  %15692 = vpow2.f32 %v7346_v3  ;;  %v7354_v23 = vmul.f32 1.442695, %v7302_v39  ;;  %v15585_v39 = vld [vmem:[%s22269_s2 + $0x70] sm:$0xff]  }
 0x7f6   : > { %23218 = vst [vmem:[#allocation88_spill] sm:$0xff] %v19459_v43  ;;  %v19470_v57 = vadd.f32 %v19287_v50, %v19309_v42  ;;  %v7307_v14 = vsub.f32 0.0, %v19441_v45  ;;  %15694 = vpow2.f32 %v7348_v29  ;;  %v7356_v52 = vmul.f32 1.442695, %v7303_v46 }
 0x7f7   : > { %23219 = vst [vmem:[#allocation89_spill] sm:$0xff] %v19465_v47  ;;  %v19475_v28 = vadd.f32 %v19287_v50, %v19312_v30  ;;  %v7308_v40 = vsub.f32 0.0, %v19446_v7  ;;  %15696 = vpow2.f32 %v7350_v11  ;;  %v7358_v9 = vmul.f32 1.442695, %v7304_v56  ;;  %10445 = vmatpush1.bf16.msra.mxu1 %v15584_v5 }
 0x7f8   : > { %23220 = vst [vmem:[#allocation90_spill] sm:$0xff] %v19470_v57  ;;  %v19481_v3 = vpop.eup %15678  ;;  %v19485_v42 = vadd.f32 %v19287_v50, %v19315_v36  ;;  %v7309_v46 = vsub.f32 0.0, %v19451_v62  ;;  %15698 = vpow2.f32 %v7352_v8  ;;  %v7360_v30 = vmul.f32 1.442695, %v7305_v4  ;;  %10446 = vmatprep.subr.bf16.mxu1 %v23215_v16 }
 0x7f9   : > { %23221 = vst [vmem:[#allocation91_spill] sm:$0xff] %v19475_v28  ;;  %v19489_v29 = vpop.eup %15680  ;;  %v19493_v56 = vadd.f32 %v19287_v50, %v19318_v25  ;;  %v7310_v11 = vsub.f32 0.0, %v19459_v43  ;;  %15700 = vpow2.f32 %v7354_v23  ;;  %v7362_v5 = vmul.f32 1.442695, %v7306_v15 }
 0x7fa   : > { %23222 = vst [vmem:[#allocation92_spill] sm:$0xff] %v19485_v42  ;;  %v19496_v6 = vpop.eup %15682  ;;  %v19500_v36 = vadd.f32 %v19287_v50, %v19321_v13  ;;  %v7311_v4 = vsub.f32 0.0, %v19465_v47  ;;  %15702 = vpow2.f32 %v7356_v52  ;;  %v7364_v8 = vmul.f32 1.442695, %v7307_v14  ;;  %v15586_v13 = vld [vmem:[%s22269_s2 + $0x78] sm:$0xff]  }
 0x7fb   : > { %23223 = vst [vmem:[#allocation93_spill] sm:$0xff] %v19493_v56  ;;  %v19503_v1 = vpop.eup %15684  ;;  %v19507_v25 = vadd.f32 %v19287_v50, %v19324_v34  ;;  %v7312_v63 = vsub.f32 0.0, %v19470_v57  ;;  %15704 = vpow2.f32 %v7358_v9  ;;  %v7366_v15 = vmul.f32 1.442695, %v7308_v40  ;;  %10447 = vmatpush1.bf16.msra.mxu1 %v15585_v39 }
 0x7fc   : > { %23224 = vst [vmem:[#allocation94_spill] sm:$0xff] %v19500_v36  ;;  %v19513_v23 = vpop.eup %15686  ;;  %v19517_v14 = vadd.f32 %v19287_v50, %v19336_v32  ;;  %v7313_v52 = vsub.f32 0.0, %v19475_v28  ;;  %15706 = vpow2.f32 %v7360_v30  ;;  %v7368_v34 = vmul.f32 1.442695, %v7309_v46  ;;  %10448 = vmatprep.subr.bf16.mxu1 %v23215_v16 }
 0x7fd   : > { %23225 = vst [vmem:[#allocation95_spill] sm:$0xff] %v19507_v25  ;;  %v19521_v24 = vpop.eup %15688  ;;  %v19525_v40 = vadd.f32 %v19287_v50, %v19339_v49  ;;  %v7314_v9 = vsub.f32 0.0, %v19485_v42  ;;  %15708 = vpow2.f32 %v7362_v5  ;;  %v7370_v39 = vmul.f32 1.442695, %v7310_v11 }
 0x7fe   : > { %23226 = vst [vmem:[#allocation96_spill] sm:$0xff] %v19517_v14  ;;  %v19528_v57 = vpop.eup %15690  ;;  %v19532_v32 = vadd.f32 %v19287_v50, %v19342_v26  ;;  %v7315_v46 = vsub.f32 0.0, %v19493_v56  ;;  %15710 = vpow2.f32 %v7364_v8  ;;  %v7372_v30 = vmul.f32 1.442695, %v7311_v4 }
 0x7ff   : > { %23227 = vst [vmem:[#allocation97_spill] sm:$0xff] %v19525_v40  ;;  %v19535_v28 = vpop.eup %15692  ;;  %v19539_v49 = vadd.f32 %v19287_v50, %v19348_v60  ;;  %v7316_v42 = vsub.f32 0.0, %v19500_v36  ;;  %15712 = vpow2.f32 %v7366_v15  ;;  %v7374_v11 = vmul.f32 1.442695, %v7312_v63  ;;  %10449 = vmatpush1.bf16.msra.mxu1 %v15586_v13 }
 0x800   : > { %23228 = vst [vmem:[#allocation98_spill] sm:$0xff] %v19532_v32  ;;  %v19542_v5 = vpop.eup %15694  ;;  %v19546_v26 = vadd.f32 %v19287_v50, %v19351_v38  ;;  %v7317_v8 = vsub.f32 0.0, %v19507_v25  ;;  %15714 = vpow2.f32 %v7368_v34  ;;  %v7376_v4 = vmul.f32 1.442695, %v7313_v52  ;;  %10618 = vmatprep.subr.bf16.mxu1 %v23215_v16 }
 0x801   : > { %23229 = vst [vmem:[#allocation99_spill] sm:$0xff] %v19539_v49  ;;  %v19550_v56 = vpop.eup %15696  ;;  %v19554_v60 = vadd.f32 %v19287_v50, %v19354_v51  ;;  %v7318_v63 = vsub.f32 0.0, %v19517_v14  ;;  %15716 = vpow2.f32 %v7370_v39  ;;  %v7378_v15 = vmul.f32 1.442695, %v7314_v9 }
 0x802   : > { %23230 = vst [vmem:[#allocation100_spill] sm:$0xff] %v19546_v26  ;;  %v19557_v13 = vpop.eup %15698  ;;  %v19561_v38 = vadd.f32 %v19287_v50, %v19360_v37  ;;  %v7319_v52 = vsub.f32 0.0, %v19525_v40  ;;  %15718 = vpow2.f32 %v7372_v30  ;;  %v7380_v34 = vmul.f32 1.442695, %v7315_v46 }
 0x803   : > { %23231 = vst [vmem:[#allocation101_spill] sm:$0xff] %v19554_v60  ;;  %v19564_v16 = vpop.eup %15700  ;;  %v19568_v51 = vadd.f32 %v19287_v50, %v19363_v53  ;;  %v7320_v14 = vsub.f32 0.0, %v19532_v32  ;;  %15720 = vpow2.f32 %v7374_v11  ;;  %v7382_v9 = vmul.f32 1.442695, %v7316_v42 }
 0x804   : > { %23232 = vst [vmem:[#allocation102_spill] sm:$0xff] %v19561_v38  ;;  %v19571_v39 = vpop.eup %15702  ;;  %v19575_v37 = vadd.f32 %v19287_v50, %v19372_v54  ;;  %v7321_v40 = vsub.f32 0.0, %v19539_v49  ;;  %15722 = vpow2.f32 %v7376_v4  ;;  %v7384_v46 = vmul.f32 1.442695, %v7317_v8 }
 0x805   : > { %23233 = vst [vmem:[#allocation103_spill] sm:$0xff] %v19568_v51  ;;  %v19578_v30 = vpop.eup %15704  ;;  %v19582_v53 = vadd.f32 %v19287_v50, %v19378_v18  ;;  %v7322_v32 = vsub.f32 0.0, %v19546_v26  ;;  %15724 = vpow2.f32 %v7378_v15  ;;  %v7386_v42 = vmul.f32 1.442695, %v7318_v63 }
 0x806   : > { %23234 = vst [vmem:[#allocation104_spill] sm:$0xff] %v19575_v37  ;;  %v19585_v11 = vpop.eup %15706  ;;  %v19589_v54 = vadd.f32 %v19287_v50, %v19381_v31  ;;  %v7323_v49 = vsub.f32 0.0, %v19554_v60  ;;  %15726 = vpow2.f32 %v7380_v34  ;;  %v7388_v8 = vmul.f32 1.442695, %v7319_v52 }
 0x807   : > { %23235 = vst [vmem:[#allocation105_spill] sm:$0xff] %v19582_v53  ;;  %v19592_v4 = vpop.eup %15708  ;;  %v19596_v18 = vadd.f32 %v19287_v50, %v19391_v2  ;;  %v7324_v26 = vsub.f32 0.0, %v19561_v38  ;;  %15728 = vpow2.f32 %v7382_v9  ;;  %v7390_v63 = vmul.f32 1.442695, %v7320_v14 }
 0x808   : > { %23236 = vst [vmem:[#allocation106_spill] sm:$0xff] %v19589_v54  ;;  %v19599_v15 = vpop.eup %15710  ;;  %v19603_v31 = vadd.f32 %v19287_v50, %v19394_v22  ;;  %v7325_v60 = vsub.f32 0.0, %v19568_v51  ;;  %15730 = vpow2.f32 %v7384_v46  ;;  %v7392_v52 = vmul.f32 1.442695, %v7321_v40 }
 0x809   : > { %23237 = vst [vmem:[#allocation107_spill] sm:$0xff] %v19596_v18  ;;  %v19606_v34 = vpop.eup %15712  ;;  %v7326_v25 = vsub.f32 0.0, %v19575_v37  ;;  %15732 = vpow2.f32 %v7386_v42  ;;  %v7394_v2 = vmul.f32 1.442695, %v7322_v32  ;;  %v19613_v14 = vadd.f32 %v19287_v50, %v19401_v61 }
 0x80a   : > { %23238 = vst [vmem:[#allocation108_spill] sm:$0xff] %v19603_v31  ;;  %v19609_v36 = vpop.eup %15714  ;;  %v7327_v9 = vsub.f32 0.0, %v19582_v53  ;;  %15734 = vpow2.f32 %v7388_v8  ;;  %v7396_v22 = vmul.f32 1.442695, %v7323_v49  ;;  %v7328_v40 = vsub.f32 0.0, %v19589_v54 }
 0x80b   : > { %v19616_v38 = vpop.eup %15716  ;;  %15736 = vpow2.f32 %v7390_v63  ;;  %v7398_v46 = vmul.f32 1.442695, %v7324_v26  ;;  %v7329_v32 = vsub.f32 0.0, %v19596_v18  ;;  %v7330_v42 = vsub.f32 0.0, %v19603_v31  ;;  %v7919_v8 = vld [vmem:[#allocation3 + $0xc] sm:$0xf] }
 0x80c   : > { %v19619_v51 = vpop.eup %15718  ;;  %15738 = vpow2.f32 %v7392_v52  ;;  %v7400_v37 = vmul.f32 1.442695, %v7325_v60  ;;  %v7402_v61 = vmul.f32 1.442695, %v7326_v25  ;;  %v7959_v49 = vld [vmem:[#allocation3 + $0x8] sm:$0xe] }
 0x80d   : > { %v19623_v50 = vpop.eup %15720  ;;  %15740 = vpow2.f32 %v7394_v2  ;;  %v7331_v54 = vsub.f32 0.0, %v19613_v14  ;;  %v7404_v26 = vmul.f32 1.442695, %v7327_v9  ;;  %v7406_v47 = vmul.f32 1.442695, %v7328_v40 }
 0x80e   : > { %v19625_v53 = vpop.eup %15722  ;;  %15742 = vpow2.f32 %v7396_v22  ;;  %v7408_v31 = vmul.f32 1.442695, %v7329_v32  ;;  %v19628_v52 = vcombine.low %v7959_v49, %v7919_v8  ;;  %v7918_v60 = vld [vmem:[#allocation3 + $0x8] sm:$0xf]  ;;  %v7410_v25 = vmul.f32 1.442695, %v7330_v42 }
 0x80f   : > { %v15725_v63 = vpop.eup %15724  ;;  %15744 = vpow2.f32 %v7398_v46  ;;  %v7412_v62 = vmul.f32 1.442695, %v7331_v54  ;;  %v7414_v22 = vadd.f32 1.0, %v19481_v3  ;;  %v19631_v9 = vcombine.low %v7918_v60, %v7919_v8 }
 0x810   : > { %v15727_v18 = vpop.eup %15726  ;;  %15746 = vpow2.f32 %v7400_v37  ;;  %v7415_v37 = vadd.f32 1.0, %v19489_v29  ;;  %v8081_v40 = vshll.u32 %v19628_v52, 16  ;;  %v7417_v54 = vadd.f32 1.0, %v19503_v1 }
 0x811   : > { %v15729_v43 = vpop.eup %15728  ;;  %15748 = vpow2.f32 %v7402_v61  ;;  %v7416_v61 = vadd.f32 1.0, %v19496_v6  ;;  %v7419_v49 = vadd.f32 1.0, %v19521_v24  ;;  %v7421_v60 = vadd.f32 1.0, %v19535_v28 }
 0x812   : > { %v15731_v2 = vpop.eup %15730  ;;  %15750 = vpow2.f32 %v7404_v26  ;;  %v7422_v6 = vadd.f32 1.0, %v19542_v5  ;;  %v7425_v24 = vadd.f32 1.0, %v19564_v16  ;;  %v7427_v29 = vadd.f32 1.0, %v19578_v30 }
 0x813   : > { %v15733_v7 = vpop.eup %15732  ;;  %15752 = vpow2.f32 %v7406_v47  ;;  %v7418_v47 = vadd.f32 1.0, %v19513_v23  ;;  %v7423_v23 = vadd.f32 1.0, %v19550_v56  ;;  %v7428_v28 = vadd.f32 1.0, %v19585_v11 }
 0x814   : > { %v15735_v46 = vpop.eup %15734  ;;  %15754 = vpow2.f32 %v7408_v31  ;;  %v7420_v31 = vadd.f32 1.0, %v19528_v57  ;;  %v7431_v56 = vadd.f32 1.0, %v19606_v34  ;;  %v19656_v16 = vadd.f32 1.0, %v19609_v36 }
 0x815   : > { %v15737_v32 = vpop.eup %15736  ;;  %15756 = vpow2.f32 %v7410_v25  ;;  %v7424_v25 = vadd.f32 1.0, %v19557_v13  ;;  %v19665_v11 = vadd.f32 1.0, %v19623_v50  ;;  %v19672_v36 = vadd.f32 1.0, %v15727_v18 }
 0x816   : > { %v15739_v42 = vpop.eup %15738  ;;  %15758 = vpow2.f32 %v7412_v62  ;;  %v19644_v62 = vrot.slane %v8081_v40, 1  ;;  %v7430_v40 = vadd.f32 1.0, %v19599_v15  ;;  %v19670_v15 = vadd.f32 1.0, %v15725_v63 }
 0x817   : > { %v15741_v8 = vpop.eup %15740  ;;  %15760 = vrcp.f32 %v7414_v22  ;;  %v7426_v22 = vadd.f32 1.0, %v19571_v39  ;;  %v19662_v39 = vadd.f32 1.0, %v19619_v51  ;;  %v19682_v50 = vadd.f32 1.0, %v15737_v32 }
 0x818   : > { %v15743_v26 = vpop.eup %15742  ;;  %15762 = vrcp.f32 %v7415_v37  ;;  %v7429_v37 = vadd.f32 1.0, %v19592_v4  ;;  %v19668_v4 = vadd.f32 1.0, %v19625_v53  ;;  %v19684_v63 = vadd.f32 1.0, %v15739_v42 }
 0x819   : > { %v15745_v1 = vpop.eup %15744  ;;  %15764 = vrcp.f32 %v7416_v61  ;;  %v19659_v61 = vadd.f32 1.0, %v19616_v38  ;;  %v19676_v38 = vadd.f32 1.0, %v15731_v2  ;;  %v19688_v18 = vadd.f32 1.0, %v15743_v26 }
 0x81a   : > { %v15747_v57 = vpop.eup %15746  ;;  %15766 = vrcp.f32 %v7417_v54  ;;  %v19674_v54 = vadd.f32 1.0, %v15729_v43  ;;  %v19690_v2 = vadd.f32 1.0, %v15745_v1 }
 0x81b   : > { %v15749_v5 = vpop.eup %15748  ;;  %15768 = vrcp.f32 %v7418_v47  ;;  %v19678_v47 = vadd.f32 1.0, %v15733_v7 }
 0x81c   : > { %v15751_v13 = vpop.eup %15750  ;;  %15770 = vrcp.f32 %v7419_v49  ;;  %v19680_v49 = vadd.f32 1.0, %v15735_v46  ;;  %v19694_v7 = vadd.f32 1.0, %v15749_v5 }
 0x81d   : > { %v15753_v30 = vpop.eup %15752  ;;  %15772 = vrcp.f32 %v7420_v31  ;;  %v19686_v31 = vadd.f32 1.0, %v15741_v8  ;;  %v19696_v32 = vadd.f32 1.0, %v15751_v13  ;;  %v23239_v13 = vld [vmem:[#allocation4_spill] sm:$0xff] }
 0x81e   : > { %v15755_v34 = vpop.eup %15754  ;;  %15774 = vrcp.f32 %v7421_v60  ;;  %v19692_v60 = vadd.f32 1.0, %v15747_v57  ;;  %vm23240_vm6 = vnez %v23239_v13  ;;  %v23249_v13 = vld [vmem:[#allocation12_spill] sm:$0xff] }
 0x81f   : > { %v15757_v51 = vpop.eup %15756  ;;  %15776 = vrcp.f32 %v7422_v6  ;;  %v19698_v6 = vadd.f32 1.0, %v15753_v30  ;;  %v19701_v26 = vadd.f32 1.0, %v15755_v34  ;;  %v23241_v34 = vld [vmem:[#allocation5_spill] sm:$0xff] }
 0x820   : > { %v15759_v53 = vpop.eup %15758  ;;  %15778 = vrcp.f32 %v7423_v23  ;;  %v19703_v23 = vadd.f32 1.0, %v15757_v51  ;;  %vm23242_vm3 = vnez %v23241_v34  ;;  %v23251_v34 = vld [vmem:[#allocation15_spill] sm:$0xff] }
 0x821   : > { %v15761_v43 = vpop.eup %15760  ;;  %15780 = vrcp.f32 %v7424_v25  ;;  %v19706_v5 = vadd.f32 1.0, %v15759_v53 }
 0x822   : > { %v15763_v46 = vpop.eup %15762  ;;  %15782 = vrcp.f32 %v7425_v24  ;;  %v7496_v42 = vmul.f32 %v15761_v43, %v19327_v35 }
 0x823   : > { %v15765_v8 = vpop.eup %15764  ;;  %15784 = vrcp.f32 %v7426_v22  ;;  %v7497_v1 = vmul.f32 %v15763_v46, %v19330_v44  ;;  %v23245_v46 = vld [vmem:[#allocation7_spill] sm:$0xff] }
 0x824   : > { %v15767_v57 = vpop.eup %15766  ;;  %15786 = vrcp.f32 %v7427_v29  ;;  %v7498_v25 = vmul.f32 %v15765_v8, %v19333_v10  ;;  %v19711_v30 = vsel %vm23240_vm6, %v7496_v42, 0.0  ;;  %v23243_v10 = vld [vmem:[#allocation6_spill] sm:$0xff]  ;;  %vm23250_vm6 = vnez %v23249_v13 }
 0x825   : > { %v15769_v24 = vpop.eup %15768  ;;  %15788 = vrcp.f32 %v7428_v28  ;;  %v7499_v35 = vmul.f32 %v15767_v57, %v19345_v48  ;;  %v19716_v51 = vsel %vm23242_vm3, %v7497_v1, 0.0  ;;  %v13039_v44 = vpack.c.bf16 %v19711_v30, %v19711_v30  ;;  %v23247_v1 = vld [vmem:[#allocation9_spill] sm:$0xff]  ;;  %v23259_v13 = vld [vmem:[#allocation22_spill] sm:$0xff] }
 0x826   : > { %v15771_v22 = vpop.eup %15770  ;;  %15790 = vrcp.f32 %v7429_v37  ;;  %v7500_v29 = vmul.f32 %v15769_v24, %v19357_v17  ;;  %vm23244_vm11 = vnez %v23243_v10  ;;  %v13040_v28 = vpack.c.bf16 %v19716_v51, %v19716_v51  ;;  %v23253_v10 = vld [vmem:[#allocation16_spill] sm:$0xff] }
 0x827   : > { %v19723_v53 = vsel %vm23244_vm11, %v7498_v25, 0.0  ;;  %v15773_v43 = vpop.eup %15772  ;;  %15792 = vrcp.f32 %v7430_v40  ;;  %v7501_v48 = vmul.f32 %v15771_v22, %v19366_v12  ;;  %vm23246_vm3 = vnez %v23245_v46  ;;  %v23255_v46 = vld [vmem:[#allocation18_spill] sm:$0xff] }
 0x828   : > { %v19730_v42 = vsel %vm23246_vm3, %v7499_v35, 0.0  ;;  %v13041_v37 = vpack.c.bf16 %v19723_v53, %v19723_v53  ;;  %v15775_v8 = vpop.eup %15774  ;;  %15794 = vrcp.f32 %v7431_v56  ;;  %v7502_v17 = vmul.f32 %v15773_v43, %v19369_v59  ;;  %v23333_v53 = vld [vmem:[#allocation74_spill] sm:$0xff] }
 0x829   : > { %vm23248_vm11 = vnez %v23247_v1  ;;  %v13042_v40 = vpack.c.bf16 %v19730_v42, %v19730_v42  ;;  %v15777_v25 = vpop.eup %15776  ;;  %15796 = vrcp.f32 %v19656_v16  ;;  %v7503_v12 = vmul.f32 %v15775_v8, %v19384_v21  ;;  %v23257_v1 = vld [vmem:[#allocation20_spill] sm:$0xff] }
 0x82a   : > { %v19737_v57 = vsel %vm23248_vm11, %v7500_v29, 0.0  ;;  %v19745_v24 = vsel %vm23250_vm6, %v7501_v48, 0.0  ;;  %v15779_v59 = vpop.eup %15778  ;;  %15798 = vrcp.f32 %v19659_v61  ;;  %v7504_v35 = vmul.f32 %v15777_v25, %v19397_v0 }
 0x82b   : > { %v13043_v56 = vpack.c.bf16 %v19737_v57, %v19737_v57  ;;  %vm23252_vm3 = vnez %v23251_v34  ;;  %v13044_v16 = vpack.c.bf16 %v19745_v24, %v19745_v24  ;;  %v15781_v21 = vpop.eup %15780  ;;  %15800 = vrcp.f32 %v19662_v39  ;;  %v23261_v34 = vld [vmem:[#allocation24_spill] sm:$0xff] }
 0x82c   : > { %v19753_v22 = vsel %vm23252_vm3, %v7502_v17, 0.0  ;;  %v7505_v29 = vmul.f32 %v15779_v59, %v19404_v55  ;;  %vm23254_vm11 = vnez %v23253_v10  ;;  %v15783_v0 = vpop.eup %15782  ;;  %15802 = vrcp.f32 %v19665_v11  ;;  %v23263_v10 = vld [vmem:[#allocation27_spill] sm:$0xff] }
 0x82d   : > { %v19761_v43 = vsel %vm23254_vm11, %v7503_v12, 0.0  ;;  %v13045_v61 = vpack.c.bf16 %v19753_v22, %v19753_v22  ;;  %v7506_v48 = vmul.f32 %v15781_v21, %v19412_v41  ;;  %vm23256_vm6 = vnez %v23255_v46  ;;  %v15785_v55 = vpop.eup %15784  ;;  %v23265_v46 = vld [vmem:[#allocation28_spill] sm:$0xff] }
 0x82e   : > { %v19769_v8 = vsel %vm23256_vm6, %v7504_v35, 0.0  ;;  %v13046_v39 = vpack.c.bf16 %v19761_v43, %v19761_v43  ;;  %15804 = vrcp.f32 %v19668_v4  ;;  %v7507_v17 = vmul.f32 %v15783_v0, %v19416_v19  ;;  %v15787_v41 = vpop.eup %15786 }
 0x82f   : > { %vm23258_vm3 = vnez %v23257_v1  ;;  %v13047_v11 = vpack.c.bf16 %v19769_v8, %v19769_v8  ;;  %15806 = vrcp.f32 %v19670_v15  ;;  %v7508_v12 = vmul.f32 %v15785_v55, %v19419_v33  ;;  %v15789_v19 = vpop.eup %15788  ;;  %v23267_v1 = vld [vmem:[#allocation30_spill] sm:$0xff] }
 0x830   : > { %v19777_v25 = vsel %vm23258_vm3, %v7505_v29, 0.0  ;;  %vm23260_vm11 = vnez %v23259_v13  ;;  %15808 = vrcp.f32 %v19672_v36  ;;  %v7509_v35 = vmul.f32 %v15787_v41, %v19423_v58  ;;  %v15791_v33 = vpop.eup %15790 }
 0x831   : > { %v19785_v59 = vsel %vm23260_vm11, %v7506_v48, 0.0  ;;  %v13048_v4 = vpack.c.bf16 %v19777_v25, %v19777_v25  ;;  %vm23262_vm6 = vnez %v23261_v34  ;;  %15810 = vrcp.f32 %v19674_v54  ;;  %v15793_v58 = vpop.eup %15792  ;;  %v23272_v34 = vld [vmem:[#allocation87_spill] sm:$0xff]  ;;  %v23330_v54 = vld [vmem:[#allocation73_spill] sm:$0xff] }
 0x832   : > { %v19793_v21 = vsel %vm23262_vm6, %v7507_v17, 0.0  ;;  %v13049_v15 = vpack.c.bf16 %v19785_v59, %v19785_v59  ;;  %v7510_v29 = vmul.f32 %v15789_v19, %v19427_v27  ;;  %vm23264_vm3 = vnez %v23263_v10  ;;  %v15795_v27 = vpop.eup %15794  ;;  %v23270_v19 = vld [vmem:[#allocation32_spill] sm:$0xff] }
 0x833   : > { %v19801_v0 = vsel %vm23264_vm3, %v7508_v12, 0.0  ;;  %v13050_v36 = vpack.c.bf16 %v19793_v21, %v19793_v21  ;;  %15812 = vrcp.f32 %v19676_v38  ;;  %v7511_v48 = vmul.f32 %v15791_v33, %v19435_v20  ;;  %v15797_v20 = vpop.eup %15796  ;;  %v23269_v12 = vld [vmem:[#allocation48_spill] sm:$0xff] }
 0x834   : > { %vm23266_vm11 = vnez %v23265_v46  ;;  %15814 = vrcp.f32 %v19678_v47  ;;  %v7512_v17 = vmul.f32 %v15793_v58, %v19441_v45  ;;  %vm23268_vm6 = vnez %v23267_v1  ;;  %v15799_v45 = vpop.eup %15798 }
 0x835   : > { %v19809_v55 = vsel %vm23266_vm11, %v7509_v35, 0.0  ;;  %v19817_v41 = vsel %vm23268_vm6, %v7510_v29, 0.0  ;;  %15816 = vrcp.f32 %v19680_v49  ;;  %v7513_v13 = vmul.f32 %v15795_v27, %v23269_v12  ;;  %v23273_v29 = vld [vmem:[#allocation34_spill] sm:$0xff]  ;;  %v15801_v58 = vpop.eup %15800  ;;  %v23276_v27 = vld [vmem:[#allocation36_spill] sm:$0xff] }
 0x836   : > { %vm23271_vm3 = vnez %v23270_v19  ;;  %15818 = vrcp.f32 %v19682_v50  ;;  %v7514_v33 = vmul.f32 %v15797_v20, %v23272_v34  ;;  %vm23274_vm11 = vnez %v23273_v29  ;;  %v15803_v20 = vpop.eup %15802  ;;  %v23279_v19 = vld [vmem:[#allocation39_spill] sm:$0xff] }
 0x837   : > { %v19825_v35 = vsel %vm23271_vm3, %v7511_v48, 0.0  ;;  %v19833_v10 = vsel %vm23274_vm11, %v7512_v17, 0.0  ;;  %15820 = vrcp.f32 %v19684_v63  ;;  %v23275_v48 = vld [vmem:[#allocation88_spill] sm:$0xff]  ;;  %vm23277_vm6 = vnez %v23276_v27  ;;  %v23278_v17 = vld [vmem:[#allocation89_spill] sm:$0xff] }
 0x838   : > { %v7515_v46 = vmul.f32 %v15799_v45, %v23275_v48  ;;  %v19841_v1 = vsel %vm23277_vm6, %v7513_v13, 0.0  ;;  %vm7713_vm3 = vcmask 1045508   ;;  %15822 = vrcp.f32 %v19686_v31  ;;  %v15805_v45 = vpop.eup %15804  ;;  %v23281_v13 = vld [vmem:[#allocation90_spill] sm:$0xff]  ;;  %v23282_v48 = vld [vmem:[#allocation40_spill] sm:$0xff] }
 0x839   : > { %v7516_v12 = vmul.f32 %v15801_v58, %v23278_v17  ;;  %vm23280_vm11 = vnez %v23279_v19  ;;  %15824 = vrcp.f32 %v19688_v18  ;;  %v7517_v29 = vmul.f32 %v15803_v20, %v23281_v13  ;;  %v15807_v58 = vpop.eup %15806  ;;  %v23285_v19 = vld [vmem:[#allocation42_spill] sm:$0xff] }
 0x83a   : > { %v19849_v34 = vsel %vm23280_vm11, %v7514_v33, 0.0  ;;  %vm23283_vm6 = vnez %v23282_v48  ;;  %15826 = vrcp.f32 %v19690_v2  ;;  %v23284_v33 = vld [vmem:[#allocation91_spill] sm:$0xff]  ;;  %vm23286_vm11 = vnez %v23285_v19  ;;  %v15809_v20 = vpop.eup %15808  ;;  %v23288_v48 = vld [vmem:[#allocation44_spill] sm:$0xff]  ;;  %v23291_v19 = vld [vmem:[#allocation46_spill] sm:$0xff] }
 0x83b   : > { %v19857_v27 = vsel %vm23283_vm6, %v7515_v46, 0.0  ;;  %v7518_v17 = vmul.f32 %v15805_v45, %v23284_v33  ;;  %v19865_v3 = vsel %vm23286_vm11, %v7516_v12, 0.0  ;;  %15828 = vrcp.f32 %v19692_v60  ;;  %v23287_v46 = vld [vmem:[#allocation92_spill] sm:$0xff]  ;;  %v15811_v45 = vpop.eup %15810  ;;  %v23290_v12 = vld [vmem:[#allocation93_spill] sm:$0xff] }
 0x83c   : > { %v7519_v13 = vmul.f32 %v15807_v58, %v23287_v46  ;;  %vm23289_vm6 = vnez %v23288_v48  ;;  %15830 = vrcp.f32 %v19694_v7  ;;  %v7520_v33 = vmul.f32 %v15809_v20, %v23290_v12  ;;  %v23294_v48 = vld [vmem:[#allocation49_spill] sm:$0xff] }
 0x83d   : > { %v19873_v31 = vsel %vm23289_vm6, %v7517_v29, 0.0  ;;  %vm23292_vm11 = vnez %v23291_v19  ;;  %v15813_v58 = vpop.eup %15812  ;;  %15832 = vrcp.f32 %v19696_v32  ;;  %v23293_v29 = vld [vmem:[#allocation94_spill] sm:$0xff]  ;;  %vm23295_vm6 = vnez %v23294_v48  ;;  %v23297_v19 = vld [vmem:[#allocation52_spill] sm:$0xff]  ;;  %v23300_v48 = vld [vmem:[#allocation53_spill] sm:$0xff] }
 0x83e   : > { %v19881_v18 = vsel %vm23292_vm11, %v7518_v17, 0.0  ;;  %v7521_v46 = vmul.f32 %v15811_v45, %v23293_v29  ;;  %v19889_v2 = vsel %vm23295_vm6, %v7519_v13, 0.0  ;;  %v15815_v20 = vpop.eup %15814  ;;  %15834 = vrcp.f32 %v19698_v6  ;;  %v23296_v17 = vld [vmem:[#allocation95_spill] sm:$0xff]  ;;  %v23299_v13 = vld [vmem:[#allocation96_spill] sm:$0xff] }
 0x83f   : > { %v7522_v12 = vmul.f32 %v15813_v58, %v23296_v17  ;;  %vm23298_vm11 = vnez %v23297_v19  ;;  %v15817_v45 = vpop.eup %15816  ;;  %15836 = vrcp.f32 %v19701_v26  ;;  %v7523_v29 = vmul.f32 %v15815_v20, %v23299_v13  ;;  %v23303_v19 = vld [vmem:[#allocation55_spill] sm:$0xff] }
 0x840   : > { %v19897_v60 = vsel %vm23298_vm11, %v7520_v33, 0.0  ;;  %vm23301_vm6 = vnez %v23300_v48  ;;  %v15819_v58 = vpop.eup %15818  ;;  %15838 = vrcp.f32 %v19703_v23  ;;  %v23302_v33 = vld [vmem:[#allocation97_spill] sm:$0xff]  ;;  %vm23304_vm11 = vnez %v23303_v19  ;;  %v23318_v23 = vld [vmem:[#allocation64_spill] sm:$0xff] }
 0x841   : > { %v19905_v7 = vsel %vm23301_vm6, %v7521_v46, 0.0  ;;  %v7524_v17 = vmul.f32 %v15817_v45, %v23302_v33  ;;  %v19913_v32 = vsel %vm23304_vm11, %v7522_v12, 0.0  ;;  %v15821_v20 = vpop.eup %15820  ;;  %15840 = vrcp.f32 %v19706_v5  ;;  %v23305_v46 = vld [vmem:[#allocation98_spill] sm:$0xff]  ;;  %v23306_v48 = vld [vmem:[#allocation57_spill] sm:$0xff]  ;;  %v23308_v33 = vld [vmem:[#allocation99_spill] sm:$0xff] }
 0x842   : > { %v7525_v13 = vmul.f32 %v15819_v58, %v23305_v46  ;;  %vm23307_vm6 = vnez %v23306_v48  ;;  %v15823_v45 = vpop.eup %15822  ;;  %v7526_v19 = vmul.f32 %v15821_v20, %v23308_v33  ;;  %v23309_v12 = vld [vmem:[#allocation59_spill] sm:$0xff]  ;;  %v7715_v5 = vrot.slane %v13039_v44, 6  ;;  %v23314_v46 = vld [vmem:[#allocation100_spill] sm:$0xff]  ;;  %v23315_v48 = vld [vmem:[#allocation61_spill] sm:$0xff] }
 0x843   : > { %v19921_v6 = vsel %vm23307_vm6, %v7523_v29, 0.0  ;;  %vm23310_vm11 = vnez %v23309_v12  ;;  %v15825_v58 = vpop.eup %15824  ;;  %vm23311_vm6 = vcmask 1041408   ;;  %v7527_v20 = vmul.f32 %v15823_v45, %v23314_v46  ;;  %v23317_v12 = vld [vmem:[#allocation101_spill] sm:$0xff] }
 0x844   : > { %v19928_v63 = vsel %vm23310_vm11, %v7524_v17, 0.0  ;;  %vm19937_vm9 = vmor %vm23311_vm6, %vm7713_vm3  ;;  %vm23316_vm15 = vnez %v23315_v48  ;;  %v7717_v30 = vrot.slane %v13040_v28, 6  ;;  %v15827_v44 = vpop.eup %15826  ;;  %v7528_v26 = vmul.f32 %v15825_v58, %v23317_v12  ;;  %7877 = vst [vmem:[#allocation3 + $0x10] sm:$0xc] %v7715_v5  ;;  %v23320_v48 = vld [vmem:[#allocation102_spill] sm:$0xff]  ;;  %v23321_v33 = vld [vmem:[#allocation65_spill] sm:$0xff] }
 0x845   : > { %v19944_v17 = vsel %vm23316_vm15, %v7525_v13, 0.0  ;;  %vm23319_vm3 = vnez %v23318_v23  ;;  %v7716_v46 = vrot.slane %v7715_v5, 4  ;;  %v15829_v13 = vpop.eup %15828  ;;  %v7529_v49 = vmul.f32 %v15827_v44, %v23320_v48  ;;  %v23323_v23 = vld [vmem:[#allocation103_spill] sm:$0xff]  ;;  %v23324_v12 = vld [vmem:[#allocation68_spill] sm:$0xff]  ;;  %v23327_v45 = vld [vmem:[#allocation69_spill] sm:$0xff] }
 0x846   : > { %v19954_v50 = vsel %vm23319_vm3, %v7526_v19, 0.0  ;;  %vm23322_vm15 = vnez %v23321_v33  ;;  %v7719_v28 = vrot.slane %v7717_v30, 4  ;;  %v15831_v58 = vpop.eup %15830  ;;  %v7530_v19 = vmul.f32 %v15829_v13, %v23323_v23 }
 0x847   : > { %v19961_v47 = vsel %vm23322_vm15, %v7527_v20, 0.0  ;;  %vm23325_vm11 = vnez %v23324_v12  ;;  %v7718_v44 = vsel %vm19937_vm9, %v7716_v46, %v7717_v30  ;;  %v15833_v33 = vpop.eup %15832  ;;  %v23326_v20 = vld [vmem:[#allocation104_spill] sm:$0xff]  ;;  %vm23328_vm6 = vnez %v23327_v45  ;;  %v23329_v12 = vld [vmem:[#allocation105_spill] sm:$0xff] }
 0x848   : > { %v19968_v38 = vsel %vm23325_vm11, %v7528_v26, 0.0  ;;  %v7531_v48 = vmul.f32 %v15831_v58, %v23326_v20  ;;  %v19977_v51 = vsel %vm23328_vm6, %v7529_v49, 0.0  ;;  %v7720_v26 = vrot.slane %v13041_v37, 6  ;;  %7878 = vst [vmem:[#allocation3 + $0x14] sm:$0xf] %v7718_v44  ;;  %v15835_v23 = vpop.eup %15834  ;;  %v23332_v58 = vld [vmem:[#allocation106_spill] sm:$0xff] }
 0x849   : > { %v7532_v5 = vmul.f32 %v15833_v33, %v23329_v12  ;;  %vm23331_vm3 = vnez %v23330_v54  ;;  %v7723_v49 = vrot.slane %v13042_v40, 6  ;;  %v15837_v46 = vpop.eup %15836  ;;  %v7533_v20 = vmul.f32 %v15835_v23, %v23332_v58  ;;  %v23335_v33 = vld [vmem:[#allocation107_spill] sm:$0xff]  ;;  %v23336_v45 = vld [vmem:[#allocation77_spill] sm:$0xff]  ;;  %v23338_v58 = vld [vmem:[#allocation108_spill] sm:$0xff] }
 0x84a   : > { %v19987_v30 = vsel %vm23331_vm3, %v7530_v19, 0.0  ;;  %vm23334_vm15 = vnez %v23333_v53  ;;  %v7721_v54 = vsel %vm19937_vm9, %v7719_v28, %v7720_v26  ;;  %v15839_v19 = vpop.eup %15838  ;;  %v7534_v12 = vmul.f32 %v15837_v46, %v23335_v33 }
 0x84b   : > { %v19997_v37 = vsel %vm23334_vm15, %v7531_v48, 0.0  ;;  %vm23337_vm11 = vnez %v23336_v45  ;;  %v7722_v23 = vrot.slane %v7720_v26, 4  ;;  %7879 = vst [vmem:[#allocation3 + $0x18] sm:$0xf] %v7721_v54  ;;  %v15841_v48 = vpop.eup %15840  ;;  %v7535_v53 = vmul.f32 %v15839_v19, %v23338_v58 }
 0x84c   : > { %v20006_v42 = vsel %vm23337_vm11, %v7532_v5, 0.0  ;;  %v13074_v40 = vpack.c.bf16 %v19997_v37, %v19997_v37  ;;  %v20013_v44 = vsel %vm18813_vm4, %v7533_v20, 0.0  ;;  %v7725_v46 = vrot.slane %v7723_v49, 4 }
 0x84d   : > { %v13075_v28 = vpack.c.bf16 %v20006_v42, %v20006_v42  ;;  %v7536_v45 = vmul.f32 %v15841_v48, %v19613_v14  ;;  %v20020_v33 = vsel %vm18846_vm13, %v7534_v12, 0.0  ;;  %v13076_v26 = vpack.c.bf16 %v20013_v44, %v20013_v44 }
 0x84e   : > { %v7724_v54 = vsel %vm19937_vm9, %v7722_v23, %v7723_v49  ;;  %v20028_v13 = vsel %vm18861_vm7, %v7535_v53, 0.0  ;;  %v13077_v20 = vpack.c.bf16 %v20020_v33, %v20020_v33  ;;  %v7726_v14 = vrot.slane %v13043_v56, 6 }
 0x84f   : > { %v7729_v12 = vrot.slane %v13044_v16, 6  ;;  %7880 = vst [vmem:[#allocation3 + $0x1c] sm:$0xf] %v7724_v54  ;;  %v20040_v58 = vsel %vm18887_vm2, %v7536_v45, 0.0  ;;  %v13078_v49 = vpack.c.bf16 %v20028_v13, %v20028_v13  ;;  %v7732_v23 = vrot.slane %v13045_v61, 6 }
 0x850   : > { %v7735_v57 = vrot.slane %v13046_v39, 6  ;;  %v13079_v24 = vpack.c.bf16 %v20040_v58, %v20040_v58  ;;  %v7727_v56 = vsel %vm19937_vm9, %v7725_v46, %v7726_v14  ;;  %v7728_v16 = vrot.slane %v7726_v14, 4 }
 0x851   : > { %v7731_v53 = vrot.slane %v7729_v12, 4  ;;  %v7734_v45 = vrot.slane %v7732_v23, 4  ;;  %v7738_v54 = vrot.slane %v13047_v11, 6  ;;  %v7741_v22 = vrot.slane %v13048_v4, 6  ;;  %7881 = vst [vmem:[#allocation3 + $0x20] sm:$0xf] %v7727_v56 }
 0x852   : > { %v7737_v5 = vrot.slane %v7735_v57, 4  ;;  %v7730_v43 = vsel %vm19937_vm9, %v7728_v16, %v7729_v12  ;;  %v7744_v39 = vrot.slane %v13049_v15, 6  ;;  %v7747_v8 = vrot.slane %v13050_v36, 6 }
 0x853   : > { %v7733_v61 = vsel %vm19937_vm9, %v7731_v53, %v7732_v23  ;;  %v7736_v11 = vsel %vm19937_vm9, %v7734_v45, %v7735_v57  ;;  %v7740_v4 = vrot.slane %v7738_v54, 4  ;;  %v7743_v46 = vrot.slane %v7741_v22, 4  ;;  %7882 = vst [vmem:[#allocation3 + $0x24] sm:$0xf] %v7730_v43 }
 0x854   : > { %v7739_v25 = vsel %vm19937_vm9, %v7737_v5, %v7738_v54  ;;  %7883 = vst [vmem:[#allocation3 + $0x28] sm:$0xf] %v7733_v61  ;;  %v7746_v19 = vrot.slane %v7744_v39, 4  ;;  %v7749_v14 = vrot.slane %v7747_v8, 4  ;;  %v23343_v59 = vpack.c.bf16 %v19801_v0, %v19801_v0  ;;  %7884 = vst [vmem:[#allocation3 + $0x2c] sm:$0xf] %v7736_v11 }
 0x855   : > { %v23344_v21 = vpack.c.bf16 %v19809_v55, %v19809_v55  ;;  %7885 = vst [vmem:[#allocation3 + $0x30] sm:$0xf] %v7739_v25  ;;  %v7742_v12 = vsel %vm19937_vm9, %v7740_v4, %v7741_v22  ;;  %v7745_v48 = vsel %vm19937_vm9, %v7743_v46, %v7744_v39  ;;  %v23345_v23 = vpack.c.bf16 %v19817_v41, %v19817_v41 }
 0x856   : > { %v7750_v15 = vrot.slane %v23343_v59, 6  ;;  %v23346_v0 = vpack.c.bf16 %v19825_v35, %v19825_v35  ;;  %v7748_v55 = vsel %vm19937_vm9, %v7746_v19, %v7747_v8  ;;  %7886 = vst [vmem:[#allocation3 + $0x34] sm:$0xf] %v7742_v12  ;;  %7887 = vst [vmem:[#allocation3 + $0x38] sm:$0xf] %v7745_v48  ;;  %v23347_v41 = vpack.c.bf16 %v19833_v10, %v19833_v10 }
 0x857   : > { %v7753_v36 = vrot.slane %v23344_v21, 6  ;;  %v7756_v57 = vrot.slane %v23345_v23, 6  ;;  %v23348_v35 = vpack.c.bf16 %v19841_v1, %v19841_v1  ;;  %7888 = vst [vmem:[#allocation3 + $0x3c] sm:$0xf] %v7748_v55  ;;  %v23349_v8 = vpack.c.bf16 %v19849_v34, %v19849_v34 }
 0x858   : > { %v7759_v56 = vrot.slane %v23346_v0, 6  ;;  %v7751_v16 = vsel %vm19937_vm9, %v7749_v14, %v7750_v15  ;;  %v7752_v53 = vrot.slane %v7750_v15, 4  ;;  %v7762_v22 = vrot.slane %v23347_v41, 6 }
 0x859   : > { %v7755_v45 = vrot.slane %v7753_v36, 4  ;;  %v7758_v5 = vrot.slane %v7756_v57, 4  ;;  %v7765_v43 = vrot.slane %v23348_v35, 6  ;;  %7889 = vst [vmem:[#allocation3 + $0x40] sm:$0xf] %v7751_v16  ;;  %v7768_v11 = vrot.slane %v23349_v8, 6 }
 0x85a   : > { %v7761_v54 = vrot.slane %v7759_v56, 4  ;;  %v7754_v61 = vsel %vm19937_vm9, %v7752_v53, %v7753_v36  ;;  %v23350_v10 = vpack.c.bf16 %v19857_v27, %v19857_v27  ;;  %v7764_v46 = vrot.slane %v7762_v22, 4 }
 0x85b   : > { %v7757_v39 = vsel %vm19937_vm9, %v7755_v45, %v7756_v57  ;;  %v7760_v1 = vsel %vm19937_vm9, %v7758_v5, %v7759_v56  ;;  %v7767_v19 = vrot.slane %v7765_v43, 4  ;;  %7890 = vst [vmem:[#allocation3 + $0x44] sm:$0xf] %v7754_v61  ;;  %v7770_v14 = vrot.slane %v7768_v11, 4 }
 0x85c   : > { %v7771_v25 = vrot.slane %v23350_v10, 6  ;;  %v7763_v4 = vsel %vm19937_vm9, %v7761_v54, %v7762_v22  ;;  %7891 = vst [vmem:[#allocation3 + $0x48] sm:$0xf] %v7757_v39  ;;  %v23351_v34 = vpack.c.bf16 %v19865_v3, %v19865_v3  ;;  %v23352_v27 = vpack.c.bf16 %v19873_v31, %v19873_v31  ;;  %7892 = vst [vmem:[#allocation3 + $0x4c] sm:$0xf] %v7760_v1 }
 0x85d   : > { %7893 = vst [vmem:[#allocation3 + $0x50] sm:$0xf] %v7763_v4  ;;  %v7766_v36 = vsel %vm19937_vm9, %v7764_v46, %v7765_v43  ;;  %v7769_v12 = vsel %vm19937_vm9, %v7767_v19, %v7768_v11  ;;  %v23353_v48 = vpack.c.bf16 %v19881_v18, %v19881_v18  ;;  %v23354_v3 = vpack.c.bf16 %v19889_v2, %v19889_v2 }
 0x85e   : > { %v7773_v59 = vrot.slane %v7771_v25, 4  ;;  %v7774_v15 = vrot.slane %v23351_v34, 6  ;;  %v7777_v21 = vrot.slane %v23352_v27, 6  ;;  %v7772_v31 = vsel %vm19937_vm9, %v7770_v14, %v7771_v25  ;;  %7894 = vst [vmem:[#allocation3 + $0x54] sm:$0xf] %v7766_v36 }
 0x85f   : > { %v7780_v23 = vrot.slane %v23353_v48, 6  ;;  %v7783_v57 = vrot.slane %v23354_v3, 6  ;;  %7895 = vst [vmem:[#allocation3 + $0x58] sm:$0xf] %v7769_v12  ;;  %v23355_v18 = vpack.c.bf16 %v19897_v60, %v19897_v60  ;;  %v23356_v2 = vpack.c.bf16 %v19905_v7, %v19905_v7  ;;  %7896 = vst [vmem:[#allocation3 + $0x5c] sm:$0xf] %v7772_v31 }
 0x860   : > { %v7775_v0 = vsel %vm19937_vm9, %v7773_v59, %v7774_v15  ;;  %v7776_v56 = vrot.slane %v7774_v15, 4  ;;  %v7779_v55 = vrot.slane %v7777_v21, 4  ;;  %v23357_v22 = vpack.c.bf16 %v19913_v32, %v19913_v32 }
 0x861   : > { %v7782_v16 = vrot.slane %v7780_v23, 4  ;;  %v7785_v53 = vrot.slane %v7783_v57, 4  ;;  %v7786_v45 = vrot.slane %v23355_v18, 6  ;;  %v7789_v5 = vrot.slane %v23356_v2, 6  ;;  %7897 = vst [vmem:[#allocation3 + $0x60] sm:$0xf] %v7775_v0 }
 0x862   : > { %v7778_v54 = vsel %vm19937_vm9, %v7776_v56, %v7777_v21  ;;  %v7781_v41 = vsel %vm19937_vm9, %v7779_v55, %v7780_v23  ;;  %v7792_v35 = vrot.slane %v23357_v22, 6  ;;  %v23358_v60 = vpack.c.bf16 %v19921_v6, %v19921_v6  ;;  %v20190_v0 = vld [vmem:[#allocation3 + $0x14] sm:$0xf]  ;;  %v7923_v18 = vld [vmem:[#allocation3 + $0x1c] sm:$0xf] }
 0x863   : > { %v7784_v7 = vsel %vm19937_vm9, %v7782_v16, %v7783_v57  ;;  %v7787_v61 = vsel %vm19937_vm9, %v7785_v53, %v7786_v45  ;;  %v7788_v39 = vrot.slane %v7786_v45, 4  ;;  %v7791_v8 = vrot.slane %v7789_v5, 4  ;;  %7898 = vst [vmem:[#allocation3 + $0x64] sm:$0xf] %v7778_v54  ;;  %7899 = vst [vmem:[#allocation3 + $0x68] sm:$0xf] %v7781_v41 }
 0x864   : > { %v7795_v43 = vrot.slane %v23358_v60, 6  ;;  %v7794_v11 = vrot.slane %v7792_v35, 4  ;;  %v23359_v32 = vpack.c.bf16 %v19928_v63, %v19928_v63  ;;  %v23360_v6 = vpack.c.bf16 %v19944_v17, %v19944_v17  ;;  %7900 = vst [vmem:[#allocation3 + $0x6c] sm:$0xf] %v7784_v7  ;;  %7901 = vst [vmem:[#allocation3 + $0x70] sm:$0xf] %v7787_v61 }
 0x865   : > { %v7790_v4 = vsel %vm19937_vm9, %v7788_v39, %v7789_v5  ;;  %v7793_v46 = vsel %vm19937_vm9, %v7791_v8, %v7792_v35  ;;  %v23361_v19 = vpack.c.bf16 %v19954_v50, %v19954_v50  ;;  %v23362_v63 = vpack.c.bf16 %v19961_v47, %v19961_v47  ;;  %v7922_v53 = vld [vmem:[#allocation3 + $0x18] sm:$0xf]  ;;  %v7920_v2 = vld [vmem:[#allocation3 + $0x10] sm:$0xf] }
 0x866   : > { %v7797_v10 = vrot.slane %v7795_v43, 4  ;;  %v7798_v25 = vrot.slane %v23359_v32, 6  ;;  %v7801_v1 = vrot.slane %v23360_v6, 6  ;;  %v7796_v17 = vsel %vm19937_vm9, %v7794_v11, %v7795_v43  ;;  %7902 = vst [vmem:[#allocation3 + $0x74] sm:$0xf] %v7790_v4 }
 0x867   : > { %v7804_v14 = vrot.slane %v23361_v19, 6  ;;  %v7807_v59 = vrot.slane %v23362_v63, 6  ;;  %7903 = vst [vmem:[#allocation3 + $0x78] sm:$0xf] %v7793_v46  ;;  %v23363_v50 = vpack.c.bf16 %v19968_v38, %v19968_v38  ;;  %v23364_v47 = vpack.c.bf16 %v19977_v51, %v19977_v51  ;;  %7904 = vst [vmem:[#allocation3 + $0x7c] sm:$0xf] %v7796_v17 }
 0x868   : > { %v7799_v34 = vsel %vm19937_vm9, %v7797_v10, %v7798_v25  ;;  %v7800_v15 = vrot.slane %v7798_v25, 4  ;;  %v7803_v27 = vrot.slane %v7801_v1, 4  ;;  %v23365_v57 = vpack.c.bf16 %v19987_v30, %v19987_v30  ;;  %v20243_v25 = vld [vmem:[#allocation3 + $0x28] sm:$0xff]  }
 0x869   : > { %v7806_v21 = vrot.slane %v7804_v14, 4  ;;  %v7809_v36 = vrot.slane %v7807_v59, 4  ;;  %v7810_v12 = vrot.slane %v23363_v50, 6  ;;  %v7813_v48 = vrot.slane %v23364_v47, 6  ;;  %7905 = vst [vmem:[#allocation3 + $0x80] sm:$0xf] %v7799_v34 }
 0x86a   : > { %v7802_v23 = vsel %vm19937_vm9, %v7800_v15, %v7801_v1  ;;  %v7805_v3 = vsel %vm19937_vm9, %v7803_v27, %v7804_v14  ;;  %v7816_v31 = vrot.slane %v23365_v57, 6  ;;  %v7819_v38 = vrot.slane %v13074_v40, 6 }
 0x86b   : > { %v7808_v51 = vsel %vm19937_vm9, %v7806_v21, %v7807_v59  ;;  %v7811_v56 = vsel %vm19937_vm9, %v7809_v36, %v7810_v12  ;;  %v7812_v55 = vrot.slane %v7810_v12, 4  ;;  %v7815_v16 = vrot.slane %v7813_v48, 4  ;;  %7906 = vst [vmem:[#allocation3 + $0x84] sm:$0xf] %v7802_v23  ;;  %7907 = vst [vmem:[#allocation3 + $0x88] sm:$0xf] %v7805_v3 }
 0x86c   : > { %v7818_v30 = vrot.slane %v7816_v31, 4  ;;  %v7821_v45 = vrot.slane %v7819_v38, 4  ;;  %v7822_v37 = vrot.slane %v13075_v28, 6  ;;  %v7825_v40 = vrot.slane %v13076_v26, 6  ;;  %7908 = vst [vmem:[#allocation3 + $0x8c] sm:$0xf] %v7808_v51 }
 0x86d   : > { %7909 = vst [vmem:[#allocation3 + $0x90] sm:$0xf] %v7811_v56  ;;  %v7814_v5 = vsel %vm19937_vm9, %v7812_v55, %v7813_v48  ;;  %v7817_v54 = vsel %vm19937_vm9, %v7815_v16, %v7816_v31  ;;  %v7828_v41 = vrot.slane %v13077_v20, 6  ;;  %v7831_v42 = vrot.slane %v13078_v49, 6  ;;  %v20212_v28 = vld [vmem:[#allocation3 + $0x20] sm:$0xff]   ;;  %v15591_v31 = vld [vmem:[%s22269_s2 + $0x80] sm:$0xff]  }
 0x86e   : > { %v7820_v44 = vsel %vm19937_vm9, %v7818_v30, %v7819_v38  ;;  %v7823_v26 = vsel %vm19937_vm9, %v7821_v45, %v7822_v37  ;;  %v7824_v22 = vrot.slane %v7822_v37, 4  ;;  %v7827_v35 = vrot.slane %v7825_v40, 4  ;;  %7910 = vst [vmem:[#allocation3 + $0x94] sm:$0xf] %v7814_v5  ;;  %7911 = vst [vmem:[#allocation3 + $0x98] sm:$0xf] %v7817_v54 }
 0x86f   : > { %v7830_v60 = vrot.slane %v7828_v41, 4  ;;  %v7833_v43 = vrot.slane %v7831_v42, 4  ;;  %v7834_v33 = vrot.slane %v13079_v24, 6  ;;  %7912 = vst [vmem:[#allocation3 + $0x9c] sm:$0xf] %v7820_v44  ;;  %v20222_v13 = vcombine.low %v7920_v2, %v20190_v0  ;;  %v20268_v51 = vld [vmem:[#allocation3 + $0x30] sm:$0xff]  }
 0x870   : > { %7913 = vst [vmem:[#allocation3 + $0xa0] sm:$0xf] %v7823_v26  ;;  %v7826_v20 = vsel %vm19937_vm9, %v7824_v22, %v7825_v40  ;;  %v7829_v49 = vsel %vm19937_vm9, %v7827_v35, %v7828_v41  ;;  %v20228_v7 = vcombine.low %v7922_v53, %v7923_v18  ;;  %v23366_v61 = vshrl.u32 %v19628_v52, 16  ;;  %v15594_v45 = vld [vmem:[%s22269_s2 + $0x88] sm:$0xff]   ;;  %v15596_v26 = vld [vmem:[%s22269_s2 + $0x90] sm:$0xff]   ;;  %v20289_v22 = vld [vmem:[#allocation3 + $0x38] sm:$0xff]  }
 0x871   : > { %v7832_v58 = vsel %vm19937_vm9, %v7830_v60, %v7831_v42  ;;  %v7835_v24 = vsel %vm19937_vm9, %v7833_v43, %v7834_v33  ;;  %7914 = vst [vmem:[#allocation3 + $0xa4] sm:$0xf] %v7826_v20  ;;  %7915 = vst [vmem:[#allocation3 + $0xa8] sm:$0xf] %v7829_v49  ;;  %v8086_v8 = vshll.u32 %v20222_v13, 16  ;;  %v20239_v11 = vshll.u32 %v20212_v28, 16 }
 0x872   : > { %v8084_v39 = vor.u32 %v19644_v62, %v23366_v61  ;;  %7916 = vst [vmem:[#allocation3 + $0xac] sm:$0xf] %v7832_v58  ;;  %7917 = vst [vmem:[#allocation3 + $0xb0] sm:$0xf] %v7835_v24  ;;  %v8094_v10 = vshll.u32 %v20228_v7, 16  ;;  %v8090_v62 = vshrl.u32 %v20222_v13, 16 }
 0x873   : > { %v8088_v32 = vrot.slane %v8086_v8, 1  ;;  %v8756_v6 = vshrl.u32 %v19631_v9, 16  ;;  %v8098_v1 = vshrl.u32 %v20228_v7, 16  ;;  %vm23367_vm4 = vsmask.f32 7424  ;;  %v15598_v49 = vld [vmem:[%s22269_s2 + $0x98] sm:$0xff]  }
 0x874   : > { %v8096_v29 = vrot.slane %v8094_v10, 1  ;;  %v23368_v19 = vshll.u32 %v19631_v9, 16  ;;  %v8104_v63 = vrot.slane %v20239_v11, 1  ;;  %vm23369_vm13 = vmmov %vm23367_vm4  ;;  %v20257_v15 = vshrl.u32 %v20212_v28, 16 }
 0x875   : > { %v8089_v4 = vsel %vm23367_vm4, %v8084_v39, %v8088_v32  ;;  %v8092_v46 = vor.u32 %v8090_v62, %v8088_v32  ;;  %v20260_v27 = vshll.u32 %v20243_v25, 16  ;;  %vm23370_vm7 = vmmov %vm23367_vm4  ;;  %v20278_v37 = vshrl.u32 %v20243_v25, 16  ;;  %v15601_v62 = vld [vmem:[%s22269_s2 + $0xa0] sm:$0xff]  }
 0x876   : > { %v8760_v14 = vrot.slane %v23368_v19, 1  ;;  %v8766_v59 = vshll.u32 %v8089_v4, 16  ;;  %v8100_v17 = vor.u32 %v8098_v1, %v8096_v29  ;;  %v8764_v21 = vshrl.u32 %v8089_v4, 16  ;;  %vm23371_vm9 = vmmov %vm23367_vm4 }
 0x877   : > { %v8097_v34 = vsel %vm23369_vm13, %v8092_v46, %v8096_v29  ;;  %v8108_v48 = vor.u32 %v20257_v15, %v8104_v63  ;;  %v8112_v38 = vrot.slane %v20260_v27, 1  ;;  %vm23372_vm2 = vmmov %vm23367_vm4  ;;  %v20281_v40 = vshll.u32 %v20268_v51, 16 }
 0x878   : > { %v8768_v36 = vrot.slane %v8766_v59, 1  ;;  %v8771_v50 = vshll.u32 %v8097_v34, 16  ;;  %v8105_v9 = vsel %vm23370_vm7, %v8100_v17, %v8104_v63  ;;  %v8761_v12 = vor.u32 %v8760_v14, %v8756_v6  ;;  %vm23373_vm6 = vmmov %vm23372_vm2  ;;  %v15603_v14 = vld [vmem:[%s22269_s2 + $0xa8] sm:$0xff]  }
 0x879   : > { %v8863_v47 = vshll.u32 %v8105_v9, 16  ;;  %v8859_v57 = vshrl.u32 %v8097_v34, 16  ;;  %v8113_v18 = vsel %vm23373_vm6, %v8108_v48, %v8112_v38  ;;  %vm23374_vm3 = vmmov %vm23372_vm2  ;;  %v8915_v2 = vshrl.u32 %v8105_v9, 16 }
 0x87a   : > { %v8769_v23 = vor.u32 %v8768_v36, %v8764_v21  ;;  %v8773_v3 = vrot.slane %v8771_v50, 1  ;;  %v8762_v53 = vsel %vm23372_vm2, %v8761_v12, %v8088_v32  ;;  %v8919_v5 = vshll.u32 %v8113_v18, 16  ;;  %vm23376_vm15 = vmmov %vm23372_vm2  ;;  %v20306_v32 = vld [vmem:[#allocation3 + $0x40] sm:$0xff]   ;;  %v20329_v36 = vld [vmem:[#allocation3 + $0x48] sm:$0xff]  }
 0x87b   : > { %v8865_v16 = vrot.slane %v8863_v47, 1  ;;  %v23375_v54 = vmov 0   ;;  %v8116_v41 = vor.u32 %v20278_v37, %v8112_v38  ;;  %v8120_v44 = vrot.slane %v20281_v40, 1  ;;  %vm23377_vm11 = vmmov %vm23372_vm2  ;;  %v15605_v50 = vld [vmem:[%s22269_s2 + $0xb0] sm:$0xff]  }
 0x87c   : > { %v8774_v56 = vsel %vm23371_vm9, %v8769_v23, %v8773_v3  ;;  %v8861_v55 = vor.u32 %v8859_v57, %v8773_v3  ;;  %v8921_v35 = vrot.slane %v8919_v5, 1  ;;  %v20295_v33 = vshrl.u32 %v20268_v51, 16  ;;  %vm23378_vm4 = vmmov %vm23372_vm2  ;;  %v15608_v3 = vld [vmem:[%s22269_s2 + $0xb8] sm:$0xff]  }
 0x87d   : > { %10450 = vmatprep.mubr.bf16.mxu1 %v8774_v56  ;;  %v8917_v42 = vor.u32 %v8915_v2, %v8865_v16  ;;  %v8121_v60 = vsel %vm23376_vm15, %v8116_v41, %v8120_v44  ;;  %v20298_v20 = vshll.u32 %v20289_v22, 16  ;;  %v8963_v61 = vshrl.u32 %v8113_v18, 16  ;;  %vm23379_vm13 = vmmov %vm23372_vm2  ;;  %v15612_v41 = vld [vmem:[%s22269_s2 + $0xc8] sm:$0xff]  }
 0x87e   : > { %10451 = vmatmul.mubr.bf16.vlgmr.msra.gmra.mrb[88].mxu1 %v8762_v53  ;;  %v8866_v30 = vsel %vm23374_vm3, %v8861_v55, %v8865_v16  ;;  %v8967_v39 = vshll.u32 %v8121_v60, 16  ;;  %v8124_v58 = vor.u32 %v20295_v33, %v8120_v44  ;;  %v20317_v46 = vshrl.u32 %v20289_v22, 16  ;;  %vm23380_vm7 = vmmov %vm23372_vm2  ;;  %v20353_v16 = vld [vmem:[#allocation3 + $0x50] sm:$0xff]   ;;  %v15610_v53 = vld [vmem:[%s22269_s2 + $0xc0] sm:$0xff]  }
 0x87f   : > { %10619 = vmatpush1.bf16.msra.mxu1 %v15591_v31  ;;  %10458 = vmatprep.mubr.bf16.mxu1 %v8866_v30  ;;  %v8922_v43 = vsel %vm23377_vm11, %v8917_v42, %v8921_v35  ;;  %v8965_v24 = vor.u32 %v8963_v61, %v8921_v35  ;;  %v8128_v8 = vrot.slane %v20298_v20, 1  ;;  %v20320_v19 = vshll.u32 %v20306_v32, 16  ;;  %vm23381_vm9 = vmmov %vm23372_vm2 }
 0x880   : > { %10620 = vmatprep.subr.bf16.mxu1 %v23375_v54  ;;  %v8969_v29 = vrot.slane %v8967_v39, 1  ;;  %v9011_v63 = vshrl.u32 %v8121_v60, 16  ;;  %v20340_v48 = vshrl.u32 %v20306_v32, 16  ;;  %v20343_v23 = vshll.u32 %v20329_v36, 16  ;;  %vm23382_vm6 = vmmov %vm23372_vm2  ;;  %v20382_v39 = vld [vmem:[#allocation3 + $0x58] sm:$0xff]  }
 0x881   : > { %v20313_v6 = vsel %vm23378_vm4, %v8124_v58, %v8128_v8  ;;  %v8132_v17 = vor.u32 %v20317_v46, %v8128_v8  ;;  %v8136_v21 = vrot.slane %v20320_v19, 1  ;;  %v20364_v2 = vshrl.u32 %v20329_v36, 16  ;;  %v15615_v58 = vld [vmem:[%s22269_s2 + $0xd0] sm:$0xff]   ;;  %vm23383_vm3 = vmmov %vm23372_vm2 }
 0x882   : > { %v8970_v4 = vsel %vm23379_vm13, %v8965_v24, %v8969_v29  ;;  %v9015_v59 = vshll.u32 %v20313_v6, 16  ;;  %v9059_v57 = vshrl.u32 %v20313_v6, 16  ;;  %v8144_v55 = vrot.slane %v20343_v23, 1  ;;  %vm23386_vm4 = vmmov %vm23372_vm2 }
 0x883   : > { %10621 = vmatpush1.bf16.msra.mxu1 %v15594_v45  ;;  %v20336_v12 = vsel %vm23380_vm7, %v8132_v17, %v8136_v21  ;;  %v8140_v38 = vor.u32 %v20340_v48, %v8136_v21  ;;  %v20367_v5 = vshll.u32 %v20353_v16, 16  ;;  %v20377_v35 = vrot.slane %v20228_v7, 1  ;;  %vm23388_vm13 = vmmov %vm23372_vm2 }
 0x884   : > { %10622 = vmatprep.subr.bf16.mxu1 %v23375_v54  ;;  %v9063_v31 = vshll.u32 %v20336_v12, 16  ;;  %v9107_v42 = vshrl.u32 %v20336_v12, 16  ;;  %vm23384_vm15 = vcmask 1046528   ;;  %vm23389_vm7 = vmmov %vm23372_vm2 }
 0x885   : > { %v20360_v30 = vsel %vm23372_vm2, %v8140_v38, %v8144_v55  ;;  %v8152_v61 = vrot.slane %v20367_v5, 1  ;;  %vm23385_vm11 = vmmov %vm23384_vm15  ;;  %v15619_v38 = vld [vmem:[%s22269_s2 + $0xe0] sm:$0xff]  }
 0x886   : > { %10459 = vmatmul.mubr.bf16.gmra.mrb[92].mxu1 %v8097_v34  ;;  %v9013_v34 = vor.u32 %v9011_v63, %v8969_v29  ;;  %v9111_v44 = vshll.u32 %v20360_v30, 16  ;;  %v20403_v63 = vshll.u32 %v20382_v39, 16 }
 0x887   : > { %10466 = vmatprep.mubr.bf16.mxu1 %v8922_v43  ;;  %10623 = vmatpush1.bf16.msra.mxu1 %v15596_v26  ;;  %v8148_v26 = vor.u32 %v20364_v2, %v8144_v55 }
 0x888   : > { %10624 = vmatprep.subr.bf16.mxu1 %v23375_v54  ;;  %v9113_v24 = vrot.slane %v9111_v44, 1  ;;  %23387 = vst [vmem:[#allocation4_spill] sm:$0xff] %v20403_v63 }
 0x889   : > { %v20389_v8 = vsel %vm23383_vm3, %v8148_v26, %v8152_v61  ;;  %vm23395_vm3 = vmmov %vm23372_vm2 }
 0x88a   : > { %v9159_v17 = vshll.u32 %v20389_v8, 16  ;;  %v9203_v44 = vshrl.u32 %v20389_v8, 16 }
 0x88b   : > { %10625 = vmatpush1.bf16.msra.mxu1 %v15598_v49  ;;  %v8249_v49 = vrot.slane %v20222_v13, 1 }
 0x88c   : > { %10626 = vmatprep.subr.bf16.mxu1 %v23375_v54 }
 0x88d   : > { %v20394_v13 = vsel %vm23385_vm11, %v8249_v49, %v20377_v35  ;;  %vm23399_vm11 = vmmov %vm23372_vm2 }
 0x88e   : > { %10467 = vmatmul.mubr.bf16.gmra.mrb[96].mxu1 %v8105_v9  ;;  %v9017_v9 = vrot.slane %v9015_v59, 1  ;;  %v15617_v59 = vld [vmem:[%s22269_s2 + $0xd8] sm:$0xff]   ;;  %v8783_v21 = vshll.u32 %v20394_v13, 16 }
 0x88f   : > { %10474 = vmatprep.mubr.bf16.mxu1 %v8970_v4  ;;  %10627 = vmatpush1.bf16.msra.mxu1 %v15601_v62  ;;  %v9155_v4 = vshrl.u32 %v20360_v30, 16 }
 0x890   : > { %10628 = vmatprep.subr.bf16.mxu1 %v23375_v54  ;;  %v9018_v47 = vsel %vm23381_vm9, %v9013_v34, %v9017_v9  ;;  %v9061_v56 = vor.u32 %v9059_v57, %v9017_v9  ;;  %v8160_v57 = vrot.slane %v20403_v63, 1  ;;  %vm23390_vm9 = vmmov %vm23372_vm2  ;;  %v7961_v63 = vld [vmem:[#allocation3 + $0x10] sm:$0xe] }
 0x891   : > { %v9157_v9 = vor.u32 %v9155_v4, %v9113_v24  ;;  %v15624_v4 = vld [vmem:[%s22269_s2 + $0xf8] sm:$0xff]  }
 0x893   : > { %10629 = vmatpush1.bf16.msra.mxu1 %v15603_v14  ;;  %v20400_v14 = vshrl.u32 %v20353_v16, 16 }
 0x894   : > { %10630 = vmatprep.subr.bf16.mxu1 %v23375_v54 }
 0x896   : > { %10475 = vmatmul.mubr.bf16.gmra.mrb[100].mxu1 %v8113_v18  ;;  %v9065_v18 = vrot.slane %v9063_v31, 1  ;;  %v20415_v31 = vld [vmem:[#allocation3 + $0x60] sm:$0xff]  }
 0x897   : > { %10482 = vmatprep.mubr.bf16.mxu1 %v9018_v47  ;;  %10631 = vmatpush1.bf16.msra.mxu1 %v15605_v50  ;;  %v8156_v50 = vor.u32 %v20400_v14, %v8152_v61  ;;  %v15623_v61 = vld [vmem:[%s22269_s2 + $0xf0] sm:$0xff]  }
 0x898   : > { %10632 = vmatprep.subr.bf16.mxu1 %v23375_v54  ;;  %v9066_v45 = vsel %vm23382_vm6, %v9061_v56, %v9065_v18  ;;  %v9109_v43 = vor.u32 %v9107_v42, %v9065_v18  ;;  %v9161_v56 = vrot.slane %v9159_v17, 1  ;;  %v15622_v42 = vld [vmem:[%s22269_s2 + $0xe8] sm:$0xff]   ;;  %vm23392_vm6 = vmmov %vm23372_vm2 }
 0x89a   : > { %v9114_v62 = vsel %vm23386_vm4, %v9109_v43, %v9113_v24  ;;  %v9162_v18 = vsel %vm23390_vm9, %v9157_v9, %v9161_v56  ;;  %vm23400_vm4 = vmmov %vm23372_vm2 }
 0x89b   : > { %10633 = vmatpush1.bf16.msra.mxu1 %v15608_v3  ;;  %v20412_v3 = vrot.slane %v8783_v21, 1  ;;  %v20462_v21 = vld [vmem:[#allocation3 + $0x70] sm:$0xff]   ;;  %vm23407_vm9 = vmmov %vm23372_vm2 }
 0x89c   : > { %10634 = vmatprep.subr.bf16.mxu1 %v23375_v54 }
 0x89e   : > { %10483 = vmatmul.mubr.bf16.gmra.mrb[104].mxu1 %v8121_v60  ;;  %v8248_v60 = vrot.slane %v19628_v52, 1 }
 0x89f   : > { %10490 = vmatprep.mubr.bf16.mxu1 %v9066_v45  ;;  %10635 = vmatpush1.bf16.msra.mxu1 %v15610_v53  ;;  %v8161_v53 = vsel %vm23389_vm7, %v8156_v50, %v8160_v57  ;;  %v20429_v45 = vshrl.u32 %v20382_v39, 16  ;;  %vm23404_vm7 = vmmov %vm23372_vm2 }
 0x8a0   : > { %10636 = vmatprep.subr.bf16.mxu1 %v23375_v54  ;;  %v8250_v52 = vsel %vm23384_vm15, %v8248_v60, %v8249_v49  ;;  %v9207_v26 = vshll.u32 %v8161_v53, 16  ;;  %v9205_v60 = vor.u32 %v9203_v44, %v9161_v56  ;;  %v20441_v49 = vld [vmem:[#allocation3 + $0x68] sm:$0xff]   ;;  %vm23396_vm15 = vmmov %vm23372_vm2 }
 0x8a1   : > { %v8778_v29 = vshll.u32 %v8250_v52, 16 }
 0x8a3   : > { %10637 = vmatpush1.bf16.msra.mxu1 %v15612_v41  ;;  %v8780_v34 = vrot.slane %v8778_v29, 1  ;;  %v20432_v41 = vshll.u32 %v20415_v31, 16  ;;  %v20454_v29 = vshll.u32 %v20441_v49, 16 }
 0x8a4   : > { %10638 = vmatprep.subr.bf16.mxu1 %v23375_v54 }
 0x8a5   : > { %23391 = vst [vmem:[#allocation5_spill] sm:$0xff] %v20432_v41  ;;  %v8168_v43 = vrot.slane %v20432_v41, 1  ;;  %23394 = vst [vmem:[#allocation7_spill] sm:$0xff] %v20454_v29 }
 0x8a6   : > { %10491 = vmatmul.mubr.bf16.gmra.mrb[108].mxu1 %v20313_v6  ;;  %v8776_v6 = vshrl.u32 %v8250_v52, 16 }
 0x8a7   : > { %10498 = vmatprep.mubr.bf16.mxu1 %v9114_v62  ;;  %10639 = vmatpush1.bf16.msra.mxu1 %v15615_v58  ;;  %v9209_v58 = vrot.slane %v9207_v26, 1  ;;  %v20451_v62 = vshrl.u32 %v20415_v31, 16 }
 0x8a8   : > { %10640 = vmatprep.subr.bf16.mxu1 %v23375_v54  ;;  %v8781_v47 = vor.u32 %v8780_v34, %v8776_v6  ;;  %v8176_v34 = vrot.slane %v20454_v29, 1 }
 0x8a9   : > { %v9210_v52 = vsel %vm23392_vm6, %v9205_v60, %v9209_v58  ;;  %23393 = vst [vmem:[#allocation6_spill] sm:$0xff] %v20451_v62  ;;  %vm23410_vm6 = vmmov %vm23372_vm2 }
 0x8aa   : > { %v20423_v55 = vsel %vm23388_vm13, %v8781_v47, %v20412_v3  ;;  %vm23403_vm13 = vmmov %vm23372_vm2 }
 0x8ab   : > { %10641 = vmatpush1.bf16.msra.mxu1 %v15617_v59  ;;  %v9251_v59 = vshrl.u32 %v8161_v53, 16 }
 0x8ac   : > { %10642 = vmatprep.subr.bf16.mxu1 %v23375_v54 }
 0x8ad   : > { %v9253_v6 = vor.u32 %v9251_v59, %v9209_v58 }
 0x8ae   : > { %10499 = vmatmul.mubr.bf16.gmra.mrb[112].mxu1 %v20336_v12  ;;  %v8164_v12 = vor.u32 %v20429_v45, %v8160_v57  ;;  %v20469_v57 = vshrl.u32 %v20441_v49, 16 }
 0x8af   : > { %10506 = vmatprep.mubr.bf16.mxu1 %v9162_v18  ;;  %10643 = vmatpush1.bf16.msra.mxu1 %v15619_v38  ;;  %v20472_v38 = vshll.u32 %v20462_v21, 16 }
 0x8b0   : > { %10644 = vmatprep.subr.bf16.mxu1 %v23375_v54  ;;  %v8169_v24 = vsel %vm23372_vm2, %v8164_v12, %v8168_v43  ;;  %23397 = vst [vmem:[#allocation9_spill] sm:$0xff] %v20469_v57  ;;  %v20476_v12 = vld [vmem:[#allocation3 + $0x78] sm:$0xff]  }
 0x8b1   : > { %v9255_v17 = vshll.u32 %v8169_v24, 16  ;;  %23398 = vst [vmem:[#allocation12_spill] sm:$0xff] %v20472_v38  ;;  %v9299_v56 = vshrl.u32 %v8169_v24, 16  ;;  %v8184_v26 = vrot.slane %v20472_v38, 1  ;;  %v20484_v58 = vshll.u32 %v20476_v12, 16 }
 0x8b3   : > { %10645 = vmatpush1.bf16.msra.mxu1 %v15622_v42  ;;  %v9257_v50 = vrot.slane %v9255_v17, 1  ;;  %v8180_v42 = vor.u32 %v20469_v57, %v8176_v34  ;;  %23402 = vst [vmem:[#allocation16_spill] sm:$0xff] %v20484_v58 }
 0x8b4   : > { %10646 = vmatprep.subr.bf16.mxu1 %v23375_v54 }
 0x8b5   : > { %v9258_v47 = vsel %vm23396_vm15, %v9253_v6, %v9257_v50  ;;  %v9301_v44 = vor.u32 %v9299_v56, %v9257_v50  ;;  %v20488_v6 = vld [vmem:[#allocation3 + $0x80] sm:$0xff]   ;;  %v8315_v56 = vrot.slane %v8098_v1, 1  ;;  %vm23414_vm15 = vmmov %vm23372_vm2 }
 0x8b6   : > { %10507 = vmatmul.mubr.bf16.gmra.mrb[116].mxu1 %v20360_v30  ;;  %v8172_v30 = vor.u32 %v20451_v62, %v8168_v43 }
 0x8b7   : > { %10514 = vmatprep.mubr.bf16.mxu1 %v9210_v52  ;;  %10647 = vmatpush1.bf16.msra.mxu1 %v15623_v61  ;;  %v20481_v61 = vshrl.u32 %v20462_v21, 16 }
 0x8b8   : > { %10648 = vmatprep.subr.bf16.mxu1 %v23375_v54  ;;  %v8177_v9 = vsel %vm23395_vm3, %v8172_v30, %v8176_v34  ;;  %v8192_v30 = vrot.slane %v20484_v58, 1  ;;  %vm23411_vm3 = vmmov %vm23372_vm2 }
 0x8b9   : > { %v9303_v18 = vshll.u32 %v8177_v9, 16  ;;  %23401 = vst [vmem:[#allocation15_spill] sm:$0xff] %v20481_v61  ;;  %v9347_v52 = vshrl.u32 %v8177_v9, 16  ;;  %v8188_v59 = vor.u32 %v20481_v61, %v8184_v26 }
 0x8bb   : > { %10649 = vmatpush1.bf16.msra.mxu1 %v15624_v4  ;;  %v9305_v60 = vrot.slane %v9303_v18, 1  ;;  %v20497_v18 = vshrl.u32 %v20476_v12, 16 }
 0x8bc   : > { %10818 = vmatprep.subr.bf16.mxu1 %v23375_v54 }
 0x8bd   : > { %v9306_v43 = vsel %vm23400_vm4, %v9301_v44, %v9305_v60  ;;  %v9349_v17 = vor.u32 %v9347_v52, %v9305_v60  ;;  %23405 = vst [vmem:[#allocation18_spill] sm:$0xff] %v20497_v18  ;;  %v8196_v60 = vor.u32 %v20497_v18, %v8192_v30  ;;  %v20504_v52 = vld [vmem:[#allocation3 + $0x88] sm:$0xff]   ;;  %vm23418_vm4 = vmmov %vm23372_vm2 }
 0x8be   : > { %10515 = vmatmul.mubr.bf16.gmra.mrb[120].mxu1 %v20389_v8  ;;  %v8185_v8 = vsel %vm23399_vm11, %v8180_v42, %v8184_v26  ;;  %v20500_v42 = vshll.u32 %v20488_v6, 16  ;;  %vm23415_vm11 = vmmov %vm23372_vm2 }
 0x8bf   : > { %10522 = vmatprep.mubr.bf16.mxu1 %v9258_v47  ;;  %v9351_v4 = vshll.u32 %v8185_v8, 16  ;;  %v8316_v47 = vrot.slane %v8094_v10, 2  ;;  %v9395_v44 = vshrl.u32 %v8185_v8, 16 }
 0x8c0   : > { %23406 = vst [vmem:[#allocation20_spill] sm:$0xff] %v20500_v42 }
 0x8c1   : > { %v9353_v34 = vrot.slane %v9351_v4, 1  ;;  %v20506_v10 = vor.u32 %v8316_v47, %v8315_v56  ;;  %v20518_v56 = vld [vmem:[#allocation3 + $0x90] sm:$0xff]  }
 0x8c3   : > { %v9354_v50 = vsel %vm23404_vm7, %v9349_v17, %v9353_v34  ;;  %v20511_v17 = vshrl.u32 %v20488_v6, 16  ;;  %vm23422_vm7 = vmmov %vm23372_vm2 }
 0x8c5   : > { %23408 = vst [vmem:[#allocation22_spill] sm:$0xff] %v20511_v17 }
 0x8c6   : > { %10523 = vmatmul.mubr.bf16.gmra.mrb[124].mxu1 %v8161_v53  ;;  %v8193_v53 = vsel %vm23403_vm13, %v8188_v59, %v8192_v30  ;;  %vm23419_vm13 = vmmov %vm23372_vm2 }
 0x8c7   : > { %10530 = vmatprep.mubr.bf16.mxu1 %v9306_v43  ;;  %v9399_v26 = vshll.u32 %v8193_v53, 16  ;;  %v8200_v43 = vrot.slane %v20500_v42, 1  ;;  %v9443_v30 = vshrl.u32 %v8193_v53, 16 }
 0x8c9   : > { %v9401_v4 = vrot.slane %v9399_v26, 1  ;;  %v8201_v1 = vsel %vm23407_vm9, %v8196_v60, %v8200_v43  ;;  %vm23423_vm9 = vmmov %vm23372_vm2 }
 0x8ca   : > { %v9491_v58 = vshrl.u32 %v8201_v1, 16 }
 0x8cb   : > { %v9445_v42 = vor.u32 %v9443_v30, %v9401_v4 }
 0x8ce   : > { %10531 = vmatmul.mubr.bf16.gmra.mrb[128].mxu1 %v8169_v24  ;;  %v9397_v24 = vor.u32 %v9395_v44, %v9353_v34  ;;  %v9447_v34 = vshll.u32 %v8201_v1, 16  ;;  %v8204_v44 = vor.u32 %v20511_v17, %v8200_v43 }
 0x8cf   : > { %10538 = vmatprep.mubr.bf16.mxu1 %v9354_v50  ;;  %v20514_v50 = vshll.u32 %v20504_v52, 16 }
 0x8d0   : > { %v9402_v59 = vsel %vm23372_vm2, %v9397_v24, %v9401_v4  ;;  %v9449_v26 = vrot.slane %v9447_v34, 1  ;;  %v20523_v24 = vshrl.u32 %v20504_v52, 16  ;;  %v20530_v34 = vld [vmem:[#allocation3 + $0x98] sm:$0xff]  }
 0x8d1   : > { %23409 = vst [vmem:[#allocation24_spill] sm:$0xff] %v20514_v50  ;;  %v8208_v47 = vrot.slane %v20514_v50, 1  ;;  %v20538_v17 = vshll.u32 %v20530_v34, 16 }
 0x8d2   : > { %v9450_v60 = vsel %vm23411_vm3, %v9445_v42, %v9449_v26  ;;  %23412 = vst [vmem:[#allocation27_spill] sm:$0xff] %v20523_v24  ;;  %v9493_v30 = vor.u32 %v9491_v58, %v9449_v26  ;;  %vm23425_vm3 = vmmov %vm23372_vm2 }
 0x8d3   : > { %v8212_v4 = vor.u32 %v20523_v24, %v8208_v47  ;;  %23417 = vst [vmem:[#allocation48_spill] sm:$0xff] %v20538_v17 }
 0x8d6   : > { %10539 = vmatmul.mubr.bf16.gmra.mrb[132].mxu1 %v8177_v9  ;;  %v8209_v9 = vsel %vm23410_vm6, %v8204_v44, %v8208_v47  ;;  %vm23424_vm6 = vmmov %vm23372_vm2 }
 0x8d7   : > { %10546 = vmatprep.mubr.bf16.mxu1 %v9402_v59  ;;  %v20526_v59 = vshll.u32 %v20518_v56, 16  ;;  %v9495_v43 = vshll.u32 %v8209_v9, 16  ;;  %v9539_v18 = vshrl.u32 %v8209_v9, 16 }
 0x8d9   : > { %23413 = vst [vmem:[#allocation28_spill] sm:$0xff] %v20526_v59  ;;  %v8216_v50 = vrot.slane %v20526_v59, 1  ;;  %v9497_v44 = vrot.slane %v9495_v43, 1  ;;  %v8224_v59 = vrot.slane %v20538_v17, 1  ;;  %v20542_v43 = vld [vmem:[#allocation3 + $0xa0] sm:$0xff]  }
 0x8da   : > { %v20550_v24 = vshll.u32 %v20542_v43, 16 }
 0x8db   : > { %v9498_v42 = vsel %vm23415_vm11, %v9493_v30, %v9497_v44  ;;  %v9541_v26 = vor.u32 %v9539_v18, %v9497_v44  ;;  %vm23427_vm11 = vcmask 1046528  }
 0x8dc   : > { %23421 = vst [vmem:[#allocation87_spill] sm:$0xff] %v20550_v24  ;;  %v8232_v17 = vrot.slane %v20550_v24, 1 }
 0x8de   : > { %10547 = vmatmul.mubr.bf16.gmra.mrb[136].mxu1 %v8185_v8  ;;  %v8217_v8 = vsel %vm23414_vm15, %v8212_v4, %v8216_v50  ;;  %vm23426_vm15 = vmmov %vm23372_vm2 }
 0x8df   : > { %10554 = vmatprep.mubr.bf16.mxu1 %v9450_v60  ;;  %v20535_v60 = vshrl.u32 %v20518_v56, 16  ;;  %v9543_v47 = vshll.u32 %v8217_v8, 16  ;;  %v9587_v38 = vshrl.u32 %v8217_v8, 16 }
 0x8e1   : > { %23416 = vst [vmem:[#allocation30_spill] sm:$0xff] %v20535_v60  ;;  %v8220_v58 = vor.u32 %v20535_v60, %v8216_v50  ;;  %v9545_v4 = vrot.slane %v9543_v47, 1  ;;  %v15621_v47 = vld [vmem:[#allocation3 + $0xa8] ss:$0 sps:$4 sm:$0x77]  }
 0x8e3   : > { %v9546_v30 = vsel %vm23419_vm13, %v9541_v26, %v9545_v4  ;;  %v9589_v44 = vor.u32 %v9587_v38, %v9545_v4  ;;  %v20557_v26 = vshrl.u32 %v20542_v43, 16 }
 0x8e5   : > { %v8236_v57 = vor.u32 %v20557_v26, %v8232_v17 }
 0x8e6   : > { %10555 = vmatmul.mubr.bf16.gmra.mrb[140].mxu1 %v8193_v53  ;;  %v8225_v53 = vsel %vm23418_vm4, %v8220_v58, %v8224_v59  ;;  %vm23428_vm4 = vmmov %vm23427_vm11 }
 0x8e7   : > { %10562 = vmatprep.mubr.bf16.mxu1 %v9498_v42  ;;  %v20547_v42 = vshrl.u32 %v20530_v34, 16  ;;  %v9591_v50 = vshll.u32 %v8225_v53, 16  ;;  %v9635_v61 = vshrl.u32 %v8225_v53, 16  ;;  %vm23429_vm13 = vmmov %vm23428_vm4 }
 0x8e9   : > { %23420 = vst [vmem:[#allocation32_spill] sm:$0xff] %v20547_v42  ;;  %v8228_v18 = vor.u32 %v20547_v42, %v8224_v59  ;;  %v9593_v60 = vrot.slane %v9591_v50, 1 }
 0x8eb   : > { %v9594_v58 = vsel %vm23423_vm9, %v9589_v44, %v9593_v60  ;;  %v9637_v59 = vor.u32 %v9635_v61, %v9593_v60  ;;  %v12912_v61 = vcombine.low %v7961_v63, %v20190_v0  ;;  %vm23431_vm9 = vmmov %vm23428_vm4 }
 0x8ee   : > { %10563 = vmatmul.mubr.bf16.gmra.mrb[144].mxu1 %v8201_v1  ;;  %v8233_v1 = vsel %vm23422_vm7, %v8228_v18, %v8232_v17  ;;  %vm23430_vm7 = vmmov %vm23372_vm2 }
 0x8ef   : > { %10570 = vmatprep.mubr.bf16.mxu1 %v9546_v30  ;;  %v8238_v30 = vshll.u32 %v15621_v47, 16  ;;  %v9639_v29 = vshll.u32 %v8233_v1, 16 }
 0x8f1   : > { %v8240_v38 = vrot.slane %v8238_v30, 1  ;;  %v9641_v4 = vrot.slane %v9639_v29, 1 }
 0x8f3   : > { %v8241_v24 = vsel %vm23372_vm2, %v8236_v57, %v8240_v38  ;;  %v9642_v50 = vsel %vm23424_vm6, %v9637_v59, %v9641_v4  ;;  %vm23432_vm6 = vmmov %vm23372_vm2 }
 0x8f4   : > { %v9687_v18 = vshll.u32 %v8241_v24, 16  ;;  %v9741_v29 = vshrl.u32 %v8241_v24, 16 }
 0x8f6   : > { %10571 = vmatmul.mubr.bf16.gmra.mrb[148].mxu1 %v8209_v9  ;;  %v9683_v9 = vshrl.u32 %v8233_v1, 16  ;;  %v9689_v42 = vrot.slane %v9687_v18, 1 }
 0x8f7   : > { %10578 = vmatprep.mubr.bf16.mxu1 %v9594_v58  ;;  %v8242_v58 = vshrl.u32 %v15621_v47, 16 }
 0x8f8   : > { %v9685_v44 = vor.u32 %v9683_v9, %v9641_v4  ;;  %v9743_v57 = vor.u32 %v9741_v29, %v9689_v42 }
 0x8f9   : > { %v8244_v41 = vor.u32 %v8242_v58, %v8240_v38 }
 0x8fa   : > { %v9690_v62 = vsel %vm23425_vm3, %v9685_v44, %v9689_v42  ;;  %vm23433_vm3 = vmmov %vm23428_vm4 }
 0x8fb   : > { %v9745_v17 = vshll.u32 %v8244_v41, 16  ;;  %v9805_v38 = vshrl.u32 %v8244_v41, 16 }
 0x8fd   : > { %v9747_v60 = vrot.slane %v9745_v17, 1 }
 0x8fe   : > { %10579 = vmatmul.mubr.bf16.gmra.mrb[152].mxu1 %v8217_v8  ;;  %v8298_v8 = vrot.slane %v12912_v61, 1  ;;  %v8257_v61 = vrot.slane %v20268_v51, 1  ;;  %v15627_v51 = vld [vmem:[%s22269_s2 + $0x108] sm:$0xff]  }
 0x8ff   : > { %10586 = vmatprep.mubr.bf16.mxu1 %v9642_v50  ;;  %v9748_v30 = vsel %vm23426_vm15, %v9743_v57, %v9747_v60  ;;  %v9807_v4 = vor.u32 %v9805_v38, %v9747_v60  ;;  %vm23434_vm15 = vmmov %vm23372_vm2 }
 0x900   : > { %v8299_v47 = vsel %vm23427_vm11, %v8298_v8, %v20377_v35  ;;  %vm23435_vm11 = vmmov %vm23433_vm3 }
 0x901   : > { %v8790_v59 = vshll.u32 %v8299_v47, 16 }
 0x903   : > { %v8792_v63 = vrot.slane %v8790_v59, 1 }
 0x906   : > { %10587 = vmatmul.mubr.bf16.gmra.mrb[156].mxu1 %v8225_v53  ;;  %v8253_v53 = vrot.slane %v20212_v28, 1 }
 0x907   : > { %10594 = vmatprep.mubr.bf16.mxu1 %v9690_v62  ;;  %v8788_v62 = vshrl.u32 %v8299_v47, 16 }
 0x908   : > { %v8254_v0 = vsel %vm23428_vm4, %v20377_v35, %v8253_v53  ;;  %vm23436_vm4 = vmmov %vm23372_vm2 }
 0x909   : > { %v8795_v42 = vshll.u32 %v8254_v0, 16  ;;  %v8793_v50 = vor.u32 %v8792_v63, %v8788_v62  ;;  %v8871_v44 = vshrl.u32 %v8254_v0, 16  ;;  %v8261_v0 = vrot.slane %v20306_v32, 1  ;;  %v15630_v62 = vld [vmem:[%s22269_s2 + $0x120] sm:$0xff]   ;;  %v15631_v32 = vld [vmem:[%s22269_s2 + $0x128] sm:$0xff]  }
 0x90b   : > { %v8797_v9 = vrot.slane %v8795_v42, 1 }
 0x90d   : > { %v8798_v28 = vsel %vm23430_vm7, %v8793_v50, %v8797_v9  ;;  %v8873_v35 = vor.u32 %v8871_v44, %v8797_v9  ;;  %vm23438_vm7 = vmmov %vm23372_vm2 }
 0x90e   : > { %10595 = vmatmul.mubr.bf16.gmra.mrb[160].mxu1 %v8233_v1  ;;  %v8255_v1 = vrot.slane %v20243_v25, 1 }
 0x90f   : > { %10602 = vmatprep.mubr.bf16.mxu1 %v9748_v30  ;;  %v8259_v30 = vrot.slane %v20289_v22, 1  ;;  %v15629_v22 = vld [vmem:[%s22269_s2 + $0x118] sm:$0xff]  }
 0x910   : > { %v8256_v18 = vsel %vm23429_vm13, %v8253_v53, %v8255_v1  ;;  %v8258_v25 = vsel %vm23431_vm9, %v8255_v1, %v8257_v61  ;;  %vm23437_vm13 = vmmov %vm23433_vm3 }
 0x911   : > { %v8875_v58 = vshll.u32 %v8256_v18, 16  ;;  %v8923_v57 = vshrl.u32 %v8256_v18, 16  ;;  %v8927_v8 = vshll.u32 %v8258_v25, 16  ;;  %v8260_v59 = vsel %vm23433_vm3, %v8257_v61, %v8259_v30  ;;  %vm23439_vm9 = vmmov %vm23433_vm3 }
 0x912   : > { %v8262_v1 = vsel %vm23435_vm11, %v8259_v30, %v8261_v0  ;;  %v22587_v30 = vrot.slane %v20542_v43, 2 }
 0x913   : > { %v8877_v29 = vrot.slane %v8875_v58, 1  ;;  %v8929_v53 = vrot.slane %v8927_v8, 1  ;;  %v9023_v18 = vshll.u32 %v8262_v1, 16  ;;  %v15632_v58 = vld [vmem:[%s22269_s2 + $0x130] sm:$0xff]  }
 0x915   : > { %v8878_v17 = vsel %vm23372_vm2, %v8873_v35, %v8877_v29  ;;  %v8925_v47 = vor.u32 %v8923_v57, %v8877_v29  ;;  %v9025_v61 = vrot.slane %v9023_v18, 1  ;;  %v20614_v35 = vld [vmem:[#allocation3 + $0xa8] sm:$0xf]  ;;  %v8265_v57 = vrot.slane %v20353_v16, 1  ;;  %v15635_v16 = vld [vmem:[%s22269_s2 + $0x148] sm:$0xff]  }
 0x916   : > { %10603 = vmatmul.mubr.bf16.gmra.mrb[164].mxu1 %v8241_v24  ;;  %v15626_v24 = vld [vmem:[%s22269_s2 + $0x100] sm:$0xff]  }
 0x917   : > { %10610 = vmatprep.mubr.bf16.mxu1 %v9807_v4  ;;  %v8930_v38 = vsel %vm23434_vm15, %v8925_v47, %v8929_v53  ;;  %v8975_v4 = vshll.u32 %v8260_v59, 16  ;;  %vm23442_vm15 = vmmov %vm23372_vm2 }
 0x919   : > { %v8977_v42 = vrot.slane %v8975_v4, 1 }
 0x91e   : > { %10611 = vmatmul.mubr.bf16.gmra.mrb[168].mxu1 %v8244_v41  ;;  %v8867_v41 = vshrl.u32 %v20394_v13, 16 }
 0x91f   : > { %10650 = vmatprep.mubr.bf16.mxu1 %v8798_v28  ;;  %v8263_v28 = vrot.slane %v20329_v36, 1  ;;  %v15633_v36 = vld [vmem:[%s22269_s2 + $0x138] sm:$0xff]  }
 0x920   : > { %v8869_v60 = vor.u32 %v8867_v41, %v20412_v3  ;;  %v8971_v3 = vshrl.u32 %v8258_v25, 16  ;;  %v9067_v41 = vshrl.u32 %v8262_v1, 16 }
 0x921   : > { %v8264_v29 = vsel %vm23437_vm13, %v8261_v0, %v8263_v28  ;;  %v20645_v0 = vld [vmem:[#allocation3 + $0xb0] sm:$0xf]  ;;  %vm23448_vm13 = vmmov %vm23372_vm2 }
 0x922   : > { %v8870_v13 = vsel %vm23432_vm6, %v8869_v60, %v8797_v9  ;;  %v8973_v63 = vor.u32 %v8971_v3, %v8929_v53  ;;  %v9019_v9 = vshrl.u32 %v8260_v59, 16  ;;  %v9069_v8 = vor.u32 %v9067_v41, %v9025_v61  ;;  %v15634_v60 = vld [vmem:[%s22269_s2 + $0x140] sm:$0xff]   ;;  %v7967_v59 = vld [vmem:[#allocation3 + $0xb4] sm:$0xf] }
 0x923   : > { %v8266_v53 = vsel %vm23439_vm9, %v8263_v28, %v8265_v57  ;;  %vm23440_vm6 = vcmask 1045504   ;;  %v9115_v3 = vshrl.u32 %v8264_v29, 16  ;;  %vm23451_vm9 = vmmov %vm23433_vm3 }
 0x924   : > { %v8978_v50 = vsel %vm23436_vm4, %v8973_v63, %v8977_v42  ;;  %v9021_v44 = vor.u32 %v9019_v9, %v8977_v42  ;;  %v9119_v4 = vshll.u32 %v8266_v53, 16  ;;  %vm23444_vm11 = vmmov %vm23440_vm6 }
 0x925   : > { %vm23447_vm4 = vmmov %vm23433_vm3 }
 0x926   : > { %10651 = vmatmul.mubr.bf16.vlgmr.msra.gmra.mrb[88].mxu1 %v20423_v55  ;;  %v15628_v55 = vld [vmem:[%s22269_s2 + $0x110] sm:$0xff]   ;;  %v9026_v25 = vsel %vm23438_vm7, %v9021_v44, %v9025_v61  ;;  %v9121_v18 = vrot.slane %v9119_v4, 1  ;;  %vm23449_vm7 = vmmov %vm23372_vm2  ;;  %v15642_v4 = vld [vmem:[%s22269_s2 + $0x168] sm:$0xff]  }
 0x927   : > { %10819 = vmatpush1.bf16.msra.mxu1 %v15626_v24  ;;  %10658 = vmatprep.mubr.bf16.mxu1 %v8878_v17  ;;  %v7962_v24 = vld [vmem:[#allocation3 + $0xac] sm:$0xf] }
 0x928   : > { %10820 = vmatprep.subr.bf16.mxu1 %v23375_v54 }
 0x92b   : > { %10821 = vmatpush1.bf16.msra.mxu1 %v15627_v51  ;;  %v9071_v51 = vshll.u32 %v8264_v29, 16 }
 0x92c   : > { %10822 = vmatprep.subr.bf16.mxu1 %v23375_v54 }
 0x92e   : > { %10659 = vmatmul.mubr.bf16.gmra.mrb[92].mxu1 %v8870_v13 }
 0x92f   : > { %10666 = vmatprep.mubr.bf16.mxu1 %v8930_v38  ;;  %10823 = vmatpush1.bf16.msra.mxu1 %v15628_v55  ;;  %v9073_v55 = vrot.slane %v9071_v51, 1 }
 0x930   : > { %10824 = vmatprep.subr.bf16.mxu1 %v23375_v54 }
 0x931   : > { %v9074_v13 = vsel %vm23372_vm2, %v9069_v8, %v9073_v55  ;;  %v9117_v42 = vor.u32 %v9115_v3, %v9073_v55 }
 0x933   : > { %10825 = vmatpush1.bf16.msra.mxu1 %v15629_v22  ;;  %v9122_v44 = vsel %vm23442_vm15, %v9117_v42, %v9121_v18  ;;  %vm23454_vm15 = vmmov %vm23447_vm4 }
 0x934   : > { %10826 = vmatprep.subr.bf16.mxu1 %v23375_v54 }
 0x936   : > { %10667 = vmatmul.mubr.bf16.gmra.mrb[96].mxu1 %v8878_v17  ;;  %v20622_v17 = vcombine.low %v20614_v35, %v7962_v24  ;;  %v15637_v24 = vld [vmem:[%s22269_s2 + $0x158] sm:$0xff]  }
 0x937   : > { %10674 = vmatprep.mubr.bf16.mxu1 %v8978_v50  ;;  %10827 = vmatpush1.bf16.msra.mxu1 %v15630_v62  ;;  %v8267_v62 = vrot.slane %v20382_v39, 1 }
 0x938   : > { %10828 = vmatprep.subr.bf16.mxu1 %v23375_v54  ;;  %v20631_v47 = vrot.slane %v20622_v17, 2  ;;  %v22586_v22 = vshrl.u32 %v20622_v17, 16  ;;  %v22585_v63 = vshll.u32 %v20622_v17, 16 }
 0x939   : > { %v8268_v39 = vsel %vm23433_vm3, %v8265_v57, %v8267_v62 }
 0x93a   : > { %v8545_v9 = vrot.slane %v22586_v22, 2  ;;  %v8546_v28 = vrot.slane %v22585_v63, 3  ;;  %v9167_v41 = vshll.u32 %v8268_v39, 16  ;;  %v9211_v42 = vshrl.u32 %v8268_v39, 16 }
 0x93b   : > { %10829 = vmatpush1.bf16.msra.mxu1 %v15631_v32  ;;  %v20653_v32 = vcombine.low %v20645_v0, %v7967_v59  ;;  %v8343_v63 = vrot.slane %v20400_v14, 1  ;;  %v8347_v22 = vrot.slane %v20429_v45, 1 }
 0x93c   : > { %10830 = vmatprep.subr.bf16.mxu1 %v23375_v54  ;;  %v20664_v61 = vor.u32 %v8546_v28, %v8545_v9 }
 0x93d   : > { %23441 = vst [vmem:[#allocation34_spill] sm:$0xff] %v20653_v32  ;;  %v22584_v29 = vrot.slane %v20653_v32, 2 }
 0x93e   : > { %10675 = vmatmul.mubr.bf16.gmra.mrb[100].mxu1 %v8930_v38  ;;  %v8446_v38 = vsel %vm23440_vm6, %v22587_v30, %v20631_v47  ;;  %23443 = vst [vmem:[#allocation88_spill] sm:$0xff] %v20664_v61  ;;  %vm23452_vm6 = vmmov %vm23433_vm3 }
 0x93f   : > { %10682 = vmatprep.mubr.bf16.mxu1 %v9026_v25  ;;  %10831 = vmatpush1.bf16.msra.mxu1 %v15632_v58  ;;  %v9615_v1 = vshll.u32 %v8446_v38, 16  ;;  %v9659_v51 = vshrl.u32 %v8446_v38, 16  ;;  %v20676_v57 = vsel %vm23444_vm11, %v20631_v47, %v22584_v29  ;;  %vm23453_vm3 = vmmov %vm23372_vm2  ;;  %v8339_v29 = vrot.slane %v20364_v2, 1 }
 0x940   : > { %10832 = vmatprep.subr.bf16.mxu1 %v23375_v54  ;;  %23445 = vst [vmem:[#allocation36_spill] sm:$0xff] %v20676_v57  ;;  %v9663_v55 = vshll.u32 %v20676_v57, 16  ;;  %vm23455_vm11 = vmmov %vm23372_vm2  ;;  %v23525_v57 = vld [vmem:[#allocation15_spill] sm:$0xff] }
 0x941   : > { %v20662_v58 = vrot.slane %v9615_v1, 1 }
 0x943   : > { %10833 = vmatpush1.bf16.msra.mxu1 %v15633_v36  ;;  %v9163_v36 = vshrl.u32 %v8266_v53, 16  ;;  %v15638_v53 = vld [vmem:[%s22269_s2 + $0x160] sm:$0xff]  }
 0x944   : > { %10834 = vmatprep.subr.bf16.mxu1 %v23375_v54 }
 0x945   : > { %v9165_v8 = vor.u32 %v9163_v36, %v9121_v18  ;;  %v8273_v36 = vrot.slane %v20462_v21, 1 }
 0x946   : > { %10683 = vmatmul.mubr.bf16.gmra.mrb[104].mxu1 %v8978_v50  ;;  %v15636_v50 = vld [vmem:[%s22269_s2 + $0x150] sm:$0xff]  }
 0x947   : > { %10690 = vmatprep.mubr.bf16.mxu1 %v9074_v13  ;;  %10835 = vmatpush1.bf16.msra.mxu1 %v15634_v60  ;;  %v20679_v60 = vor.u32 %v9659_v51, %v20662_v58 }
 0x948   : > { %10836 = vmatprep.subr.bf16.mxu1 %v23375_v54 }
 0x94b   : > { %10837 = vmatpush1.bf16.msra.mxu1 %v15635_v16  ;;  %v9169_v16 = vrot.slane %v9167_v41, 1 }
 0x94c   : > { %10838 = vmatprep.subr.bf16.mxu1 %v23375_v54 }
 0x94d   : > { %v9170_v38 = vsel %vm23448_vm13, %v9165_v8, %v9169_v16  ;;  %vm23456_vm13 = vmmov %vm23372_vm2 }
 0x94e   : > { %10691 = vmatmul.mubr.bf16.gmra.mrb[108].mxu1 %v9026_v25  ;;  %v8269_v25 = vrot.slane %v20415_v31, 1  ;;  %v20686_v31 = vrot.slane %v9663_v55, 1 }
 0x94f   : > { %10698 = vmatprep.mubr.bf16.mxu1 %v9122_v44  ;;  %10839 = vmatpush1.bf16.msra.mxu1 %v15636_v50  ;;  %v15644_v50 = vld [vmem:[%s22269_s2 + $0x170] sm:$0xff]  }
 0x950   : > { %10840 = vmatprep.subr.bf16.mxu1 %v23375_v54  ;;  %23446 = vst [vmem:[#allocation89_spill] sm:$0xff] %v20686_v31  ;;  %v8270_v59 = vsel %vm23447_vm4, %v8267_v62, %v8269_v25  ;;  %v20693_v3 = vsel %vm23449_vm7, %v20679_v60, %v20686_v31  ;;  %v8271_v62 = vrot.slane %v20441_v49, 1  ;;  %v15645_v49 = vld [vmem:[%s22269_s2 + $0x178] sm:$0xff]   ;;  %vm23457_vm7 = vcmask 1044480  }
 0x951   : > { %23450 = vst [vmem:[#allocation39_spill] sm:$0xff] %v20693_v3  ;;  %v9215_v1 = vshll.u32 %v8270_v59, 16  ;;  %v9259_v39 = vshrl.u32 %v8270_v59, 16  ;;  %v23526_v3 = vld [vmem:[#allocation12_spill] sm:$0xff] }
 0x952   : > { %v8272_v18 = vsel %vm23451_vm9, %v8269_v25, %v8271_v62  ;;  %vm23459_vm9 = vmmov %vm23447_vm4  ;;  %v8360_v61 = vrot.slane %v23526_v3, 2 }
 0x953   : > { %10841 = vmatpush1.bf16.msra.mxu1 %v15637_v24  ;;  %v9217_v9 = vrot.slane %v9215_v1, 1  ;;  %v9263_v24 = vshll.u32 %v8272_v18, 16  ;;  %v9307_v8 = vshrl.u32 %v8272_v18, 16  ;;  %v7971_v18 = vld [vmem:[#allocation3 + $0xbc] sm:$0x3] }
 0x954   : > { %10842 = vmatprep.subr.bf16.mxu1 %v23375_v54 }
 0x955   : > { %v9261_v41 = vor.u32 %v9259_v39, %v9217_v9  ;;  %v9265_v51 = vrot.slane %v9263_v24, 1  ;;  %v8279_v24 = vrot.slane %v20504_v52, 1 }
 0x956   : > { %10699 = vmatmul.mubr.bf16.gmra.mrb[112].mxu1 %v9074_v13  ;;  %v9213_v13 = vor.u32 %v9211_v42, %v9169_v16 }
 0x957   : > { %10706 = vmatprep.mubr.bf16.mxu1 %v9170_v38  ;;  %10843 = vmatpush1.bf16.msra.mxu1 %v15638_v53  ;;  %v9266_v25 = vsel %vm23453_vm3, %v9261_v41, %v9265_v51  ;;  %v8275_v53 = vrot.slane %v20476_v12, 1  ;;  %v9309_v16 = vor.u32 %v9307_v8, %v9265_v51  ;;  %v7968_v12 = vld [vmem:[#allocation3 + $0xb8] sm:$0xf] }
 0x958   : > { %10844 = vmatprep.subr.bf16.mxu1 %v23375_v54  ;;  %v9218_v28 = vsel %vm23372_vm2, %v9213_v13, %v9217_v9  ;;  %v12921_v41 = vcombine.low %v7968_v12, %v7971_v18  ;;  %vm23460_vm2 = vmmov %vm23457_vm7 }
 0x95b   : > { %10845 = vmatpush1.bf16.msra.mxu1 %v15642_v4  ;;  %v8276_v4 = vsel %vm23454_vm15, %v8273_v36, %v8275_v53  ;;  %vm23465_vm15 = vmmov %vm23453_vm3 }
 0x95c   : > { %10846 = vmatprep.subr.bf16.mxu1 %v23375_v54  ;;  %v9359_v1 = vshll.u32 %v8276_v4, 16 }
 0x95e   : > { %10707 = vmatmul.mubr.bf16.gmra.mrb[116].mxu1 %v9122_v44  ;;  %v8274_v44 = vsel %vm23452_vm6, %v8271_v62, %v8273_v36  ;;  %v8277_v62 = vrot.slane %v20488_v6, 1  ;;  %v9361_v13 = vrot.slane %v9359_v1, 1  ;;  %v8607_v36 = vrot.slane %v20653_v32, 3  ;;  %vm23461_vm6 = vmmov %vm23453_vm3 }
 0x95f   : > { %10714 = vmatprep.mubr.bf16.mxu1 %v9218_v28  ;;  %10847 = vmatpush1.bf16.msra.mxu1 %v15644_v50  ;;  %v9311_v55 = vshll.u32 %v8274_v44, 16  ;;  %v9355_v42 = vshrl.u32 %v8274_v44, 16  ;;  %v20726_v44 = vrot.slane %v12921_v41, 3  ;;  %v23527_v32 = vmov 0.0  }
 0x960   : > { %10848 = vmatprep.subr.bf16.mxu1 %v23375_v54  ;;  %v8278_v50 = vsel %vm23447_vm4, %v8275_v53, %v8277_v62  ;;  %v8280_v8 = vsel %vm23459_vm9, %v8277_v62, %v8279_v24 }
 0x961   : > { %v9313_v59 = vrot.slane %v9311_v55, 1  ;;  %v9407_v39 = vshll.u32 %v8278_v50, 16  ;;  %23458 = vst [vmem:[#allocation90_spill] sm:$0xff] %v20726_v44  ;;  %v8610_v53 = vsel %vm23460_vm2, %v8607_v36, %v20726_v44  ;;  %v9451_v1 = vshrl.u32 %v8278_v50, 16  ;;  %vm23471_vm2 = vmmov %vm23453_vm3 }
 0x962   : > { %v9797_v62 = vshrl.u32 %v8610_v53, 16 }
 0x963   : > { %10849 = vmatpush1.bf16.msra.mxu1 %v15645_v49  ;;  %v9314_v21 = vsel %vm23455_vm11, %v9309_v16, %v9313_v59  ;;  %v22583_v49 = vrot.slane %v20622_v17, 3  ;;  %v9801_v16 = vshll.u32 %v20726_v44, 16  ;;  %vm23467_vm11 = vmmov %vm23447_vm4 }
 0x964   : > { %11018 = vmatprep.subr.bf16.mxu1 %v23375_v54  ;;  %vm23468_vm4 = vmmov %vm23453_vm3 }
 0x965   : > { %v8608_v51 = vsel %vm23457_vm7, %v22583_v49, %v8607_v36  ;;  %v20736_v18 = vrot.slane %v9801_v16, 1  ;;  %vm23470_vm7 = vmmov %vm23453_vm3 }
 0x966   : > { %10715 = vmatmul.mubr.bf16.gmra.mrb[120].mxu1 %v9170_v38  ;;  %v9357_v38 = vor.u32 %v9355_v42, %v9313_v59  ;;  %v9679_v55 = vshll.u32 %v8608_v51, 16  ;;  %v9737_v42 = vshll.u32 %v8610_v53, 16 }
 0x967   : > { %10722 = vmatprep.mubr.bf16.mxu1 %v9266_v25  ;;  %23463 = vst [vmem:[#allocation91_spill] sm:$0xff] %v20736_v18 }
 0x968   : > { %v9362_v9 = vsel %vm23456_vm13, %v9357_v38, %v9361_v13  ;;  %v20733_v59 = vrot.slane %v9679_v55, 1  ;;  %v9455_v38 = vshll.u32 %v8280_v8, 16  ;;  %v9739_v12 = vrot.slane %v9737_v42, 1  ;;  %vm23469_vm13 = vmmov %vm23459_vm9 }
 0x969   : > { %v9499_v55 = vshrl.u32 %v8280_v8, 16 }
 0x96a   : > { %23462 = vst [vmem:[#allocation40_spill] sm:$0xff] %v20733_v59  ;;  %v9799_v36 = vor.u32 %v9797_v62, %v9739_v12  ;;  %v9457_v41 = vrot.slane %v9455_v38, 1 }
 0x96e   : > { %10723 = vmatmul.mubr.bf16.gmra.mrb[124].mxu1 %v9218_v28  ;;  %v9403_v28 = vshrl.u32 %v8276_v4, 16  ;;  %v9733_v4 = vshrl.u32 %v8608_v51, 16 }
 0x96f   : > { %10730 = vmatprep.mubr.bf16.mxu1 %v9314_v21 }
 0x970   : > { %v9405_v6 = vor.u32 %v9403_v28, %v9361_v13  ;;  %v9735_v13 = vor.u32 %v9733_v4, %v20733_v59  ;;  %v8281_v28 = vrot.slane %v20518_v56, 1  ;;  %v8283_v56 = vrot.slane %v20530_v34, 1 }
 0x971   : > { %v8300_v34 = vrot.slane %v20622_v17, 1 }
 0x972   : > { %v8282_v50 = vsel %vm23467_vm11, %v8279_v24, %v8281_v28  ;;  %v8284_v4 = vsel %vm23469_vm13, %v8281_v28, %v8283_v56  ;;  %v8285_v24 = vrot.slane %v20542_v43, 1  ;;  %vm23475_vm11 = vmmov %vm23471_vm2 }
 0x973   : > { %v9503_v53 = vshll.u32 %v8282_v50, 16  ;;  %v9551_v38 = vshll.u32 %v8284_v4, 16  ;;  %v9595_v62 = vshrl.u32 %v8284_v4, 16  ;;  %vm23477_vm13 = vmmov %vm23471_vm2 }
 0x975   : > { %v9505_v16 = vrot.slane %v9503_v53, 1 }
 0x976   : > { %10731 = vmatmul.mubr.bf16.gmra.mrb[128].mxu1 %v9266_v25  ;;  %v9409_v25 = vrot.slane %v9407_v39, 1 }
 0x977   : > { %10738 = vmatprep.mubr.bf16.mxu1 %v9362_v9 }
 0x978   : > { %v9410_v52 = vsel %vm23461_vm6, %v9405_v6, %v9409_v25  ;;  %v9453_v39 = vor.u32 %v9451_v1, %v9409_v25  ;;  %v20744_v6 = vsel %vm23465_vm15, %v9799_v36, %v20736_v18  ;;  %v9501_v25 = vor.u32 %v9499_v55, %v9457_v41  ;;  %vm23472_vm6 = vmmov %vm23459_vm9  ;;  %v23511_v18 = vld [vmem:[#allocation6_spill] sm:$0xff] }
 0x979   : > { %23466 = vst [vmem:[#allocation92_spill] sm:$0xff] %v20744_v6  ;;  %v9547_v1 = vshrl.u32 %v8282_v50, 16  ;;  %vm23474_vm15 = vmmov %vm23472_vm6  ;;  %v8351_v44 = vrot.slane %v23511_v18, 1 }
 0x97a   : > { %v9458_v51 = vsel %vm23468_vm4, %v9453_v39, %v9457_v41  ;;  %v9506_v42 = vsel %vm23470_vm7, %v9501_v25, %v9505_v16  ;;  %v8301_v39 = vsel %vm23472_vm6, %v8285_v24, %v8300_v34  ;;  %v20758_v41 = vcombine.low %v20645_v0, %v20645_v0  ;;  %vm23476_vm4 = vmmov %vm23472_vm6 }
 0x97b   : > { %v9647_v55 = vshll.u32 %v8301_v39, 16  ;;  %vm23478_vm7 = vmmov %vm23471_vm2 }
 0x97c   : > { %v8302_v53 = vrot.slane %v20758_v41, 1 }
 0x97d   : > { %v9649_v25 = vrot.slane %v9647_v55, 1 }
 0x97e   : > { %10739 = vmatmul.mubr.bf16.gmra.mrb[132].mxu1 %v9314_v21  ;;  %v20740_v21 = vsel %vm23453_vm3, %v9735_v13, %v9739_v12  ;;  %v9553_v13 = vrot.slane %v9551_v38, 1  ;;  %v8286_v12 = vsel %vm23459_vm9, %v8283_v56, %v8285_v24  ;;  %vm23473_vm3 = vmmov %vm23471_vm2  ;;  %v8303_v4 = vsel %vm23474_vm15, %v8300_v34, %v8302_v53 }
 0x97f   : > { %10746 = vmatprep.mubr.bf16.mxu1 %v9410_v52  ;;  %23464 = vst [vmem:[#allocation42_spill] sm:$0xff] %v20740_v21  ;;  %v9599_v28 = vshll.u32 %v8286_v12, 16  ;;  %v9700_v38 = vshll.u32 %v8303_v4, 16  ;;  %v9757_v34 = vshrl.u32 %v8303_v4, 16  ;;  %vm23479_vm9 = vmmov %vm23471_vm2  ;;  %vm23483_vm15 = vsmask.f32 6400 }
 0x980   : > { %vm23481_vm6 = vmmov %vm23473_vm3  ;;  %v23518_v21 = vld [vmem:[#allocation9_spill] sm:$0xff] }
 0x981   : > { %v9601_v36 = vrot.slane %v9599_v28, 1  ;;  %v7964_v28 = vld [vmem:[#allocation3 + $0x10] sm:$0xc]  ;;  %v8355_v59 = vrot.slane %v23518_v21, 1 }
 0x986   : > { %10747 = vmatmul.mubr.bf16.gmra.mrb[136].mxu1 %v9362_v9  ;;  %v9549_v9 = vor.u32 %v9547_v1, %v9505_v16  ;;  %v12911_v16 = vcombine.low %v20614_v35, %v20614_v35 }
 0x987   : > { %10754 = vmatprep.mubr.bf16.mxu1 %v9458_v51 }
 0x988   : > { %v9554_v8 = vsel %vm23471_vm2, %v9549_v9, %v9553_v13  ;;  %v8287_v0 = vrot.slane %v12911_v16, 1  ;;  %vm23480_vm2 = vcmask 1045504  }
 0x98e   : > { %10755 = vmatmul.mubr.bf16.gmra.mrb[140].mxu1 %v9410_v52  ;;  %v9597_v52 = vor.u32 %v9595_v62, %v9553_v13  ;;  %v8288_v13 = vsel %vm23476_vm4, %v8285_v24, %v8287_v0  ;;  %vm23485_vm4 = vmmov %vm23480_vm2 }
 0x98f   : > { %10762 = vmatprep.mubr.bf16.mxu1 %v9506_v42  ;;  %v9692_v62 = vshll.u32 %v8288_v13, 16 }
 0x990   : > { %v9602_v50 = vsel %vm23473_vm3, %v9597_v52, %v9601_v36  ;;  %vm23482_vm3 = vmmov %vm23480_vm2 }
 0x991   : > { %v9694_v55 = vrot.slane %v9692_v62, 1 }
 0x996   : > { %10763 = vmatmul.mubr.bf16.gmra.mrb[144].mxu1 %v9458_v51  ;;  %v9643_v51 = vshrl.u32 %v8286_v12, 16  ;;  %v9702_v12 = vrot.slane %v9700_v38, 1 }
 0x997   : > { %10770 = vmatprep.mubr.bf16.mxu1 %v9554_v8 }
 0x998   : > { %v9645_v56 = vor.u32 %v9643_v51, %v9601_v36  ;;  %v16029_v36 = vld [vmem:[#allocation3 + $0x14] sm:$0xf]  ;;  %v9759_v51 = vor.u32 %v9757_v34, %v9702_v12 }
 0x999   : > { %v12915_v35 = vcombine.low %v7964_v28, %v16029_v36  ;;  %v9749_v28 = vshrl.u32 %v8288_v13, 16 }
 0x99a   : > { %v9650_v1 = vsel %vm23475_vm11, %v9645_v56, %v9649_v25  ;;  %v9695_v24 = vsel %vm23478_vm7, %v9645_v56, %v9694_v55  ;;  %v8319_v56 = vrot.slane %v20257_v15, 1  ;;  %vm23484_vm11 = vmmov %vm23483_vm15 }
 0x99b   : > { %v8308_v16 = vshrl.u32 %v12915_v35, 16  ;;  %v9751_v62 = vor.u32 %v9749_v28, %v9694_v55  ;;  %v16031_v28 = vld [vmem:[#allocation3 + $0x28] sm:$0xff]   ;;  %vm23487_vm7 = vmmov %vm23484_vm11 }
 0x99d   : > { %v8310_v38 = vrot.slane %v8308_v16, 1 }
 0x99e   : > { %10771 = vmatmul.mubr.bf16.gmra.mrb[148].mxu1 %v9506_v42  ;;  %v9696_v42 = vshrl.u32 %v8301_v39, 16  ;;  %v8408_v39 = vrot.slane %v12915_v35, 2 }
 0x99f   : > { %10778 = vmatprep.mubr.bf16.mxu1 %v9602_v50 }
 0x9a0   : > { %v9698_v9 = vor.u32 %v9696_v42, %v9649_v25  ;;  %v8409_v25 = vrot.slane %v20228_v7, 2 }
 0x9a2   : > { %v9703_v52 = vsel %vm23477_vm13, %v9698_v9, %v9702_v12  ;;  %v8410_v4 = vsel %vm23480_vm2, %v8408_v39, %v8409_v25  ;;  %v16030_v12 = vld [vmem:[#allocation3 + $0x20] sm:$0xff]   ;;  %vm23486_vm13 = vmmov %vm23481_vm6 }
 0x9a3   : > { %v20772_v36 = vrot.slane %v16030_v12, 2  ;;  %v8812_v39 = vshrl.u32 %v8410_v4, 16 }
 0x9a5   : > { %v8412_v13 = vsel %vm23482_vm3, %v8409_v25, %v20772_v36  ;;  %v8323_v25 = vrot.slane %v20278_v37, 1  ;;  %vm23489_vm3 = vmmov %vm23487_vm7 }
 0x9a6   : > { %10779 = vmatmul.mubr.bf16.gmra.mrb[152].mxu1 %v9554_v8  ;;  %v9761_v8 = vshll.u32 %v8302_v53, 16 }
 0x9a7   : > { %10786 = vmatprep.mubr.bf16.mxu1 %v9650_v1  ;;  %v8311_v1 = vshll.u32 %v12915_v35, 16  ;;  %v8814_v35 = vshll.u32 %v8410_v4, 16 }
 0x9a8   : > { %v9763_v42 = vrot.slane %v9761_v8, 1  ;;  %v9811_v8 = vshrl.u32 %v8302_v53, 16  ;;  %v9808_v53 = vshrl.u32 %v8287_v0, 16 }
 0x9a9   : > { %v8313_v9 = vrot.slane %v8311_v1, 2  ;;  %v8816_v1 = vrot.slane %v8814_v35, 1  ;;  %v8324_v35 = vrot.slane %v20260_v27, 2 }
 0x9aa   : > { %v9813_v16 = vor.u32 %v9811_v8, %v9763_v42 }
 0x9ab   : > { %v8314_v34 = vor.u32 %v8313_v9, %v8310_v38  ;;  %v8817_v12 = vor.u32 %v8816_v1, %v8812_v39  ;;  %v16032_v1 = vld [vmem:[#allocation3 + $0x30] sm:$0xff]  }
 0x9ad   : > { %v8318_v55 = vsel %vm23483_vm15, %v8314_v34, %v20506_v10  ;;  %vm23490_vm15 = vmmov %vm23481_vm6 }
 0x9ae   : > { %10787 = vmatmul.mubr.bf16.gmra.mrb[156].mxu1 %v9602_v50  ;;  %v9764_v50 = vsel %vm23479_vm9, %v9759_v51, %v9763_v42  ;;  %v8802_v9 = vshll.u32 %v8318_v55, 16  ;;  %v8800_v34 = vshrl.u32 %v8318_v55, 16  ;;  %v8328_v55 = vrot.slane %v20281_v40, 2  ;;  %vm23488_vm9 = vmmov %vm23481_vm6 }
 0x9af   : > { %10794 = vmatprep.mubr.bf16.mxu1 %v9703_v52  ;;  %v9753_v52 = vshll.u32 %v8287_v0, 16 }
 0x9b0   : > { %v8804_v8 = vrot.slane %v8802_v9, 1 }
 0x9b1   : > { %v9755_v7 = vrot.slane %v9753_v52, 1  ;;  %v8413_v52 = vrot.slane %v16031_v28, 2  ;;  %v8327_v28 = vrot.slane %v20295_v33, 1 }
 0x9b3   : > { %v9756_v51 = vsel %vm23481_vm6, %v9751_v62, %v9755_v7  ;;  %v9810_v49 = vor.u32 %v9808_v53, %v9755_v7  ;;  %v8414_v4 = vsel %vm23485_vm4, %v20772_v36, %v8413_v52  ;;  %v8887_v7 = vshrl.u32 %v8412_v13, 16  ;;  %v15647_v53 = vld [vmem:[%s22269_s2 + $0x180] sm:$0xff]   ;;  %vm23492_vm4 = vmmov %vm23481_vm6 }
 0x9b6   : > { %10795 = vmatmul.mubr.bf16.gmra.mrb[160].mxu1 %v9695_v24  ;;  %v8320_v24 = vrot.slane %v20239_v11, 2 }
 0x9b7   : > { %10802 = vmatprep.mubr.bf16.mxu1 %v9764_v50  ;;  %v8819_v50 = vshll.u32 %v8412_v13, 16 }
 0x9b8   : > { %v8321_v38 = vor.u32 %v8320_v24, %v8319_v56  ;;  %v8831_v24 = vshll.u32 %v8414_v4, 16 }
 0x9b9   : > { %v8821_v62 = vrot.slane %v8819_v50, 1 }
 0x9ba   : > { %v8322_v42 = vsel %vm23484_vm11, %v20506_v10, %v8321_v38  ;;  %v8415_v10 = vrot.slane %v16032_v1, 2  ;;  %v20791_v9 = vrot.slane %v8831_v24, 1  ;;  %v16033_v24 = vld [vmem:[#allocation3 + $0x38] sm:$0xff]   ;;  %vm23491_vm11 = vmmov %vm23480_vm2 }
 0x9bb   : > { %v8822_v0 = vsel %vm23486_vm13, %v8817_v12, %v8821_v62  ;;  %v8807_v56 = vshll.u32 %v8322_v42, 16  ;;  %v8889_v39 = vor.u32 %v8887_v7, %v8821_v62  ;;  %vm23493_vm13 = vmmov %vm23489_vm3 }
 0x9bc   : > { %v8416_v12 = vsel %vm23480_vm2, %v8413_v52, %v8415_v10  ;;  %v8417_v52 = vrot.slane %v16033_v24, 2 }
 0x9bd   : > { %v8809_v50 = vrot.slane %v8807_v56, 1  ;;  %v8890_v62 = vsel %vm23481_vm6, %v8889_v39, %v20791_v9  ;;  %vm23497_vm6 = vmmov %vm23489_vm3 }
 0x9be   : > { %10803 = vmatmul.mubr.bf16.gmra.mrb[164].mxu1 %v9756_v51  ;;  %v8325_v51 = vor.u32 %v8324_v35, %v8323_v25  ;;  %v8879_v25 = vshrl.u32 %v8322_v42, 16  ;;  %v15649_v42 = vld [vmem:[%s22269_s2 + $0x190] sm:$0xff]  }
 0x9bf   : > { %10810 = vmatprep.mubr.bf16.mxu1 %v9813_v16  ;;  %v8805_v16 = vor.u32 %v8804_v8, %v8800_v34  ;;  %v8891_v8 = vshrl.u32 %v8414_v4, 16  ;;  %v8329_v34 = vor.u32 %v8328_v55, %v8327_v28  ;;  %v8331_v4 = vrot.slane %v20317_v46, 1 }
 0x9c0   : > { %v8881_v56 = vor.u32 %v8879_v25, %v8809_v50  ;;  %v8418_v28 = vsel %vm23491_vm11, %v8415_v10, %v8417_v52  ;;  %v8939_v25 = vshrl.u32 %v8416_v12, 16  ;;  %v16034_v10 = vld [vmem:[#allocation3 + $0x40] sm:$0xff]  }
 0x9c1   : > { %v8810_v13 = vsel %vm23488_vm9, %v8805_v16, %v8809_v50  ;;  %v8893_v7 = vor.u32 %v8891_v8, %v20791_v9  ;;  %v8330_v39 = vsel %vm23489_vm3, %v8325_v51, %v8329_v34  ;;  %vm23495_vm9 = vmmov %vm23480_vm2 }
 0x9c2   : > { %vm23496_vm2 = vmmov %vm23492_vm4 }
 0x9c3   : > { %vm23498_vm3 = vmmov %vm23496_vm2 }
 0x9c4   : > { %vm23500_vm11 = vmmov %vm23496_vm2 }
 0x9c6   : > { %10811 = vmatmul.mubr.bf16.gmra.mrb[168].mxu1 %v9810_v49  ;;  %v8326_v49 = vsel %vm23487_vm7, %v8321_v38, %v8325_v51  ;;  %v15648_v38 = vld [vmem:[%s22269_s2 + $0x188] sm:$0xff]   ;;  %v15650_v51 = vld [vmem:[%s22269_s2 + $0x198] sm:$0xff]   ;;  %vm23494_vm7 = vmmov %vm23492_vm4 }
 0x9c7   : > { %10850 = vmatprep.mubr.bf16.mxu1 %v8822_v0  ;;  %v8883_v35 = vshll.u32 %v8326_v49, 16  ;;  %v8895_v0 = vshll.u32 %v8416_v12, 16  ;;  %v8336_v12 = vrot.slane %v20320_v19, 2 }
 0x9c9   : > { %v8885_v16 = vrot.slane %v8883_v35, 1  ;;  %v8897_v1 = vrot.slane %v8895_v0, 1  ;;  %v8943_v35 = vshll.u32 %v8418_v28, 16  ;;  %v8419_v0 = vrot.slane %v16034_v10, 2 }
 0x9cb   : > { %v8886_v50 = vsel %vm23490_vm15, %v8881_v56, %v8885_v16  ;;  %v20815_v55 = vsel %vm23492_vm4, %v8893_v7, %v8897_v1  ;;  %v8941_v56 = vor.u32 %v8939_v25, %v8897_v1  ;;  %v8945_v7 = vrot.slane %v8943_v35, 1  ;;  %vm23499_vm15 = vmmov %vm23495_vm9 }
 0x9cc   : > { %vm23501_vm4 = vmmov %vm23497_vm6 }
 0x9cd   : > { %v20832_v1 = vsel %vm23496_vm2, %v8941_v56, %v8945_v7 }
 0x9ce   : > { %10851 = vmatmul.mubr.bf16.vlgmr.msra.gmra.mrb[88].mxu1 %v8810_v13  ;;  %v8931_v13 = vshrl.u32 %v8326_v49, 16  ;;  %v15651_v49 = vld [vmem:[%s22269_s2 + $0x1a0] sm:$0xff]  }
 0x9cf   : > { %11019 = vmatpush1.bf16.msra.mxu1 %v15647_v53  ;;  %10858 = vmatprep.mubr.bf16.mxu1 %v8890_v62  ;;  %v8332_v53 = vrot.slane %v20298_v20, 2  ;;  %v8935_v62 = vshll.u32 %v8330_v39, 16 }
 0x9d0   : > { %11020 = vmatprep.subr.bf16.mxu1 %v23375_v54  ;;  %v8933_v8 = vor.u32 %v8931_v13, %v8885_v16 }
 0x9d1   : > { %v8937_v24 = vrot.slane %v8935_v62, 1  ;;  %v8987_v62 = vshrl.u32 %v8418_v28, 16  ;;  %v8340_v28 = vrot.slane %v20343_v23, 2 }
 0x9d3   : > { %11021 = vmatpush1.bf16.msra.mxu1 %v15648_v38  ;;  %v8333_v38 = vor.u32 %v8332_v53, %v8331_v4  ;;  %v8938_v16 = vsel %vm23494_vm7, %v8933_v8, %v8937_v24  ;;  %v8420_v4 = vsel %vm23495_vm9, %v8417_v52, %v8419_v0  ;;  %v8979_v53 = vshrl.u32 %v8330_v39, 16  ;;  %v16035_v52 = vld [vmem:[#allocation3 + $0x48] sm:$0xff]   ;;  %vm23503_vm7 = vmmov %vm23495_vm9 }
 0x9d4   : > { %11022 = vmatprep.subr.bf16.mxu1 %v23375_v54  ;;  %v8421_v8 = vrot.slane %v16035_v52, 2  ;;  %v8989_v10 = vor.u32 %v8987_v62, %v8945_v7  ;;  %v15653_v39 = vld [vmem:[%s22269_s2 + $0x1b0] sm:$0xff]   ;;  %v8341_v62 = vor.u32 %v8340_v28, %v8339_v29  ;;  %vm23504_vm9 = vmmov %vm23496_vm2 }
 0x9d5   : > { %v8981_v35 = vor.u32 %v8979_v53, %v8937_v24 }
 0x9d6   : > { %10859 = vmatmul.mubr.bf16.gmra.mrb[92].mxu1 %v8886_v50  ;;  %v8335_v50 = vrot.slane %v20340_v48, 1 }
 0x9d7   : > { %10866 = vmatprep.mubr.bf16.mxu1 %v20815_v55  ;;  %11023 = vmatpush1.bf16.msra.mxu1 %v15649_v42  ;;  %v8334_v42 = vsel %vm23493_vm13, %v8329_v34, %v8333_v38  ;;  %v15652_v34 = vld [vmem:[%s22269_s2 + $0x1a8] sm:$0xff]   ;;  %vm23502_vm13 = vmmov %vm23496_vm2 }
 0x9d8   : > { %11024 = vmatprep.subr.bf16.mxu1 %v23375_v54  ;;  %v8983_v13 = vshll.u32 %v8334_v42, 16  ;;  %v8337_v25 = vor.u32 %v8336_v12, %v8335_v50  ;;  %v8422_v50 = vsel %vm23499_vm15, %v8419_v0, %v8421_v8  ;;  %v9027_v12 = vshrl.u32 %v8334_v42, 16  ;;  %v16036_v0 = vld [vmem:[#allocation3 + $0x50] sm:$0xff]   ;;  %v15655_v42 = vld [vmem:[%s22269_s2 + $0x1c0] sm:$0xff]   ;;  %vm23505_vm2 = vmmov %vm23501_vm4 }
 0x9da   : > { %v8985_v56 = vrot.slane %v8983_v13, 1  ;;  %v9035_v13 = vshrl.u32 %v8420_v4, 16 }
 0x9db   : > { %11025 = vmatpush1.bf16.msra.mxu1 %v15650_v51  ;;  %v8991_v51 = vshll.u32 %v8420_v4, 16  ;;  %v8344_v4 = vrot.slane %v20367_v5, 2 }
 0x9dc   : > { %11026 = vmatprep.subr.bf16.mxu1 %v23375_v54  ;;  %v8986_v24 = vsel %vm23498_vm3, %v8981_v35, %v8985_v56  ;;  %v8423_v35 = vrot.slane %v16036_v0, 2 }
 0x9de   : > { %10867 = vmatmul.mubr.bf16.gmra.mrb[96].mxu1 %v8938_v16  ;;  %v8338_v16 = vsel %vm23497_vm6, %v8333_v38, %v8337_v25  ;;  %v15654_v38 = vld [vmem:[%s22269_s2 + $0x1b8] sm:$0xff]   ;;  %vm23507_vm6 = vmmov %vm23498_vm3 }
 0x9df   : > { %10874 = vmatprep.mubr.bf16.mxu1 %v20832_v1  ;;  %11027 = vmatpush1.bf16.msra.mxu1 %v15651_v49  ;;  %v8993_v49 = vrot.slane %v8991_v51, 1  ;;  %v9031_v53 = vshll.u32 %v8338_v16, 16  ;;  %v9029_v51 = vor.u32 %v9027_v12, %v8985_v56  ;;  %v8424_v56 = vsel %vm23503_vm7, %v8421_v8, %v8423_v35  ;;  %v16037_v8 = vld [vmem:[#allocation3 + $0x58] sm:$0xff]   ;;  %vm23508_vm3 = vmmov %vm23503_vm7 }
 0x9e0   : > { %11028 = vmatprep.subr.bf16.mxu1 %v23375_v54  ;;  %v9075_v28 = vshrl.u32 %v8338_v16, 16  ;;  %v15657_v16 = vld [vmem:[%s22269_s2 + $0x1d0] sm:$0xff]   ;;  %vm23509_vm15 = vmmov %vm23507_vm6 }
 0x9e1   : > { %v20849_v7 = vsel %vm23500_vm11, %v8989_v10, %v8993_v49  ;;  %v9037_v52 = vor.u32 %v9035_v13, %v8993_v49  ;;  %v9033_v10 = vrot.slane %v9031_v53, 1  ;;  %v9083_v53 = vshrl.u32 %v8422_v50, 16  ;;  %vm23510_vm11 = vmmov %vm23505_vm2 }
 0x9e2   : > { %v8345_v13 = vor.u32 %v8344_v4, %v8343_v63 }
 0x9e3   : > { %11029 = vmatpush1.bf16.msra.mxu1 %v15652_v34  ;;  %v9039_v34 = vshll.u32 %v8422_v50, 16  ;;  %v9034_v29 = vsel %vm23502_vm13, %v9029_v51, %v9033_v10  ;;  %v8425_v51 = vrot.slane %v16037_v8, 2  ;;  %v23506_v50 = vld [vmem:[#allocation4_spill] sm:$0xff]  ;;  %vm23514_vm13 = vmmov %vm23508_vm3 }
 0x9e4   : > { %11030 = vmatprep.subr.bf16.mxu1 %v23375_v54  ;;  %v8348_v30 = vrot.slane %v23506_v50, 2 }
 0x9e6   : > { %10875 = vmatmul.mubr.bf16.gmra.mrb[100].mxu1 %v8986_v24  ;;  %v8342_v24 = vsel %vm23501_vm4, %v8337_v25, %v8341_v62  ;;  %v15656_v25 = vld [vmem:[%s22269_s2 + $0x1c8] sm:$0xff]   ;;  %vm23513_vm4 = vmmov %vm23507_vm6 }
 0x9e7   : > { %10882 = vmatprep.mubr.bf16.mxu1 %v20849_v7  ;;  %11031 = vmatpush1.bf16.msra.mxu1 %v15653_v39  ;;  %v9041_v39 = vrot.slane %v9039_v34, 1  ;;  %v9079_v12 = vshll.u32 %v8342_v24, 16  ;;  %v9077_v34 = vor.u32 %v9075_v28, %v9033_v10  ;;  %v8426_v10 = vsel %vm23508_vm3, %v8423_v35, %v8425_v51  ;;  %v16038_v35 = vld [vmem:[#allocation3 + $0x60] sm:$0xff]   ;;  %vm23515_vm7 = vmmov %vm23513_vm4 }
 0x9e8   : > { %11032 = vmatprep.subr.bf16.mxu1 %v23375_v54  ;;  %v9123_v4 = vshrl.u32 %v8342_v24, 16  ;;  %v15659_v24 = vld [vmem:[%s22269_s2 + $0x1e0] sm:$0xff]  }
 0x9e9   : > { %v20866_v49 = vsel %vm23504_vm9, %v9037_v52, %v9041_v39  ;;  %v9085_v0 = vor.u32 %v9083_v53, %v9041_v39  ;;  %v9081_v52 = vrot.slane %v9079_v12, 1  ;;  %v9131_v12 = vshrl.u32 %v8424_v56, 16  ;;  %vm23517_vm9 = vmmov %vm23505_vm2 }
 0x9ea   : > { %v8349_v53 = vor.u32 %v8348_v30, %v8347_v22 }
 0x9eb   : > { %11033 = vmatpush1.bf16.msra.mxu1 %v15654_v38  ;;  %v9087_v38 = vshll.u32 %v8424_v56, 16  ;;  %v9082_v63 = vsel %vm23507_vm6, %v9077_v34, %v9081_v52  ;;  %v8427_v34 = vrot.slane %v16038_v35, 2  ;;  %v23512_v56 = vld [vmem:[#allocation5_spill] sm:$0xff]  ;;  %vm23521_vm6 = vmmov %vm23508_vm3 }
 0x9ec   : > { %11034 = vmatprep.subr.bf16.mxu1 %v23375_v54  ;;  %v8352_v6 = vrot.slane %v23512_v56, 2 }
 0x9ed   : > { %v8428_v22 = vsel %vm23514_vm13, %v8425_v51, %v8427_v34  ;;  %v16039_v51 = vld [vmem:[#allocation3 + $0x68] sm:$0xff]  }
 0x9ee   : > { %10883 = vmatmul.mubr.bf16.gmra.mrb[104].mxu1 %v9034_v29  ;;  %v8346_v29 = vsel %vm23505_vm2, %v8341_v62, %v8345_v13  ;;  %v15658_v62 = vld [vmem:[%s22269_s2 + $0x1d8] sm:$0xff]   ;;  %vm23520_vm2 = vmmov %vm23513_vm4 }
 0x9ef   : > { %10890 = vmatprep.mubr.bf16.mxu1 %v20866_v49  ;;  %11035 = vmatpush1.bf16.msra.mxu1 %v15655_v42  ;;  %v9089_v42 = vrot.slane %v9087_v38, 1  ;;  %v9127_v28 = vshll.u32 %v8346_v29, 16  ;;  %v9125_v38 = vor.u32 %v9123_v4, %v9081_v52  ;;  %vm23522_vm3 = vmmov %vm23520_vm2 }
 0x9f0   : > { %11036 = vmatprep.subr.bf16.mxu1 %v23375_v54  ;;  %vm23530_vm13 = vmmov %vm23520_vm2 }
 0x9f1   : > { %v20883_v39 = vsel %vm23509_vm15, %v9085_v0, %v9089_v42  ;;  %v9133_v8 = vor.u32 %v9131_v12, %v9089_v42  ;;  %v9129_v0 = vrot.slane %v9127_v28, 1  ;;  %v9171_v42 = vshrl.u32 %v8346_v29, 16  ;;  %v15662_v29 = vld [vmem:[%s22269_s2 + $0x1f0] sm:$0xff]   ;;  %vm23524_vm15 = vmmov %vm23517_vm9 }
 0x9f2   : > { %v9179_v28 = vshrl.u32 %v8426_v10, 16  ;;  %v8353_v12 = vor.u32 %v8352_v6, %v8351_v44 }
 0x9f3   : > { %11037 = vmatpush1.bf16.msra.mxu1 %v15656_v25  ;;  %v9135_v25 = vshll.u32 %v8426_v10, 16  ;;  %v9130_v30 = vsel %vm23513_vm4, %v9125_v38, %v9129_v0  ;;  %v8429_v38 = vrot.slane %v16039_v51, 2  ;;  %v23519_v10 = vld [vmem:[#allocation7_spill] sm:$0xff]  ;;  %vm23529_vm4 = vmmov %vm23521_vm6 }
 0x9f4   : > { %11038 = vmatprep.subr.bf16.mxu1 %v23375_v54  ;;  %v8356_v31 = vrot.slane %v23519_v10, 2 }
 0x9f5   : > { %v8430_v6 = vsel %vm23521_vm6, %v8427_v34, %v8429_v38  ;;  %v16040_v34 = vld [vmem:[#allocation3 + $0x70] sm:$0xff]   ;;  %vm23537_vm6 = vmmov %vm23522_vm3 }
 0x9f6   : > { %10891 = vmatmul.mubr.bf16.gmra.mrb[108].mxu1 %v9082_v63  ;;  %v8350_v63 = vsel %vm23510_vm11, %v8345_v13, %v8349_v53  ;;  %v15661_v13 = vld [vmem:[%s22269_s2 + $0x1e8] sm:$0xff]   ;;  %vm23528_vm11 = vmmov %vm23520_vm2 }
 0x9f7   : > { %10898 = vmatprep.mubr.bf16.mxu1 %v20883_v39  ;;  %11039 = vmatpush1.bf16.msra.mxu1 %v15657_v16  ;;  %v9137_v16 = vrot.slane %v9135_v25, 1  ;;  %v9175_v4 = vshll.u32 %v8350_v63, 16  ;;  %v9173_v25 = vor.u32 %v9171_v42, %v9129_v0 }
 0x9f8   : > { %11040 = vmatprep.subr.bf16.mxu1 %v23375_v54 }
 0x9f9   : > { %v20900_v52 = vsel %vm23515_vm7, %v9133_v8, %v9137_v16  ;;  %v9181_v35 = vor.u32 %v9179_v28, %v9137_v16  ;;  %v9177_v8 = vrot.slane %v9175_v4, 1  ;;  %v9219_v16 = vshrl.u32 %v8350_v63, 16  ;;  %vm23532_vm7 = vmmov %vm23517_vm9 }
 0x9fa   : > { %23516 = vst [vmem:[#allocation44_spill] sm:$0xff] %v20900_v52  ;;  %v9227_v4 = vshrl.u32 %v8428_v22, 16  ;;  %v8357_v28 = vor.u32 %v8356_v31, %v8355_v59 }
 0x9fb   : > { %11041 = vmatpush1.bf16.msra.mxu1 %v15658_v62  ;;  %v9183_v62 = vshll.u32 %v8428_v22, 16  ;;  %v9178_v44 = vsel %vm23520_vm2, %v9173_v25, %v9177_v8  ;;  %v8431_v25 = vrot.slane %v16040_v34, 2 }
 0x9fc   : > { %11042 = vmatprep.subr.bf16.mxu1 %v23375_v54  ;;  %v8358_v63 = vsel %vm23524_vm15, %v8353_v12, %v8357_v28  ;;  %vm23542_vm15 = vmmov %vm23537_vm6 }
 0x9fd   : > { %v8432_v31 = vsel %vm23529_vm4, %v8429_v38, %v8431_v25  ;;  %v23533_v38 = vld [vmem:[#allocation18_spill] sm:$0xff] }
 0x9fe   : > { %10899 = vmatmul.mubr.bf16.gmra.mrb[112].mxu1 %v9130_v30  ;;  %v8354_v30 = vsel %vm23517_vm9, %v8349_v53, %v8353_v12  ;;  %v15663_v53 = vld [vmem:[%s22269_s2 + $0x1f8] sm:$0xff]   ;;  %v9279_v12 = vshll.u32 %v8432_v31, 16  ;;  %vm23535_vm9 = vmmov %vm23520_vm2 }
 0x9ff   : > { %10906 = vmatprep.mubr.bf16.mxu1 %v20900_v52  ;;  %11043 = vmatpush1.bf16.msra.mxu1 %v15659_v24  ;;  %v9185_v24 = vrot.slane %v9183_v62, 1  ;;  %v9223_v42 = vshll.u32 %v8354_v30, 16  ;;  %v9221_v62 = vor.u32 %v9219_v16, %v9177_v8  ;;  %v9267_v59 = vshrl.u32 %v8354_v30, 16  ;;  %v23534_v52 = vld [vmem:[#allocation16_spill] sm:$0xff]  ;;  %vm23536_vm2 = vmmov %vm23529_vm4 }
 0xa00   : > { %11044 = vmatprep.subr.bf16.mxu1 %v23375_v54  ;;  %v9271_v8 = vshll.u32 %v8358_v63, 16  ;;  %vm23544_vm4 = vmmov %vm23537_vm6 }
 0xa01   : > { %v20917_v0 = vsel %vm23522_vm3, %v9181_v35, %v9185_v24  ;;  %v9229_v51 = vor.u32 %v9227_v4, %v9185_v24  ;;  %v9225_v35 = vrot.slane %v9223_v42, 1  ;;  %v9275_v24 = vshrl.u32 %v8430_v6, 16  ;;  %vm23539_vm3 = vmmov %vm23532_vm7 }
 0xa02   : > { %23523 = vst [vmem:[#allocation93_spill] sm:$0xff] %v20917_v0  ;;  %v9273_v34 = vrot.slane %v9271_v8, 1  ;;  %v16042_v8 = vld [vmem:[#allocation3 + $0x80] sm:$0xff]  }
 0xa03   : > { %11045 = vmatpush1.bf16.msra.mxu1 %v15661_v13  ;;  %v9231_v13 = vshll.u32 %v8430_v6, 16  ;;  %v9226_v22 = vsel %vm23528_vm11, %v9221_v62, %v9225_v35  ;;  %v9269_v42 = vor.u32 %v9267_v59, %v9225_v35  ;;  %vm23543_vm11 = vmmov %vm23536_vm2 }
 0xa04   : > { %11046 = vmatprep.subr.bf16.mxu1 %v23375_v54 }
 0xa05   : > { %v9274_v3 = vsel %vm23535_vm9, %v9269_v42, %v9273_v34  ;;  %vm23550_vm9 = vmmov %vm23536_vm2 }
 0xa06   : > { %10907 = vmatmul.mubr.bf16.gmra.mrb[116].mxu1 %v9178_v44  ;;  %v9233_v44 = vrot.slane %v9231_v13, 1 }
 0xa07   : > { %10914 = vmatprep.mubr.bf16.mxu1 %v20917_v0  ;;  %11047 = vmatpush1.bf16.msra.mxu1 %v15662_v29  ;;  %v8359_v29 = vrot.slane %v23525_v57, 1  ;;  %v9281_v0 = vrot.slane %v9279_v12, 1 }
 0xa08   : > { %11048 = vmatprep.subr.bf16.mxu1 %v23375_v54  ;;  %v20931_v54 = vsel %vm23530_vm13, %v9229_v51, %v9233_v44  ;;  %v9277_v13 = vor.u32 %v9275_v24, %v9233_v44  ;;  %v8364_v51 = vrot.slane %v23534_v52, 2  ;;  %v9323_v44 = vshrl.u32 %v8432_v31, 16  ;;  %v23541_v52 = vld [vmem:[#allocation20_spill] sm:$0xff]  ;;  %vm23546_vm13 = vmmov %vm23539_vm3 }
 0xa09   : > { %23531 = vst [vmem:[#allocation46_spill] sm:$0xff] %v20931_v54  ;;  %v8361_v16 = vor.u32 %v8360_v61, %v8359_v29  ;;  %v9315_v61 = vshrl.u32 %v8358_v63, 16  ;;  %v8435_v24 = vrot.slane %v16042_v8, 2 }
 0xa0a   : > { %v20940_v6 = vsel %vm23537_vm6, %v9277_v13, %v9281_v0  ;;  %v9325_v12 = vor.u32 %v9323_v44, %v9281_v0  ;;  %v8368_v13 = vrot.slane %v23541_v52, 2  ;;  %v23548_v52 = vld [vmem:[#allocation24_spill] sm:$0xff]  ;;  %vm23553_vm6 = vmmov %vm23539_vm3 }
 0xa0b   : > { %11049 = vmatpush1.bf16.msra.mxu1 %v15663_v53  ;;  %v16041_v53 = vld [vmem:[#allocation3 + $0x78] sm:$0xff]   ;;  %v8362_v62 = vsel %vm23532_vm7, %v8357_v28, %v8361_v16  ;;  %23538 = vst [vmem:[#allocation94_spill] sm:$0xff] %v20940_v6  ;;  %v9317_v28 = vor.u32 %v9315_v61, %v9273_v34  ;;  %vm23549_vm7 = vmmov %vm23544_vm4 }
 0xa0c   : > { %14241 = vmatprep.subr.bf16.mxu1 %v23527_v32  ;;  %v8433_v4 = vrot.slane %v16041_v53, 2  ;;  %v9319_v35 = vshll.u32 %v8362_v62, 16  ;;  %v9363_v34 = vshrl.u32 %v8362_v62, 16 }
 0xa0e   : > { %10915 = vmatmul.mubr.bf16.gmra.mrb[120].mxu1 %v9226_v22  ;;  %v8363_v22 = vrot.slane %v23533_v38, 1  ;;  %v8434_v30 = vsel %vm23536_vm2, %v8431_v25, %v8433_v4  ;;  %v9321_v53 = vrot.slane %v9319_v35, 1  ;;  %v23540_v25 = vld [vmem:[#allocation22_spill] sm:$0xff]  ;;  %v8436_v63 = vsel %vm23543_vm11, %v8433_v4, %v8435_v24  ;;  %v16043_v35 = vld [vmem:[#allocation3 + $0x88] sm:$0xff]   ;;  %v23547_v4 = vld [vmem:[#allocation27_spill] sm:$0xff] }
 0xa0f   : > { %10922 = vmatprep.mubr.bf16.mxu1 %v20931_v54  ;;  %v9327_v29 = vshll.u32 %v8434_v30, 16  ;;  %v8437_v44 = vrot.slane %v16043_v35, 2  ;;  %vm23551_vm2 = vmmov %vm23544_vm4 }
 0xa10   : > { %v8365_v59 = vor.u32 %v8364_v51, %v8363_v22  ;;  %v9322_v38 = vsel %vm23542_vm15, %v9317_v28, %v9321_v53  ;;  %v9371_v22 = vshrl.u32 %v8434_v30, 16  ;;  %v9375_v51 = vshll.u32 %v8436_v63, 16  ;;  %vm23557_vm15 = vmmov %vm23550_vm9 }
 0xa11   : > { %v9329_v54 = vrot.slane %v9327_v29, 1  ;;  %v8438_v62 = vsel %vm23550_vm9, %v8435_v24, %v8437_v44  ;;  %v23554_v24 = vld [vmem:[#allocation30_spill] sm:$0xff]  ;;  %vm23558_vm11 = vmmov %vm23551_vm2 }
 0xa12   : > { %v8366_v42 = vsel %vm23539_vm3, %v8361_v16, %v8365_v59  ;;  %v9365_v16 = vor.u32 %v9363_v34, %v9321_v53  ;;  %vm23556_vm3 = vmmov %vm23551_vm2 }
 0xa13   : > { %v20949_v31 = vsel %vm23544_vm4, %v9325_v12, %v9329_v54  ;;  %v9367_v0 = vshll.u32 %v8366_v42, 16  ;;  %v9373_v29 = vor.u32 %v9371_v22, %v9329_v54  ;;  %v8372_v12 = vrot.slane %v23548_v52, 2  ;;  %v23555_v52 = vld [vmem:[#allocation28_spill] sm:$0xff]  ;;  %vm23561_vm4 = vmmov %vm23553_vm6 }
 0xa14   : > { %23545 = vst [vmem:[#allocation49_spill] sm:$0xff] %v20949_v31  ;;  %v9411_v53 = vshrl.u32 %v8366_v42, 16 }
 0xa15   : > { %v9369_v8 = vrot.slane %v9367_v0, 1  ;;  %v16044_v0 = vld [vmem:[#allocation3 + $0x90] sm:$0xff]  }
 0xa16   : > { %10923 = vmatmul.mubr.bf16.gmra.mrb[124].mxu1 %v9274_v3  ;;  %v8367_v3 = vrot.slane %v23540_v25, 1  ;;  %v8439_v22 = vrot.slane %v16044_v0, 2 }
 0xa17   : > { %10930 = vmatprep.mubr.bf16.mxu1 %v20940_v6  ;;  %v9377_v6 = vrot.slane %v9375_v51, 1  ;;  %v9370_v25 = vsel %vm23549_vm7, %v9365_v16, %v9369_v8  ;;  %vm23565_vm7 = vmmov %vm23550_vm9 }
 0xa18   : > { %v8369_v61 = vor.u32 %v8368_v13, %v8367_v3  ;;  %v9419_v3 = vshrl.u32 %v8436_v63, 16  ;;  %v9423_v13 = vshll.u32 %v8438_v62, 16  ;;  %v8440_v42 = vsel %vm23557_vm15, %v8437_v44, %v8439_v22  ;;  %vm23566_vm9 = vmmov %vm23551_vm2 }
 0xa19   : > { %v20958_v30 = vsel %vm23551_vm2, %v9373_v29, %v9377_v6  ;;  %v8376_v29 = vrot.slane %v23555_v52, 2 }
 0xa1a   : > { %v8370_v28 = vsel %vm23546_vm13, %v8365_v59, %v8369_v61  ;;  %23552 = vst [vmem:[#allocation95_spill] sm:$0xff] %v20958_v30  ;;  %v9413_v59 = vor.u32 %v9411_v53, %v9369_v8  ;;  %v9421_v51 = vor.u32 %v9419_v3, %v9377_v6  ;;  %vm23564_vm13 = vmmov %vm23551_vm2 }
 0xa1b   : > { %v9415_v54 = vshll.u32 %v8370_v28, 16  ;;  %v9459_v8 = vshrl.u32 %v8370_v28, 16  ;;  %vm23568_vm2 = vmmov %vm23561_vm4 }
 0xa1d   : > { %v9417_v35 = vrot.slane %v9415_v54, 1  ;;  %v20970_v54 = vld [vmem:[#allocation3 + $0x98] sm:$0xff]  }
 0xa1e   : > { %10931 = vmatmul.mubr.bf16.gmra.mrb[128].mxu1 %v9322_v38  ;;  %v8371_v38 = vrot.slane %v23547_v4, 1  ;;  %23560 = vst [vmem:[#allocation96_spill] sm:$0xff] %v20970_v54  ;;  %v8441_v3 = vrot.slane %v20970_v54, 2 }
 0xa1f   : > { %10938 = vmatprep.mubr.bf16.mxu1 %v20949_v31  ;;  %v9425_v31 = vrot.slane %v9423_v13, 1  ;;  %v9418_v4 = vsel %vm23556_vm3, %v9413_v59, %v9417_v35 }
 0xa20   : > { %v8373_v34 = vor.u32 %v8372_v12, %v8371_v38  ;;  %v9467_v38 = vshrl.u32 %v8438_v62, 16  ;;  %v9471_v12 = vshll.u32 %v8440_v42, 16  ;;  %v8442_v62 = vsel %vm23565_vm7, %v8439_v22, %v8441_v3  ;;  %v23569_v22 = vld [vmem:[#allocation87_spill] sm:$0xff] }
 0xa21   : > { %v20967_v63 = vsel %vm23558_vm11, %v9421_v51, %v9425_v31  ;;  %vm23577_vm11 = vmmov %vm23568_vm2 }
 0xa22   : > { %v8374_v16 = vsel %vm23553_vm6, %v8369_v61, %v8373_v34  ;;  %23559 = vst [vmem:[#allocation52_spill] sm:$0xff] %v20967_v63  ;;  %v9461_v61 = vor.u32 %v9459_v8, %v9417_v35  ;;  %v9469_v13 = vor.u32 %v9467_v38, %v9425_v31  ;;  %v9473_v0 = vrot.slane %v9471_v12, 1  ;;  %vm23570_vm6 = vmmov %vm23556_vm3 }
 0xa23   : > { %v9463_v6 = vshll.u32 %v8374_v16, 16  ;;  %v9519_v8 = vshll.u32 %v8442_v62, 16  ;;  %vm23572_vm3 = vmmov %vm23565_vm7 }
 0xa24   : > { %v20979_v35 = vsel %vm23566_vm9, %v9469_v13, %v9473_v0  ;;  %vm23573_vm15 = vmmov %vm23570_vm6 }
 0xa25   : > { %v9465_v59 = vrot.slane %v9463_v6, 1  ;;  %23567 = vst [vmem:[#allocation53_spill] sm:$0xff] %v20979_v35  ;;  %v9521_v54 = vrot.slane %v9519_v8, 1  ;;  %vm23580_vm7 = vmmov %vm23568_vm2 }
 0xa26   : > { %10939 = vmatmul.mubr.bf16.gmra.mrb[132].mxu1 %v9370_v25  ;;  %v8375_v25 = vrot.slane %v23554_v24, 1 }
 0xa27   : > { %10946 = vmatprep.mubr.bf16.mxu1 %v20958_v30  ;;  %v23563_v30 = vld [vmem:[#allocation48_spill] sm:$0xff]  ;;  %v9466_v28 = vsel %vm23564_vm13, %v9461_v61, %v9465_v59  ;;  %v8383_v61 = vrot.slane %v20557_v26, 1 }
 0xa28   : > { %v8377_v53 = vor.u32 %v8376_v29, %v8375_v25  ;;  %v8380_v52 = vrot.slane %v23563_v30, 2  ;;  %v9507_v25 = vshrl.u32 %v8374_v16, 16  ;;  %v9515_v29 = vshrl.u32 %v8440_v42, 16 }
 0xa29   : > { %v23571_v30 = vrot.slane %v20542_v43, 2  ;;  %v23576_v43 = vshll.u32 %v20622_v17, 16 }
 0xa2a   : > { %v8378_v44 = vsel %vm23561_vm4, %v8373_v34, %v8377_v53  ;;  %v9509_v34 = vor.u32 %v9507_v25, %v9465_v59  ;;  %v9517_v38 = vor.u32 %v9515_v29, %v9473_v0  ;;  %v9563_v0 = vshrl.u32 %v8442_v62, 16  ;;  %vm23578_vm4 = vmmov %vm23570_vm6 }
 0xa2b   : > { %v9511_v31 = vshll.u32 %v8378_v44, 16  ;;  %v8444_v16 = vsel %vm23572_vm3, %v8441_v3, %v23571_v30  ;;  %v23575_v29 = vshrl.u32 %v20622_v17, 16  ;;  %v7965_v30 = vld [vmem:[#allocation3 + $0xb4] sm:$0x1]  ;;  %vm23579_vm13 = vmmov %vm23578_vm4 }
 0xa2c   : > { %v20990_v42 = vsel %vm23573_vm15, %v9517_v38, %v9521_v54  ;;  %vm23581_vm9 = vmmov %vm23578_vm4 }
 0xa2d   : > { %v9513_v12 = vrot.slane %v9511_v31, 1  ;;  %23574 = vst [vmem:[#allocation97_spill] sm:$0xff] %v20990_v42  ;;  %v9565_v31 = vor.u32 %v9563_v0, %v9521_v54  ;;  %v8390_v8 = vrot.slane %v23575_v29, 1  ;;  %vm23585_vm15 = vmmov %vm23578_vm4 }
 0xa2e   : > { %10947 = vmatmul.mubr.bf16.gmra.mrb[136].mxu1 %v9418_v4  ;;  %v23562_v4 = vld [vmem:[#allocation32_spill] sm:$0xff] }
 0xa2f   : > { %10954 = vmatprep.mubr.bf16.mxu1 %v20967_v63  ;;  %v8379_v51 = vrot.slane %v23562_v4, 1  ;;  %v9514_v13 = vsel %vm23570_vm6, %v9509_v34, %v9513_v12  ;;  %v8393_v34 = vrot.slane %v23576_v43, 2  ;;  %vm23583_vm6 = vmmov %vm23578_vm4 }
 0xa31   : > { %v8381_v6 = vor.u32 %v8380_v52, %v8379_v51  ;;  %v9555_v52 = vshrl.u32 %v8378_v44, 16  ;;  %v16046_v44 = vld [vmem:[#allocation3 + $0xb0] sm:$0xf]  ;;  %v8394_v54 = vor.u32 %v8393_v34, %v8390_v8 }
 0xa33   : > { %v8382_v63 = vsel %vm23568_vm2, %v8377_v53, %v8381_v6  ;;  %v9567_v53 = vshll.u32 %v8444_v16, 16  ;;  %v9557_v25 = vor.u32 %v9555_v52, %v9513_v12  ;;  %v8397_v52 = vshrl.u32 %v20758_v41, 16  ;;  %vm23582_vm2 = vmmov %vm23572_vm3 }
 0xa34   : > { %v9559_v59 = vshll.u32 %v8382_v63, 16  ;;  %v9603_v12 = vshrl.u32 %v8382_v63, 16  ;;  %vm23584_vm3 = vmmov %vm23580_vm7 }
 0xa36   : > { %10955 = vmatmul.mubr.bf16.gmra.mrb[140].mxu1 %v9466_v28  ;;  %v8384_v28 = vrot.slane %v23569_v22, 2  ;;  %v9561_v3 = vrot.slane %v9559_v59, 1  ;;  %v8400_v59 = vshll.u32 %v20758_v41, 16 }
 0xa37   : > { %10962 = vmatprep.mubr.bf16.mxu1 %v20979_v35  ;;  %v12916_v35 = vcombine.low %v16046_v44, %v7965_v30 }
 0xa38   : > { %v8385_v51 = vor.u32 %v8384_v28, %v8383_v61  ;;  %v9611_v28 = vshrl.u32 %v8444_v16, 16  ;;  %v9605_v0 = vor.u32 %v9603_v12, %v9561_v3  ;;  %v8402_v43 = vrot.slane %v8400_v59, 2 }
 0xa39   : > { %v8477_v59 = vrot.slane %v20257_v15, 2  ;;  %v8482_v15 = vrot.slane %v20260_v27, 3 }
 0xa3a   : > { %v8386_v38 = vsel %vm23577_vm11, %v8381_v6, %v8385_v51  ;;  %v8447_v6 = vrot.slane %v12916_v35, 2  ;;  %v16047_v35 = vld [vmem:[#allocation3 + $0x1c] sm:$0xf]  ;;  %vm23586_vm11 = vmmov %vm23578_vm4 }
 0xa3b   : > { %v9607_v61 = vshll.u32 %v8386_v38, 16  ;;  %v9651_v41 = vshrl.u32 %v8386_v38, 16 }
 0xa3c   : > { %v8448_v63 = vsel %vm23582_vm2, %v20631_v47, %v8447_v6 }
 0xa3d   : > { %v9609_v29 = vrot.slane %v9607_v61, 1  ;;  %v9713_v30 = vshll.u32 %v8448_v63, 16 }
 0xa3e   : > { %10963 = vmatmul.mubr.bf16.gmra.mrb[144].mxu1 %v9514_v13  ;;  %v9569_v13 = vrot.slane %v9567_v53, 1 }
 0xa3f   : > { %10970 = vmatprep.mubr.bf16.mxu1 %v20990_v42  ;;  %v9562_v42 = vsel %vm23578_vm4, %v9557_v25, %v9561_v3  ;;  %v8395_v25 = vsel %vm23580_vm7, %v8385_v51, %v8394_v54  ;;  %v9610_v8 = vsel %vm23581_vm9, %v9605_v0, %v9609_v29  ;;  %v9715_v47 = vrot.slane %v9713_v30, 1  ;;  %vm23589_vm9 = vmmov %vm23578_vm4 }
 0xa40   : > { %v21000_v62 = vsel %vm23579_vm13, %v9565_v31, %v9569_v13  ;;  %v9613_v53 = vor.u32 %v9611_v28, %v9569_v13  ;;  %v7970_v31 = vld [vmem:[#allocation3 + $0x18] sm:$0x8]  ;;  %v9655_v34 = vshll.u32 %v8395_v25, 16  ;;  %v9653_v13 = vor.u32 %v9651_v41, %v9609_v29  ;;  %vm23587_vm13 = vmmov %vm23578_vm4 }
 0xa41   : > { %v21014_v51 = vcombine.low %v7970_v31, %v16047_v35  ;;  %v9716_v38 = vsel %vm23586_vm11, %v20679_v60, %v9715_v47  ;;  %v9777_v31 = vshll.u32 %v8447_v6, 16  ;;  %vm23588_vm7 = vsmask.f32 5376  ;;  %vm23594_vm11 = vmmov %vm23578_vm4 }
 0xa42   : > { %v21011_v16 = vsel %vm23583_vm6, %v9613_v53, %v20662_v58  ;;  %v9657_v44 = vrot.slane %v9655_v34, 1  ;;  %vm23590_vm2 = vmmov %vm23588_vm7  ;;  %vm23591_vm6 = vcmask 1045504  }
 0xa43   : > { %v8470_v12 = vshrl.u32 %v21014_v51, 16  ;;  %v8473_v61 = vshll.u32 %v21014_v51, 16 }
 0xa44   : > { %v9658_v58 = vsel %vm23585_vm15, %v9653_v13, %v9657_v44  ;;  %v7966_v13 = vld [vmem:[#allocation3 + $0x18] sm:$0xc]  ;;  %vm23593_vm15 = vmmov %vm23578_vm4 }
 0xa45   : > { %v8472_v53 = vrot.slane %v8470_v12, 2  ;;  %v8475_v29 = vrot.slane %v8473_v61, 3  ;;  %v12917_v61 = vcombine.low %v7966_v13, %v16047_v35  ;;  %v8486_v35 = vrot.slane %v20281_v40, 3 }
 0xa46   : > { %10971 = vmatmul.mubr.bf16.gmra.mrb[148].mxu1 %v9562_v42  ;;  %v8399_v42 = vrot.slane %v8397_v52, 1  ;;  %v9704_v52 = vshrl.u32 %v8395_v25, 16  ;;  %v8481_v25 = vrot.slane %v20278_v37, 2  ;;  %v8490_v40 = vrot.slane %v20298_v20, 3 }
 0xa47   : > { %10978 = vmatprep.mubr.bf16.mxu1 %v21000_v62  ;;  %v8476_v41 = vor.u32 %v8475_v29, %v8472_v53 }
 0xa48   : > { %v8403_v3 = vor.u32 %v8402_v43, %v8399_v42  ;;  %v8478_v42 = vrot.slane %v20239_v11, 3  ;;  %v9773_v43 = vshrl.u32 %v8448_v63, 16 }
 0xa4a   : > { %v8404_v28 = vsel %vm23584_vm3, %v8394_v54, %v8403_v3  ;;  %v9775_v34 = vor.u32 %v9773_v43, %v9715_v47  ;;  %v8479_v30 = vor.u32 %v8478_v42, %v8477_v59  ;;  %v9769_v63 = vshll.u32 %v8403_v3, 16  ;;  %vm23592_vm3 = vmmov %vm23590_vm2 }
 0xa4b   : > { %v9708_v0 = vshll.u32 %v8404_v28, 16  ;;  %v9765_v11 = vshrl.u32 %v8404_v28, 16  ;;  %v8485_v42 = vrot.slane %v20295_v33, 2  ;;  %v8489_v33 = vrot.slane %v20317_v46, 2 }
 0xa4c   : > { %v9771_v53 = vrot.slane %v9769_v63, 1  ;;  %v15666_v63 = vld [vmem:[%s22269_s2 + $0x200] sm:$0xff]  }
 0xa4d   : > { %v9710_v54 = vrot.slane %v9708_v0, 1  ;;  %v8460_v0 = vrot.slane %v12917_v61, 2 }
 0xa4e   : > { %10979 = vmatmul.mubr.bf16.gmra.mrb[152].mxu1 %v9610_v8  ;;  %v9706_v8 = vor.u32 %v9704_v52, %v9657_v44  ;;  %v8480_v44 = vsel %vm23588_vm7, %v8476_v41, %v8479_v30  ;;  %v9817_v52 = vshrl.u32 %v8447_v6, 16  ;;  %vm23597_vm7 = vmmov %vm23590_vm2 }
 0xa4f   : > { %10986 = vmatprep.mubr.bf16.mxu1 %v21011_v16  ;;  %v9767_v47 = vor.u32 %v9765_v11, %v9710_v54  ;;  %v8838_v59 = vshll.u32 %v8480_v44, 16  ;;  %v8461_v43 = vsel %vm23591_vm6, %v8460_v0, %v20772_v36  ;;  %v8491_v11 = vor.u32 %v8490_v40, %v8489_v33  ;;  %vm23598_vm6 = vmmov %vm23589_vm9 }
 0xa50   : > { %v9711_v60 = vsel %vm23578_vm4, %v9706_v8, %v9710_v54  ;;  %v8826_v8 = vshll.u32 %v8461_v43, 16  ;;  %v9814_v54 = vshrl.u32 %v8403_v3, 16  ;;  %v8824_v36 = vshrl.u32 %v8461_v43, 16  ;;  %vm23595_vm4 = vmmov %vm23590_vm2 }
 0xa51   : > { %v9772_v37 = vsel %vm23589_vm9, %v9767_v47, %v9771_v53  ;;  %v8840_v28 = vrot.slane %v8838_v59, 1  ;;  %v8493_v47 = vrot.slane %v20340_v48, 2  ;;  %v15667_v59 = vld [vmem:[%s22269_s2 + $0x208] sm:$0xff]   ;;  %v8505_v40 = vrot.slane %v20429_v45, 2 }
 0xa52   : > { %v9816_v13 = vor.u32 %v9814_v54, %v9771_v53  ;;  %v8502_v54 = vrot.slane %v20367_v5, 3  ;;  %v15672_v5 = vld [vmem:[%s22269_s2 + $0x230] sm:$0xff]  }
 0xa56   : > { %10987 = vmatmul.mubr.bf16.gmra.mrb[156].mxu1 %v9658_v58  ;;  %v9779_v58 = vrot.slane %v9777_v31, 1  ;;  %v8836_v31 = vshrl.u32 %v8480_v44, 16 }
 0xa57   : > { %10994 = vmatprep.mubr.bf16.mxu1 %v9716_v38  ;;  %v8483_v38 = vor.u32 %v8482_v15, %v8481_v25 }
 0xa58   : > { %v9780_v12 = vsel %vm23587_vm13, %v9775_v34, %v9779_v58  ;;  %v9819_v29 = vor.u32 %v9817_v52, %v9779_v58  ;;  %v8487_v34 = vor.u32 %v8486_v35, %v8485_v42  ;;  %v8841_v41 = vor.u32 %v8840_v28, %v8836_v31  ;;  %vm23596_vm13 = vmmov %vm23589_vm9  ;;  %v15669_v28 = vld [vmem:[%s22269_s2 + $0x218] sm:$0xff]  }
 0xa59   : > { %v8484_v27 = vsel %vm23590_vm2, %v8479_v30, %v8483_v38  ;;  %v8498_v42 = vrot.slane %v20343_v23, 3  ;;  %v15670_v23 = vld [vmem:[%s22269_s2 + $0x220] sm:$0xff]  }
 0xa5a   : > { %v8843_v6 = vshll.u32 %v8484_v27, 16  ;;  %v8488_v30 = vsel %vm23592_vm3, %v8483_v38, %v8487_v34  ;;  %v8899_v15 = vshrl.u32 %v8484_v27, 16  ;;  %v8492_v20 = vsel %vm23595_vm4, %v8487_v34, %v8491_v11  ;;  %vm23599_vm3 = vmmov %vm23590_vm2 }
 0xa5b   : > { %v8494_v38 = vrot.slane %v20320_v19, 3  ;;  %v8947_v0 = vshrl.u32 %v8488_v30, 16  ;;  %v8951_v53 = vshll.u32 %v8492_v20, 16  ;;  %v15668_v19 = vld [vmem:[%s22269_s2 + $0x210] sm:$0xff]   ;;  %v8497_v27 = vrot.slane %v20364_v2, 2  ;;  %vm23602_vm4 = vmmov %vm23598_vm6 }
 0xa5c   : > { %v8845_v58 = vrot.slane %v8843_v6, 1  ;;  %v8995_v43 = vshrl.u32 %v8492_v20, 16  ;;  %v8501_v34 = vrot.slane %v20400_v14, 2 }
 0xa5d   : > { %v8953_v48 = vrot.slane %v8951_v53, 1  ;;  %v8499_v6 = vor.u32 %v8498_v42, %v8497_v27  ;;  %v8514_v53 = vrot.slane %v23519_v10, 3  ;;  %v23606_v27 = vld [vmem:[#allocation12_spill] sm:$0xff] }
 0xa5e   : > { %10995 = vmatmul.mubr.bf16.gmra.mrb[160].mxu1 %v9711_v60  ;;  %v8828_v60 = vrot.slane %v8826_v8, 1  ;;  %v8846_v25 = vsel %vm23593_vm15, %v8841_v41, %v8845_v58  ;;  %v8901_v3 = vor.u32 %v8899_v15, %v8845_v58  ;;  %vm23600_vm15 = vmmov %vm23598_vm6  ;;  %v15674_v15 = vld [vmem:[%s22269_s2 + $0x238] sm:$0xff]   ;;  %v8518_v42 = vrot.slane %v23606_v27, 3 }
 0xa5f   : > { %11002 = vmatprep.mubr.bf16.mxu1 %v9780_v12  ;;  %v8903_v12 = vshll.u32 %v8488_v30, 16  ;;  %v8997_v8 = vor.u32 %v8995_v43, %v8953_v48  ;;  %v8503_v30 = vor.u32 %v8502_v54, %v8501_v34  ;;  %v23612_v34 = vld [vmem:[#allocation93_spill] sm:$0xff] }
 0xa60   : > { %v8829_v61 = vor.u32 %v8828_v60, %v8824_v36 }
 0xa61   : > { %v8905_v44 = vrot.slane %v8903_v12, 1 }
 0xa62   : > { %v8834_v46 = vsel %vm23594_vm11, %v8829_v61, %v20791_v9  ;;  %v8495_v9 = vor.u32 %v8494_v38, %v8493_v47  ;;  %vm23601_vm11 = vmmov %vm23590_vm2 }
 0xa63   : > { %v8906_v52 = vsel %vm23596_vm13, %v8901_v3, %v8905_v44  ;;  %vm23603_vm13 = vmmov %vm23590_vm2 }
 0xa66   : > { %11003 = vmatmul.mubr.bf16.gmra.mrb[164].mxu1 %v9772_v37  ;;  %v8496_v37 = vsel %vm23597_vm7, %v8491_v11, %v8495_v9  ;;  %vm23604_vm7 = vmmov %vm23602_vm4 }
 0xa67   : > { %11010 = vmatprep.mubr.bf16.mxu1 %v9819_v29  ;;  %v8949_v29 = vor.u32 %v8947_v0, %v8905_v44  ;;  %v8999_v31 = vshll.u32 %v8496_v37, 16  ;;  %v9043_v58 = vshrl.u32 %v8496_v37, 16  ;;  %v8513_v0 = vrot.slane %v23518_v21, 2 }
 0xa68   : > { %v8517_v37 = vrot.slane %v23525_v57, 2 }
 0xa69   : > { %v8954_v35 = vsel %vm23589_vm9, %v8949_v29, %v8953_v48  ;;  %v9001_v2 = vrot.slane %v8999_v31, 1  ;;  %vm23605_vm9 = vmmov %vm23590_vm2 }
 0xa6b   : > { %v9002_v41 = vsel %vm23598_vm6, %v8997_v8, %v9001_v2  ;;  %v9045_v33 = vor.u32 %v9043_v58, %v9001_v2  ;;  %vm23609_vm6 = vmmov %vm23599_vm3  ;;  %v23610_v8 = vld [vmem:[#allocation18_spill] sm:$0xff]  ;;  %v23611_v2 = vld [vmem:[#allocation16_spill] sm:$0xff] }
 0xa6e   : > { %11011 = vmatmul.mubr.bf16.gmra.mrb[168].mxu1 %v9816_v13  ;;  %v15671_v13 = vld [vmem:[%s22269_s2 + $0x228] sm:$0xff]  }
 0xa6f   : > { %11050 = vmatprep.mubr.bf16.mxu1 %v8846_v25  ;;  %v8506_v25 = vrot.slane %v23506_v50, 3 }
 0xa71   : > { %v8507_v11 = vor.u32 %v8506_v25, %v8505_v40  ;;  %v23617_v40 = vld [vmem:[#allocation46_spill] sm:$0xff] }
 0xa73   : > { %v8508_v50 = vsel %vm23601_vm11, %v8503_v30, %v8507_v11 }
 0xa74   : > { %v9143_v20 = vshll.u32 %v8508_v50, 16 }
 0xa76   : > { %11051 = vmatmul.mubr.bf16.vlgmr.msra.gmra.mrb[88].mxu1 %v8834_v46 }
 0xa77   : > { %14242 = vmatpush3.bf16.msra.mxu1 %v15666_v63  ;;  %11058 = vmatprep.mubr.bf16.mxu1 %v8906_v52  ;;  %v8510_v63 = vrot.slane %v23512_v56, 3  ;;  %v9145_v52 = vrot.slane %v9143_v20, 1 }
 0xa78   : > { %14243 = vmatprep.subr.bf16.mxu1 %v23527_v32 }
 0xa7b   : > { %14244 = vmatpush3.bf16.msra.mxu1 %v15667_v59 }
 0xa7c   : > { %14245 = vmatprep.subr.bf16.mxu1 %v23527_v32 }
 0xa7e   : > { %11059 = vmatmul.mubr.bf16.gmra.mrb[92].mxu1 %v20815_v55  ;;  %v8500_v55 = vsel %vm23590_vm2, %v8495_v9, %v8499_v6  ;;  %v8515_v9 = vor.u32 %v8514_v53, %v8513_v0  ;;  %vm23608_vm2 = vmmov %vm23602_vm4  ;;  %v8533_v53 = vrot.slane %v23554_v24, 2 }
 0xa7f   : > { %11066 = vmatprep.mubr.bf16.mxu1 %v8954_v35  ;;  %14246 = vmatpush3.bf16.msra.mxu1 %v15668_v19  ;;  %v9047_v60 = vshll.u32 %v8500_v55, 16  ;;  %v9091_v12 = vshrl.u32 %v8500_v55, 16  ;;  %v23607_v35 = vld [vmem:[#allocation44_spill] sm:$0xff]  ;;  %v8522_v55 = vrot.slane %v23611_v2, 3  ;;  %vm23618_vm11 = vmmov %vm23608_vm2  ;;  %v8541_v2 = vrot.slane %v20557_v26, 2 }
 0xa80   : > { %14247 = vmatprep.subr.bf16.mxu1 %v23527_v32 }
 0xa81   : > { %v9049_v14 = vrot.slane %v9047_v60, 1 }
 0xa83   : > { %14248 = vmatpush3.bf16.msra.mxu1 %v15669_v28  ;;  %v9050_v36 = vsel %vm23600_vm15, %v9045_v33, %v9049_v14  ;;  %v9093_v3 = vor.u32 %v9091_v12, %v9049_v14  ;;  %v8519_v28 = vor.u32 %v8518_v42, %v8517_v37  ;;  %vm23614_vm15 = vmmov %vm23609_vm6  ;;  %v23615_v33 = vld [vmem:[#allocation22_spill] sm:$0xff]  ;;  %v23616_v14 = vld [vmem:[#allocation20_spill] sm:$0xff] }
 0xa84   : > { %14249 = vmatprep.subr.bf16.mxu1 %v23527_v32 }
 0xa86   : > { %11067 = vmatmul.mubr.bf16.gmra.mrb[96].mxu1 %v20832_v1  ;;  %v8504_v1 = vsel %vm23599_vm3, %v8499_v6, %v8503_v30  ;;  %v8520_v6 = vsel %vm23609_vm6, %v8515_v9, %v8519_v28  ;;  %vm23613_vm3 = vmmov %vm23608_vm2 }
 0xa87   : > { %11074 = vmatprep.mubr.bf16.mxu1 %v9002_v41  ;;  %14250 = vmatpush3.bf16.msra.mxu1 %v15670_v23  ;;  %v9095_v61 = vshll.u32 %v8504_v1, 16  ;;  %v9139_v46 = vshrl.u32 %v8504_v1, 16  ;;  %v8521_v23 = vrot.slane %v23610_v8, 2  ;;  %v9287_v41 = vshll.u32 %v8520_v6, 16 }
 0xa88   : > { %14251 = vmatprep.subr.bf16.mxu1 %v23527_v32  ;;  %v8526_v1 = vrot.slane %v23616_v14, 3 }
 0xa89   : > { %v9097_v45 = vrot.slane %v9095_v61, 1  ;;  %v9289_v60 = vrot.slane %v9287_v41, 1 }
 0xa8b   : > { %14252 = vmatpush3.bf16.msra.mxu1 %v15671_v13  ;;  %v9098_v44 = vsel %vm23602_vm4, %v9093_v3, %v9097_v45  ;;  %v9141_v38 = vor.u32 %v9139_v46, %v9097_v45  ;;  %v8523_v13 = vor.u32 %v8522_v55, %v8521_v23  ;;  %vm23619_vm4 = vmmov %vm23609_vm6  ;;  %v23620_v45 = vld [vmem:[#allocation27_spill] sm:$0xff]  ;;  %v8542_v55 = vrot.slane %v23569_v22, 3  ;;  %v23638_v22 = vld [vmem:[#allocation34_spill] sm:$0xff] }
 0xa8c   : > { %14253 = vmatprep.subr.bf16.mxu1 %v23527_v32  ;;  %vm23631_vm6 = vmmov %vm23613_vm3  ;;  %v8550_v14 = vshrl.u32 %v23638_v22, 16 }
 0xa8d   : > { %v8524_v30 = vsel %vm23614_vm15, %v8519_v28, %v8523_v13  ;;  %vm23634_vm15 = vmmov %vm23631_vm6  ;;  %v8543_v41 = vor.u32 %v8542_v55, %v8541_v2 }
 0xa8e   : > { %11075 = vmatmul.mubr.bf16.gmra.mrb[100].mxu1 %v20849_v7  ;;  %v8509_v7 = vrot.slane %v23511_v18, 2  ;;  %v9146_v18 = vsel %vm23604_vm7, %v9141_v38, %v9145_v52  ;;  %v9379_v20 = vshrl.u32 %v8524_v30, 16  ;;  %vm23624_vm7 = vmmov %vm23619_vm4 }
 0xa8f   : > { %11082 = vmatprep.mubr.bf16.mxu1 %v9050_v36  ;;  %14254 = vmatpush3.bf16.msra.mxu1 %v15672_v5  ;;  %v8525_v5 = vrot.slane %v23615_v33, 2  ;;  %v9331_v36 = vshrl.u32 %v8520_v6, 16 }
 0xa90   : > { %14255 = vmatprep.subr.bf16.mxu1 %v23527_v32  ;;  %v8511_v47 = vor.u32 %v8510_v63, %v8509_v7  ;;  %v23621_v7 = vld [vmem:[#allocation24_spill] sm:$0xff] }
 0xa91   : > { %v8527_v12 = vor.u32 %v8526_v1, %v8525_v5  ;;  %v9333_v61 = vor.u32 %v9331_v36, %v9289_v60  ;;  %v8530_v63 = vrot.slane %v23621_v7, 3  ;;  %v8553_v1 = vshll.u32 %v23638_v22, 16  ;;  %v23639_v36 = vld [vmem:[#allocation88_spill] sm:$0xff] }
 0xa92   : > { %v8512_v59 = vsel %vm23603_vm13, %v8507_v11, %v8511_v47  ;;  %v8516_v48 = vsel %vm23605_vm9, %v8511_v47, %v8515_v9  ;;  %vm23623_vm13 = vmmov %vm23608_vm2 }
 0xa93   : > { %14256 = vmatpush3.bf16.msra.mxu1 %v15674_v15  ;;  %v9191_v56 = vshll.u32 %v8512_v59, 16  ;;  %v9239_v10 = vshll.u32 %v8516_v48, 16  ;;  %v9283_v54 = vshrl.u32 %v8516_v48, 16  ;;  %v9335_v15 = vshll.u32 %v8524_v30, 16  ;;  %vm23627_vm9 = vmmov %vm23608_vm2  ;;  %v23636_v30 = vld [vmem:[#allocation53_spill] sm:$0xff] }
 0xa94   : > { %v8528_v3 = vsel %vm23619_vm4, %v8523_v13, %v8527_v12 }
 0xa95   : > { %v9193_v19 = vrot.slane %v9191_v56, 1  ;;  %v9241_v31 = vrot.slane %v9239_v10, 1  ;;  %v9337_v11 = vrot.slane %v9335_v15, 1  ;;  %v9383_v47 = vshll.u32 %v8528_v3, 16  ;;  %v23626_v56 = vld [vmem:[#allocation49_spill] sm:$0xff]  ;;  %v23630_v10 = vld [vmem:[#allocation95_spill] sm:$0xff] }
 0xa96   : > { %11083 = vmatmul.mubr.bf16.gmra.mrb[104].mxu1 %v20866_v49  ;;  %v9187_v49 = vshrl.u32 %v8508_v50, 16  ;;  %v8529_v50 = vrot.slane %v23620_v45, 2 }
 0xa97   : > { %11090 = vmatprep.mubr.bf16.mxu1 %v9098_v44  ;;  %v9285_v58 = vor.u32 %v9283_v54, %v9241_v31  ;;  %v23622_v44 = vld [vmem:[#allocation94_spill] sm:$0xff]  ;;  %v9338_v46 = vsel %vm23623_vm13, %v9333_v61, %v9337_v11  ;;  %v8552_v61 = vrot.slane %v8550_v14, 2 }
 0xa98   : > { %v9189_v29 = vor.u32 %v9187_v49, %v9145_v52  ;;  %v8531_v38 = vor.u32 %v8530_v63, %v8529_v50  ;;  %v9381_v52 = vor.u32 %v9379_v20, %v9337_v11  ;;  %v8555_v11 = vrot.slane %v8553_v1, 3  ;;  %v23641_v50 = vld [vmem:[#allocation97_spill] sm:$0xff] }
 0xa99   : > { %v9290_v25 = vsel %vm23618_vm11, %v9285_v58, %v9289_v60 }
 0xa9a   : > { %v9194_v21 = vsel %vm23608_vm2, %v9189_v29, %v9193_v19  ;;  %v8532_v0 = vsel %vm23624_vm7, %v8527_v12, %v8531_v38  ;;  %v9427_v29 = vshrl.u32 %v8528_v3, 16  ;;  %vm23628_vm2 = vmmov %vm23619_vm4  ;;  %v16048_v3 = vld [vmem:[#allocation3 + $0xb8] sm:$0xf] }
 0xa9b   : > { %v9475_v28 = vshrl.u32 %v8532_v0, 16  ;;  %vm23635_vm11 = vmmov %vm23628_vm2 }
 0xa9c   : > { %vm23637_vm4 = vmmov %vm23631_vm6 }
 0xa9d   : > { %vm23640_vm13 = vmmov %vm23628_vm2 }
 0xa9e   : > { %11091 = vmatmul.mubr.bf16.gmra.mrb[108].mxu1 %v20883_v39  ;;  %v9235_v39 = vshrl.u32 %v8512_v59, 16  ;;  %v9385_v59 = vrot.slane %v9383_v47, 1  ;;  %v8548_v15 = vsel %vm23640_vm13, %v8543_v41, %v23639_v36  ;;  %vm23642_vm7 = vmmov %vm23637_vm4 }
 0xa9f   : > { %11098 = vmatprep.mubr.bf16.mxu1 %v9146_v18  ;;  %v23625_v18 = vld [vmem:[#allocation28_spill] sm:$0xff]  ;;  %v9623_v63 = vshll.u32 %v8548_v15, 16 }
 0xaa0   : > { %v9237_v43 = vor.u32 %v9235_v39, %v9193_v19  ;;  %v8534_v49 = vrot.slane %v23625_v18, 3  ;;  %v9386_v9 = vsel %vm23627_vm9, %v9381_v52, %v9385_v59  ;;  %v9431_v19 = vshll.u32 %v8532_v0, 16  ;;  %vm23643_vm9 = vmmov %vm23628_vm2 }
 0xaa1   : > { %v9429_v37 = vor.u32 %v9427_v29, %v9385_v59  ;;  %v9625_v52 = vrot.slane %v9623_v63, 1 }
 0xaa2   : > { %v9242_v57 = vsel %vm23613_vm3, %v9237_v43, %v9241_v31  ;;  %v8535_v48 = vor.u32 %v8534_v49, %v8533_v53  ;;  %v9433_v27 = vrot.slane %v9431_v19, 1  ;;  %vm23632_vm3 = vmmov %vm23628_vm2  ;;  %v9667_v49 = vshrl.u32 %v8548_v15, 16 }
 0xaa4   : > { %v8536_v42 = vsel %vm23628_vm2, %v8531_v38, %v8535_v48  ;;  %v9434_v24 = vsel %vm23631_vm6, %v9429_v37, %v9433_v27  ;;  %v9477_v6 = vor.u32 %v9475_v28, %v9433_v27  ;;  %vm23644_vm2 = vmmov %vm23637_vm4  ;;  %v9669_v29 = vor.u32 %v9667_v49, %v9625_v52 }
 0xaa5   : > { %v9479_v43 = vshll.u32 %v8536_v42, 16  ;;  %vm23645_vm6 = vmmov %vm23632_vm3 }
 0xaa6   : > { %11099 = vmatmul.mubr.bf16.gmra.mrb[112].mxu1 %v23607_v35  ;;  %v8537_v35 = vrot.slane %v23562_v4, 2  ;;  %vm23654_vm13 = vmmov %vm23644_vm2 }
 0xaa7   : > { %11106 = vmatprep.mubr.bf16.mxu1 %v9194_v21  ;;  %v23629_v21 = vld [vmem:[#allocation48_spill] sm:$0xff]  ;;  %v9481_v8 = vrot.slane %v9479_v43, 1 }
 0xaa8   : > { %v8538_v39 = vrot.slane %v23629_v21, 3 }
 0xaa9   : > { %v9482_v4 = vsel %vm23634_vm15, %v9477_v6, %v9481_v8  ;;  %vm23648_vm15 = vcmask 1045504  }
 0xaaa   : > { %v8539_v31 = vor.u32 %v8538_v39, %v8537_v35  ;;  %v23647_v39 = vrot.slane %v23638_v22, 2 }
 0xaac   : > { %v8540_v23 = vsel %vm23632_vm3, %v8535_v48, %v8539_v31  ;;  %v8544_v60 = vsel %vm23635_vm11, %v8539_v31, %v8543_v41  ;;  %vm23646_vm3 = vmmov %vm23644_vm2  ;;  %v23651_v31 = vld [vmem:[#allocation36_spill] sm:$0xff] }
 0xaad   : > { %v9527_v54 = vshll.u32 %v8540_v23, 16  ;;  %v9571_v26 = vshrl.u32 %v8540_v23, 16  ;;  %v9575_v5 = vshll.u32 %v8544_v60, 16  ;;  %vm23650_vm11 = vmmov %vm23644_vm2  ;;  %v23652_v23 = vld [vmem:[#allocation89_spill] sm:$0xff] }
 0xaae   : > { %11107 = vmatmul.mubr.bf16.gmra.mrb[116].mxu1 %v23612_v34  ;;  %v23633_v34 = vld [vmem:[#allocation52_spill] sm:$0xff] }
 0xaaf   : > { %11114 = vmatprep.mubr.bf16.mxu1 %v9242_v57  ;;  %v9523_v57 = vshrl.u32 %v8536_v42, 16  ;;  %v9529_v58 = vrot.slane %v9527_v54, 1  ;;  %v9577_v12 = vrot.slane %v9575_v5, 1 }
 0xab1   : > { %v9525_v13 = vor.u32 %v9523_v57, %v9481_v8 }
 0xab3   : > { %v9530_v33 = vsel %vm23637_vm4, %v9525_v13, %v9529_v58  ;;  %vm23653_vm4 = vmmov %vm23644_vm2 }
 0xab6   : > { %11115 = vmatmul.mubr.bf16.gmra.mrb[120].mxu1 %v23617_v40  ;;  %v9573_v40 = vor.u32 %v9571_v26, %v9529_v58  ;;  %v16049_v26 = vld [vmem:[#allocation3 + $0x20] sm:$0xff]  }
 0xab7   : > { %11122 = vmatprep.mubr.bf16.mxu1 %v9290_v25  ;;  %v7969_v25 = vld [vmem:[#allocation3 + $0xbc] sm:$0x1]  ;;  %v8571_v5 = vrot.slane %v16049_v26, 3  ;;  %v16057_v26 = vld [vmem:[#allocation3 + $0x60] sm:$0xff]  }
 0xab8   : > { %v12919_v45 = vcombine.low %v16048_v3, %v7969_v25  ;;  %v9578_v7 = vsel %vm23642_vm7, %v9573_v40, %v9577_v12  ;;  %vm23655_vm7 = vmmov %vm23644_vm2  ;;  %v16050_v25 = vld [vmem:[#allocation3 + $0x28] sm:$0xff]  }
 0xaba   : > { %v8559_v20 = vshrl.u32 %v12919_v45, 16  ;;  %v8562_v47 = vshll.u32 %v12919_v45, 16  ;;  %v8464_v35 = vrot.slane %v12919_v45, 2  ;;  %v16051_v45 = vld [vmem:[#allocation3 + $0x30] sm:$0xff]  }
 0xabc   : > { %v8561_v0 = vrot.slane %v8559_v20, 2  ;;  %v8564_v53 = vrot.slane %v8562_v47, 3  ;;  %v9785_v54 = vshll.u32 %v8464_v35, 16  ;;  %v9820_v1 = vshrl.u32 %v8464_v35, 16 }
 0xabe   : > { %11123 = vmatmul.mubr.bf16.gmra.mrb[124].mxu1 %v23622_v44  ;;  %v9619_v44 = vshrl.u32 %v8544_v60, 16 }
 0xabf   : > { %11130 = vmatprep.mubr.bf16.mxu1 %v9338_v46  ;;  %v8556_v46 = vor.u32 %v8555_v11, %v8552_v61 }
 0xac0   : > { %v9621_v38 = vor.u32 %v9619_v44, %v9577_v12 }
 0xac1   : > { %v8557_v59 = vsel %vm23643_vm9, %v23639_v36, %v8556_v46  ;;  %vm23656_vm9 = vcmask 1044480   ;;  %v8573_v36 = vrot.slane %v16050_v25, 3 }
 0xac2   : > { %v9626_v18 = vsel %vm23644_vm2, %v9621_v38, %v9625_v52  ;;  %v9725_v27 = vshrl.u32 %v8557_v59, 16  ;;  %vm23657_vm2 = vmmov %vm23656_vm9  ;;  %v16052_v38 = vld [vmem:[#allocation3 + $0x38] sm:$0xff]  }
 0xac3   : > { %v8574_v61 = vsel %vm23657_vm2, %v8571_v5, %v8573_v36  ;;  %v8577_v52 = vrot.slane %v16052_v38, 3 }
 0xac4   : > { %v8855_v3 = vshll.u32 %v8574_v61, 16  ;;  %v8907_v20 = vshrl.u32 %v8574_v61, 16 }
 0xac6   : > { %11131 = vmatmul.mubr.bf16.gmra.mrb[128].mxu1 %v23626_v56  ;;  %v9671_v56 = vshll.u32 %v8557_v59, 16  ;;  %v8857_v63 = vrot.slane %v8855_v3, 1 }
 0xac7   : > { %11138 = vmatprep.mubr.bf16.mxu1 %v9386_v9  ;;  %v8565_v9 = vor.u32 %v8564_v53, %v8561_v0 }
 0xac8   : > { %v9673_v19 = vrot.slane %v9671_v56, 1  ;;  %v8909_v59 = vor.u32 %v8907_v20, %v8857_v63 }
 0xac9   : > { %v8566_v48 = vsel %vm23645_vm6, %v8556_v46, %v8565_v9  ;;  %v9793_v43 = vshll.u32 %v8565_v9, 16  ;;  %v9823_v58 = vshrl.u32 %v8565_v9, 16  ;;  %vm23658_vm6 = vmmov 0   ;;  %v16053_v9 = vld [vmem:[#allocation3 + $0x40] sm:$0xff]  }
 0xaca   : > { %v9674_v37 = vsel %vm23646_vm3, %v9669_v29, %v9673_v19  ;;  %v9729_v42 = vshll.u32 %v8566_v48, 16  ;;  %v9727_v21 = vor.u32 %v9725_v27, %v9673_v19  ;;  %v9789_v8 = vshrl.u32 %v8566_v48, 16  ;;  %vm23659_vm3 = vmmov %vm23657_vm2 }
 0xacb   : > { %v8579_v29 = vrot.slane %v16053_v9, 3 }
 0xace   : > { %11139 = vmatmul.mubr.bf16.gmra.mrb[132].mxu1 %v23630_v10  ;;  %v8465_v10 = vsel %vm23648_vm15, %v23647_v39, %v8464_v35  ;;  %vm23660_vm15 = vmmov %vm23653_vm4 }
 0xacf   : > { %11146 = vmatprep.mubr.bf16.mxu1 %v9434_v24  ;;  %v23649_v24 = vld [vmem:[#allocation39_spill] sm:$0xff]  ;;  %v9721_v6 = vshll.u32 %v8465_v10, 16  ;;  %v9781_v13 = vshrl.u32 %v8465_v10, 16 }
 0xad6   : > { %11147 = vmatmul.mubr.bf16.gmra.mrb[136].mxu1 %v23633_v34  ;;  %v9795_v34 = vrot.slane %v9793_v43, 1 }
 0xad7   : > { %11154 = vmatprep.mubr.bf16.mxu1 %v9482_v4  ;;  %v9723_v4 = vrot.slane %v9721_v6, 1 }
 0xad8   : > { %v9825_v22 = vor.u32 %v9823_v58, %v9795_v34 }
 0xad9   : > { %v9783_v60 = vor.u32 %v9781_v13, %v9723_v4 }
 0xade   : > { %11155 = vmatmul.mubr.bf16.gmra.mrb[140].mxu1 %v23636_v30  ;;  %v9787_v30 = vrot.slane %v9785_v54, 1 }
 0xadf   : > { %11162 = vmatprep.mubr.bf16.mxu1 %v9530_v33  ;;  %v8570_v33 = vrot.slane %v21014_v51, 3 }
 0xae0   : > { %v9788_v14 = vsel %vm23655_vm7, %v9783_v60, %v9787_v30  ;;  %v9822_v12 = vor.u32 %v9820_v1, %v9787_v30  ;;  %vm23663_vm7 = vmmov %vm23653_vm4 }
 0xae1   : > { %v8572_v40 = vsel %vm23656_vm9, %v8570_v33, %v8571_v5  ;;  %vm23664_vm9 = vmmov %vm23657_vm2  ;;  %v8587_v5 = vrot.slane %v16057_v26, 3 }
 0xae2   : > { %v8850_v15 = vshll.u32 %v8572_v40, 16  ;;  %v8848_v51 = vshrl.u32 %v8572_v40, 16 }
 0xae4   : > { %v8852_v11 = vrot.slane %v8850_v15, 1  ;;  %v16058_v15 = vld [vmem:[#allocation3 + $0x68] sm:$0xff]  }
 0xae6   : > { %11163 = vmatmul.mubr.bf16.gmra.mrb[144].mxu1 %v23641_v50  ;;  %v8575_v50 = vrot.slane %v16051_v45, 3 }
 0xae7   : > { %11170 = vmatprep.mubr.bf16.mxu1 %v9578_v7  ;;  %v8853_v7 = vor.u32 %v8852_v11, %v8848_v51 }
 0xae8   : > { %v8576_v44 = vsel %vm23659_vm3, %v8573_v36, %v8575_v50 }
 0xae9   : > { %v8858_v46 = vsel %vm23660_vm15, %v8853_v7, %v8857_v63  ;;  %v8911_v47 = vshll.u32 %v8576_v44, 16  ;;  %v8955_v49 = vshrl.u32 %v8576_v44, 16  ;;  %v16059_v7 = vld [vmem:[#allocation3 + $0x70] sm:$0xff]  }
 0xaea   : > { %v8591_v63 = vrot.slane %v16059_v7, 3 }
 0xaeb   : > { %v8913_v0 = vrot.slane %v8911_v47, 1 }
 0xaed   : > { %v8957_v19 = vor.u32 %v8955_v49, %v8913_v0 }
 0xaee   : > { %11171 = vmatmul.mubr.bf16.gmra.mrb[148].mxu1 %v21000_v62  ;;  %v9731_v62 = vrot.slane %v9729_v42, 1 }
 0xaef   : > { %11178 = vmatprep.mubr.bf16.mxu1 %v9626_v18  ;;  %v8914_v18 = vsel %vm23653_vm4, %v8909_v59, %v8913_v0  ;;  %v16060_v59 = vld [vmem:[#allocation3 + $0x78] sm:$0xff]  }
 0xaf0   : > { %v9732_v28 = vsel %vm23650_vm11, %v9727_v21, %v9731_v62  ;;  %v9791_v55 = vor.u32 %v9789_v8, %v9731_v62  ;;  %vm23661_vm11 = vmmov %vm23657_vm2  ;;  %v16054_v21 = vld [vmem:[#allocation3 + $0x48] sm:$0xff]   ;;  %v8593_v0 = vrot.slane %v16060_v59, 3 }
 0xaf1   : > { %v8578_v53 = vsel %vm23661_vm11, %v8575_v50, %v8577_v52  ;;  %v8581_v62 = vrot.slane %v16054_v21, 3  ;;  %vm23667_vm11 = vmmov %vm23659_vm3  ;;  %v23690_v59 = vld [vmem:[#allocation92_spill] sm:$0xff] }
 0xaf2   : > { %v9796_v41 = vsel %vm23654_vm13, %v9791_v55, %v9795_v34  ;;  %v8959_v56 = vshll.u32 %v8578_v53, 16  ;;  %vm23662_vm13 = vmmov %vm23657_vm2  ;;  %v9003_v42 = vshrl.u32 %v8578_v53, 16 }
 0xaf3   : > { %vm23665_vm2 = vmmov %vm23653_vm4 }
 0xaf4   : > { %v8961_v48 = vrot.slane %v8959_v56, 1  ;;  %vm23666_vm15 = vmmov %vm23665_vm2 }
 0xaf6   : > { %11179 = vmatmul.mubr.bf16.gmra.mrb[152].mxu1 %v21011_v16  ;;  %v9717_v16 = vshrl.u32 %v23651_v31, 16  ;;  %v8962_v27 = vsel %vm23663_vm7, %v8957_v19, %v8961_v48  ;;  %v9005_v39 = vor.u32 %v9003_v42, %v8961_v48  ;;  %vm23670_vm7 = vmmov %vm23665_vm2  ;;  %v16061_v19 = vld [vmem:[#allocation3 + $0x80] sm:$0xff]  }
 0xaf7   : > { %11186 = vmatprep.mubr.bf16.mxu1 %v9674_v37  ;;  %v8580_v37 = vsel %vm23662_vm13, %v8577_v52, %v8579_v29  ;;  %vm23669_vm13 = vmmov %vm23659_vm3  ;;  %v8595_v48 = vrot.slane %v16061_v19, 3 }
 0xaf8   : > { %v9719_v2 = vor.u32 %v9717_v16, %v23652_v23  ;;  %v9007_v35 = vshll.u32 %v8580_v37, 16  ;;  %v9051_v43 = vshrl.u32 %v8580_v37, 16  ;;  %v16055_v16 = vld [vmem:[#allocation3 + $0x50] sm:$0xff]  }
 0xaf9   : > { %v8583_v6 = vrot.slane %v16055_v16, 3 }
 0xafa   : > { %v9724_v57 = vsel %vm23653_vm4, %v9719_v2, %v9723_v4  ;;  %v9009_v10 = vrot.slane %v9007_v35, 1  ;;  %vm23668_vm4 = vmmov %vm23665_vm2 }
 0xafb   : > { %v8584_v2 = vsel %vm23659_vm3, %v8581_v62, %v8583_v6 }
 0xafc   : > { %v9053_v8 = vor.u32 %v9051_v43, %v9009_v10  ;;  %v9103_v4 = vshll.u32 %v8584_v2, 16  ;;  %v9147_v30 = vshrl.u32 %v8584_v2, 16 }
 0xafe   : > { %11187 = vmatmul.mubr.bf16.gmra.mrb[156].mxu1 %v23649_v24  ;;  %v8582_v24 = vsel %vm23664_vm9, %v8579_v29, %v8581_v62  ;;  %v9105_v13 = vrot.slane %v9103_v4, 1  ;;  %vm23671_vm9 = vmmov %vm23659_vm3 }
 0xaff   : > { %11194 = vmatprep.mubr.bf16.mxu1 %v9732_v28  ;;  %v9010_v28 = vsel %vm23665_vm2, %v9005_v39, %v9009_v10  ;;  %v9055_v31 = vshll.u32 %v8582_v24, 16  ;;  %v9099_v34 = vshrl.u32 %v8582_v24, 16  ;;  %v16062_v39 = vld [vmem:[#allocation3 + $0x88] sm:$0xff]  }
 0xb00   : > { %v8597_v10 = vrot.slane %v16062_v39, 3 }
 0xb01   : > { %v9057_v23 = vrot.slane %v9055_v31, 1 }
 0xb03   : > { %v9058_v55 = vsel %vm23666_vm15, %v9053_v8, %v9057_v23  ;;  %vm23672_vm15 = vmmov %vm23665_vm2  ;;  %v16063_v8 = vld [vmem:[#allocation3 + $0x90] sm:$0xff]  }
 0xb06   : > { %11195 = vmatmul.mubr.bf16.gmra.mrb[160].mxu1 %v9724_v57  ;;  %v16056_v57 = vld [vmem:[#allocation3 + $0x58] sm:$0xff]  }
 0xb07   : > { %11202 = vmatprep.mubr.bf16.mxu1 %v9796_v41  ;;  %v8585_v54 = vrot.slane %v16056_v57, 3  ;;  %v9101_v41 = vor.u32 %v9099_v34, %v9057_v23  ;;  %v8599_v23 = vrot.slane %v16063_v8, 3  ;;  %v23700_v8 = vld [vmem:[#allocation14_spill] sm:$0xff] }
 0xb09   : > { %v8586_v58 = vsel %vm23667_vm11, %v8583_v6, %v8585_v54  ;;  %v9106_v60 = vsel %vm23668_vm4, %v9101_v41, %v9105_v13  ;;  %v8588_v1 = vsel %vm23669_vm13, %v8585_v54, %v8587_v5  ;;  %vm23673_vm11 = vmmov %vm23659_vm3  ;;  %v8600_v34 = vsel %vm23659_vm3, %v8597_v10, %v8599_v23  ;;  %v23679_v41 = vld [vmem:[#allocation96_spill] sm:$0xff] }
 0xb0a   : > { %v9151_v33 = vshll.u32 %v8586_v58, 16  ;;  %v9195_v25 = vshrl.u32 %v8586_v58, 16  ;;  %v9199_v36 = vshll.u32 %v8588_v1, 16  ;;  %v9243_v45 = vshrl.u32 %v8588_v1, 16  ;;  %vm23674_vm4 = vmmov %vm23665_vm2 }
 0xb0b   : > { %v8594_v49 = vsel %vm23673_vm11, %v8591_v63, %v8593_v0  ;;  %vm23675_vm13 = vmmov %vm23659_vm3  ;;  %v9487_v54 = vshll.u32 %v8600_v34, 16  ;;  %v9531_v26 = vshrl.u32 %v8600_v34, 16 }
 0xb0c   : > { %v9201_v11 = vrot.slane %v9199_v36, 1  ;;  %v9343_v29 = vshll.u32 %v8594_v49, 16  ;;  %v8596_v42 = vsel %vm23675_vm13, %v8593_v0, %v8595_v48  ;;  %v9387_v21 = vshrl.u32 %v8594_v49, 16  ;;  %vm23680_vm11 = vmmov %vm23659_vm3  ;;  %v23691_v0 = vld [vmem:[#allocation90_spill] sm:$0xff] }
 0xb0d   : > { %v9391_v62 = vshll.u32 %v8596_v42, 16  ;;  %v9435_v16 = vshrl.u32 %v8596_v42, 16  ;;  %vm23682_vm13 = vmmov %vm23659_vm3 }
 0xb0e   : > { %11203 = vmatmul.mubr.bf16.gmra.mrb[164].mxu1 %v9788_v14  ;;  %v9153_v14 = vrot.slane %v9151_v33, 1  ;;  %v9245_v44 = vor.u32 %v9243_v45, %v9201_v11 }
 0xb0f   : > { %11210 = vmatprep.mubr.bf16.mxu1 %v9825_v22  ;;  %v9149_v22 = vor.u32 %v9147_v30, %v9105_v13  ;;  %v8601_v13 = vrot.slane %v23679_v41, 3 }
 0xb10   : > { %v9197_v61 = vor.u32 %v9195_v25, %v9153_v14 }
 0xb11   : > { %v9154_v40 = vsel %vm23670_vm7, %v9149_v22, %v9153_v14  ;;  %vm23676_vm7 = vmmov %vm23665_vm2  ;;  %v8602_v30 = vsel %vm23680_vm11, %v8599_v23, %v8601_v13  ;;  %v16064_v22 = vld [vmem:[#allocation3 + $0xa0] sm:$0xff]  }
 0xb12   : > { %v9202_v3 = vsel %vm23665_vm2, %v9197_v61, %v9201_v11  ;;  %v8603_v14 = vrot.slane %v16064_v22, 3  ;;  %v23684_v11 = vrot.slane %v20622_v17, 3 }
 0xb14   : > { %v8604_v25 = vsel %vm23682_vm13, %v8601_v13, %v8603_v14  ;;  %vm23701_vm13 = vnez %v23700_v8 }
 0xb15   : > { %v9627_v7 = vshrl.u32 %v8604_v25, 16 }
 0xb16   : > { %11211 = vmatmul.mubr.bf16.gmra.mrb[168].mxu1 %v9822_v12  ;;  %v8589_v12 = vrot.slane %v16058_v15, 3  ;;  %v9579_v15 = vshrl.u32 %v8602_v30, 16 }
 0xb17   : > { %14257 = vmatprep.mubr.msk.bf16.mxu1 %vm23658_vm6, %v23527_v32 }
 0xb18   : > { %v8590_v51 = vsel %vm23671_vm9, %v8587_v5, %v8589_v12  ;;  %v8592_v20 = vsel %vm23659_vm3, %v8589_v12, %v8591_v63  ;;  %vm23677_vm9 = vmmov %vm23659_vm3  ;;  %v9535_v5 = vshll.u32 %v8602_v30, 16  ;;  %v9583_v12 = vshll.u32 %v8604_v25, 16  ;;  %v23708_v25 = vld [vmem:[#allocation23_spill] sm:$0xff] }
 0xb19   : > { %v9247_v50 = vshll.u32 %v8590_v51, 16  ;;  %v9291_v38 = vshrl.u32 %v8590_v51, 16  ;;  %v9295_v52 = vshll.u32 %v8592_v20, 16  ;;  %v9339_v9 = vshrl.u32 %v8592_v20, 16 }
 0xb1a   : > { %v8598_v43 = vsel %vm23677_vm9, %v8595_v48, %v8597_v10  ;;  %vm23685_vm9 = vmmov %vm23659_vm3 }
 0xb1b   : > { %v9439_v6 = vshll.u32 %v8598_v43, 16  ;;  %v9483_v57 = vshrl.u32 %v8598_v43, 16  ;;  %v8606_v51 = vsel %vm23685_vm9, %v8603_v14, %v23684_v11  ;;  %vm23686_vm3 = vmmov %vm23665_vm2  ;;  %v23710_v11 = vld [vmem:[#allocation25_spill] sm:$0xff] }
 0xb1c   : > { %v9675_v17 = vshrl.u32 %v8606_v51, 16 }
 0xb1e   : > { %14258 = vmatmul.mubr.bf16.vlgmr.msra.gmra.mrb[88].mxu1 %v8858_v46  ;;  %v9249_v46 = vrot.slane %v9247_v50, 1  ;;  %v9631_v50 = vshll.u32 %v8606_v51, 16 }
 0xb1f   : > { %14261 = vmatprep.mubr.msk.bf16.mxu1 %vm23658_vm6, %v23527_v32 }
 0xb20   : > { %v9250_v47 = vsel %vm23672_vm15, %v9245_v44, %v9249_v46  ;;  %v9293_v53 = vor.u32 %v9291_v38, %v9249_v46  ;;  %vm23678_vm15 = vmmov %vm23665_vm2  ;;  %v9633_v44 = vrot.slane %v9631_v50, 1 }
 0xb22   : > { %v9677_v20 = vor.u32 %v9675_v17, %v9633_v44 }
 0xb26   : > { %14262 = vmatmul.mubr.bf16.gmra.mrb[92].mxu1 %v8914_v18  ;;  %v9297_v18 = vrot.slane %v9295_v52, 1  ;;  %v23689_v52 = vld [vmem:[#allocation42_spill] sm:$0xff] }
 0xb27   : > { %14265 = vmatprep.mubr.msk.bf16.mxu1 %vm23658_vm6, %v23527_v32 }
 0xb28   : > { %v9298_v56 = vsel %vm23674_vm4, %v9293_v53, %v9297_v18  ;;  %v9341_v37 = vor.u32 %v9339_v9, %v9297_v18  ;;  %vm23681_vm4 = vmmov %vm23665_vm2  ;;  %v9826_v53 = vshrl.u32 %v23691_v0, 16  ;;  %v23692_v18 = vld [vmem:[#allocation91_spill] sm:$0xff] }
 0xb29   : > { %v23716_v0 = vld [vmem:[#allocation31_spill] sm:$0xff] }
 0xb2a   : > { %v9828_v49 = vor.u32 %v9826_v53, %v23692_v18 }
 0xb2e   : > { %14266 = vmatmul.mubr.bf16.gmra.mrb[96].mxu1 %v8962_v27  ;;  %v9345_v27 = vrot.slane %v9343_v29, 1 }
 0xb2f   : > { %14269 = vmatprep.mubr.msk.bf16.mxu1 %vm23658_vm6, %v23527_v32 }
 0xb30   : > { %v9346_v35 = vsel %vm23676_vm7, %v9341_v37, %v9345_v27  ;;  %v9389_v24 = vor.u32 %v9387_v21, %v9345_v27  ;;  %vm23683_vm7 = vmmov %vm23665_vm2  ;;  %v23694_v37 = vld [vmem:[#allocation8_spill] sm:$0xff] }
 0xb31   : > { %vm23695_vm11 = vnez %v23694_v37 }
 0xb36   : > { %14270 = vmatmul.mubr.bf16.gmra.mrb[100].mxu1 %v9010_v28  ;;  %v9393_v28 = vrot.slane %v9391_v62, 1 }
 0xb37   : > { %14273 = vmatprep.mubr.msk.bf16.mxu1 %vm23658_vm6, %v23527_v32 }
 0xb38   : > { %v9394_v31 = vsel %vm23665_vm2, %v9389_v24, %v9393_v28  ;;  %v9437_v2 = vor.u32 %v9435_v16, %v9393_v28  ;;  %v23698_v28 = vld [vmem:[#allocation13_spill] sm:$0xff] }
 0xb3e   : > { %14274 = vmatmul.mubr.bf16.gmra.mrb[104].mxu1 %v9058_v55  ;;  %v9441_v55 = vrot.slane %v9439_v6, 1 }
 0xb3f   : > { %14277 = vmatprep.mubr.msk.bf16.mxu1 %vm23658_vm6, %v23527_v32 }
 0xb40   : > { %v9442_v4 = vsel %vm23678_vm15, %v9437_v2, %v9441_v55  ;;  %v9485_v58 = vor.u32 %v9483_v57, %v9441_v55  ;;  %vm23688_vm15 = vmmov %vm23665_vm2 }
 0xb46   : > { %14278 = vmatmul.mubr.bf16.gmra.mrb[108].mxu1 %v9106_v60  ;;  %v9489_v60 = vrot.slane %v9487_v54, 1 }
 0xb47   : > { %14281 = vmatprep.mubr.msk.bf16.mxu1 %vm23658_vm6, %v23527_v32 }
 0xb48   : > { %v9490_v33 = vsel %vm23681_vm4, %v9485_v58, %v9489_v60  ;;  %v9533_v1 = vor.u32 %v9531_v26, %v9489_v60  ;;  %vm23699_vm4 = vnez %v23698_v28  ;;  %v23704_v58 = vld [vmem:[#allocation19_spill] sm:$0xff] }
 0xb49   : > { %vm23705_vm9 = vnez %v23704_v58 }
 0xb4e   : > { %14282 = vmatmul.mubr.bf16.gmra.mrb[112].mxu1 %v9154_v40  ;;  %v9537_v40 = vrot.slane %v9535_v5, 1  ;;  %v23706_v5 = vld [vmem:[#allocation21_spill] sm:$0xff] }
 0xb4f   : > { %14285 = vmatprep.mubr.msk.bf16.mxu1 %vm23658_vm6, %v23527_v32 }
 0xb50   : > { %v9538_v36 = vsel %vm23683_vm7, %v9533_v1, %v9537_v40  ;;  %v9581_v61 = vor.u32 %v9579_v15, %v9537_v40 }
 0xb56   : > { %14286 = vmatmul.mubr.bf16.gmra.mrb[116].mxu1 %v9202_v3  ;;  %v9585_v3 = vrot.slane %v9583_v12, 1 }
 0xb57   : > { %14289 = vmatprep.mubr.msk.bf16.mxu1 %vm23658_vm6, %v23527_v32 }
 0xb58   : > { %v9586_v45 = vsel %vm23665_vm2, %v9581_v61, %v9585_v3  ;;  %v9629_v63 = vor.u32 %v9627_v7, %v9585_v3  ;;  %vm23707_vm2 = vnez %v23706_v5  ;;  %v23712_v7 = vld [vmem:[#allocation26_spill] sm:$0xff] }
 0xb5a   : > { %v9634_v46 = vsel %vm23686_vm3, %v9629_v63, %v9633_v44  ;;  %vm23709_vm3 = vnez %v23708_v25 }
 0xb5e   : > { %14290 = vmatmul.mubr.bf16.gmra.mrb[120].mxu1 %v9250_v47  ;;  %v23687_v47 = vld [vmem:[#allocation40_spill] sm:$0xff] }
 0xb5f   : > { %14293 = vmatprep.mubr.msk.bf16.mxu1 %vm23658_vm6, %v23527_v32  ;;  %v9682_v38 = vsel %vm23688_vm15, %v9677_v20, %v23687_v47  ;;  %vm23711_vm15 = vnez %v23710_v11  ;;  %v23714_v20 = vld [vmem:[#allocation29_spill] sm:$0xff] }
 0xb66   : > { %14294 = vmatmul.mubr.bf16.gmra.mrb[124].mxu1 %v9298_v56 }
 0xb67   : > { %14297 = vmatprep.mubr.msk.bf16.mxu1 %vm23658_vm6, %v23527_v32 }
 0xb6e   : > { %14298 = vmatmul.mubr.bf16.gmra.mrb[128].mxu1 %v9346_v35 }
 0xb6f   : > { %14301 = vmatprep.mubr.msk.bf16.mxu1 %vm23658_vm6, %v23527_v32 }
 0xb76   : > { %14302 = vmatmul.mubr.bf16.gmra.mrb[132].mxu1 %v9394_v31 }
 0xb77   : > { %14305 = vmatprep.mubr.msk.bf16.mxu1 %vm23658_vm6, %v23527_v32 }
 0xb7e   : > { %14306 = vmatmul.mubr.bf16.gmra.mrb[136].mxu1 %v9442_v4  ;;  %v23702_v4 = vld [vmem:[#allocation17_spill] sm:$0xff] }
 0xb7f   : > { %14309 = vmatprep.mubr.msk.bf16.mxu1 %vm23658_vm6, %v23527_v32  ;;  %vm23703_vm7 = vnez %v23702_v4 }
 0xb86   : > { %14310 = vmatmul.mubr.bf16.gmra.mrb[140].mxu1 %v9490_v33 }
 0xb87   : > { %14313 = vmatprep.mubr.msk.bf16.mxu1 %vm23658_vm6, %v23527_v32 }
 0xb8e   : > { %14314 = vmatmul.mubr.bf16.gmra.mrb[144].mxu1 %v9538_v36 }
 0xb8f   : > { %14317 = vmatprep.mubr.msk.bf16.mxu1 %vm23658_vm6, %v23527_v32 }
 0xb96   : > { %14318 = vmatmul.mubr.bf16.gmra.mrb[148].mxu1 %v9586_v45 }
 0xb97   : > { %14321 = vmatprep.mubr.msk.bf16.mxu1 %vm23658_vm6, %v23527_v32 }
 0xb9e   : > { %14322 = vmatmul.mubr.bf16.gmra.mrb[152].mxu1 %v9634_v46 }
 0xb9f   : > { %14325 = vmatprep.mubr.msk.bf16.mxu1 %vm23658_vm6, %v23527_v32 }
 0xba6   : > { %14326 = vmatmul.mubr.bf16.gmra.mrb[156].mxu1 %v9682_v38 }
 0xba7   : > { %14329 = vmatprep.mubr.msk.bf16.mxu1 %vm23658_vm6, %v23527_v32 }
 0xbae   : > { %14330 = vmatmul.mubr.bf16.gmra.mrb[160].mxu1 %v23689_v52 }
 0xbaf   : > { %14333 = vmatprep.mubr.msk.bf16.mxu1 %vm23658_vm6, %v23527_v32 }
 0xbb6   : > { %14334 = vmatmul.mubr.bf16.gmra.mrb[164].mxu1 %v23690_v59 }
 0xbb7   : > { %14337 = vmatprep.mubr.msk.bf16.mxu1 %vm23658_vm6, %v23527_v32  ;;  %v23696_v32 = vld [vmem:[#allocation11_spill] sm:$0xff] }
 0xbb8   : > { %vm23697_vm6 = vnez %v23696_v32 }
 0xbbe   : > { %14338 = vmatmul.mubr.bf16.gmra.mrb[168].mxu1 %v9828_v49 }
 0xbf1   : > { %v21249_v56 = vpop.f32.mrb[88].mxu1 }
 0xbf2   : > { %v14259_v9 = vpop.f32.mrb[89].mxu1  ;;  %v11418_v48 = vsel %vm23167_vm0, %v21249_v56, 0.0 }
 0xbf3   : > { %v21251_v29 = vpop.f32.mrb[90].mxu1 }
 0xbf4   : > { %v11419_v27 = vsel %vm23695_vm11, %v21251_v29, 0.0  ;;  %v14260_v42 = vpop.f32.mrb[91].mxu1 }
 0xbf5   : > { %v11459_v35 = vadd.f32 %v11419_v27, %v11418_v48  ;;  %v23718_v48 = vld [vmem:[#allocation33_spill] sm:$0xff] }
 0xbf9   : > { %v21259_v21 = vpop.f32.mrb[92].mxu1 }
 0xbfa   : > { %v11420_v62 = vsel %vm23697_vm6, %v21259_v21, 0.0  ;;  %v14263_v39 = vpop.f32.mrb[93].mxu1 }
 0xbfb   : > { %v11460_v10 = vadd.f32 %v11459_v35, %v11420_v62  ;;  %v21264_v24 = vpop.f32.mrb[94].mxu1  ;;  %v23720_v39 = vld [vmem:[#allocation35_spill] sm:$0xff] }
 0xbfc   : > { %v11421_v43 = vsel %vm23699_vm4, %v21264_v24, 0.0  ;;  %v14264_v31 = vpop.f32.mrb[95].mxu1 }
 0xbfd   : > { %v11461_v16 = vadd.f32 %v11460_v10, %v11421_v43 }
 0xc01   : > { %v21269_v6 = vpop.f32.mrb[96].mxu1 }
 0xc02   : > { %v11422_v23 = vsel %vm23701_vm13, %v21269_v6, 0.0  ;;  %v14267_v2 = vpop.f32.mrb[97].mxu1 }
 0xc03   : > { %v11462_v55 = vadd.f32 %v11461_v16, %v11422_v23  ;;  %v21274_v34 = vpop.f32.mrb[98].mxu1  ;;  %v23722_v23 = vld [vmem:[#allocation37_spill] sm:$0xff] }
 0xc04   : > { %v11423_v57 = vsel %vm23703_vm7, %v21274_v34, 0.0  ;;  %v14268_v54 = vpop.f32.mrb[99].mxu1 }
 0xc05   : > { %v11463_v41 = vadd.f32 %v11462_v55, %v11423_v57 }
 0xc09   : > { %v21279_v13 = vpop.f32.mrb[100].mxu1 }
 0xc0a   : > { %v11424_v60 = vsel %vm23705_vm9, %v21279_v13, 0.0  ;;  %v14271_v30 = vpop.f32.mrb[101].mxu1 }
 0xc0b   : > { %v11464_v33 = vadd.f32 %v11463_v41, %v11424_v60  ;;  %v21284_v26 = vpop.f32.mrb[102].mxu1  ;;  %v23724_v41 = vld [vmem:[#allocation38_spill] sm:$0xff] }
 0xc0c   : > { %v11425_v22 = vsel %vm23707_vm2, %v21284_v26, 0.0  ;;  %v14272_v14 = vpop.f32.mrb[103].mxu1  ;;  %vm23713_vm2 = vnez %v23712_v7 }
 0xc0d   : > { %v11465_v1 = vadd.f32 %v11464_v33, %v11425_v22  ;;  %v23726_v14 = vld [vmem:[#allocation41_spill] sm:$0xff] }
 0xc11   : > { %v21289_v40 = vpop.f32.mrb[104].mxu1 }
 0xc12   : > { %v11426_v36 = vsel %vm23709_vm3, %v21289_v40, 0.0  ;;  %v14275_v15 = vpop.f32.mrb[105].mxu1  ;;  %vm23715_vm3 = vnez %v23714_v20 }
 0xc13   : > { %v11466_v12 = vadd.f32 %v11465_v1, %v11426_v36  ;;  %v21294_v61 = vpop.f32.mrb[106].mxu1 }
 0xc14   : > { %v11427_v51 = vsel %vm23711_vm15, %v21294_v61, 0.0  ;;  %v14276_v3 = vpop.f32.mrb[107].mxu1  ;;  %vm23717_vm15 = vnez %v23716_v0 }
 0xc15   : > { %v11467_v45 = vadd.f32 %v11466_v12, %v11427_v51  ;;  %v23728_v51 = vld [vmem:[#allocation43_spill] sm:$0xff] }
 0xc19   : > { %v21299_v50 = vpop.f32.mrb[108].mxu1 }
 0xc1a   : > { %v11428_v63 = vsel %vm23713_vm2, %v21299_v50, 0.0  ;;  %v14279_v44 = vpop.f32.mrb[109].mxu1  ;;  %vm23719_vm2 = vnez %v23718_v48 }
 0xc1b   : > { %v11468_v46 = vadd.f32 %v11467_v45, %v11428_v63  ;;  %v21304_v17 = vpop.f32.mrb[110].mxu1 }
 0xc1c   : > { %v11429_v47 = vsel %vm23715_vm3, %v21304_v17, 0.0  ;;  %v14280_v38 = vpop.f32.mrb[111].mxu1  ;;  %vm23721_vm3 = vnez %v23720_v39 }
 0xc1d   : > { %v11469_v52 = vadd.f32 %v11468_v46, %v11429_v47  ;;  %v23730_v46 = vld [vmem:[#allocation45_spill] sm:$0xff] }
 0xc21   : > { %v21309_v59 = vpop.f32.mrb[112].mxu1 }
 0xc22   : > { %v11430_v53 = vsel %vm23717_vm15, %v21309_v59, 0.0  ;;  %v14283_v18 = vpop.f32.mrb[113].mxu1  ;;  %vm23723_vm15 = vnez %v23722_v23 }
 0xc23   : > { %v11470_v49 = vadd.f32 %v11469_v52, %v11430_v53  ;;  %v21314_v9 = vpop.f32.mrb[114].mxu1  ;;  %v23733_v18 = vld [vmem:[#allocation47_spill] sm:$0xff] }
 0xc24   : > { %v11431_v27 = vsel %vm23719_vm2, %v21314_v9, 0.0  ;;  %v14284_v42 = vpop.f32.mrb[115].mxu1  ;;  %vm23725_vm2 = vnez %v23724_v41 }
 0xc25   : > { %v11471_v35 = vadd.f32 %v11470_v49, %v11431_v27 }
 0xc29   : > { %v21319_v62 = vpop.f32.mrb[116].mxu1 }
 0xc2a   : > { %v11432_v10 = vsel %vm23721_vm3, %v21319_v62, 0.0  ;;  %v14287_v43 = vpop.f32.mrb[117].mxu1  ;;  %vm23727_vm3 = vnez %v23726_v14 }
 0xc2b   : > { %v11472_v31 = vadd.f32 %v11471_v35, %v11432_v10  ;;  %v21324_v16 = vpop.f32.mrb[118].mxu1  ;;  %v23736_v10 = vld [vmem:[#allocation50_spill] sm:$0xff] }
 0xc2c   : > { %v11433_v2 = vsel %vm23723_vm15, %v21324_v16, 0.0  ;;  %v14288_v55 = vpop.f32.mrb[119].mxu1  ;;  %vm23729_vm15 = vnez %v23728_v51 }
 0xc2d   : > { %v11473_v57 = vadd.f32 %v11472_v31, %v11433_v2 }
 0xc31   : > { %v21329_v54 = vpop.f32.mrb[120].mxu1 }
 0xc32   : > { %v11434_v60 = vsel %vm23725_vm2, %v21329_v54, 0.0  ;;  %v14291_v30 = vpop.f32.mrb[121].mxu1  ;;  %vm23731_vm2 = vnez %v23730_v46 }
 0xc33   : > { %v11474_v33 = vadd.f32 %v11473_v57, %v11434_v60  ;;  %v21334_v22 = vpop.f32.mrb[122].mxu1  ;;  %v23739_v57 = vld [vmem:[#allocation51_spill] sm:$0xff] }
 0xc34   : > { %v11435_v1 = vsel %vm23727_vm3, %v21334_v22, 0.0  ;;  %v14292_v36 = vpop.f32.mrb[123].mxu1  ;;  %vm23734_vm3 = vnez %v23733_v18 }
 0xc35   : > { %v11475_v15 = vadd.f32 %v11474_v33, %v11435_v1  ;;  %v23742_v36 = vld [vmem:[#allocation54_spill] sm:$0xff] }
 0xc39   : > { %v21339_v12 = vpop.f32.mrb[124].mxu1 }
 0xc3a   : > { %v11436_v3 = vsel %vm23729_vm15, %v21339_v12, 0.0  ;;  %v14295_v45 = vpop.f32.mrb[125].mxu1  ;;  %vm23737_vm15 = vnez %v23736_v10 }
 0xc3b   : > { %v11476_v63 = vadd.f32 %v11475_v15, %v11436_v3  ;;  %v21344_v44 = vpop.f32.mrb[126].mxu1 }
 0xc3c   : > { %v11437_v47 = vsel %vm23731_vm2, %v21344_v44, 0.0  ;;  %v14296_v38 = vpop.f32.mrb[127].mxu1  ;;  %vm23740_vm2 = vnez %v23739_v57 }
 0xc3d   : > { %v11477_v52 = vadd.f32 %v11476_v63, %v11437_v47  ;;  %v23745_v47 = vld [vmem:[#allocation56_spill] sm:$0xff] }
 0xc41   : > { %v21349_v53 = vpop.f32.mrb[128].mxu1 }
 0xc42   : > { %23732 = vst [vmem:[#allocation55_spill] sm:$0xff] %v21349_v53  ;;  %v11438_v49 = vsel %vm23734_vm3, %v21349_v53, 0.0  ;;  %v14299_v27 = vpop.f32.mrb[129].mxu1  ;;  %vm23743_vm3 = vnez %v23742_v36 }
 0xc43   : > { %v11478_v42 = vadd.f32 %v11477_v52, %v11438_v49  ;;  %v21354_v35 = vpop.f32.mrb[130].mxu1 }
 0xc44   : > { %23735 = vst [vmem:[#allocation98_spill] sm:$0xff] %v21354_v35  ;;  %v11439_v43 = vsel %vm23737_vm15, %v21354_v35, 0.0  ;;  %v14300_v31 = vpop.f32.mrb[131].mxu1  ;;  %vm23746_vm15 = vnez %v23745_v47 }
 0xc45   : > { %v11479_v2 = vadd.f32 %v11478_v42, %v11439_v43  ;;  %v23748_v42 = vld [vmem:[#allocation58_spill] sm:$0xff] }
 0xc49   : > { %v21359_v55 = vpop.f32.mrb[132].mxu1 }
 0xc4a   : > { %23738 = vst [vmem:[#allocation57_spill] sm:$0xff] %v21359_v55  ;;  %v11440_v60 = vsel %vm23740_vm2, %v21359_v55, 0.0  ;;  %v14303_v30 = vpop.f32.mrb[133].mxu1  ;;  %vm23749_vm2 = vnez %v23748_v42 }
 0xc4b   : > { %v11480_v33 = vadd.f32 %v11479_v2, %v11440_v60  ;;  %v21364_v1 = vpop.f32.mrb[134].mxu1  ;;  %v23751_v30 = vld [vmem:[#allocation60_spill] sm:$0xff] }
 0xc4c   : > { %23741 = vst [vmem:[#allocation99_spill] sm:$0xff] %v21364_v1  ;;  %v11441_v15 = vsel %vm23743_vm3, %v21364_v1, 0.0  ;;  %v14304_v3 = vpop.f32.mrb[135].mxu1  ;;  %vm23752_vm3 = vnez %v23751_v30 }
 0xc4d   : > { %v11481_v45 = vadd.f32 %v11480_v33, %v11441_v15 }
 0xc51   : > { %v21369_v63 = vpop.f32.mrb[136].mxu1 }
 0xc52   : > { %23744 = vst [vmem:[#allocation59_spill] sm:$0xff] %v21369_v63  ;;  %v11442_v38 = vsel %vm23746_vm15, %v21369_v63, 0.0  ;;  %v14307_v52 = vpop.f32.mrb[137].mxu1 }
 0xc53   : > { %v11482_v49 = vadd.f32 %v11481_v45, %v11442_v38  ;;  %v21374_v27 = vpop.f32.mrb[138].mxu1  ;;  %v23754_v45 = vld [vmem:[#allocation62_spill] sm:$0xff] }
 0xc54   : > { %23747 = vst [vmem:[#allocation100_spill] sm:$0xff] %v21374_v27  ;;  %v11443_v43 = vsel %vm23749_vm2, %v21374_v27, 0.0  ;;  %v14308_v31 = vpop.f32.mrb[139].mxu1  ;;  %vm23755_vm15 = vnez %v23754_v45 }
 0xc55   : > { %v11483_v2 = vadd.f32 %v11482_v49, %v11443_v43  ;;  %v23757_v49 = vld [vmem:[#allocation63_spill] sm:$0xff] }
 0xc56   : > { %vm23758_vm2 = vnez %v23757_v49 }
 0xc59   : > { %v21379_v60 = vpop.f32.mrb[140].mxu1 }
 0xc5a   : > { %23750 = vst [vmem:[#allocation61_spill] sm:$0xff] %v21379_v60  ;;  %v11444_v33 = vsel %vm23752_vm3, %v21379_v60, 0.0  ;;  %v14311_v15 = vpop.f32.mrb[141].mxu1 }
 0xc5b   : > { %v11484_v3 = vadd.f32 %v11483_v2, %v11444_v33  ;;  %v21384_v47 = vpop.f32.mrb[142].mxu1  ;;  %v23760_v2 = vld [vmem:[#allocation66_spill] sm:$0xff] }
 0xc5c   : > { %23753 = vst [vmem:[#allocation101_spill] sm:$0xff] %v21384_v47  ;;  %v11445_v38 = vsel %vm23755_vm15, %v21384_v47, 0.0  ;;  %v14312_v52 = vpop.f32.mrb[143].mxu1  ;;  %vm23761_vm3 = vnez %v23760_v2 }
 0xc5d   : > { %v11485_v36 = vadd.f32 %v11484_v3, %v11445_v38 }
 0xc61   : > { %v21389_v42 = vpop.f32.mrb[144].mxu1 }
 0xc62   : > { %23756 = vst [vmem:[#allocation64_spill] sm:$0xff] %v21389_v42  ;;  %v11446_v43 = vsel %vm23758_vm2, %v21389_v42, 0.0  ;;  %v14315_v31 = vpop.f32.mrb[145].mxu1 }
 0xc63   : > { %v11486_v27 = vadd.f32 %v11485_v36, %v11446_v43  ;;  %v21394_v30 = vpop.f32.mrb[146].mxu1 }
 0xc64   : > { %23759 = vst [vmem:[#allocation102_spill] sm:$0xff] %v21394_v30  ;;  %v11447_v33 = vsel %vm23761_vm3, %v21394_v30, 0.0  ;;  %v14316_v15 = vpop.f32.mrb[147].mxu1 }
 0xc65   : > { %v11487_v60 = vadd.f32 %v11486_v27, %v11447_v33 }
 0xc69   : > { %v21399_v45 = vpop.f32.mrb[148].mxu1 }
 0xc6a   : > { %23762 = vst [vmem:[#allocation65_spill] sm:$0xff] %v21399_v45  ;;  %v11448_v38 = vsel %vm23206_vm14, %v21399_v45, 0.0  ;;  %v14319_v52 = vpop.f32.mrb[149].mxu1 }
 0xc6b   : > { %v11488_v47 = vadd.f32 %v11487_v60, %v11448_v38  ;;  %v21404_v49 = vpop.f32.mrb[150].mxu1 }
 0xc6c   : > { %23764 = vst [vmem:[#allocation103_spill] sm:$0xff] %v21404_v49  ;;  %v11449_v43 = vsel %vm23207_vm8, %v21404_v49, 0.0  ;;  %v14320_v31 = vpop.f32.mrb[151].mxu1 }
 0xc6d   : > { %v11489_v42 = vadd.f32 %v11488_v47, %v11449_v43 }
 0xc71   : > { %v21409_v2 = vpop.f32.mrb[152].mxu1 }
 0xc72   : > { %23766 = vst [vmem:[#allocation68_spill] sm:$0xff] %v21409_v2  ;;  %v11450_v33 = vsel %vm23208_vm10, %v21409_v2, 0.0  ;;  %v14323_v15 = vpop.f32.mrb[153].mxu1 }
 0xc73   : > { %v11490_v30 = vadd.f32 %v11489_v42, %v11450_v33  ;;  %v11383_v3 = vpop.f32.mrb[154].mxu1  ;;  %v23771_v42 = vld [vmem:[#allocation79_spill] sm:$0xff] }
 0xc74   : > { %v11451_v60 = vsel %vm18737_vm12, %v11383_v3, 0.0  ;;  %v14324_v38 = vpop.f32.mrb[155].mxu1  ;;  %vm23772_vm10 = vnez %v23771_v42 }
 0xc75   : > { %v11491_v52 = vadd.f32 %v11490_v30, %v11451_v60  ;;  %v23773_v30 = vld [vmem:[#allocation81_spill] sm:$0xff] }
 0xc76   : > { %vm23774_vm12 = vnez %v23773_v30 }
 0xc79   : > { %v11388_v57 = vpop.f32.mrb[156].mxu1 }
 0xc7a   : > { %v11452_v36 = vsel %vm18768_vm5, %v11388_v57, 0.0  ;;  %v14327_v31 = vpop.f32.mrb[157].mxu1 }
 0xc7b   : > { %v11492_v47 = vadd.f32 %v11491_v52, %v11452_v36  ;;  %v11391_v43 = vpop.f32.mrb[158].mxu1  ;;  %v23775_v36 = vld [vmem:[#allocation83_spill] sm:$0xff] }
 0xc7c   : > { %v11453_v10 = vsel %vm18794_vm1, %v11391_v43, 0.0  ;;  %v14328_v27 = vpop.f32.mrb[159].mxu1  ;;  %vm23776_vm5 = vnez %v23775_v36 }
 0xc7d   : > { %v11493_v2 = vadd.f32 %v11492_v47, %v11453_v10  ;;  %v23777_v10 = vld [vmem:[#allocation84_spill] sm:$0xff] }
 0xc7e   : > { %vm23778_vm1 = vnez %v23777_v10 }
 0xc81   : > { %v11396_v15 = vpop.f32.mrb[160].mxu1 }
 0xc82   : > { %v11454_v33 = vsel %vm23772_vm10, %v11396_v15, 0.0  ;;  %v14331_v45 = vpop.f32.mrb[161].mxu1 }
 0xc83   : > { %v11494_v1 = vadd.f32 %v11493_v2, %v11454_v33  ;;  %v11399_v38 = vpop.f32.mrb[162].mxu1  ;;  %v23779_v2 = vld [vmem:[#allocation86_spill] sm:$0xff] }
 0xc84   : > { %v11455_v60 = vsel %vm23774_vm12, %v11399_v38, 0.0  ;;  %v14332_v63 = vpop.f32.mrb[163].mxu1  ;;  %vm23780_vm10 = vnez %v23779_v2  ;;  %vm23781_vm12 = vcmask 1043456  }
 0xc85   : > { %v11495_v18 = vadd.f32 %v11494_v1, %v11455_v60 }
 0xc89   : > { %v11404_v31 = vpop.f32.mrb[164].mxu1 }
 0xc8a   : > { %v11456_v52 = vsel %vm23776_vm5, %v11404_v31, 0.0  ;;  %v14335_v49 = vpop.f32.mrb[165].mxu1 }
 0xc8b   : > { %v11496_v55 = vadd.f32 %v11495_v18, %v11456_v52  ;;  %v11407_v27 = vpop.f32.mrb[166].mxu1 }
 0xc8c   : > { %v11457_v47 = vsel %vm23778_vm1, %v11407_v27, 0.0  ;;  %v14336_v42 = vpop.f32.mrb[167].mxu1 }
 0xc8d   : > { %v11497_v46 = vadd.f32 %v11496_v55, %v11457_v47 }
 0xc91   : > { %v11412_v45 = vpop.f32.mrb[168].mxu1 }
 0xc92   : > { %v11458_v33 = vsel %vm23780_vm10, %v11412_v45, 0.0  ;;  %v14339_v30 = vpop.f32.mrb[169].mxu1 }
 0xc93   : > { %v11415_v35 = vpop.f32.mrb[170].mxu1  ;;  %v11498_v1 = vsel %vm23781_vm12, %v11458_v33, 0.0  ;;  %vm23782_vm12 = vnez %v23706_v5 }
 0xc94   : > { %v14340_v63 = vpop.f32.mrb[171].mxu1  ;;  %v11499_v60 = vadd.f32 %v11498_v1, %v11497_v46 }
 0xc96   : > { %11500 = vadd.xlane.f32.xlu1 %v11499_v60 }
 0xd23   : > { %v11501_v36 = vpop.xlane.xlu1 %11500 }
 0xd24   : > { %v11502_v49 = vrot.slane %v11501_v36, 4 }
 0xd26   : > { %v11503_v18 = vadd.f32 %v11502_v49, %v11501_v36 }
 0xd28   : > { %v11504_v52 = vrot.slane %v11503_v18, 2 }
 0xd2a   : > { %v11505_v51 = vadd.f32 %v11504_v52, %v11503_v18 }
 0xd2c   : > { %v11506_v10 = vrot.slane %v11505_v51, 1 }
 0xd2e   : > { %v11507_v53 = vadd.f32 %v11506_v10, %v11505_v51 }
 0xd30   : > { %15365 = vpush %v11507_v53 }
 0xd61   : > { %s15366_s25 = spop %15365 }
 0xd62   : > { %s11509_s26 = smul.f32 0.00048828125, %s15366_s25 }
 0xd64   : > { %v21431_v55 = vstv %s11509_s26 }
 0xd65   : > { %v21434_v42 = vsub.f32 %v11383_v3, %v21431_v55  ;;  %v21437_v35 = vsub.f32 %v11388_v57, %v21431_v55  ;;  %v21440_v46 = vsub.f32 %v11391_v43, %v21431_v55  ;;  %v21443_v30 = vsub.f32 %v11396_v15, %v21431_v55 }
 0xd66   : > { %v21446_v36 = vsub.f32 %v11399_v38, %v21431_v55  ;;  %v21449_v51 = vsub.f32 %v11404_v31, %v21431_v55  ;;  %v21452_v53 = vsub.f32 %v11407_v27, %v21431_v55  ;;  %v21455_v3 = vsub.f32 %v11412_v45, %v21431_v55 }
 0xd67   : > { %v21459_v57 = vsub.f32 %v21249_v56, %v21431_v55  ;;  %v21463_v43 = vsub.f32 %v21251_v29, %v21431_v55  ;;  %v21467_v15 = vsub.f32 %v21259_v21, %v21431_v55  ;;  %v21477_v56 = vsub.f32 %v21264_v24, %v21431_v55 }
 0xd68   : > { %v21481_v29 = vsub.f32 %v21269_v6, %v21431_v55  ;;  %v21488_v19 = vsub.f32 %v21274_v34, %v21431_v55  ;;  %v21495_v45 = vsub.f32 %v21279_v13, %v21431_v55  ;;  %v21502_v34 = vsub.f32 %v21284_v26, %v21431_v55 }
 0xd69   : > { %v11552_v38 = vsel %vm23167_vm0, %v21459_v57, 0.0  ;;  %v11553_v31 = vsel %vm23695_vm11, %v21463_v43, 0.0  ;;  %v11554_v21 = vsel %vm23697_vm6, %v21467_v15, 0.0  ;;  %v11555_v37 = vsel %vm23699_vm4, %v21477_v56, 0.0 }
 0xd6a   : > { %v11593_v27 = vmul.f32 %v11552_v38, %v11552_v38  ;;  %v11594_v10 = vmul.f32 %v11553_v31, %v11553_v31  ;;  %v11595_v24 = vmul.f32 %v11554_v21, %v11554_v21  ;;  %v11556_v6 = vsel %vm23701_vm13, %v21481_v29, 0.0 }
 0xd6b   : > { %v11596_v32 = vmul.f32 %v11555_v37, %v11555_v37  ;;  %v11557_v28 = vsel %vm23703_vm7, %v21488_v19, 0.0  ;;  %v11597_v1 = vmul.f32 %v11556_v6, %v11556_v6  ;;  %v21509_v13 = vsub.f32 %v21289_v40, %v21431_v55 }
 0xd6c   : > { %v11634_v47 = vadd.f32 %v11594_v10, %v11593_v27  ;;  %v11558_v8 = vsel %vm23705_vm9, %v21495_v45, 0.0  ;;  %v11598_v60 = vmul.f32 %v11557_v28, %v11557_v28  ;;  %v21516_v26 = vsub.f32 %v21294_v61, %v21431_v55 }
 0xd6d   : > { %v11559_v4 = vsel %vm23782_vm12, %v21502_v34, 0.0  ;;  %v11599_v18 = vmul.f32 %v11558_v8, %v11558_v8  ;;  %v21523_v40 = vsub.f32 %v21299_v50, %v21431_v55  ;;  %vm23783_vm0 = vnez %v23708_v25 }
 0xd6e   : > { %v11635_v33 = vadd.f32 %v11634_v47, %v11595_v24  ;;  %v11560_v58 = vsel %vm23783_vm0, %v21509_v13, 0.0  ;;  %v11600_v38 = vmul.f32 %v11559_v4, %v11559_v4  ;;  %v21530_v61 = vsub.f32 %v21304_v17, %v21431_v55 }
 0xd6f   : > { %vm23784_vm11 = vnez %v23710_v11  ;;  %v11601_v27 = vmul.f32 %v11560_v58, %v11560_v58  ;;  %v21537_v50 = vsub.f32 %v21309_v59, %v21431_v55  ;;  %vm23785_vm6 = vnez %v23712_v7  ;;  %v23793_v58 = vld [vmem:[#allocation55_spill] sm:$0xff] }
 0xd70   : > { %v11636_v63 = vadd.f32 %v11635_v33, %v11596_v32  ;;  %v11561_v5 = vsel %vm23784_vm11, %v21516_v26, 0.0  ;;  %v11562_v25 = vsel %vm23785_vm6, %v21523_v40, 0.0  ;;  %v21544_v17 = vsub.f32 %v21314_v9, %v21431_v55 }
 0xd71   : > { %v11602_v21 = vmul.f32 %v11561_v5, %v11561_v5  ;;  %vm23786_vm4 = vnez %v23714_v20  ;;  %v11603_v24 = vmul.f32 %v11562_v25, %v11562_v25  ;;  %v21551_v59 = vsub.f32 %v21319_v62, %v21431_v55 }
 0xd72   : > { %v11637_v49 = vadd.f32 %v11636_v63, %v11597_v1  ;;  %v11563_v11 = vsel %vm23786_vm4, %v21530_v61, 0.0  ;;  %vm23787_vm13 = vnez %v23716_v0  ;;  %v21558_v9 = vsub.f32 %v21324_v16, %v21431_v55 }
 0xd73   : > { %v11564_v7 = vsel %vm23787_vm13, %v21537_v50, 0.0  ;;  %v11604_v6 = vmul.f32 %v11563_v11, %v11563_v11  ;;  %vm23788_vm7 = vnez %v23718_v48  ;;  %v21565_v62 = vsub.f32 %v21329_v54, %v21431_v55 }
 0xd74   : > { %v11638_v52 = vadd.f32 %v11637_v49, %v11598_v60  ;;  %v11565_v20 = vsel %vm23788_vm7, %v21544_v17, 0.0  ;;  %v11605_v33 = vmul.f32 %v11564_v7, %v11564_v7  ;;  %vm23789_vm9 = vnez %v23720_v39 }
 0xd75   : > { %v11566_v0 = vsel %vm23789_vm9, %v21551_v59, 0.0  ;;  %v11606_v1 = vmul.f32 %v11565_v20, %v11565_v20  ;;  %v21572_v16 = vsub.f32 %v21334_v22, %v21431_v55  ;;  %vm23790_vm12 = vnez %v23722_v23 }
 0xd76   : > { %v11639_v31 = vadd.f32 %v11638_v52, %v11599_v18  ;;  %v11567_v48 = vsel %vm23790_vm12, %v21558_v9, 0.0  ;;  %v11607_v8 = vmul.f32 %v11566_v0, %v11566_v0  ;;  %v21579_v54 = vsub.f32 %v21339_v12, %v21431_v55 }
 0xd77   : > { %vm23791_vm0 = vnez %v23724_v41  ;;  %v11608_v49 = vmul.f32 %v11567_v48, %v11567_v48  ;;  %v21586_v22 = vsub.f32 %v21344_v44, %v21431_v55  ;;  %vm23792_vm11 = vnez %v23726_v14 }
 0xd78   : > { %v11640_v10 = vadd.f32 %v11639_v31, %v11600_v38  ;;  %v11568_v39 = vsel %vm23791_vm0, %v21565_v62, 0.0  ;;  %v11569_v23 = vsel %vm23792_vm11, %v21572_v16, 0.0  ;;  %v21593_v12 = vsub.f32 %v23793_v58, %v21431_v55  ;;  %v23794_v38 = vld [vmem:[#allocation43_spill] sm:$0xff] }
 0xd79   : > { %v11609_v18 = vmul.f32 %v11568_v39, %v11568_v39  ;;  %vm23795_vm6 = vnez %v23794_v38  ;;  %v11610_v31 = vmul.f32 %v11569_v23, %v11569_v23 }
 0xd7a   : > { %v11641_v37 = vadd.f32 %v11640_v10, %v11601_v27  ;;  %v11570_v41 = vsel %vm23795_vm6, %v21579_v54, 0.0  ;;  %v23796_v27 = vld [vmem:[#allocation98_spill] sm:$0xff]  ;;  %v23797_v10 = vld [vmem:[#allocation45_spill] sm:$0xff] }
 0xd7b   : > { %v21600_v44 = vsub.f32 %v23796_v27, %v21431_v55  ;;  %vm23798_vm4 = vnez %v23797_v10  ;;  %v11611_v25 = vmul.f32 %v11570_v41, %v11570_v41  ;;  %v23811_v41 = vld [vmem:[#allocation61_spill] sm:$0xff] }
 0xd7c   : > { %v11642_v47 = vadd.f32 %v11641_v37, %v11602_v21  ;;  %v11571_v14 = vsel %vm23798_vm4, %v21586_v22, 0.0  ;;  %v23799_v37 = vld [vmem:[#allocation57_spill] sm:$0xff] }
 0xd7d   : > { %v21607_v11 = vsub.f32 %v23799_v37, %v21431_v55  ;;  %v11612_v7 = vmul.f32 %v11571_v14, %v11571_v14  ;;  %v23815_v37 = vld [vmem:[#allocation58_spill] sm:$0xff] }
 0xd7e   : > { %v11643_v32 = vadd.f32 %v11642_v47, %v11603_v24  ;;  %v23800_v24 = vld [vmem:[#allocation47_spill] sm:$0xff]  ;;  %vm23816_vm11 = vnez %v23815_v37 }
 0xd7f   : > { %vm23801_vm13 = vnez %v23800_v24 }
 0xd80   : > { %v11644_v28 = vadd.f32 %v11643_v32, %v11604_v6  ;;  %v11572_v47 = vsel %vm23801_vm13, %v21593_v12, 0.0  ;;  %v23802_v32 = vld [vmem:[#allocation99_spill] sm:$0xff]  ;;  %vm23843_vm13 = vcmask 1043456  }
 0xd81   : > { %v21614_v20 = vsub.f32 %v23802_v32, %v21431_v55  ;;  %v11613_v0 = vmul.f32 %v11572_v47, %v11572_v47 }
 0xd82   : > { %v11645_v63 = vadd.f32 %v11644_v28, %v11605_v33  ;;  %v23803_v33 = vld [vmem:[#allocation50_spill] sm:$0xff] }
 0xd83   : > { %vm23804_vm7 = vnez %v23803_v33  ;;  %v23818_v33 = vld [vmem:[#allocation60_spill] sm:$0xff] }
 0xd84   : > { %v11646_v60 = vadd.f32 %v11645_v63, %v11606_v1  ;;  %v11573_v28 = vsel %vm23804_vm7, %v21600_v44, 0.0  ;;  %v23805_v63 = vld [vmem:[#allocation59_spill] sm:$0xff]  ;;  %vm23819_vm6 = vnez %v23818_v33 }
 0xd85   : > { %v21621_v48 = vsub.f32 %v23805_v63, %v21431_v55  ;;  %v11614_v39 = vmul.f32 %v11573_v28, %v11573_v28  ;;  %v23820_v63 = vld [vmem:[#allocation102_spill] sm:$0xff] }
 0xd86   : > { %v11647_v4 = vadd.f32 %v11646_v60, %v11607_v8  ;;  %v23806_v8 = vld [vmem:[#allocation51_spill] sm:$0xff] }
 0xd87   : > { %vm23807_vm9 = vnez %v23806_v8  ;;  %v21656_v8 = vsub.f32 %v23820_v63, %v21431_v55 }
 0xd88   : > { %v11648_v52 = vadd.f32 %v11647_v4, %v11608_v49  ;;  %v11574_v60 = vsel %vm23807_vm9, %v21607_v11, 0.0  ;;  %v23808_v4 = vld [vmem:[#allocation100_spill] sm:$0xff] }
 0xd89   : > { %v21628_v23 = vsub.f32 %v23808_v4, %v21431_v55  ;;  %v11615_v58 = vmul.f32 %v11574_v60, %v11574_v60 }
 0xd8a   : > { %v11649_v5 = vadd.f32 %v11648_v52, %v11609_v18  ;;  %v23809_v18 = vld [vmem:[#allocation54_spill] sm:$0xff] }
 0xd8b   : > { %vm23810_vm12 = vnez %v23809_v18  ;;  %v11577_v24 = vsel %vm23816_vm11, %v21628_v23, 0.0  ;;  %v23822_v18 = vld [vmem:[#allocation65_spill] sm:$0xff] }
 0xd8c   : > { %v11650_v21 = vadd.f32 %v11649_v5, %v11610_v31  ;;  %v11575_v52 = vsel %vm23810_vm12, %v21614_v20, 0.0  ;;  %v21635_v31 = vsub.f32 %v23811_v41, %v21431_v55  ;;  %v23812_v5 = vld [vmem:[#allocation56_spill] sm:$0xff] }
 0xd8d   : > { %vm23813_vm0 = vnez %v23812_v5  ;;  %v11616_v10 = vmul.f32 %v11575_v52, %v11575_v52  ;;  %v21663_v52 = vsub.f32 %v23822_v18, %v21431_v55 }
 0xd8e   : > { %v11651_v6 = vadd.f32 %v11650_v21, %v11611_v25  ;;  %v11576_v27 = vsel %vm23813_vm0, %v21621_v48, 0.0  ;;  %v23814_v25 = vld [vmem:[#allocation101_spill] sm:$0xff]  ;;  %v11578_v28 = vsel %vm23819_vm6, %v21635_v31, 0.0 }
 0xd8f   : > { %v21642_v21 = vsub.f32 %v23814_v25, %v21431_v55  ;;  %v11617_v47 = vmul.f32 %v11576_v27, %v11576_v27  ;;  %v23824_v27 = vld [vmem:[#allocation103_spill] sm:$0xff]  ;;  %v11581_v25 = vsel %vm23761_vm3, %v21656_v8, 0.0  ;;  %v11582_v33 = vsel %vm23206_vm14, %v21663_v52, 0.0 }
 0xd90   : > { %v11652_v1 = vadd.f32 %v11651_v6, %v11612_v7  ;;  %v23817_v6 = vld [vmem:[#allocation64_spill] sm:$0xff]  ;;  %v11623_v60 = vmul.f32 %v11582_v33, %v11582_v33 }
 0xd91   : > { %v21649_v32 = vsub.f32 %v23817_v6, %v21431_v55 }
 0xd92   : > { %v11653_v49 = vadd.f32 %v11652_v1, %v11613_v0  ;;  %v11618_v0 = vmul.f32 %v11577_v24, %v11577_v24 }
 0xd94   : > { %v11654_v38 = vadd.f32 %v11653_v49, %v11614_v39  ;;  %v11579_v39 = vsel %vm23755_vm15, %v21642_v21, 0.0  ;;  %v11619_v49 = vmul.f32 %v11578_v28, %v11578_v28  ;;  %v11622_v28 = vmul.f32 %v11581_v25, %v11581_v25 }
 0xd95   : > { %v11620_v41 = vmul.f32 %v11579_v39, %v11579_v39 }
 0xd96   : > { %v11655_v14 = vadd.f32 %v11654_v38, %v11615_v58  ;;  %v11580_v38 = vsel %vm23758_vm2, %v21649_v32, 0.0 }
 0xd97   : > { %v11621_v37 = vmul.f32 %v11580_v38, %v11580_v38 }
 0xd98   : > { %v11656_v7 = vadd.f32 %v11655_v14, %v11616_v10  ;;  %v21670_v10 = vsub.f32 %v23824_v27, %v21431_v55  ;;  %v23833_v27 = vld [vmem:[#allocation75_spill] sm:$0xff] }
 0xd99   : > { %vm23834_vm14 = vnez %v23833_v27  ;;  %v11591_v27 = vsel %vm23778_vm1, %v21452_v53, 0.0 }
 0xd9a   : > { %v11657_v1 = vadd.f32 %v11656_v7, %v11617_v47  ;;  %v23826_v47 = vld [vmem:[#allocation68_spill] sm:$0xff]  ;;  %v11583_v63 = vsel %vm23207_vm8, %v21670_v10, 0.0  ;;  %v11586_v14 = vsel %vm23834_vm14, %v21437_v35, 0.0 }
 0xd9b   : > { %v21677_v7 = vsub.f32 %v23826_v47, %v21431_v55  ;;  %v11624_v18 = vmul.f32 %v11583_v63, %v11583_v63  ;;  %v23831_v55 = vld [vmem:[#allocation72_spill] sm:$0xff]  ;;  %v11627_v6 = vmul.f32 %v11586_v14, %v11586_v14 }
 0xd9c   : > { %v11658_v4 = vadd.f32 %v11657_v1, %v11618_v0  ;;  %vm23832_vm3 = vnez %v23831_v55  ;;  %v11592_v55 = vsel %vm23780_vm10, %v21455_v3, 0.0 }
 0xd9d   : > { %v11585_v38 = vsel %vm23832_vm3, %v21434_v42, 0.0 }
 0xd9e   : > { %v11659_v5 = vadd.f32 %v11658_v4, %v11619_v49  ;;  %v23829_v49 = vld [vmem:[#allocation71_spill] sm:$0xff]  ;;  %v11626_v25 = vmul.f32 %v11585_v38, %v11585_v38 }
 0xd9f   : > { %vm23830_vm2 = vnez %v23829_v49 }
 0xda0   : > { %v11660_v24 = vadd.f32 %v11659_v5, %v11620_v41  ;;  %v11584_v4 = vsel %vm23830_vm2, %v21677_v7, 0.0 }
 0xda1   : > { %v11625_v41 = vmul.f32 %v11584_v4, %v11584_v4 }
 0xda2   : > { %v11661_v0 = vadd.f32 %v11660_v24, %v11621_v37  ;;  %v23835_v24 = vld [vmem:[#allocation76_spill] sm:$0xff] }
 0xda3   : > { %vm23836_vm8 = vnez %v23835_v24  ;;  %v11632_v24 = vmul.f32 %v11591_v27, %v11591_v27 }
 0xda4   : > { %v11662_v39 = vadd.f32 %v11661_v0, %v11622_v28  ;;  %v11587_v47 = vsel %vm23836_vm8, %v21440_v46, 0.0  ;;  %v23837_v28 = vld [vmem:[#allocation79_spill] sm:$0xff] }
 0xda5   : > { %vm23838_vm15 = vnez %v23837_v28  ;;  %v11628_v1 = vmul.f32 %v11587_v47, %v11587_v47 }
 0xda6   : > { %v11663_v58 = vadd.f32 %v11662_v39, %v11623_v60  ;;  %v11588_v0 = vsel %vm23838_vm15, %v21443_v30, 0.0  ;;  %v23839_v60 = vld [vmem:[#allocation81_spill] sm:$0xff] }
 0xda7   : > { %vm23840_vm4 = vnez %v23839_v60  ;;  %v11629_v49 = vmul.f32 %v11588_v0, %v11588_v0 }
 0xda8   : > { %v11664_v5 = vadd.f32 %v11663_v58, %v11624_v18  ;;  %v11589_v39 = vsel %vm23840_vm4, %v21446_v36, 0.0  ;;  %v11590_v58 = vsel %vm23776_vm5, %v21449_v51, 0.0 }
 0xda9   : > { %v11630_v38 = vmul.f32 %v11589_v39, %v11589_v39  ;;  %v11631_v14 = vmul.f32 %v11590_v58, %v11590_v58 }
 0xdaa   : > { %v11665_v37 = vadd.f32 %v11664_v5, %v11625_v41 }
 0xdac   : > { %v11666_v33 = vadd.f32 %v11665_v37, %v11626_v25  ;;  %v11633_v37 = vmul.f32 %v11592_v55, %v11592_v55 }
 0xdae   : > { %v11667_v63 = vadd.f32 %v11666_v33, %v11627_v6  ;;  %v11673_v33 = vsel %vm23843_vm13, %v11633_v37, 0.0 }
 0xdb0   : > { %v11668_v4 = vadd.f32 %v11667_v63, %v11628_v1 }
 0xdb2   : > { %v11669_v41 = vadd.f32 %v11668_v4, %v11629_v49 }
 0xdb4   : > { %v11670_v25 = vadd.f32 %v11669_v41, %v11630_v38 }
 0xdb6   : > { %v11671_v47 = vadd.f32 %v11670_v25, %v11631_v14 }
 0xdb8   : > { %v11672_v6 = vadd.f32 %v11671_v47, %v11632_v24 }
 0xdba   : > { %v11674_v28 = vadd.f32 %v11673_v33, %v11672_v6 }
 0xdbc   : > { %11675 = vadd.xlane.f32.xlu1 %v11674_v28 }
 0xe49   : > { %v11676_v0 = vpop.xlane.xlu1 %11675 }
 0xe4a   : > { %v11677_v1 = vrot.slane %v11676_v0, 4 }
 0xe4c   : > { %v11678_v2 = vadd.f32 %v11677_v1, %v11676_v0 }
 0xe4e   : > { %v11679_v63 = vrot.slane %v11678_v2, 2 }
 0xe50   : > { %v11680_v60 = vadd.f32 %v11679_v63, %v11678_v2 }
 0xe52   : > { %v11681_v39 = vrot.slane %v11680_v60, 1 }
 0xe54   : > { %v11682_v49 = vadd.f32 %v11681_v39, %v11680_v60 }
 0xe56   : > { %15367 = vpush %v11682_v49 }
 0xe87   : > { %s15368_s27 = spop %15367 }
 0xe88   : > { %s11684_s28 = smul.f32 0.00048828125, %s15368_s27 }
 0xe8a   : > { %s11685_s29 = sadd.f32 1e-05, %s11684_s28 }
 0xe8c   : > { %v11686_v4 = vstv %s11685_s29 }
 0xe8d   : > { %15842 = vrsqrt.f32 %v11686_v4 }
 0xe97   : > { %v15843_v18 = vpop.eup %15842 }
 0xe98   : > { %15369 = vpush %v15843_v18 }
 0xec9   : > { %s15370_s30 = spop %15369 }
 0xeca   : > { %v11691_v58 = vstv %s15370_s30 }
 0xecb   : > { %v11692_v55 = vmul.f32 %v11691_v58, %v21459_v57  ;;  %v11693_v38 = vmul.f32 %v11691_v58, %v21463_v43  ;;  %v11694_v41 = vmul.f32 %v11691_v58, %v21467_v15  ;;  %v11695_v5 = vmul.f32 %v11691_v58, %v21477_v56 }
 0xecc   : > { %v11696_v27 = vmul.f32 %v11691_v58, %v21481_v29  ;;  %v11697_v14 = vmul.f32 %v11691_v58, %v21488_v19  ;;  %v11698_v25 = vmul.f32 %v11691_v58, %v21495_v45  ;;  %v11699_v37 = vmul.f32 %v11691_v58, %v21502_v34 }
 0xecd   : > { %v11700_v24 = vmul.f32 %v11691_v58, %v21509_v13  ;;  %v11701_v47 = vmul.f32 %v11691_v58, %v21516_v26  ;;  %v11702_v57 = vmul.f32 %v11691_v58, %v21523_v40  ;;  %v11703_v43 = vmul.f32 %v11691_v58, %v21530_v61 }
 0xece   : > { %v11704_v15 = vmul.f32 %v11691_v58, %v21537_v50  ;;  %v11705_v56 = vmul.f32 %v11691_v58, %v21544_v17  ;;  %v11706_v29 = vmul.f32 %v11691_v58, %v21551_v59  ;;  %v11707_v19 = vmul.f32 %v11691_v58, %v21558_v9 }
 0xecf   : > { %v11708_v45 = vmul.f32 %v11691_v58, %v21565_v62  ;;  %v11709_v34 = vmul.f32 %v11691_v58, %v21572_v16  ;;  %v11710_v13 = vmul.f32 %v11691_v58, %v21579_v54  ;;  %v11711_v26 = vmul.f32 %v11691_v58, %v21586_v22  ;;  %v12994_v54 = vld [vmem:[%s22270_s3 + $0x2] ss:$0 sm:$0xff] }
 0xed0   : > { %v11712_v40 = vmul.f32 %v11691_v58, %v21593_v12  ;;  %v11713_v61 = vmul.f32 %v11691_v58, %v21600_v44  ;;  %v11714_v50 = vmul.f32 %v11691_v58, %v21607_v11  ;;  %v11715_v17 = vmul.f32 %v11691_v58, %v21614_v20 }
 0xed1   : > { %v11716_v59 = vmul.f32 %v11691_v58, %v21621_v48  ;;  %v11717_v9 = vmul.f32 %v11691_v58, %v21628_v23  ;;  %v11718_v62 = vmul.f32 %v11691_v58, %v21635_v31  ;;  %v11719_v16 = vmul.f32 %v11691_v58, %v21642_v21 }
 0xed2   : > { %v11720_v22 = vmul.f32 %v11691_v58, %v21649_v32  ;;  %v11721_v12 = vmul.f32 %v11691_v58, %v21656_v8  ;;  %v11722_v44 = vmul.f32 %v11691_v58, %v21663_v52  ;;  %v11723_v11 = vmul.f32 %v11691_v58, %v21670_v10 }
 0xed3   : > { %v11724_v20 = vmul.f32 %v11691_v58, %v21677_v7  ;;  %v11725_v48 = vmul.f32 %v11691_v58, %v21434_v42  ;;  %v11726_v23 = vmul.f32 %v11691_v58, %v21437_v35  ;;  %v11727_v31 = vmul.f32 %v11691_v58, %v21440_v46 }
 0xed4   : > { %v11728_v21 = vmul.f32 %v11691_v58, %v21443_v30  ;;  %v11729_v6 = vmul.f32 %v11691_v58, %v21446_v36  ;;  %v11730_v32 = vmul.f32 %v11691_v58, %v21449_v51  ;;  %v11731_v8 = vmul.f32 %v11691_v58, %v21452_v53 }
 0xed5   : > { %v11732_v52 = vmul.f32 %v11691_v58, %v21455_v3  ;;  %v11737_v33 = vmul.f32 %v12994_v54, %v11692_v55  ;;  %v11738_v10 = vmul.f32 %v12994_v54, %v11693_v38  ;;  %v11739_v28 = vmul.f32 %v12994_v54, %v11694_v41 }
 0xed6   : > { %v11740_v7 = vmul.f32 %v12994_v54, %v11695_v5  ;;  %v11741_v0 = vmul.f32 %v12994_v54, %v11696_v27  ;;  %v11742_v42 = vmul.f32 %v12994_v54, %v11697_v14  ;;  %v11743_v1 = vmul.f32 %v12994_v54, %v11698_v25  ;;  %v12995_v14 = vld [vmem:[%s22270_s3 + $0x3] ss:$0 sm:$0xff] }
 0xed7   : > { %v11744_v35 = vmul.f32 %v12994_v54, %v11699_v37  ;;  %v11745_v2 = vmul.f32 %v12994_v54, %v11700_v24  ;;  %v11746_v46 = vmul.f32 %v12994_v54, %v11701_v47  ;;  %v11747_v63 = vmul.f32 %v12994_v54, %v11702_v57 }
 0xed8   : > { %v11748_v30 = vmul.f32 %v12994_v54, %v11703_v43  ;;  %v11749_v60 = vmul.f32 %v12994_v54, %v11704_v15  ;;  %v11750_v36 = vmul.f32 %v12994_v54, %v11705_v56  ;;  %v11751_v39 = vmul.f32 %v12994_v54, %v11706_v29 }
 0xed9   : > { %v11752_v51 = vmul.f32 %v12994_v54, %v11707_v19  ;;  %v11753_v49 = vmul.f32 %v12994_v54, %v11708_v45  ;;  %v11754_v53 = vmul.f32 %v12994_v54, %v11709_v34  ;;  %v11755_v4 = vmul.f32 %v12994_v54, %v11710_v13 }
 0xeda   : > { %v11756_v3 = vmul.f32 %v12994_v54, %v11711_v26  ;;  %v11757_v18 = vmul.f32 %v12994_v54, %v11712_v40  ;;  %v11758_v58 = vmul.f32 %v12994_v54, %v11713_v61  ;;  %v11759_v55 = vmul.f32 %v12994_v54, %v11714_v50 }
 0xedb   : > { %v11760_v38 = vmul.f32 %v12994_v54, %v11715_v17  ;;  %v11761_v41 = vmul.f32 %v12994_v54, %v11716_v59  ;;  %v11762_v5 = vmul.f32 %v12994_v54, %v11717_v9  ;;  %v11763_v27 = vmul.f32 %v12994_v54, %v11718_v62 }
 0xedc   : > { %v11764_v25 = vmul.f32 %v12994_v54, %v11719_v16  ;;  %v11765_v37 = vmul.f32 %v12994_v54, %v11720_v22  ;;  %v11766_v24 = vmul.f32 %v12994_v54, %v11721_v12  ;;  %v11767_v47 = vmul.f32 %v12994_v54, %v11722_v44 }
 0xedd   : > { %v11768_v57 = vmul.f32 %v12994_v54, %v11723_v11  ;;  %v11769_v43 = vmul.f32 %v12994_v54, %v11724_v20  ;;  %v11770_v15 = vmul.f32 %v12994_v54, %v11725_v48  ;;  %v11771_v56 = vmul.f32 %v12994_v54, %v11726_v23 }
 0xede   : > { %v11772_v29 = vmul.f32 %v12994_v54, %v11727_v31  ;;  %v11773_v19 = vmul.f32 %v12994_v54, %v11728_v21  ;;  %v11774_v45 = vmul.f32 %v12994_v54, %v11729_v6  ;;  %v11775_v34 = vmul.f32 %v12994_v54, %v11730_v32 }
 0xedf   : > { %v11776_v13 = vmul.f32 %v12994_v54, %v11731_v8  ;;  %v11777_v26 = vmul.f32 %v12994_v54, %v11732_v52  ;;  %v21760_v40 = vadd.f32 %v12995_v14, %v11737_v33  ;;  %v21762_v61 = vadd.f32 %v12995_v14, %v11738_v10 }
 0xee0   : > { %v21764_v50 = vadd.f32 %v12995_v14, %v11739_v28  ;;  %v21766_v17 = vadd.f32 %v12995_v14, %v11740_v7  ;;  %v21768_v59 = vadd.f32 %v12995_v14, %v11741_v0  ;;  %v21770_v9 = vadd.f32 %v12995_v14, %v11742_v42 }
 0xee1   : > { %v21772_v62 = vadd.f32 %v12995_v14, %v11743_v1  ;;  %v21774_v16 = vadd.f32 %v12995_v14, %v11744_v35  ;;  %v21776_v22 = vadd.f32 %v12995_v14, %v11745_v2  ;;  %v21778_v12 = vadd.f32 %v12995_v14, %v11746_v46 }
 0xee2   : > { %v21780_v54 = vadd.f32 %v12995_v14, %v11747_v63  ;;  %v21782_v44 = vadd.f32 %v12995_v14, %v11748_v30  ;;  %v21784_v11 = vadd.f32 %v12995_v14, %v11749_v60  ;;  %v21786_v20 = vadd.f32 %v12995_v14, %v11750_v36 }
 0xee3   : > { %v21788_v48 = vadd.f32 %v12995_v14, %v11751_v39  ;;  %v21790_v23 = vadd.f32 %v12995_v14, %v11752_v51  ;;  %v21792_v31 = vadd.f32 %v12995_v14, %v11753_v49  ;;  %v21794_v21 = vadd.f32 %v12995_v14, %v11754_v53 }
 0xee4   : > { %23844 = vst [vmem:[#allocation104_spill] sm:$0xff] %v21782_v44  ;;  %23845 = vst [vmem:[#allocation69_spill] sm:$0xff] %v21784_v11  ;;  %v21796_v6 = vadd.f32 %v12995_v14, %v11755_v4  ;;  %v21798_v32 = vadd.f32 %v12995_v14, %v11756_v3  ;;  %v21800_v8 = vadd.f32 %v12995_v14, %v11757_v18  ;;  %v11823_v51 = vmin.f32 %v21760_v40, 20.0 }
 0xee5   : > { %23846 = vst [vmem:[#allocation105_spill] sm:$0xff] %v21786_v20  ;;  %23847 = vst [vmem:[#allocation73_spill] sm:$0xff] %v21790_v23  ;;  %v21802_v52 = vadd.f32 %v12995_v14, %v11758_v58  ;;  %v21804_v33 = vadd.f32 %v12995_v14, %v11759_v55  ;;  %v21806_v10 = vadd.f32 %v12995_v14, %v11760_v38  ;;  %v11824_v3 = vmin.f32 %v21762_v61, 20.0 }
 0xee6   : > { %23848 = vst [vmem:[#allocation106_spill] sm:$0xff] %v21792_v31  ;;  %23849 = vst [vmem:[#allocation74_spill] sm:$0xff] %v21794_v21  ;;  %v21808_v28 = vadd.f32 %v12995_v14, %v11761_v41  ;;  %v21810_v7 = vadd.f32 %v12995_v14, %v11762_v5  ;;  %v21812_v0 = vadd.f32 %v12995_v14, %v11763_v27  ;;  %v11825_v58 = vmin.f32 %v21764_v50, 20.0 }
 0xee7   : > { %23850 = vst [vmem:[#allocation107_spill] sm:$0xff] %v21796_v6  ;;  %23851 = vst [vmem:[#allocation77_spill] sm:$0xff] %v21798_v32  ;;  %v21814_v42 = vadd.f32 %v12995_v14, %v11764_v25  ;;  %v21816_v1 = vadd.f32 %v12995_v14, %v11765_v37  ;;  %v21818_v35 = vadd.f32 %v12995_v14, %v11766_v24  ;;  %v11826_v55 = vmin.f32 %v21766_v17, 20.0 }
 0xee8   : > { %23852 = vst [vmem:[#allocation108_spill] sm:$0xff] %v21800_v8  ;;  %23853 = vst [vmem:[#allocation78_spill] sm:$0xff] %v21802_v52  ;;  %v21820_v2 = vadd.f32 %v12995_v14, %v11767_v47  ;;  %v21822_v46 = vadd.f32 %v12995_v14, %v11768_v57  ;;  %v21824_v63 = vadd.f32 %v12995_v14, %v11769_v43  ;;  %v11827_v38 = vmin.f32 %v21768_v59, 20.0 }
 0xee9   : > { %23854 = vst [vmem:[#allocation80_spill] sm:$0xff] %v21804_v33  ;;  %23855 = vst [vmem:[#allocation82_spill] sm:$0xff] %v21806_v10  ;;  %v21826_v30 = vadd.f32 %v12995_v14, %v11770_v15  ;;  %v21828_v60 = vadd.f32 %v12995_v14, %v11771_v56  ;;  %v21830_v36 = vadd.f32 %v12995_v14, %v11772_v29  ;;  %v11828_v41 = vmin.f32 %v21770_v9, 20.0 }
 0xeea   : > { %23856 = vst [vmem:[#allocation85_spill] sm:$0xff] %v21808_v28  ;;  %23857 = vst [vmem:[#allocation4_spill] sm:$0xff] %v21810_v7  ;;  %v21832_v39 = vadd.f32 %v12995_v14, %v11773_v19  ;;  %v21835_v49 = vadd.f32 %v12995_v14, %v11774_v45  ;;  %v21837_v53 = vadd.f32 %v12995_v14, %v11775_v34  ;;  %v11829_v5 = vmin.f32 %v21772_v62, 20.0 }
 0xeeb   : > { %23858 = vst [vmem:[#allocation6_spill] sm:$0xff] %v21812_v0  ;;  %23859 = vst [vmem:[#allocation5_spill] sm:$0xff] %v21814_v42  ;;  %v21839_v4 = vadd.f32 %v12995_v14, %v11776_v13  ;;  %v21842_v18 = vadd.f32 %v12995_v14, %v11777_v26  ;;  %v11830_v27 = vmin.f32 %v21774_v16, 20.0  ;;  %v11831_v25 = vmin.f32 %v21776_v22, 20.0 }
 0xeec   : > { %23860 = vst [vmem:[#allocation9_spill] sm:$0xff] %v21816_v1  ;;  %23861 = vst [vmem:[#allocation7_spill] sm:$0xff] %v21818_v35  ;;  %v11832_v37 = vmin.f32 %v21778_v12, 20.0  ;;  %v11833_v24 = vmin.f32 %v21780_v54, 20.0  ;;  %v11834_v14 = vmin.f32 %v21782_v44, 20.0  ;;  %v11835_v57 = vmin.f32 %v21784_v11, 20.0 }
 0xeed   : > { %23862 = vst [vmem:[#allocation15_spill] sm:$0xff] %v21820_v2  ;;  %23863 = vst [vmem:[#allocation30_spill] sm:$0xff] %v21822_v46  ;;  %v11864_v47 = vmul.f32 1.442695, %v11823_v51  ;;  %v11836_v43 = vmin.f32 %v21786_v20, 20.0  ;;  %v11837_v15 = vmin.f32 %v21788_v48, 20.0 }
 0xeee   : > { %23864 = vst [vmem:[#allocation32_spill] sm:$0xff] %v21824_v63  ;;  %23865 = vst [vmem:[#allocation87_spill] sm:$0xff] %v21826_v30  ;;  %v11866_v56 = vmul.f32 1.442695, %v11824_v3  ;;  %v11838_v29 = vmin.f32 %v21790_v23, 20.0  ;;  %v11839_v19 = vmin.f32 %v21792_v31, 20.0 }
 0xeef   : > { %23866 = vst [vmem:[#allocation12_spill] sm:$0xff] %v21828_v60  ;;  %23867 = vst [vmem:[#allocation44_spill] sm:$0xff] %v21830_v36  ;;  %v11840_v45 = vmin.f32 %v21794_v21, 20.0  ;;  %v11868_v34 = vmul.f32 1.442695, %v11825_v58  ;;  %v11841_v13 = vmin.f32 %v21796_v6, 20.0  ;;  %15844 = vpow2.f32 %v11864_v47 }
 0xef0   : > { %23868 = vst [vmem:[#allocation18_spill] sm:$0xff] %v21832_v39  ;;  %23869 = vst [vmem:[#allocation16_spill] sm:$0xff] %v21835_v49  ;;  %v11842_v26 = vmin.f32 %v21798_v32, 20.0  ;;  %v11843_v51 = vmin.f32 %v21800_v8, 20.0  ;;  %v11870_v44 = vmul.f32 1.442695, %v11826_v55  ;;  %15846 = vpow2.f32 %v11866_v56 }
 0xef1   : > { %23870 = vst [vmem:[#allocation93_spill] sm:$0xff] %v21837_v53  ;;  %23871 = vst [vmem:[#allocation22_spill] sm:$0xff] %v21839_v4  ;;  %v11844_v11 = vmin.f32 %v21802_v52, 20.0  ;;  %v11845_v20 = vmin.f32 %v21804_v33, 20.0  ;;  %v11872_v3 = vmul.f32 1.442695, %v11827_v38  ;;  %15848 = vpow2.f32 %v11868_v34 }
 0xef2   : > { %23872 = vst [vmem:[#allocation20_spill] sm:$0xff] %v21842_v18  ;;  %v11846_v23 = vmin.f32 %v21806_v10, 20.0  ;;  %v11847_v31 = vmin.f32 %v21808_v28, 20.0  ;;  %v11874_v21 = vmul.f32 1.442695, %v11828_v41  ;;  %v11848_v58 = vmin.f32 %v21810_v7, 20.0 }
 0xef3   : > { %v11849_v6 = vmin.f32 %v21812_v0, 20.0  ;;  %v11876_v32 = vmul.f32 1.442695, %v11829_v5  ;;  %v11850_v55 = vmin.f32 %v21814_v42, 20.0  ;;  %v11851_v52 = vmin.f32 %v21816_v1, 20.0 }
 0xef4   : > { %15850 = vpow2.f32 %v11870_v44  ;;  %v11878_v33 = vmul.f32 1.442695, %v11830_v27  ;;  %v11852_v38 = vmin.f32 %v21818_v35, 20.0  ;;  %v11853_v47 = vmin.f32 %v21820_v2, 20.0 }
 0xef5   : > { %15852 = vpow2.f32 %v11872_v3  ;;  %v11880_v28 = vmul.f32 1.442695, %v11831_v25  ;;  %v11854_v41 = vmin.f32 %v21822_v46, 20.0  ;;  %v11855_v56 = vmin.f32 %v21824_v63, 20.0 }
 0xef6   : > { %15854 = vpow2.f32 %v11874_v21  ;;  %v11882_v0 = vmul.f32 1.442695, %v11832_v37  ;;  %v11856_v5 = vmin.f32 %v21826_v30, 20.0  ;;  %v11857_v34 = vmin.f32 %v21828_v60, 20.0 }
 0xef7   : > { %15856 = vpow2.f32 %v11876_v32  ;;  %v11884_v1 = vmul.f32 1.442695, %v11833_v24  ;;  %v11858_v44 = vmin.f32 %v21830_v36, 20.0  ;;  %v11859_v27 = vmin.f32 %v21832_v39, 20.0 }
 0xef8   : > { %15858 = vpow2.f32 %v11878_v33  ;;  %v11886_v2 = vmul.f32 1.442695, %v11834_v14  ;;  %v11860_v25 = vmin.f32 %v21835_v49, 20.0  ;;  %v11861_v3 = vmin.f32 %v21837_v53, 20.0 }
 0xef9   : > { %15860 = vpow2.f32 %v11880_v28  ;;  %v11888_v63 = vmul.f32 1.442695, %v11835_v57  ;;  %v11862_v21 = vmin.f32 %v21839_v4, 20.0  ;;  %v11890_v37 = vmul.f32 1.442695, %v11836_v43  ;;  %v15845_v60 = vpop.eup %15844 }
 0xefa   : > { %15862 = vpow2.f32 %v11882_v0  ;;  %v11892_v30 = vmul.f32 1.442695, %v11837_v15  ;;  %v11894_v32 = vmul.f32 1.442695, %v11838_v29  ;;  %v11896_v24 = vmul.f32 1.442695, %v11839_v19  ;;  %v15847_v46 = vpop.eup %15846 }
 0xefb   : > { %15864 = vpow2.f32 %v11884_v1  ;;  %v11898_v36 = vmul.f32 1.442695, %v11840_v45  ;;  %v11900_v33 = vmul.f32 1.442695, %v11841_v13  ;;  %v11902_v14 = vmul.f32 1.442695, %v11842_v26  ;;  %v15849_v49 = vpop.eup %15848 }
 0xefc   : > { %15866 = vpow2.f32 %v11886_v2  ;;  %v11904_v39 = vmul.f32 1.442695, %v11843_v51  ;;  %v11906_v53 = vmul.f32 1.442695, %v11844_v11  ;;  %v11908_v28 = vmul.f32 1.442695, %v11845_v20 }
 0xefd   : > { %15868 = vpow2.f32 %v11888_v63  ;;  %v11910_v57 = vmul.f32 1.442695, %v11846_v23  ;;  %v21882_v0 = vmul.f32 1.442695, %v11847_v31  ;;  %v21884_v43 = vmul.f32 1.442695, %v11848_v58 }
 0xefe   : > { %v15851_v35 = vpop.eup %15850  ;;  %15870 = vpow2.f32 %v11890_v37  ;;  %v21886_v1 = vmul.f32 1.442695, %v11849_v6  ;;  %v21888_v29 = vmul.f32 1.442695, %v11850_v55  ;;  %v21890_v2 = vmul.f32 1.442695, %v11851_v52 }
 0xeff   : > { %v15853_v15 = vpop.eup %15852  ;;  %15872 = vpow2.f32 %v11892_v30  ;;  %v21892_v19 = vmul.f32 1.442695, %v11852_v38  ;;  %v21894_v11 = vmul.f32 1.442695, %v11853_v47  ;;  %v21896_v20 = vmul.f32 1.442695, %v11854_v41 }
 0xf00   : > { %v15855_v63 = vpop.eup %15854  ;;  %15874 = vpow2.f32 %v11894_v32  ;;  %v21898_v23 = vmul.f32 1.442695, %v11855_v56  ;;  %v21900_v6 = vmul.f32 1.442695, %v11856_v5  ;;  %v21902_v45 = vmul.f32 1.442695, %v11857_v34 }
 0xf01   : > { %v15857_v31 = vpop.eup %15856  ;;  %15876 = vpow2.f32 %v11896_v24  ;;  %v21904_v30 = vmul.f32 1.442695, %v11858_v44  ;;  %v11946_v13 = vadd.f32 2.0, %v15845_v60  ;;  %v11947_v26 = vadd.f32 2.0, %v15847_v46 }
 0xf02   : > { %v15859_v52 = vpop.eup %15858  ;;  %15878 = vpow2.f32 %v11898_v36  ;;  %v11948_v51 = vadd.f32 2.0, %v15849_v49  ;;  %v21906_v55 = vmul.f32 1.442695, %v11859_v27  ;;  %v11949_v38 = vadd.f32 2.0, %v15851_v35 }
 0xf03   : > { %v15861_v58 = vpop.eup %15860  ;;  %15880 = vpow2.f32 %v11900_v33  ;;  %v11950_v47 = vadd.f32 2.0, %v15853_v15  ;;  %v21908_v56 = vmul.f32 1.442695, %v11860_v25  ;;  %v11951_v5 = vadd.f32 2.0, %v15855_v63 }
 0xf04   : > { %v15863_v41 = vpop.eup %15862  ;;  %15882 = vpow2.f32 %v11902_v14  ;;  %v11952_v34 = vadd.f32 2.0, %v15857_v31  ;;  %v11863_v44 = vmin.f32 %v21842_v18, 20.0  ;;  %v21911_v32 = vmul.f32 1.442695, %v11861_v3 }
 0xf05   : > { %v15865_v37 = vpop.eup %15864  ;;  %v21913_v36 = vmul.f32 1.442695, %v11862_v21  ;;  %v11953_v24 = vadd.f32 2.0, %v15859_v52  ;;  %15884 = vpow2.f32 %v11904_v39  ;;  %v21915_v27 = vmul.f32 %v15845_v60, %v11946_v13 }
 0xf06   : > { %v15867_v4 = vpop.eup %15866  ;;  %v21917_v33 = vmul.f32 %v15847_v46, %v11947_v26  ;;  %v21919_v42 = vmul.f32 %v15849_v49, %v11948_v51  ;;  %15886 = vpow2.f32 %v11906_v53  ;;  %v11954_v14 = vadd.f32 2.0, %v15861_v58 }
 0xf07   : > { %v15869_v25 = vpop.eup %15868  ;;  %v21921_v7 = vmul.f32 %v15851_v35, %v11949_v38  ;;  %v21923_v10 = vmul.f32 %v15853_v15, %v11950_v47  ;;  %15888 = vpow2.f32 %v11908_v28  ;;  %v11955_v21 = vadd.f32 2.0, %v15863_v41 }
 0xf08   : > { %v15871_v3 = vpop.eup %15870  ;;  %v21925_v18 = vmul.f32 %v15855_v63, %v11951_v5  ;;  %v21927_v8 = vmul.f32 %v15857_v31, %v11952_v34  ;;  %15890 = vpow2.f32 %v11910_v57  ;;  %v21929_v46 = vmul.f32 1.442695, %v11863_v44 }
 0xf09   : > { %v15873_v60 = vpop.eup %15872  ;;  %v11956_v39 = vadd.f32 2.0, %v15865_v37  ;;  %v21931_v49 = vmul.f32 %v15859_v52, %v11953_v24  ;;  %v11957_v13 = vadd.f32 2.0, %v15867_v4  ;;  %v21935_v35 = vmul.f32 %v21915_v27, %v21760_v40 }
 0xf0a   : > { %v15875_v53 = vpop.eup %15874  ;;  %v21939_v28 = vmul.f32 %v21917_v33, %v21762_v61  ;;  %v21943_v15 = vmul.f32 %v21919_v42, %v21764_v50  ;;  %15892 = vpow2.f32 %v21882_v0  ;;  %v21946_v63 = vmul.f32 %v15861_v58, %v11954_v14  ;;  %v23873_v14 = vld [vmem:[#allocation104_spill] sm:$0xff] }
 0xf0b   : > { %v15877_v57 = vpop.eup %15876  ;;  %v21950_v31 = vmul.f32 %v21921_v7, %v21766_v17  ;;  %v21954_v40 = vmul.f32 %v21923_v10, %v21768_v59  ;;  %v11958_v61 = vadd.f32 2.0, %v15869_v25  ;;  %v21956_v26 = vmul.f32 %v15863_v41, %v11955_v21 }
 0xf0c   : > { %v15879_v52 = vpop.eup %15878  ;;  %v21960_v50 = vmul.f32 %v21925_v18, %v21770_v9  ;;  %v21964_v0 = vmul.f32 %v21927_v8, %v21772_v62  ;;  %15894 = vpow2.f32 %v21884_v43  ;;  %v11959_v17 = vadd.f32 2.0, %v15871_v3 }
 0xf0d   : > { %v15881_v51 = vpop.eup %15880  ;;  %v21967_v58 = vmul.f32 %v15865_v37, %v11956_v39  ;;  %v21971_v59 = vmul.f32 %v21931_v49, %v21774_v16  ;;  %15896 = vpow2.f32 %v21886_v1  ;;  %v11960_v47 = vadd.f32 2.0, %v15873_v60 }
 0xf0e   : > { %v15883_v38 = vpop.eup %15882  ;;  %v11961_v9 = vadd.f32 2.0, %v15875_v53  ;;  %v21974_v41 = vmul.f32 %v15867_v4, %v11957_v13  ;;  %15898 = vpow2.f32 %v21888_v29  ;;  %v11962_v62 = vadd.f32 2.0, %v15877_v57 }
 0xf0f   : > { %v11963_v5 = vadd.f32 2.0, %v15879_v52  ;;  %v21979_v43 = vmul.f32 %v21946_v63, %v21776_v22  ;;  %v15885_v34 = vpop.eup %15884  ;;  %15900 = vpow2.f32 %v21890_v2  ;;  %v11964_v16 = vadd.f32 2.0, %v15881_v51 }
 0xf10   : > { %v21982_v37 = vmul.f32 %v15869_v25, %v11958_v61  ;;  %v21986_v1 = vmul.f32 %v21956_v26, %v21778_v12  ;;  %v15887_v4 = vpop.eup %15886  ;;  %15902 = vpow2.f32 %v21892_v19  ;;  %v11965_v29 = vadd.f32 2.0, %v15883_v38 }
 0xf11   : > { %v21989_v44 = vmul.f32 %v15871_v3, %v11959_v17  ;;  %v21993_v22 = vmul.f32 %v21967_v58, %v21780_v54  ;;  %v15889_v24 = vpop.eup %15888  ;;  %15904 = vpow2.f32 %v21894_v11  ;;  %v21996_v2 = vmul.f32 %v15873_v60, %v11960_v47  ;;  %v23874_v60 = vld [vmem:[#allocation69_spill] sm:$0xff] }
 0xf12   : > { %v21998_v25 = vmul.f32 %v15875_v53, %v11961_v9  ;;  %v22002_v12 = vmul.f32 %v21974_v41, %v23873_v14  ;;  %v15891_v21 = vpop.eup %15890  ;;  %15906 = vpow2.f32 %v21896_v20  ;;  %v11966_v19 = vadd.f32 2.0, %v15885_v34  ;;  %v23875_v20 = vld [vmem:[#allocation105_spill] sm:$0xff]  ;;  %v23881_v14 = vld [vmem:[#allocation107_spill] sm:$0xff] }
 0xf13   : > { %v22005_v3 = vmul.f32 %v15877_v57, %v11962_v62  ;;  %v22007_v39 = vmul.f32 %v15879_v52, %v11963_v5  ;;  %15908 = vpow2.f32 %v21898_v23  ;;  %v11967_v54 = vadd.f32 2.0, %v15887_v4  ;;  %v23879_v5 = vld [vmem:[#allocation74_spill] sm:$0xff] }
 0xf14   : > { %v22010_v11 = vmul.f32 %v15881_v51, %v11964_v16  ;;  %v22014_v53 = vmul.f32 %v21982_v37, %v23874_v60  ;;  %v15893_v13 = vpop.eup %15892  ;;  %15910 = vpow2.f32 %v21900_v6  ;;  %v11968_v61 = vadd.f32 2.0, %v15889_v24  ;;  %v23876_v51 = vld [vmem:[#allocation73_spill] sm:$0xff] }
 0xf15   : > { %v22017_v17 = vmul.f32 %v15883_v38, %v11965_v29  ;;  %v22021_v57 = vmul.f32 %v21989_v44, %v23875_v20  ;;  %15912 = vpow2.f32 %v21902_v45  ;;  %v11969_v23 = vadd.f32 2.0, %v15891_v21  ;;  %v23877_v38 = vld [vmem:[#allocation106_spill] sm:$0xff] }
 0xf16   : > { %v22026_v52 = vmul.f32 %v21996_v2, %v21788_v48  ;;  %v22030_v47 = vmul.f32 %v21998_v25, %v23876_v51  ;;  %v15895_v9 = vpop.eup %15894  ;;  %15914 = vpow2.f32 %v21904_v30  ;;  %v22033_v6 = vmul.f32 %v15885_v34, %v11966_v19  ;;  %v23883_v19 = vld [vmem:[#allocation77_spill] sm:$0xff] }
 0xf17   : > { %v22037_v62 = vmul.f32 %v22005_v3, %v23877_v38  ;;  %v22041_v45 = vmul.f32 %v22007_v39, %v23879_v5  ;;  %v15897_v16 = vpop.eup %15896  ;;  %15916 = vpow2.f32 %v21906_v55  ;;  %v11970_v48 = vadd.f32 2.0, %v15893_v13 }
 0xf18   : > { %v22044_v29 = vmul.f32 %v15887_v4, %v11967_v54  ;;  %v22048_v60 = vmul.f32 %v22010_v11, %v23881_v14  ;;  %v15899_v30 = vpop.eup %15898  ;;  %15918 = vpow2.f32 %v21908_v56  ;;  %v22051_v34 = vmul.f32 %v15889_v24, %v11968_v61  ;;  %v23885_v24 = vld [vmem:[#allocation108_spill] sm:$0xff] }
 0xf19   : > { %23878 = vst [vmem:[#allocation46_spill] sm:$0xff] %v22037_v62  ;;  %23880 = vst [vmem:[#allocation27_spill] sm:$0xff] %v22041_v45  ;;  %v22055_v20 = vmul.f32 %v22017_v17, %v23883_v19  ;;  %v12069_v51 = vadd.f32 2.0, %v21915_v27  ;;  %v15901_v38 = vpop.eup %15900  ;;  %15920 = vpow2.f32 %v21911_v32  ;;  %v11971_v55 = vadd.f32 2.0, %v15895_v9  ;;  %v23887_v32 = vld [vmem:[#allocation78_spill] sm:$0xff] }
 0xf1a   : > { %23882 = vst [vmem:[#allocation24_spill] sm:$0xff] %v22048_v60  ;;  %v22059_v4 = vmul.f32 %v15891_v21, %v11969_v23  ;;  %v12070_v54 = vadd.f32 2.0, %v21917_v33  ;;  %v15903_v5 = vpop.eup %15902  ;;  %15922 = vpow2.f32 %v21913_v36  ;;  %v11972_v56 = vadd.f32 2.0, %v15897_v16 }
 0xf1b   : > { %23884 = vst [vmem:[#allocation94_spill] sm:$0xff] %v22055_v20  ;;  %v22065_v61 = vmul.f32 %v22033_v6, %v23885_v24  ;;  %v12071_v14 = vadd.f32 2.0, %v21919_v42  ;;  %v15905_v19 = vpop.eup %15904  ;;  %15924 = vpow2.f32 %v21929_v46  ;;  %v22069_v27 = vmul.f32 %v15893_v13, %v11970_v48  ;;  %v23889_v20 = vld [vmem:[#allocation80_spill] sm:$0xff]  ;;  %v23891_v46 = vld [vmem:[#allocation82_spill] sm:$0xff] }
 0xf1c   : > { %v22073_v21 = vmul.f32 %v22044_v29, %v23887_v32  ;;  %v12072_v33 = vadd.f32 2.0, %v21921_v7  ;;  %v15907_v23 = vpop.eup %15906  ;;  %v11973_v36 = vadd.f32 2.0, %v15899_v30  ;;  %v22078_v60 = vmul.f32 %v22051_v34, %v23889_v20 }
 0xf1d   : > { %23886 = vst [vmem:[#allocation28_spill] sm:$0xff] %v22065_v61  ;;  %v12073_v24 = vadd.f32 2.0, %v21923_v10  ;;  %15926 = vrcp.f32 %v12069_v51  ;;  %v15909_v42 = vpop.eup %15908  ;;  %v22081_v61 = vmul.f32 %v15895_v9, %v11971_v55  ;;  %v22085_v13 = vmul.f32 %v22059_v4, %v23891_v46  ;;  %v23893_v51 = vld [vmem:[#allocation85_spill] sm:$0xff] }
 0xf1e   : > { %23888 = vst [vmem:[#allocation49_spill] sm:$0xff] %v22073_v21  ;;  %23890 = vst [vmem:[#allocation48_spill] sm:$0xff] %v22078_v60  ;;  %v12074_v48 = vadd.f32 2.0, %v21925_v18  ;;  %15928 = vrcp.f32 %v12070_v54  ;;  %v15911_v7 = vpop.eup %15910  ;;  %v11974_v32 = vadd.f32 2.0, %v15901_v38  ;;  %v22088_v21 = vmul.f32 %v15897_v16, %v11972_v56 }
 0xf1f   : > { %23892 = vst [vmem:[#allocation95_spill] sm:$0xff] %v22085_v13  ;;  %v12075_v20 = vadd.f32 2.0, %v21927_v8  ;;  %15930 = vrcp.f32 %v12071_v14  ;;  %v15913_v60 = vpop.eup %15912  ;;  %v11975_v10 = vadd.f32 2.0, %v15903_v5  ;;  %v22093_v9 = vmul.f32 %v22069_v27, %v23893_v51 }
 0xf20   : > { %v12076_v55 = vadd.f32 2.0, %v21931_v49  ;;  %15932 = vrcp.f32 %v12072_v33  ;;  %v15915_v46 = vpop.eup %15914  ;;  %v11976_v13 = vadd.f32 2.0, %v15905_v19  ;;  %v22096_v18 = vmul.f32 %v15899_v30, %v11973_v36  ;;  %v23895_v49 = vld [vmem:[#allocation4_spill] sm:$0xff] }
 0xf21   : > { %23894 = vst [vmem:[#allocation52_spill] sm:$0xff] %v22093_v9  ;;  %v12077_v54 = vadd.f32 2.0, %v21946_v63  ;;  %15934 = vrcp.f32 %v12073_v24  ;;  %v22099_v16 = vpop.eup %15916  ;;  %v11977_v8 = vadd.f32 2.0, %v15907_v23  ;;  %v11978_v56 = vadd.f32 2.0, %v15909_v42 }
 0xf22   : > { %v12078_v14 = vadd.f32 2.0, %v21956_v26  ;;  %15936 = vrcp.f32 %v12074_v48  ;;  %v22102_v45 = vpop.eup %15918  ;;  %v11979_v51 = vadd.f32 2.0, %v15911_v7  ;;  %v22106_v33 = vmul.f32 %v22081_v61, %v23895_v49 }
 0xf23   : > { %v12079_v30 = vadd.f32 2.0, %v21967_v58  ;;  %15938 = vrcp.f32 %v12075_v20  ;;  %v22109_v63 = vpop.eup %15920  ;;  %v22111_v36 = vmul.f32 %v15901_v38, %v11974_v32  ;;  %v22113_v24 = vmul.f32 %v15903_v5, %v11975_v10 }
 0xf24   : > { %23896 = vst [vmem:[#allocation53_spill] sm:$0xff] %v22106_v33  ;;  %v12080_v26 = vadd.f32 2.0, %v21974_v41  ;;  %15940 = vrcp.f32 %v12076_v55  ;;  %v22116_v48 = vpop.eup %15922  ;;  %v11980_v9 = vadd.f32 2.0, %v15913_v60  ;;  %v22118_v62 = vmul.f32 %v15905_v19, %v11976_v13 }
 0xf25   : > { %v12081_v49 = vadd.f32 2.0, %v21982_v37  ;;  %15942 = vrcp.f32 %v12077_v54  ;;  %v22121_v33 = vpop.eup %15924  ;;  %v22124_v58 = vmul.f32 %v15907_v23, %v11977_v8  ;;  %v22126_v38 = vmul.f32 %v15909_v42, %v11978_v56 }
 0xf26   : > { %v12082_v5 = vadd.f32 2.0, %v21989_v44  ;;  %15944 = vrcp.f32 %v12078_v14  ;;  %v11981_v32 = vadd.f32 2.0, %v15915_v46  ;;  %v22129_v20 = vmul.f32 %v15911_v7, %v11979_v51 }
 0xf27   : > { %v15927_v41 = vpop.eup %15926  ;;  %v12083_v19 = vadd.f32 2.0, %v21996_v2  ;;  %15946 = vrcp.f32 %v12079_v30  ;;  %v11982_v37 = vadd.f32 2.0, %v22099_v16  ;;  %v12084_v10 = vadd.f32 2.0, %v21998_v25 }
 0xf28   : > { %v15929_v13 = vpop.eup %15928  ;;  %15948 = vrcp.f32 %v12080_v26  ;;  %v12151_v23 = vmul.f32 %v15927_v41, %v21935_v35  ;;  %v22135_v55 = vmul.f32 %v15913_v60, %v11980_v9  ;;  %v12085_v44 = vadd.f32 2.0, %v22005_v3 }
 0xf29   : > { %v15931_v42 = vpop.eup %15930  ;;  %15950 = vrcp.f32 %v12081_v49  ;;  %v12152_v7 = vmul.f32 %v15929_v13, %v21939_v28  ;;  %v11983_v2 = vadd.f32 2.0, %v22102_v45  ;;  %v12086_v25 = vadd.f32 2.0, %v22007_v39 }
 0xf2a   : > { %v15933_v54 = vpop.eup %15932  ;;  %15952 = vrcp.f32 %v12082_v5  ;;  %v12153_v35 = vmul.f32 %v15931_v42, %v21943_v15  ;;  %v12087_v3 = vadd.f32 2.0, %v22010_v11  ;;  %v22149_v56 = vmul.f32 %v15915_v46, %v11981_v32 }
 0xf2b   : > { %v15935_v60 = vpop.eup %15934  ;;  %15954 = vrcp.f32 %v12083_v19  ;;  %v12154_v28 = vmul.f32 %v15933_v54, %v21950_v31  ;;  %v13124_v9 = vpack.c.bf16 %v12152_v7, %v12151_v23  ;;  %v12088_v14 = vadd.f32 2.0, %v22017_v17 }
 0xf2c   : > { %v15937_v8 = vpop.eup %15936  ;;  %15956 = vrcp.f32 %v12084_v10  ;;  %v12155_v51 = vmul.f32 %v15935_v60, %v21954_v40  ;;  %v12089_v30 = vadd.f32 2.0, %v22033_v6  ;;  %v11984_v31 = vadd.f32 2.0, %v22109_v63 }
 0xf2d   : > { %v15939_v39 = vpop.eup %15938  ;;  %15958 = vrcp.f32 %v12085_v44  ;;  %v12156_v15 = vmul.f32 %v15937_v8, %v21960_v50  ;;  %13125 = vst [vmem:[%s22142_s11] sm:$0xff] %v13124_v9   ;;  %v13129_v11 = vpack.c.bf16 %v12154_v28, %v12153_v35  ;;  %v12090_v46 = vadd.f32 2.0, %v22044_v29 }
 0xf2e   : > { %v15941_v26 = vpop.eup %15940  ;;  %15960 = vrcp.f32 %v12086_v25  ;;  %v12157_v17 = vmul.f32 %v15939_v39, %v21964_v0  ;;  %v12091_v40 = vadd.f32 2.0, %v22051_v34  ;;  %v22163_v41 = vmul.f32 %v22099_v16, %v11982_v37 }
 0xf2f   : > { %v15943_v49 = vpop.eup %15942  ;;  %15962 = vrcp.f32 %v12087_v3  ;;  %v12158_v6 = vmul.f32 %v15941_v26, %v21971_v59  ;;  %13221 = vst [vmem:[%s22142_s11 + $0x8] sm:$0xff] %v13129_v11   ;;  %v13134_v5 = vpack.c.bf16 %v12156_v15, %v12155_v51  ;;  %v12092_v32 = vadd.f32 2.0, %v22059_v4 }
 0xf30   : > { %v15945_v50 = vpop.eup %15944  ;;  %15964 = vrcp.f32 %v12088_v14  ;;  %v12159_v29 = vmul.f32 %v15943_v49, %v21979_v43  ;;  %v12093_v19 = vadd.f32 2.0, %v22069_v27  ;;  %v11985_v10 = vadd.f32 2.0, %v22116_v48  ;;  %v23897_v14 = vld [vmem:[#allocation46_spill] sm:$0xff] }
 0xf31   : > { %v15947_v0 = vpop.eup %15946  ;;  %15966 = vrcp.f32 %v12089_v30  ;;  %v12160_v34 = vmul.f32 %v15945_v50, %v21986_v1  ;;  %13222 = vst [vmem:[%s22142_s11 + $0x10] sm:$0xff] %v13134_v5   ;;  %v13139_v59 = vpack.c.bf16 %v12158_v6, %v12157_v17  ;;  %v12094_v16 = vadd.f32 2.0, %v22081_v61  ;;  %v23898_v30 = vld [vmem:[#allocation27_spill] sm:$0xff] }
 0xf32   : > { %v15949_v13 = vpop.eup %15948  ;;  %15968 = vrcp.f32 %v12090_v46  ;;  %v12161_v4 = vmul.f32 %v15947_v0, %v21993_v22  ;;  %v12095_v43 = vadd.f32 2.0, %v22088_v21  ;;  %v22177_v42 = vmul.f32 %v22102_v45, %v11983_v2 }
 0xf33   : > { %v15951_v37 = vpop.eup %15950  ;;  %15970 = vrcp.f32 %v12091_v40  ;;  %v12162_v27 = vmul.f32 %v15949_v13, %v22002_v12  ;;  %13223 = vst [vmem:[%s22142_s11 + $0x18] sm:$0xff] %v13139_v59   ;;  %v13144_v23 = vpack.c.bf16 %v12160_v34, %v12159_v29  ;;  %v12096_v44 = vadd.f32 2.0, %v22096_v18  ;;  %v23900_v40 = vld [vmem:[#allocation94_spill] sm:$0xff]  ;;  %v23901_v29 = vld [vmem:[#allocation28_spill] sm:$0xff]  ;;  %v23902_v59 = vld [vmem:[#allocation49_spill] sm:$0xff] }
 0xf34   : > { %v15953_v1 = vpop.eup %15952  ;;  %15972 = vrcp.f32 %v12092_v32  ;;  %v12163_v61 = vmul.f32 %v15951_v37, %v22014_v53  ;;  %v12097_v7 = vadd.f32 2.0, %v22111_v36  ;;  %v11986_v35 = vadd.f32 2.0, %v22121_v33 }
 0xf35   : > { %v15955_v22 = vpop.eup %15954  ;;  %15974 = vrcp.f32 %v12093_v19  ;;  %v12164_v54 = vmul.f32 %v15953_v1, %v22021_v57  ;;  %13224 = vst [vmem:[%s22142_s11 + $0x20] sm:$0xff] %v13144_v23   ;;  %v13149_v12 = vpack.c.bf16 %v12162_v27, %v12161_v4  ;;  %v12098_v45 = vadd.f32 2.0, %v22113_v24  ;;  %v23903_v4 = vld [vmem:[#allocation6_spill] sm:$0xff] }
 0xf36   : > { %v15957_v25 = vpop.eup %15956  ;;  %15976 = vrcp.f32 %v12094_v16  ;;  %v12165_v2 = vmul.f32 %v15955_v22, %v22026_v52  ;;  %v12099_v53 = vadd.f32 2.0, %v22118_v62  ;;  %v22191_v9 = vmul.f32 %v22109_v63, %v11984_v31  ;;  %v23899_v31 = vld [vmem:[#allocation24_spill] sm:$0xff] }
 0xf37   : > { %v15959_v60 = vpop.eup %15958  ;;  %15978 = vrcp.f32 %v12095_v43  ;;  %v12166_v3 = vmul.f32 %v15957_v25, %v22030_v47  ;;  %13225 = vst [vmem:[%s22142_s11 + $0x28] sm:$0xff] %v13149_v12   ;;  %v13154_v28 = vpack.c.bf16 %v12164_v54, %v12163_v61  ;;  %v12100_v8 = vadd.f32 2.0, %v22124_v58  ;;  %v23904_v43 = vld [vmem:[#allocation48_spill] sm:$0xff]  ;;  %v23906_v54 = vld [vmem:[#allocation5_spill] sm:$0xff] }
 0xf38   : > { %v15961_v57 = vpop.eup %15960  ;;  %15980 = vrcp.f32 %v12096_v44  ;;  %v12167_v51 = vmul.f32 %v15959_v60, %v23897_v14  ;;  %v12101_v39 = vadd.f32 2.0, %v22126_v38  ;;  %v22199_v26 = vmul.f32 %v22116_v48, %v11985_v10  ;;  %v23905_v44 = vld [vmem:[#allocation95_spill] sm:$0xff]  ;;  %v23907_v25 = vld [vmem:[#allocation52_spill] sm:$0xff]  ;;  %v23908_v60 = vld [vmem:[#allocation53_spill] sm:$0xff] }
 0xf39   : > { %v15963_v52 = vpop.eup %15962  ;;  %15982 = vrcp.f32 %v12097_v7  ;;  %v12168_v15 = vmul.f32 %v15961_v57, %v23898_v30  ;;  %13226 = vst [vmem:[%s22142_s11 + $0x30] sm:$0xff] %v13154_v28   ;;  %v13159_v47 = vpack.c.bf16 %v12166_v3, %v12165_v2  ;;  %v12102_v63 = vadd.f32 2.0, %v22129_v20  ;;  %v23909_v57 = vld [vmem:[#allocation9_spill] sm:$0xff] }
 0xf3a   : > { %v15965_v11 = vpop.eup %15964  ;;  %15984 = vrcp.f32 %v12098_v45  ;;  %v12169_v46 = vmul.f32 %v15963_v52, %v23899_v31  ;;  %v12103_v49 = vadd.f32 2.0, %v22135_v55  ;;  %v22207_v32 = vmul.f32 %v22121_v33, %v11986_v35 }
 0xf3b   : > { %v15967_v17 = vpop.eup %15966  ;;  %15986 = vrcp.f32 %v12099_v53  ;;  %v12170_v6 = vmul.f32 %v15965_v11, %v23900_v40  ;;  %13227 = vst [vmem:[%s22142_s11 + $0x38] sm:$0xff] %v13159_v47   ;;  %v13164_v5 = vpack.c.bf16 %v12168_v15, %v12167_v51  ;;  %v12104_v48 = vadd.f32 2.0, %v22149_v56  ;;  %v23910_v51 = vld [vmem:[#allocation7_spill] sm:$0xff]  ;;  %v23913_v40 = vld [vmem:[#allocation32_spill] sm:$0xff] }
 0xf3c   : > { %v15969_v50 = vpop.eup %15968  ;;  %15988 = vrcp.f32 %v12100_v8  ;;  %v12171_v0 = vmul.f32 %v15967_v17, %v23901_v29  ;;  %v12105_v34 = vadd.f32 2.0, %v22163_v41  ;;  %v12054_v37 = vmul.f32 %v22088_v21, %v23903_v4  ;;  %v23911_v47 = vld [vmem:[#allocation15_spill] sm:$0xff] }
 0xf3d   : > { %v15971_v19 = vpop.eup %15970  ;;  %15990 = vrcp.f32 %v12101_v39  ;;  %v12172_v13 = vmul.f32 %v15969_v50, %v23902_v59  ;;  %13228 = vst [vmem:[%s22142_s11 + $0x40] sm:$0xff] %v13164_v5   ;;  %v13169_v10 = vpack.c.bf16 %v12170_v6, %v12169_v46  ;;  %v12106_v33 = vadd.f32 2.0, %v22177_v42 }
 0xf3e   : > { %v15973_v16 = vpop.eup %15972  ;;  %15992 = vrcp.f32 %v12102_v63  ;;  %v12173_v27 = vmul.f32 %v15971_v19, %v23904_v43  ;;  %v12107_v1 = vadd.f32 2.0, %v22191_v9  ;;  %v12055_v12 = vmul.f32 %v22096_v18, %v23906_v54 }
 0xf3f   : > { %v15975_v23 = vpop.eup %15974  ;;  %15994 = vrcp.f32 %v12103_v49  ;;  %v12174_v61 = vmul.f32 %v15973_v16, %v23905_v44  ;;  %13229 = vst [vmem:[%s22142_s11 + $0x48] sm:$0xff] %v13169_v10   ;;  %v13174_v22 = vpack.c.bf16 %v12172_v13, %v12171_v0  ;;  %v12108_v21 = vadd.f32 2.0, %v22199_v26  ;;  %v23916_v10 = vld [vmem:[#allocation44_spill] sm:$0xff] }
 0xf40   : > { %v15977_v7 = vpop.eup %15976  ;;  %15996 = vrcp.f32 %v12104_v48  ;;  %v12175_v35 = vmul.f32 %v15975_v23, %v23907_v25  ;;  %v12109_v2 = vadd.f32 2.0, %v22207_v32  ;;  %v12056_v8 = vmul.f32 %v22111_v36, %v23909_v57  ;;  %v23912_v36 = vld [vmem:[#allocation30_spill] sm:$0xff]  ;;  %v23914_v48 = vld [vmem:[#allocation87_spill] sm:$0xff]  ;;  %v23918_v23 = vld [vmem:[#allocation16_spill] sm:$0xff] }
 0xf41   : > { %v15979_v45 = vpop.eup %15978  ;;  %15998 = vrcp.f32 %v12105_v34  ;;  %v12176_v53 = vmul.f32 %v15977_v7, %v23908_v60  ;;  %13230 = vst [vmem:[%s22142_s11 + $0x50] sm:$0xff] %v13174_v22   ;;  %v13179_v3 = vpack.c.bf16 %v12174_v61, %v12173_v27  ;;  %v12057_v52 = vmul.f32 %v22113_v24, %v23910_v51  ;;  %v23919_v22 = vld [vmem:[#allocation93_spill] sm:$0xff] }
 0xf42   : > { %v15981_v28 = vpop.eup %15980  ;;  %16000 = vrcp.f32 %v12106_v33  ;;  %v12177_v18 = vmul.f32 %v15979_v45, %v12054_v37  ;;  %v12058_v11 = vmul.f32 %v22118_v62, %v23911_v47  ;;  %v12059_v46 = vmul.f32 %v22124_v58, %v23912_v36  ;;  %v23915_v58 = vld [vmem:[#allocation12_spill] sm:$0xff]  ;;  %v23917_v33 = vld [vmem:[#allocation18_spill] sm:$0xff] }
 0xf43   : > { %v15983_v14 = vpop.eup %15982  ;;  %16002 = vrcp.f32 %v12107_v1  ;;  %v12178_v39 = vmul.f32 %v15981_v28, %v12055_v12  ;;  %13231 = vst [vmem:[%s22142_s11 + $0x58] sm:$0xff] %v13179_v3   ;;  %v13184_v30 = vpack.c.bf16 %v12176_v53, %v12175_v35  ;;  %v12060_v6 = vmul.f32 %v22126_v38, %v23913_v40  ;;  %v23920_v12 = vld [vmem:[#allocation22_spill] sm:$0xff]  ;;  %v23921_v35 = vld [vmem:[#allocation20_spill] sm:$0xff] }
 0xf44   : > { %v15985_v15 = vpop.eup %15984  ;;  %16004 = vrcp.f32 %v12108_v21  ;;  %v12179_v63 = vmul.f32 %v15983_v14, %v12056_v8  ;;  %v12061_v62 = vmul.f32 %v22129_v20, %v23914_v48  ;;  %v12062_v34 = vmul.f32 %v22135_v55, %v23915_v58 }
 0xf45   : > { %v15987_v31 = vpop.eup %15986  ;;  %16006 = vrcp.f32 %v12109_v2  ;;  %v12180_v17 = vmul.f32 %v15985_v15, %v12057_v52  ;;  %13232 = vst [vmem:[%s22142_s11 + $0x60] sm:$0xff] %v13184_v30   ;;  %v13189_v24 = vpack.c.bf16 %v12178_v39, %v12177_v18  ;;  %v12063_v16 = vmul.f32 %v22149_v56, %v23916_v10 }
 0xf46   : > { %v15989_v49 = vpop.eup %15988  ;;  %v12181_v5 = vmul.f32 %v15987_v31, %v12058_v11  ;;  %v12064_v20 = vmul.f32 %v22163_v41, %v23917_v33  ;;  %v12065_v1 = vmul.f32 %v22177_v42, %v23918_v23  ;;  %v12066_v56 = vmul.f32 %v22191_v9, %v23919_v22 }
 0xf47   : > { %v15991_v50 = vpop.eup %15990  ;;  %v12182_v29 = vmul.f32 %v15989_v49, %v12059_v46  ;;  %13233 = vst [vmem:[%s22142_s11 + $0x68] sm:$0xff] %v13189_v24   ;;  %v13194_v0 = vpack.c.bf16 %v12180_v17, %v12179_v63  ;;  %v12067_v41 = vmul.f32 %v22199_v26, %v23920_v12  ;;  %v12068_v45 = vmul.f32 %v22207_v32, %v23921_v35 }
 0xf48   : > { %v15993_v19 = vpop.eup %15992  ;;  %v12183_v59 = vmul.f32 %v15991_v50, %v12060_v6 }
 0xf49   : > { %v15995_v13 = vpop.eup %15994  ;;  %v12184_v4 = vmul.f32 %v15993_v19, %v12061_v62  ;;  %13234 = vst [vmem:[%s22142_s11 + $0x70] sm:$0xff] %v13194_v0   ;;  %v13199_v38 = vpack.c.bf16 %v12182_v29, %v12181_v5 }
 0xf4a   : > { %v15997_v37 = vpop.eup %15996  ;;  %v12185_v43 = vmul.f32 %v15995_v13, %v12062_v34 }
 0xf4b   : > { %v15999_v27 = vpop.eup %15998  ;;  %v12186_v44 = vmul.f32 %v15997_v37, %v12063_v16  ;;  %13235 = vst [vmem:[%s22142_s11 + $0x78] sm:$0xff] %v13199_v38   ;;  %v13204_v55 = vpack.c.bf16 %v12184_v4, %v12183_v59 }
 0xf4c   : > { %v16001_v61 = vpop.eup %16000  ;;  %v12187_v7 = vmul.f32 %v15999_v27, %v12064_v20 }
 0xf4d   : > { %v16003_v54 = vpop.eup %16002  ;;  %v12188_v21 = vmul.f32 %v16001_v61, %v12065_v1  ;;  %13236 = vst [vmem:[%s22142_s11 + $0x80] sm:$0xff] %v13204_v55   ;;  %v13209_v25 = vpack.c.bf16 %v12186_v44, %v12185_v43 }
 0xf4e   : > { %v16005_v42 = vpop.eup %16004  ;;  %v12189_v2 = vmul.f32 %v16003_v54, %v12066_v56 }
 0xf4f   : > { %v16007_v60 = vpop.eup %16006  ;;  %v12190_v53 = vmul.f32 %v16005_v42, %v12067_v41  ;;  %13237 = vst [vmem:[%s22142_s11 + $0x88] sm:$0xff] %v13209_v25   ;;  %v13214_v3 = vpack.c.bf16 %v12188_v21, %v12187_v7 }
 0xf50   : > { %v12191_v9 = vmul.f32 %v16007_v60, %v12068_v45 }
 0xf51   : > { %13238 = vst [vmem:[%s22142_s11 + $0x90] sm:$0xff] %v13214_v3   ;;  %v13219_v28 = vpack.c.bf16 %v12190_v53, %v12189_v2 }
 0xf52   : > { %v13120_v57 = vpack.c.bf16 %v12191_v9, %v12191_v9 }
 0xf53   : > { %13239 = vst [vmem:[%s22142_s11 + $0x98] sm:$0xff] %v13219_v28  }
 0xf54   : > { %12397 = vst [vmem:[%s22142_s11 + $0xa0] sm:$0x3] %v13120_v57 }
 0xf55 PF: > { %s14_s15 = sadd.s32 1, %s16071_s15  }
 0xf56   : > { %p11_p4 = scmp.ge.s32.totalorder %s14_s15, 4  }
 0xf58   :  { %13 = sbr.rel (!%p11_p4) target bundleno = 1 (0x1), region = 74 }

</bundles_post_ra>
